<compile_context>
chip_gen: v5e
topology: v5e:2x2
jax: 0.10.0
libtpu: 0.0.40
codegen_flags: <defaults>
</compile_context>

<pallas_src>
import functools

import jax
import jax.numpy as jnp
from jax import lax
from jax.experimental import pallas as pl
from jax.experimental.pallas import tpu as pltpu


NDF = 32
LRELU_ALPHA = 0.2
BN_EPS = 1e-5

LAYER_CFG = [
    # (cin, cout, k, stride, pad, has_bn, has_lrelu)
    (3,       NDF,     4, 2, 1, False, True),
    (NDF,     NDF * 2, 4, 2, 1, True,  True),
    (NDF * 2, NDF * 4, 4, 2, 1, True,  True),
    (NDF * 4, NDF * 8, 4, 2, 1, True,  True),
    (NDF * 8, 1,       4, 1, 0, False, False),
]


# ----------------------------------------------------------------------------
# Pallas kernels
# ----------------------------------------------------------------------------
def _conv_lrelu_kernel(a_ref, b_ref, o_ref, *, alpha):
    """(tm, K) x (K, Cout) im2col-conv tile with fused LeakyReLU."""
    y = jnp.dot(a_ref[...], b_ref[...], preferred_element_type=jnp.float32)
    o_ref[...] = jnp.where(y >= 0, y, alpha * y)


def _conv_bn_lrelu_kernel(a_ref, b_ref, g_ref, bt_ref, o_ref, *, eps, alpha):
    """Whole-slab conv matmul + BatchNorm (batch stats) + LeakyReLU, fused.

    a_ref: (M, K) bf16 patches, b_ref: (K, C) bf16 weights, g/bt: (1, C) f32.
    Rows of the (M, C) result enumerate every (n, h, w) position, so a column
    mean/var equals the per-channel batch statistics.  All BN math in f32.
    """
    y = jnp.dot(a_ref[...], b_ref[...], preferred_element_type=jnp.float32)
    mean = jnp.mean(y, axis=0, keepdims=True)
    var = jnp.mean(jnp.square(y - mean), axis=0, keepdims=True)   # biased, as torch
    out = g_ref[...] * ((y - mean) * lax.rsqrt(var + eps)) + bt_ref[...]
    o_ref[...] = jnp.where(out >= 0, out, alpha * out)


def _conv_bn_lrelu_head_kernel(a_ref, b_ref, g_ref, bt_ref, w5_ref, o_ref,
                               *, eps, alpha, batch):
    """Layer 4 (conv + BN + LReLU) fused with layer 5 (4x4 valid conv -> scalar).

    The final conv produces one pixel per sample, so it is done as a VPU
    multiply + lane/sublane reduction over each sample's (16, 256) activation
    block rather than a degenerate MXU matmul.
    """
    y = jnp.dot(a_ref[...], b_ref[...], preferred_element_type=jnp.float32)
    mean = jnp.mean(y, axis=0, keepdims=True)
    var = jnp.mean(jnp.square(y - mean), axis=0, keepdims=True)
    a = g_ref[...] * ((y - mean) * lax.rsqrt(var + eps)) + bt_ref[...]
    a = jnp.where(a >= 0, a, alpha * a)                    # (M4, C4) f32
    # Quantize activations at the same point the matmul path would (bf16 operands).
    a = a.astype(jnp.bfloat16).astype(jnp.float32)
    w5 = w5_ref[...].astype(jnp.float32)                   # (rows, C4)
    rows = a.shape[0] // batch
    outs = []
    for b in range(batch):                                 # tiny static loop
        prod = a[b * rows:(b + 1) * rows, :] * w5          # (rows, C4)
        s = jnp.sum(prod, axis=1, keepdims=True)           # lane reduce -> (rows, 1)
        outs.append(jnp.sum(s, axis=0, keepdims=True))     # sublane reduce -> (1, 1)
    o_ref[...] = jnp.concatenate(outs, axis=0)             # (batch, 1)


# ----------------------------------------------------------------------------
# Wrappers
# ----------------------------------------------------------------------------
def _pick_tile_m(m):
    if m <= 1024:
        return m                      # whole-M single step for small slabs
    for tm in (1024, 512, 256, 128, 64, 32, 16, 8):
        if m % tm == 0:
            return tm
    return m


def _to_bf16_pad_k(patches, w2d, mult=128):
    """Cast matmul operands to bf16; zero-pad K to a lane-dense multiple of 128."""
    patches = patches.astype(jnp.bfloat16)
    w2d = w2d.astype(jnp.bfloat16)
    k = patches.shape[1]
    kp = -(-k // mult) * mult
    if kp != k:
        patches = jnp.pad(patches, ((0, 0), (0, kp - k)))
        w2d = jnp.pad(w2d, ((0, kp - k), (0, 0)))
    return patches, w2d


def conv_lrelu(patches, w2d, *, alpha=LRELU_ALPHA):
    """Layer-1 conv: (M, K) @ (K, Cout) with fused LeakyReLU, M tiled."""
    patches, w2d = _to_bf16_pad_k(patches, w2d)
    m, k = patches.shape
    _, cout = w2d.shape
    tm = _pick_tile_m(m)
    kernel = functools.partial(_conv_lrelu_kernel, alpha=alpha)
    return pl.pallas_call(
        kernel,
        out_shape=jax.ShapeDtypeStruct((m, cout), jnp.float32),
        grid=(m // tm,),
        in_specs=[pl.BlockSpec((tm, k), lambda i: (i, 0)),
                  pl.BlockSpec((k, cout), lambda i: (0, 0))],
        out_specs=pl.BlockSpec((tm, cout), lambda i: (i, 0)),
        compiler_params=pltpu.CompilerParams(
            dimension_semantics=("parallel",)),   # disjoint M tiles -> both v7x TCs
    )(patches, w2d)


def conv_bn_lrelu(patches, w2d, gamma, beta, *, eps=BN_EPS, alpha=LRELU_ALPHA):
    """Fused conv + BN + LeakyReLU.  Single whole-slab invocation (slabs are tiny)."""
    patches, w2d = _to_bf16_pad_k(patches, w2d)
    m, _ = patches.shape
    _, cout = w2d.shape
    kernel = functools.partial(_conv_bn_lrelu_kernel, eps=eps, alpha=alpha)
    return pl.pallas_call(
        kernel,
        out_shape=jax.ShapeDtypeStruct((m, cout), jnp.float32),
    )(patches, w2d, gamma, beta)


def conv_bn_lrelu_head(patches, w2d, gamma, beta, w5_rows, *, batch,
                       eps=BN_EPS, alpha=LRELU_ALPHA):
    """Fused layer-4 conv + BN + LReLU + layer-5 head conv -> (batch, 1)."""
    patches, w2d = _to_bf16_pad_k(patches, w2d)
    kernel = functools.partial(_conv_bn_lrelu_head_kernel,
                               eps=eps, alpha=alpha, batch=batch)
    return pl.pallas_call(
        kernel,
        out_shape=jax.ShapeDtypeStruct((batch, 1), jnp.float32),
    )(patches, w2d, gamma, beta, w5_rows.astype(jnp.bfloat16))


# ----------------------------------------------------------------------------
# im2col glue (plain JAX, gather-free: pad + strided slices + stack)
# ----------------------------------------------------------------------------
def im2col(x_nhwc, k, stride, pad):
    """(N, H, W, C) -> (N*Ho*Wo, k*k*C) patch matrix, plus (N, Ho, Wo)."""
    x = jnp.pad(x_nhwc, ((0, 0), (pad, pad), (pad, pad), (0, 0)))
    n, hp, wp, c = x.shape
    ho = (hp - k) // stride + 1
    wo = (wp - k) // stride + 1
    cols = []
    for dh in range(k):
        for dw in range(k):
            cols.append(lax.slice(
                x, (0, dh, dw, 0),
                (n, dh + stride * (ho - 1) + 1, dw + stride * (wo - 1) + 1, c),
                (1, stride, stride, 1)))                  # (N, Ho, Wo, C)
    patches = jnp.stack(cols, axis=3)                     # (N, Ho, Wo, k*k, C)
    return patches.reshape(n * ho * wo, k * k * c), (n, ho, wo)


def torch_weight_to_2d(w_oihw):
    """(Cout, Cin, kh, kw) -> (kh*kw*Cin, Cout) matching im2col flatten order."""
    cout, cin, kh, kw = w_oihw.shape
    return w_oihw.transpose(2, 3, 1, 0).reshape(kh * kw * cin, cout)


# ----------------------------------------------------------------------------
# Discriminator forward
# ----------------------------------------------------------------------------
def init_params(key):
    params = []
    for (cin, cout, k, _, _, has_bn, _) in LAYER_CFG:
        key, wk, gk = jax.random.split(key, 3)
        w = 0.02 * jax.random.normal(wk, (cout, cin, k, k), jnp.float32)
        if has_bn:
            gamma = 1.0 + 0.02 * jax.random.normal(gk, (cout,), jnp.float32)
            beta = jnp.zeros((cout,), jnp.float32)
        else:
            gamma, beta = None, None
        params.append({"w": w, "gamma": gamma, "beta": beta})
    return params


def discriminator_forward(x_nchw, params):
    x = jnp.transpose(x_nchw, (0, 2, 3, 1)).astype(jnp.float32)   # NCHW -> NHWC

    # layer 1: conv + LeakyReLU
    _, cout, k, s, p, _, _ = LAYER_CFG[0]
    patches, (n, ho, wo) = im2col(x, k, s, p)
    y = conv_lrelu(patches, torch_weight_to_2d(params[0]["w"]))
    x = y.reshape(n, ho, wo, cout)

    # layers 2, 3: conv + BN + LeakyReLU fused in one kernel each
    for li in (1, 2):
        _, cout, k, s, p, _, _ = LAYER_CFG[li]
        patches, (n, ho, wo) = im2col(x, k, s, p)
        y = conv_bn_lrelu(patches, torch_weight_to_2d(params[li]["w"]),
                          params[li]["gamma"].reshape(1, cout),
                          params[li]["beta"].reshape(1, cout))
        x = y.reshape(n, ho, wo, cout)

    # layers 4 + 5: conv + BN + LReLU + 4x4 head conv, all in one kernel
    _, cout, k, s, p, _, _ = LAYER_CFG[3]
    patches, (n, ho, wo) = im2col(x, k, s, p)                     # (N*16, 2048)
    w5 = params[4]["w"]                                           # (1, 256, 4, 4)
    k5 = w5.shape[-1]
    w5_rows = w5.transpose(2, 3, 1, 0).reshape(k5 * k5, cout)     # (16, 256)
    out = conv_bn_lrelu_head(patches, torch_weight_to_2d(params[3]["w"]),
                             params[3]["gamma"].reshape(1, cout),
                             params[3]["beta"].reshape(1, cout),
                             w5_rows, batch=n)                    # (N, 1)
    return jnp.squeeze(out)                                       # torch .squeeze()


# ----------------------------------------------------------------------------
# Pure-JAX reference (no Pallas)
# ----------------------------------------------------------------------------
def reference_forward(x_nchw, params, *, bf16_matmul_inputs=True):
    """With bf16_matmul_inputs=True the reference mirrors the kernel's
    quantization point (bf16 conv operands, f32 accumulation); with False it
    is the exact f32 torch semantics."""
    x = x_nchw.astype(jnp.float32)
    for (cin, cout, k, s, p, has_bn, has_lrelu), prm in zip(LAYER_CFG, params):
        lhs, rhs = x, prm["w"]
        if bf16_matmul_inputs:
            lhs, rhs = lhs.astype(jnp.bfloat16), rhs.astype(jnp.bfloat16)
        x = lax.conv_general_dilated(
            lhs, rhs, window_strides=(s, s), padding=[(p, p), (p, p)],
            dimension_numbers=("NCHW", "OIHW", "NCHW"),
            preferred_element_type=jnp.float32)
        if has_bn:
            mean = jnp.mean(x, axis=(0, 2, 3), keepdims=True)
            var = jnp.mean((x - mean) ** 2, axis=(0, 2, 3), keepdims=True)
            x = (x - mean) * lax.rsqrt(var + BN_EPS)
            x = x * prm["gamma"].reshape(1, cout, 1, 1) + \
                prm["beta"].reshape(1, cout, 1, 1)
        if has_lrelu:
            x = jnp.where(x >= 0, x, LRELU_ALPHA * x)
    return jnp.squeeze(x)


# ----------------------------------------------------------------------------
if __name__ == "__main__":
    key = jax.random.PRNGKey(0)
    key, xkey = jax.random.split(key)
    # DCGAN discriminator topology needs a 64x64 input to reach a 1x1 final map.
    x = jax.random.normal(xkey, (2, 3, 64, 64), jnp.float32)
    params = init_params(key)

    fwd = jax.jit(discriminator_forward)
    out = jax.block_until_ready(fwd(x, params))

    ref_q = jax.block_until_ready(
        reference_forward(x, params, bf16_matmul_inputs=True))
    ref_f32 = jax.block_until_ready(
        reference_forward(x, params, bf16_matmul_inputs=False))

    assert out.shape == ref_q.shape == (2,), (out.shape, ref_q.shape)
    # Tight check vs. the reference using the same bf16 matmul-operand quantization.
    assert jnp.allclose(out, ref_q, rtol=2e-3, atol=2e-3), (out, ref_q)
    # Looser check vs. the exact f32 torch-semantics reference (bf16 noise only).
    assert jnp.allclose(out, ref_f32, rtol=5e-2, atol=1e-1), (out, ref_f32)

    print("KERNEL_OK")
</pallas_src>

<mosaic_0001>
module attributes {stable_mosaic.version = 11 : i64} {
  func.func @_conv_lrelu_kernel(%arg0: i32, %arg1: memref<1024x128xbf16, #tpu.memory_space<vmem>>, %arg2: memref<128x32xbf16, #tpu.memory_space<vmem>>, %arg3: memref<1024x32xf32, #tpu.memory_space<vmem>>) attributes {dimension_semantics = [#tpu.dimension_semantics<parallel>], iteration_bounds = array<i64: 2>, scalar_prefetch = 0 : i64, scratch_operands = 0 : i64, tpu.core_type = #tpu.core_type<tc>, window_params = [{transform_indices = @transform_0, window_bounds = array<i64: 1024, 128>}, {pipeline_mode = #tpu.pipeline_mode<synchronous>, transform_indices = @transform_1, window_bounds = array<i64: 128, 32>}, {transform_indices = @transform_2, window_bounds = array<i64: 1024, 32>}]} {
    %c0 = arith.constant 0 : index
    %c0_0 = arith.constant 0 : index
    %0 = vector.load %arg1[%c0, %c0_0] : memref<1024x128xbf16, #tpu.memory_space<vmem>>, vector<1024x128xbf16>
    %c0_1 = arith.constant 0 : index
    %c0_2 = arith.constant 0 : index
    %1 = vector.load %arg2[%c0_1, %c0_2] : memref<128x32xbf16, #tpu.memory_space<vmem>>, vector<128x32xbf16>
    %cst = arith.constant dense<0.000000e+00> : vector<1024x32xf32>
    %2 = tpu.matmul %0, %1, %cst {dimension_numbers = #tpu.dot_dimension_numbers<[1], [0], [0], [1], [0, 0, 1, 1], [], []>} : vector<1024x128xbf16>, vector<128x32xbf16>, vector<1024x32xf32> -> vector<1024x32xf32>
    %cst_3 = arith.constant 0.000000e+00 : f32
    %3 = vector.broadcast %cst_3 : f32 to vector<1024x32xf32>
    %4 = arith.cmpf oge, %2, %3 : vector<1024x32xf32>
    %cst_4 = arith.constant 2.000000e-01 : f32
    %5 = vector.broadcast %cst_4 : f32 to vector<1024x32xf32>
    %6 = arith.mulf %5, %2 : vector<1024x32xf32>
    %7 = arith.select %4, %2, %6 : vector<1024x32xi1>, vector<1024x32xf32>
    %c0_5 = arith.constant 0 : index
    %c0_6 = arith.constant 0 : index
    %8 = vector.load %arg3[%c0_5, %c0_6] : memref<1024x32xf32, #tpu.memory_space<vmem>>, vector<1024x32xf32>
    tpu.vector_store %arg3[%c0_5, %c0_6], %7 {strides = array<i32>} : memref<1024x32xf32, #tpu.memory_space<vmem>>, vector<1024x32xf32>,
    return
  }
  func.func @transform_0(%arg0: i32) -> (i32, i32) {
    %c0_i32 = arith.constant 0 : i32
    %c0_i32_0 = arith.constant 0 : i32
    return %arg0, %c0_i32 : i32, i32
  }
  func.func @transform_1(%arg0: i32) -> (i32, i32) {
    %c0_i32 = arith.constant 0 : i32
    %c0_i32_0 = arith.constant 0 : i32
    %c0_i32_1 = arith.constant 0 : i32
    return %c0_i32, %c0_i32_0 : i32, i32
  }
  func.func @transform_2(%arg0: i32) -> (i32, i32) {
    %c0_i32 = arith.constant 0 : i32
    %c0_i32_0 = arith.constant 0 : i32
    return %arg0, %c0_i32 : i32, i32
  }
}

module attributes {stable_mosaic.version = 11 : i64} {
  func.func @_conv_bn_lrelu_kernel(%arg0: memref<512x512xbf16, #tpu.memory_space<vmem>>, %arg1: memref<512x64xbf16, #tpu.memory_space<vmem>>, %arg2: memref<1x64xf32, #tpu.memory_space<vmem>>, %arg3: memref<1x64xf32, #tpu.memory_space<vmem>>, %arg4: memref<512x64xf32, #tpu.memory_space<vmem>>) attributes {dimension_semantics = [], scalar_prefetch = 0 : i64, scratch_operands = 0 : i64, tpu.core_type = #tpu.core_type<tc>} {
    %c0 = arith.constant 0 : index
    %c0_0 = arith.constant 0 : index
    %0 = vector.load %arg0[%c0, %c0_0] : memref<512x512xbf16, #tpu.memory_space<vmem>>, vector<512x512xbf16>
    %c0_1 = arith.constant 0 : index
    %c0_2 = arith.constant 0 : index
    %1 = vector.load %arg1[%c0_1, %c0_2] : memref<512x64xbf16, #tpu.memory_space<vmem>>, vector<512x64xbf16>
    %cst = arith.constant dense<0.000000e+00> : vector<512x64xf32>
    %2 = tpu.matmul %0, %1, %cst {dimension_numbers = #tpu.dot_dimension_numbers<[1], [0], [0], [1], [0, 0, 1, 1], [], []>} : vector<512x512xbf16>, vector<512x64xbf16>, vector<512x64xf32> -> vector<512x64xf32>
    %cst_3 = arith.constant dense<0.000000e+00> : vector<64xf32>
    %3 = vector.multi_reduction <add>, %2, %cst_3 [0] : vector<512x64xf32> to vector<64xf32>
    %4 = vector.shape_cast %3 : vector<64xf32> to vector<1x64xf32>
    %cst_4 = arith.constant 5.120000e+02 : f32
    %5 = vector.broadcast %cst_4 : f32 to vector<1x64xf32>
    %6 = arith.divf %4, %5 : vector<1x64xf32>
    %7 = vector.broadcast %6 : vector<1x64xf32> to vector<512x64xf32>
    %8 = arith.subf %2, %7 : vector<512x64xf32>
    %9 = arith.mulf %8, %8 : vector<512x64xf32>
    %cst_5 = arith.constant dense<0.000000e+00> : vector<64xf32>
    %10 = vector.multi_reduction <add>, %9, %cst_5 [0] : vector<512x64xf32> to vector<64xf32>
    %11 = vector.shape_cast %10 : vector<64xf32> to vector<1x64xf32>
    %cst_6 = arith.constant 5.120000e+02 : f32
    %12 = vector.broadcast %cst_6 : f32 to vector<1x64xf32>
    %13 = arith.divf %11, %12 : vector<1x64xf32>
    %c0_7 = arith.constant 0 : index
    %c0_8 = arith.constant 0 : index
    %14 = vector.load %arg2[%c0_7, %c0_8] : memref<1x64xf32, #tpu.memory_space<vmem>>, vector<1x64xf32>
    %15 = vector.broadcast %6 : vector<1x64xf32> to vector<512x64xf32>
    %16 = arith.subf %2, %15 : vector<512x64xf32>
    %cst_9 = arith.constant 9.99999974E-6 : f32
    %17 = vector.broadcast %cst_9 : f32 to vector<1x64xf32>
    %18 = arith.addf %13, %17 : vector<1x64xf32>
    %19 = math.rsqrt %18 : vector<1x64xf32>
    %20 = vector.broadcast %19 : vector<1x64xf32> to vector<512x64xf32>
    %21 = arith.mulf %16, %20 : vector<512x64xf32>
    %22 = vector.broadcast %14 : vector<1x64xf32> to vector<512x64xf32>
    %23 = arith.mulf %22, %21 : vector<512x64xf32>
    %c0_10 = arith.constant 0 : index
    %c0_11 = arith.constant 0 : index
    %24 = vector.load %arg3[%c0_10, %c0_11] : memref<1x64xf32, #tpu.memory_space<vmem>>, vector<1x64xf32>
    %25 = vector.broadcast %24 : vector<1x64xf32> to vector<512x64xf32>
    %26 = arith.addf %23, %25 : vector<512x64xf32>
    %cst_12 = arith.constant 0.000000e+00 : f32
    %27 = vector.broadcast %cst_12 : f32 to vector<512x64xf32>
    %28 = arith.cmpf oge, %26, %27 : vector<512x64xf32>
    %cst_13 = arith.constant 2.000000e-01 : f32
    %29 = vector.broadcast %cst_13 : f32 to vector<512x64xf32>
    %30 = arith.mulf %29, %26 : vector<512x64xf32>
    %31 = arith.select %28, %26, %30 : vector<512x64xi1>, vector<512x64xf32>
    %c0_14 = arith.constant 0 : index
    %c0_15 = arith.constant 0 : index
    %32 = vector.load %arg4[%c0_14, %c0_15] : memref<512x64xf32, #tpu.memory_space<vmem>>, vector<512x64xf32>
    tpu.vector_store %arg4[%c0_14, %c0_15], %31 {strides = array<i32>} : memref<512x64xf32, #tpu.memory_space<vmem>>, vector<512x64xf32>,
    return
  }
}

module attributes {stable_mosaic.version = 11 : i64} {
  func.func @_conv_bn_lrelu_kernel(%arg0: memref<128x1024xbf16, #tpu.memory_space<vmem>>, %arg1: memref<1024x128xbf16, #tpu.memory_space<vmem>>, %arg2: memref<1x128xf32, #tpu.memory_space<vmem>>, %arg3: memref<1x128xf32, #tpu.memory_space<vmem>>, %arg4: memref<128x128xf32, #tpu.memory_space<vmem>>) attributes {dimension_semantics = [], scalar_prefetch = 0 : i64, scratch_operands = 0 : i64, tpu.core_type = #tpu.core_type<tc>} {
    %c0 = arith.constant 0 : index
    %c0_0 = arith.constant 0 : index
    %0 = vector.load %arg0[%c0, %c0_0] : memref<128x1024xbf16, #tpu.memory_space<vmem>>, vector<128x1024xbf16>
    %c0_1 = arith.constant 0 : index
    %c0_2 = arith.constant 0 : index
    %1 = vector.load %arg1[%c0_1, %c0_2] : memref<1024x128xbf16, #tpu.memory_space<vmem>>, vector<1024x128xbf16>
    %cst = arith.constant dense<0.000000e+00> : vector<128x128xf32>
    %2 = tpu.matmul %0, %1, %cst {dimension_numbers = #tpu.dot_dimension_numbers<[1], [0], [0], [1], [0, 0, 1, 1], [], []>} : vector<128x1024xbf16>, vector<1024x128xbf16>, vector<128x128xf32> -> vector<128x128xf32>
    %cst_3 = arith.constant dense<0.000000e+00> : vector<128xf32>
    %3 = vector.multi_reduction <add>, %2, %cst_3 [0] : vector<128x128xf32> to vector<128xf32>
    %4 = vector.shape_cast %3 : vector<128xf32> to vector<1x128xf32>
    %cst_4 = arith.constant 1.280000e+02 : f32
    %5 = vector.broadcast %cst_4 : f32 to vector<1x128xf32>
    %6 = arith.divf %4, %5 : vector<1x128xf32>
    %7 = vector.broadcast %6 : vector<1x128xf32> to vector<128x128xf32>
    %8 = arith.subf %2, %7 : vector<128x128xf32>
    %9 = arith.mulf %8, %8 : vector<128x128xf32>
    %cst_5 = arith.constant dense<0.000000e+00> : vector<128xf32>
    %10 = vector.multi_reduction <add>, %9, %cst_5 [0] : vector<128x128xf32> to vector<128xf32>
    %11 = vector.shape_cast %10 : vector<128xf32> to vector<1x128xf32>
    %cst_6 = arith.constant 1.280000e+02 : f32
    %12 = vector.broadcast %cst_6 : f32 to vector<1x128xf32>
    %13 = arith.divf %11, %12 : vector<1x128xf32>
    %c0_7 = arith.constant 0 : index
    %c0_8 = arith.constant 0 : index
    %14 = vector.load %arg2[%c0_7, %c0_8] : memref<1x128xf32, #tpu.memory_space<vmem>>, vector<1x128xf32>
    %15 = vector.broadcast %6 : vector<1x128xf32> to vector<128x128xf32>
    %16 = arith.subf %2, %15 : vector<128x128xf32>
    %cst_9 = arith.constant 9.99999974E-6 : f32
    %17 = vector.broadcast %cst_9 : f32 to vector<1x128xf32>
    %18 = arith.addf %13, %17 : vector<1x128xf32>
    %19 = math.rsqrt %18 : vector<1x128xf32>
    %20 = vector.broadcast %19 : vector<1x128xf32> to vector<128x128xf32>
    %21 = arith.mulf %16, %20 : vector<128x128xf32>
    %22 = vector.broadcast %14 : vector<1x128xf32> to vector<128x128xf32>
    %23 = arith.mulf %22, %21 : vector<128x128xf32>
    %c0_10 = arith.constant 0 : index
    %c0_11 = arith.constant 0 : index
    %24 = vector.load %arg3[%c0_10, %c0_11] : memref<1x128xf32, #tpu.memory_space<vmem>>, vector<1x128xf32>
    %25 = vector.broadcast %24 : vector<1x128xf32> to vector<128x128xf32>
    %26 = arith.addf %23, %25 : vector<128x128xf32>
    %cst_12 = arith.constant 0.000000e+00 : f32
    %27 = vector.broadcast %cst_12 : f32 to vector<128x128xf32>
    %28 = arith.cmpf oge, %26, %27 : vector<128x128xf32>
    %cst_13 = arith.constant 2.000000e-01 : f32
    %29 = vector.broadcast %cst_13 : f32 to vector<128x128xf32>
    %30 = arith.mulf %29, %26 : vector<128x128xf32>
    %31 = arith.select %28, %26, %30 : vector<128x128xi1>, vector<128x128xf32>
    %c0_14 = arith.constant 0 : index
    %c0_15 = arith.constant 0 : index
    %32 = vector.load %arg4[%c0_14, %c0_15] : memref<128x128xf32, #tpu.memory_space<vmem>>, vector<128x128xf32>
    tpu.vector_store %arg4[%c0_14, %c0_15], %31 {strides = array<i32>} : memref<128x128xf32, #tpu.memory_space<vmem>>, vector<128x128xf32>,
    return
  }
}

module attributes {stable_mosaic.version = 11 : i64} {
  func.func @_conv_bn_lrelu_head_kernel(%arg0: memref<32x2048xbf16, #tpu.memory_space<vmem>>, %arg1: memref<2048x256xbf16, #tpu.memory_space<vmem>>, %arg2: memref<1x256xf32, #tpu.memory_space<vmem>>, %arg3: memref<1x256xf32, #tpu.memory_space<vmem>>, %arg4: memref<16x256xbf16, #tpu.memory_space<vmem>>, %arg5: memref<2x1xf32, #tpu.memory_space<vmem>>) attributes {dimension_semantics = [], scalar_prefetch = 0 : i64, scratch_operands = 0 : i64, tpu.core_type = #tpu.core_type<tc>} {
    %c0 = arith.constant 0 : index
    %c0_0 = arith.constant 0 : index
    %0 = vector.load %arg0[%c0, %c0_0] : memref<32x2048xbf16, #tpu.memory_space<vmem>>, vector<32x2048xbf16>
    %c0_1 = arith.constant 0 : index
    %c0_2 = arith.constant 0 : index
    %1 = vector.load %arg1[%c0_1, %c0_2] : memref<2048x256xbf16, #tpu.memory_space<vmem>>, vector<2048x256xbf16>
    %cst = arith.constant dense<0.000000e+00> : vector<32x256xf32>
    %2 = tpu.matmul %0, %1, %cst {dimension_numbers = #tpu.dot_dimension_numbers<[1], [0], [0], [1], [0, 0, 1, 1], [], []>} : vector<32x2048xbf16>, vector<2048x256xbf16>, vector<32x256xf32> -> vector<32x256xf32>
    %cst_3 = arith.constant dense<0.000000e+00> : vector<256xf32>
    %3 = vector.multi_reduction <add>, %2, %cst_3 [0] : vector<32x256xf32> to vector<256xf32>
    %4 = vector.shape_cast %3 : vector<256xf32> to vector<1x256xf32>
    %cst_4 = arith.constant 3.200000e+01 : f32
    %5 = vector.broadcast %cst_4 : f32 to vector<1x256xf32>
    %6 = arith.divf %4, %5 : vector<1x256xf32>
    %7 = vector.broadcast %6 : vector<1x256xf32> to vector<32x256xf32>
    %8 = arith.subf %2, %7 : vector<32x256xf32>
    %9 = arith.mulf %8, %8 : vector<32x256xf32>
    %cst_5 = arith.constant dense<0.000000e+00> : vector<256xf32>
    %10 = vector.multi_reduction <add>, %9, %cst_5 [0] : vector<32x256xf32> to vector<256xf32>
    %11 = vector.shape_cast %10 : vector<256xf32> to vector<1x256xf32>
    %cst_6 = arith.constant 3.200000e+01 : f32
    %12 = vector.broadcast %cst_6 : f32 to vector<1x256xf32>
    %13 = arith.divf %11, %12 : vector<1x256xf32>
    %c0_7 = arith.constant 0 : index
    %c0_8 = arith.constant 0 : index
    %14 = vector.load %arg2[%c0_7, %c0_8] : memref<1x256xf32, #tpu.memory_space<vmem>>, vector<1x256xf32>
    %15 = vector.broadcast %6 : vector<1x256xf32> to vector<32x256xf32>
    %16 = arith.subf %2, %15 : vector<32x256xf32>
    %cst_9 = arith.constant 9.99999974E-6 : f32
    %17 = vector.broadcast %cst_9 : f32 to vector<1x256xf32>
    %18 = arith.addf %13, %17 : vector<1x256xf32>
    %19 = math.rsqrt %18 : vector<1x256xf32>
    %20 = vector.broadcast %19 : vector<1x256xf32> to vector<32x256xf32>
    %21 = arith.mulf %16, %20 : vector<32x256xf32>
    %22 = vector.broadcast %14 : vector<1x256xf32> to vector<32x256xf32>
    %23 = arith.mulf %22, %21 : vector<32x256xf32>
    %c0_10 = arith.constant 0 : index
    %c0_11 = arith.constant 0 : index
    %24 = vector.load %arg3[%c0_10, %c0_11] : memref<1x256xf32, #tpu.memory_space<vmem>>, vector<1x256xf32>
    %25 = vector.broadcast %24 : vector<1x256xf32> to vector<32x256xf32>
    %26 = arith.addf %23, %25 : vector<32x256xf32>
    %cst_12 = arith.constant 0.000000e+00 : f32
    %27 = vector.broadcast %cst_12 : f32 to vector<32x256xf32>
    %28 = arith.cmpf oge, %26, %27 : vector<32x256xf32>
    %cst_13 = arith.constant 2.000000e-01 : f32
    %29 = vector.broadcast %cst_13 : f32 to vector<32x256xf32>
    %30 = arith.mulf %29, %26 : vector<32x256xf32>
    %31 = arith.select %28, %26, %30 : vector<32x256xi1>, vector<32x256xf32>
    %32 = arith.truncf %31 : vector<32x256xf32> to vector<32x256xbf16>
    %33 = arith.extf %32 : vector<32x256xbf16> to vector<32x256xf32>
    %c0_14 = arith.constant 0 : index
    %c0_15 = arith.constant 0 : index
    %34 = vector.load %arg4[%c0_14, %c0_15] : memref<16x256xbf16, #tpu.memory_space<vmem>>, vector<16x256xbf16>
    %35 = arith.extf %34 : vector<16x256xbf16> to vector<16x256xf32>
    %36 = vector.extract_strided_slice %33 {offsets = [0, 0], sizes = [16, 256], strides = [1, 1]} : vector<32x256xf32> to vector<16x256xf32>
    %37 = arith.mulf %36, %35 : vector<16x256xf32>
    %cst_16 = arith.constant dense<0.000000e+00> : vector<16xf32>
    %38 = vector.multi_reduction <add>, %37, %cst_16 [1] : vector<16x256xf32> to vector<16xf32>
    %39 = vector.shape_cast %38 : vector<16xf32> to vector<16x1xf32>
    %cst_17 = arith.constant dense<0.000000e+00> : vector<1xf32>
    %40 = vector.multi_reduction <add>, %39, %cst_17 [0] : vector<16x1xf32> to vector<1xf32>
    %41 = vector.shape_cast %40 : vector<1xf32> to vector<1x1xf32>
    %42 = vector.extract_strided_slice %33 {offsets = [16, 0], sizes = [16, 256], strides = [1, 1]} : vector<32x256xf32> to vector<16x256xf32>
    %43 = arith.mulf %42, %35 : vector<16x256xf32>
    %cst_18 = arith.constant dense<0.000000e+00> : vector<16xf32>
    %44 = vector.multi_reduction <add>, %43, %cst_18 [1] : vector<16x256xf32> to vector<16xf32>
    %45 = vector.shape_cast %44 : vector<16xf32> to vector<16x1xf32>
    %cst_19 = arith.constant dense<0.000000e+00> : vector<1xf32>
    %46 = vector.multi_reduction <add>, %45, %cst_19 [0] : vector<16x1xf32> to vector<1xf32>
    %47 = vector.shape_cast %46 : vector<1xf32> to vector<1x1xf32>
    %48 = tpu.concatenate %41, %47 in 0 : vector<1x1xf32>, vector<1x1xf32> -> vector<2x1xf32>
    %c0_20 = arith.constant 0 : index
    %c0_21 = arith.constant 0 : index
    %49 = vector.load %arg5[%c0_20, %c0_21] : memref<2x1xf32, #tpu.memory_space<vmem>>, vector<2x1xf32>
    tpu.vector_store %arg5[%c0_20, %c0_21], %48 {strides = array<i32>} : memref<2x1xf32, #tpu.memory_space<vmem>>, vector<2x1xf32>,
    return
  }
}

</mosaic_0001>

<bundles_post_ra>
// kernel: discriminator_forward.4
= control target key start
LH: loop header
LB: loop body
LE: loop exit
PB: predicated region body
PF: predicated region fallthrough
CT: control target
= control target key end

     0   :  { %s2047_s9 = smov 0   ;;  %s2416_s0 = inlined_call_operand.vmem [shape: bf16[2048,128], index: 0, kind: input, shape index: {}]   ;;  %s2417_s1 = inlined_call_operand.vmem [shape: bf16[128,32], index: 1, kind: input, shape index: {}]   ;;  %s2418_s2 = inlined_call_operand.vmem [shape: f32[2048,32], index: 2, kind: output, shape index: {}]  }
   0x1 LB: > { %s1621_s10 = sadd.s32 4294967295, %s2030_s9   ;;  %p1625_p0 = scmp.ge.s32.totalorder %s2030_s9, 1  ;;  %s2030_s9 = sphi %s2047_s9, %s12_s9  }
   0x2   : > { %p113_p1 = scmp.lt.s32.totalorder %s2030_s9, 3 }
   0x4   : > { %p114_p2 = pnand %p1625_p0, %p113_p1 }
   0x5   : > { %s1626_s19 = sshll.u32 (!%p114_p2), %s1621_s10, 7 }
   0x6   : > { %117 = sbr.rel (%p114_p2) target bundleno = 429 (0x1ad), region = 28  ;;  %p136_p3 = scmp.lt.s32.totalorder (!%p114_p2), %s1626_s19, 255 }
   0xb   : > { %v1991_v0 = vld [vmem:[%s2417_s1 + $0x38] sm:$0xff]  ;;  %v1990_v1 = vld [vmem:[%s2417_s1 + $0x30] sm:$0xff]  ;;  %v1989_v2 = vld [vmem:[%s2417_s1 + $0x28] sm:$0xff]  ;;  %s2420_s19 = smov (!%p136_p3, %s1626_s19), 255  ;;  %vm1436_vm0 = vcmask 261120  }
   0xc   : > { %723 = vmatpush.bf16.msra.mxu0 %v1991_v0  ;;  %1992 = vmatpush.bf16.msra.mxu1 %v1991_v0  ;;  %v1988_v3 = vld [vmem:[%s2417_s1 + $0x20] sm:$0xff]  ;;  %v1987_v4 = vld [vmem:[%s2417_s1 + $0x18] sm:$0xff]  ;;  %v1986_v5 = vld [vmem:[%s2417_s1 + $0x10] sm:$0xff]  ;;  %s1627_s26 = sshll.u32 %s2420_s19, 2  ;;  %s1629_s4 = sshll.u32 %s2420_s19, 3 }
   0xd   : > { %1993 = vmatpush.bf16.msra.mxu2 %v1991_v0  ;;  %1994 = vmatpush.bf16.msra.mxu3 %v1991_v0  ;;  %v1985_v6 = vld [vmem:[%s2417_s1 + $0x8] sm:$0xff]  ;;  %v1984_v7 = vld [vmem:[%s2417_s1] sm:$0xff]  ;;  %s2085_s3 = scalar_lea.vmem %s2416_s0, %s1627_s26  ;;  %s2127_s7 = scalar_lea.vmem %s2418_s2, %s1629_s4 }
   0xe   : > { %v1920_v8 = vld [vmem:[%s2085_s3] sm:$0xff]  ;;  %v1921_v12 = vld [vmem:[%s2085_s3 + $0x8] sm:$0xff]  ;;  %v1922_v16 = vld [vmem:[%s2085_s3 + $0x10] sm:$0xff] }
   0xf   : > { %v1936_v9 = vld [vmem:[%s2085_s3 + $0x80] sm:$0xff]  ;;  %v1937_v13 = vld [vmem:[%s2085_s3 + $0x88] sm:$0xff]  ;;  %v1938_v17 = vld [vmem:[%s2085_s3 + $0x90] sm:$0xff] }
  0x10   : > { %724 = vmatpush.bf16.msra.mxu0 %v1990_v1  ;;  %1995 = vmatpush.bf16.msra.mxu1 %v1990_v1  ;;  %v1952_v10 = vld [vmem:[%s2085_s3 + $0x100] sm:$0xff]  ;;  %v1953_v14 = vld [vmem:[%s2085_s3 + $0x108] sm:$0xff]  ;;  %v1954_v18 = vld [vmem:[%s2085_s3 + $0x110] sm:$0xff] }
  0x11   : > { %1996 = vmatpush.bf16.msra.mxu2 %v1990_v1  ;;  %1997 = vmatpush.bf16.msra.mxu3 %v1990_v1  ;;  %v1968_v11 = vld [vmem:[%s2085_s3 + $0x180] sm:$0xff]  ;;  %v1969_v15 = vld [vmem:[%s2085_s3 + $0x188] sm:$0xff]  ;;  %v1970_v19 = vld [vmem:[%s2085_s3 + $0x190] sm:$0xff] }
  0x12   : > { %v1923_v20 = vld [vmem:[%s2085_s3 + $0x18] sm:$0xff]  ;;  %v1924_v24 = vld [vmem:[%s2085_s3 + $0x20] sm:$0xff]  ;;  %v1925_v28 = vld [vmem:[%s2085_s3 + $0x28] sm:$0xff] }
  0x13   : > { %v1939_v21 = vld [vmem:[%s2085_s3 + $0x98] sm:$0xff]  ;;  %v1940_v25 = vld [vmem:[%s2085_s3 + $0xa0] sm:$0xff]  ;;  %v1941_v29 = vld [vmem:[%s2085_s3 + $0xa8] sm:$0xff] }
  0x14   : > { %725 = vmatpush.bf16.msra.mxu0 %v1989_v2  ;;  %1998 = vmatpush.bf16.msra.mxu1 %v1989_v2  ;;  %v1955_v22 = vld [vmem:[%s2085_s3 + $0x118] sm:$0xff]  ;;  %v1956_v26 = vld [vmem:[%s2085_s3 + $0x120] sm:$0xff]  ;;  %v1957_v30 = vld [vmem:[%s2085_s3 + $0x128] sm:$0xff] }
  0x15   : > { %1999 = vmatpush.bf16.msra.mxu2 %v1989_v2  ;;  %2000 = vmatpush.bf16.msra.mxu3 %v1989_v2  ;;  %v1971_v23 = vld [vmem:[%s2085_s3 + $0x198] sm:$0xff]  ;;  %v1972_v27 = vld [vmem:[%s2085_s3 + $0x1a0] sm:$0xff]  ;;  %v1973_v31 = vld [vmem:[%s2085_s3 + $0x1a8] sm:$0xff] }
  0x16   : > { %v1926_v32 = vld [vmem:[%s2085_s3 + $0x30] sm:$0xff]  ;;  %v1927_v36 = vld [vmem:[%s2085_s3 + $0x38] sm:$0xff]  ;;  %v1928_v40 = vld [vmem:[%s2085_s3 + $0x40] sm:$0xff] }
  0x17   : > { %v1942_v33 = vld [vmem:[%s2085_s3 + $0xb0] sm:$0xff]  ;;  %v1943_v37 = vld [vmem:[%s2085_s3 + $0xb8] sm:$0xff]  ;;  %v1944_v41 = vld [vmem:[%s2085_s3 + $0xc0] sm:$0xff] }
  0x18   : > { %726 = vmatpush.bf16.msra.mxu0 %v1988_v3  ;;  %2001 = vmatpush.bf16.msra.mxu1 %v1988_v3  ;;  %v1958_v34 = vld [vmem:[%s2085_s3 + $0x130] sm:$0xff]  ;;  %v1959_v38 = vld [vmem:[%s2085_s3 + $0x138] sm:$0xff]  ;;  %v1960_v44 = vld [vmem:[%s2085_s3 + $0x140] sm:$0xff] }
  0x19   : > { %2002 = vmatpush.bf16.msra.mxu2 %v1988_v3  ;;  %2003 = vmatpush.bf16.msra.mxu3 %v1988_v3  ;;  %v1974_v35 = vld [vmem:[%s2085_s3 + $0x1b0] sm:$0xff]  ;;  %v1975_v39 = vld [vmem:[%s2085_s3 + $0x1b8] sm:$0xff]  ;;  %v1976_v45 = vld [vmem:[%s2085_s3 + $0x1c0] sm:$0xff] }
  0x1a   : > { %v1929_v62 = vld [vmem:[%s2085_s3 + $0x48] sm:$0xff] }
  0x1b   : > { %v1945_v1 = vld [vmem:[%s2085_s3 + $0xc8] sm:$0xff] }
  0x1c   : > { %727 = vmatpush.bf16.msra.mxu0 %v1987_v4  ;;  %2004 = vmatpush.bf16.msra.mxu1 %v1987_v4  ;;  %v1961_v2 = vld [vmem:[%s2085_s3 + $0x148] sm:$0xff] }
  0x1d   : > { %2005 = vmatpush.bf16.msra.mxu2 %v1987_v4  ;;  %2006 = vmatpush.bf16.msra.mxu3 %v1987_v4  ;;  %v1977_v3 = vld [vmem:[%s2085_s3 + $0x1c8] sm:$0xff] }
  0x20   : > { %728 = vmatpush.bf16.msra.mxu0 %v1986_v5  ;;  %2007 = vmatpush.bf16.msra.mxu1 %v1986_v5 }
  0x21   : > { %2008 = vmatpush.bf16.msra.mxu2 %v1986_v5  ;;  %2009 = vmatpush.bf16.msra.mxu3 %v1986_v5 }
  0x24   : > { %729 = vmatpush.bf16.msra.mxu0 %v1985_v6  ;;  %2010 = vmatpush.bf16.msra.mxu1 %v1985_v6 }
  0x25   : > { %2011 = vmatpush.bf16.msra.mxu2 %v1985_v6  ;;  %2012 = vmatpush.bf16.msra.mxu3 %v1985_v6 }
  0x28   : > { %730 = vmatpush.bf16.msra.mxu0 %v1984_v7  ;;  %2013 = vmatpush.bf16.msra.mxu1 %v1984_v7 }
  0x29   : > { %2014 = vmatpush.bf16.msra.mxu2 %v1984_v7  ;;  %2015 = vmatpush.bf16.msra.mxu3 %v1984_v7 }
  0x2b   : > { %731 = vmatmul.bf16.vlgmr.msra.gmra.mxu0 %v1920_v8  ;;  %811 = vmatmul.bf16.vlgmr.msra.gmra.mxu1 %v1936_v9 }
  0x2c   : > { %891 = vmatmul.bf16.vlgmr.msra.gmra.mxu2 %v1952_v10  ;;  %971 = vmatmul.bf16.vlgmr.msra.gmra.mxu3 %v1968_v11 }
  0x3b   : > { %736 = vmatmul.bf16.gmra.mxu0 %v1921_v12  ;;  %816 = vmatmul.bf16.gmra.mxu1 %v1937_v13 }
  0x3c   : > { %896 = vmatmul.bf16.gmra.mxu2 %v1953_v14  ;;  %976 = vmatmul.bf16.gmra.mxu3 %v1969_v15 }
  0x4b   : > { %741 = vmatmul.bf16.gmra.mxu0 %v1922_v16  ;;  %821 = vmatmul.bf16.gmra.mxu1 %v1938_v17 }
  0x4c   : > { %901 = vmatmul.bf16.gmra.mxu2 %v1954_v18  ;;  %981 = vmatmul.bf16.gmra.mxu3 %v1970_v19 }
  0x5b   : > { %746 = vmatmul.bf16.gmra.mxu0 %v1923_v20  ;;  %826 = vmatmul.bf16.gmra.mxu1 %v1939_v21 }
  0x5c   : > { %906 = vmatmul.bf16.gmra.mxu2 %v1955_v22  ;;  %986 = vmatmul.bf16.gmra.mxu3 %v1971_v23 }
  0x6b   : > { %751 = vmatmul.bf16.gmra.mxu0 %v1924_v24  ;;  %831 = vmatmul.bf16.gmra.mxu1 %v1940_v25 }
  0x6c   : > { %911 = vmatmul.bf16.gmra.mxu2 %v1956_v26  ;;  %991 = vmatmul.bf16.gmra.mxu3 %v1972_v27  ;;  %v1930_v26 = vld [vmem:[%s2085_s3 + $0x50] sm:$0xff] }
  0x7b   : > { %756 = vmatmul.bf16.gmra.mxu0 %v1925_v28  ;;  %836 = vmatmul.bf16.gmra.mxu1 %v1941_v29  ;;  %v1946_v29 = vld [vmem:[%s2085_s3 + $0xd0] sm:$0xff] }
  0x7c   : > { %916 = vmatmul.bf16.gmra.mxu2 %v1957_v30  ;;  %996 = vmatmul.bf16.gmra.mxu3 %v1973_v31  ;;  %v1962_v30 = vld [vmem:[%s2085_s3 + $0x150] sm:$0xff] }
  0x7d   : > { %v1978_v31 = vld [vmem:[%s2085_s3 + $0x1d0] sm:$0xff] }
  0x8b   : > { %761 = vmatmul.bf16.gmra.mxu0 %v1926_v32  ;;  %841 = vmatmul.bf16.gmra.mxu1 %v1942_v33 }
  0x8c   : > { %921 = vmatmul.bf16.gmra.mxu2 %v1958_v34  ;;  %1001 = vmatmul.bf16.gmra.mxu3 %v1974_v35 }
  0x9b   : > { %766 = vmatmul.bf16.gmra.mxu0 %v1927_v36  ;;  %846 = vmatmul.bf16.gmra.mxu1 %v1943_v37 }
  0x9c   : > { %926 = vmatmul.bf16.gmra.mxu2 %v1959_v38  ;;  %1006 = vmatmul.bf16.gmra.mxu3 %v1975_v39 }
  0xa8   : > { %v732_v42 = vpop.f32.mrf.mxu0  ;;  %v812_v43 = vpop.f32.mrf.mxu1 }
  0xa9   : > { %vm1052_vm1 = vcmp.ge.f32.partialorder %v732_v42, 0.0  ;;  %v1180_v46 = vmul.f32 0.2, %v732_v42  ;;  %vm1084_vm2 = vcmp.ge.f32.partialorder %v812_v43, 0.0  ;;  %v1212_v47 = vmul.f32 0.2, %v812_v43 }
  0xab   : > { %v1308_v48 = vsel %vm1052_vm1, %v732_v42, %v1180_v46  ;;  %v1340_v49 = vsel %vm1084_vm2, %v812_v43, %v1212_v47  ;;  %771 = vmatmul.bf16.gmra.mxu0 %v1928_v40  ;;  %851 = vmatmul.bf16.gmra.mxu1 %v1944_v41 }
  0xac   : > { %1437 = vst.msk [vmem:[%s2127_s7] sm:$0xff] %vm1436_vm0, %v1308_v48  ;;  %931 = vmatmul.bf16.gmra.mxu2 %v1960_v44  ;;  %1011 = vmatmul.bf16.gmra.mxu3 %v1976_v45 }
  0xad   : > { %1469 = vst.msk [vmem:[%s2127_s7 + $0x100] sm:$0xff] %vm1436_vm0, %v1340_v49 }
  0xaf   : > { %v892_v50 = vpop.f32.mrf.mxu2  ;;  %v972_v51 = vpop.f32.mrf.mxu3 }
  0xb0   : > { %vm1116_vm3 = vcmp.ge.f32.partialorder %v892_v50, 0.0  ;;  %v1244_v52 = vmul.f32 0.2, %v892_v50  ;;  %vm1148_vm4 = vcmp.ge.f32.partialorder %v972_v51, 0.0  ;;  %v1276_v53 = vmul.f32 0.2, %v972_v51  ;;  %v734_v54 = vpop.f32.mrf.mxu0  ;;  %v814_v55 = vpop.f32.mrf.mxu1 }
  0xb1   : > { %vm1053_vm5 = vcmp.ge.f32.partialorder %v734_v54, 0.0  ;;  %v1181_v56 = vmul.f32 0.2, %v734_v54  ;;  %vm1085_vm6 = vcmp.ge.f32.partialorder %v814_v55, 0.0  ;;  %v1213_v57 = vmul.f32 0.2, %v814_v55 }
  0xb2   : > { %v1372_v58 = vsel %vm1116_vm3, %v892_v50, %v1244_v52  ;;  %v1404_v59 = vsel %vm1148_vm4, %v972_v51, %v1276_v53 }
  0xb3   : > { %1501 = vst.msk [vmem:[%s2127_s7 + $0x200] sm:$0xff] %vm1436_vm0, %v1372_v58  ;;  %v1309_v60 = vsel %vm1053_vm5, %v734_v54, %v1181_v56  ;;  %v1341_v61 = vsel %vm1085_vm6, %v814_v55, %v1213_v57  ;;  %v1931_v54 = vld [vmem:[%s2085_s3 + $0x58] sm:$0xff] }
  0xb4   : > { %1533 = vst.msk [vmem:[%s2127_s7 + $0x300] sm:$0xff] %vm1436_vm0, %v1404_v59  ;;  %v1947_v57 = vld [vmem:[%s2085_s3 + $0xd8] sm:$0xff] }
  0xb5   : > { %1438 = vst.msk [vmem:[%s2127_s7 + $0x8] sm:$0xff] %vm1436_vm0, %v1309_v60  ;;  %v1963_v58 = vld [vmem:[%s2085_s3 + $0x158] sm:$0xff] }
  0xb6   : > { %1470 = vst.msk [vmem:[%s2127_s7 + $0x108] sm:$0xff] %vm1436_vm0, %v1341_v61  ;;  %v1979_v59 = vld [vmem:[%s2085_s3 + $0x1d8] sm:$0xff] }
  0xb7   : > { %v894_v63 = vpop.f32.mrf.mxu2  ;;  %v974_v0 = vpop.f32.mrf.mxu3 }
  0xb8   : > { %vm1117_vm7 = vcmp.ge.f32.partialorder %v894_v63, 0.0  ;;  %v1245_v4 = vmul.f32 0.2, %v894_v63  ;;  %vm1149_vm8 = vcmp.ge.f32.partialorder %v974_v0, 0.0  ;;  %v1277_v5 = vmul.f32 0.2, %v974_v0  ;;  %v737_v6 = vpop.f32.mrf.mxu0  ;;  %v817_v7 = vpop.f32.mrf.mxu1 }
  0xb9   : > { %vm1054_vm9 = vcmp.ge.f32.partialorder %v737_v6, 0.0  ;;  %v1182_v8 = vmul.f32 0.2, %v737_v6  ;;  %vm1086_vm10 = vcmp.ge.f32.partialorder %v817_v7, 0.0  ;;  %v1214_v9 = vmul.f32 0.2, %v817_v7 }
  0xba   : > { %v1373_v10 = vsel %vm1117_vm7, %v894_v63, %v1245_v4  ;;  %v1405_v11 = vsel %vm1149_vm8, %v974_v0, %v1277_v5 }
  0xbb   : > { %1502 = vst.msk [vmem:[%s2127_s7 + $0x208] sm:$0xff] %vm1436_vm0, %v1373_v10  ;;  %v1310_v12 = vsel %vm1054_vm9, %v737_v6, %v1182_v8  ;;  %v1342_v13 = vsel %vm1086_vm10, %v817_v7, %v1214_v9  ;;  %776 = vmatmul.bf16.gmra.mxu0 %v1929_v62  ;;  %856 = vmatmul.bf16.gmra.mxu1 %v1945_v1 }
  0xbc   : > { %1534 = vst.msk [vmem:[%s2127_s7 + $0x308] sm:$0xff] %vm1436_vm0, %v1405_v11  ;;  %936 = vmatmul.bf16.gmra.mxu2 %v1961_v2  ;;  %1016 = vmatmul.bf16.gmra.mxu3 %v1977_v3 }
  0xbd   : > { %1439 = vst.msk [vmem:[%s2127_s7 + $0x10] sm:$0xff] %vm1436_vm0, %v1310_v12 }
  0xbe   : > { %1471 = vst.msk [vmem:[%s2127_s7 + $0x110] sm:$0xff] %vm1436_vm0, %v1342_v13 }
  0xbf   : > { %v897_v14 = vpop.f32.mrf.mxu2  ;;  %v977_v15 = vpop.f32.mrf.mxu3 }
  0xc0   : > { %vm1118_vm11 = vcmp.ge.f32.partialorder %v897_v14, 0.0  ;;  %v1246_v16 = vmul.f32 0.2, %v897_v14  ;;  %vm1150_vm12 = vcmp.ge.f32.partialorder %v977_v15, 0.0  ;;  %v1278_v17 = vmul.f32 0.2, %v977_v15  ;;  %v739_v18 = vpop.f32.mrf.mxu0  ;;  %v819_v19 = vpop.f32.mrf.mxu1 }
  0xc1   : > { %vm1055_vm13 = vcmp.ge.f32.partialorder %v739_v18, 0.0  ;;  %v1183_v20 = vmul.f32 0.2, %v739_v18  ;;  %vm1087_vm14 = vcmp.ge.f32.partialorder %v819_v19, 0.0  ;;  %v1215_v21 = vmul.f32 0.2, %v819_v19 }
  0xc2   : > { %v1374_v22 = vsel %vm1118_vm11, %v897_v14, %v1246_v16  ;;  %v1406_v23 = vsel %vm1150_vm12, %v977_v15, %v1278_v17 }
  0xc3   : > { %1503 = vst.msk [vmem:[%s2127_s7 + $0x210] sm:$0xff] %vm1436_vm0, %v1374_v22  ;;  %v1311_v24 = vsel %vm1055_vm13, %v739_v18, %v1183_v20  ;;  %v1343_v25 = vsel %vm1087_vm14, %v819_v19, %v1215_v21  ;;  %v1932_v18 = vld [vmem:[%s2085_s3 + $0x60] sm:$0xff] }
  0xc4   : > { %1535 = vst.msk [vmem:[%s2127_s7 + $0x310] sm:$0xff] %vm1436_vm0, %v1406_v23  ;;  %v1948_v21 = vld [vmem:[%s2085_s3 + $0xe0] sm:$0xff] }
  0xc5   : > { %1440 = vst.msk [vmem:[%s2127_s7 + $0x18] sm:$0xff] %vm1436_vm0, %v1311_v24  ;;  %v1964_v22 = vld [vmem:[%s2085_s3 + $0x160] sm:$0xff] }
  0xc6   : > { %1472 = vst.msk [vmem:[%s2127_s7 + $0x118] sm:$0xff] %vm1436_vm0, %v1343_v25  ;;  %v1980_v23 = vld [vmem:[%s2085_s3 + $0x1e0] sm:$0xff] }
  0xc7   : > { %v899_v27 = vpop.f32.mrf.mxu2  ;;  %v979_v28 = vpop.f32.mrf.mxu3 }
  0xc8   : > { %vm1119_vm15 = vcmp.ge.f32.partialorder %v899_v27, 0.0  ;;  %v1247_v32 = vmul.f32 0.2, %v899_v27  ;;  %vm1151_vm1 = vcmp.ge.f32.partialorder %v979_v28, 0.0  ;;  %v1279_v33 = vmul.f32 0.2, %v979_v28  ;;  %v742_v34 = vpop.f32.mrf.mxu0  ;;  %v822_v35 = vpop.f32.mrf.mxu1 }
  0xc9   : > { %vm1056_vm2 = vcmp.ge.f32.partialorder %v742_v34, 0.0  ;;  %v1184_v36 = vmul.f32 0.2, %v742_v34  ;;  %vm1088_vm3 = vcmp.ge.f32.partialorder %v822_v35, 0.0  ;;  %v1216_v37 = vmul.f32 0.2, %v822_v35 }
  0xca   : > { %v1375_v38 = vsel %vm1119_vm15, %v899_v27, %v1247_v32  ;;  %v1407_v39 = vsel %vm1151_vm1, %v979_v28, %v1279_v33 }
  0xcb   : > { %1504 = vst.msk [vmem:[%s2127_s7 + $0x218] sm:$0xff] %vm1436_vm0, %v1375_v38  ;;  %v1312_v40 = vsel %vm1056_vm2, %v742_v34, %v1184_v36  ;;  %v1344_v41 = vsel %vm1088_vm3, %v822_v35, %v1216_v37  ;;  %781 = vmatmul.bf16.gmra.mxu0 %v1930_v26  ;;  %861 = vmatmul.bf16.gmra.mxu1 %v1946_v29 }
  0xcc   : > { %1536 = vst.msk [vmem:[%s2127_s7 + $0x318] sm:$0xff] %vm1436_vm0, %v1407_v39  ;;  %941 = vmatmul.bf16.gmra.mxu2 %v1962_v30  ;;  %1021 = vmatmul.bf16.gmra.mxu3 %v1978_v31 }
  0xcd   : > { %1441 = vst.msk [vmem:[%s2127_s7 + $0x20] sm:$0xff] %vm1436_vm0, %v1312_v40 }
  0xce   : > { %1473 = vst.msk [vmem:[%s2127_s7 + $0x120] sm:$0xff] %vm1436_vm0, %v1344_v41 }
  0xcf   : > { %v902_v42 = vpop.f32.mrf.mxu2  ;;  %v982_v43 = vpop.f32.mrf.mxu3 }
  0xd0   : > { %vm1120_vm4 = vcmp.ge.f32.partialorder %v902_v42, 0.0  ;;  %v1248_v44 = vmul.f32 0.2, %v902_v42  ;;  %vm1152_vm5 = vcmp.ge.f32.partialorder %v982_v43, 0.0  ;;  %v1280_v45 = vmul.f32 0.2, %v982_v43  ;;  %v744_v46 = vpop.f32.mrf.mxu0  ;;  %v824_v47 = vpop.f32.mrf.mxu1 }
  0xd1   : > { %vm1057_vm6 = vcmp.ge.f32.partialorder %v744_v46, 0.0  ;;  %v1185_v48 = vmul.f32 0.2, %v744_v46  ;;  %vm1089_vm7 = vcmp.ge.f32.partialorder %v824_v47, 0.0  ;;  %v1217_v49 = vmul.f32 0.2, %v824_v47 }
  0xd2   : > { %v1376_v50 = vsel %vm1120_vm4, %v902_v42, %v1248_v44  ;;  %v1408_v51 = vsel %vm1152_vm5, %v982_v43, %v1280_v45 }
  0xd3   : > { %1505 = vst.msk [vmem:[%s2127_s7 + $0x220] sm:$0xff] %vm1436_vm0, %v1376_v50  ;;  %v1313_v52 = vsel %vm1057_vm6, %v744_v46, %v1185_v48  ;;  %v1345_v53 = vsel %vm1089_vm7, %v824_v47, %v1217_v49  ;;  %v1933_v46 = vld [vmem:[%s2085_s3 + $0x68] sm:$0xff] }
  0xd4   : > { %1537 = vst.msk [vmem:[%s2127_s7 + $0x320] sm:$0xff] %vm1436_vm0, %v1408_v51  ;;  %v1949_v49 = vld [vmem:[%s2085_s3 + $0xe8] sm:$0xff] }
  0xd5   : > { %1442 = vst.msk [vmem:[%s2127_s7 + $0x28] sm:$0xff] %vm1436_vm0, %v1313_v52  ;;  %v1965_v50 = vld [vmem:[%s2085_s3 + $0x168] sm:$0xff] }
  0xd6   : > { %1474 = vst.msk [vmem:[%s2127_s7 + $0x128] sm:$0xff] %vm1436_vm0, %v1345_v53  ;;  %v1981_v51 = vld [vmem:[%s2085_s3 + $0x1e8] sm:$0xff] }
  0xd7   : > { %v904_v55 = vpop.f32.mrf.mxu2  ;;  %v984_v56 = vpop.f32.mrf.mxu3 }
  0xd8   : > { %vm1121_vm8 = vcmp.ge.f32.partialorder %v904_v55, 0.0  ;;  %v1249_v60 = vmul.f32 0.2, %v904_v55  ;;  %vm1153_vm9 = vcmp.ge.f32.partialorder %v984_v56, 0.0  ;;  %v1281_v61 = vmul.f32 0.2, %v984_v56  ;;  %v747_v62 = vpop.f32.mrf.mxu0  ;;  %v827_v63 = vpop.f32.mrf.mxu1 }
  0xd9   : > { %vm1058_vm10 = vcmp.ge.f32.partialorder %v747_v62, 0.0  ;;  %v1186_v0 = vmul.f32 0.2, %v747_v62  ;;  %vm1090_vm11 = vcmp.ge.f32.partialorder %v827_v63, 0.0  ;;  %v1218_v1 = vmul.f32 0.2, %v827_v63 }
  0xda   : > { %v1377_v2 = vsel %vm1121_vm8, %v904_v55, %v1249_v60  ;;  %v1409_v3 = vsel %vm1153_vm9, %v984_v56, %v1281_v61 }
  0xdb   : > { %1506 = vst.msk [vmem:[%s2127_s7 + $0x228] sm:$0xff] %vm1436_vm0, %v1377_v2  ;;  %v1314_v4 = vsel %vm1058_vm10, %v747_v62, %v1186_v0  ;;  %v1346_v5 = vsel %vm1090_vm11, %v827_v63, %v1218_v1  ;;  %786 = vmatmul.bf16.gmra.mxu0 %v1931_v54  ;;  %866 = vmatmul.bf16.gmra.mxu1 %v1947_v57 }
  0xdc   : > { %1538 = vst.msk [vmem:[%s2127_s7 + $0x328] sm:$0xff] %vm1436_vm0, %v1409_v3  ;;  %946 = vmatmul.bf16.gmra.mxu2 %v1963_v58  ;;  %1026 = vmatmul.bf16.gmra.mxu3 %v1979_v59 }
  0xdd   : > { %1443 = vst.msk [vmem:[%s2127_s7 + $0x30] sm:$0xff] %vm1436_vm0, %v1314_v4 }
  0xde   : > { %1475 = vst.msk [vmem:[%s2127_s7 + $0x130] sm:$0xff] %vm1436_vm0, %v1346_v5 }
  0xdf   : > { %v907_v6 = vpop.f32.mrf.mxu2  ;;  %v987_v7 = vpop.f32.mrf.mxu3 }
  0xe0   : > { %vm1122_vm12 = vcmp.ge.f32.partialorder %v907_v6, 0.0  ;;  %v1250_v8 = vmul.f32 0.2, %v907_v6  ;;  %vm1154_vm13 = vcmp.ge.f32.partialorder %v987_v7, 0.0  ;;  %v1282_v9 = vmul.f32 0.2, %v987_v7  ;;  %v749_v10 = vpop.f32.mrf.mxu0  ;;  %v829_v11 = vpop.f32.mrf.mxu1 }
  0xe1   : > { %vm1059_vm14 = vcmp.ge.f32.partialorder %v749_v10, 0.0  ;;  %v1187_v12 = vmul.f32 0.2, %v749_v10  ;;  %vm1091_vm15 = vcmp.ge.f32.partialorder %v829_v11, 0.0  ;;  %v1219_v13 = vmul.f32 0.2, %v829_v11 }
  0xe2   : > { %v1378_v14 = vsel %vm1122_vm12, %v907_v6, %v1250_v8  ;;  %v1410_v15 = vsel %vm1154_vm13, %v987_v7, %v1282_v9 }
  0xe3   : > { %1507 = vst.msk [vmem:[%s2127_s7 + $0x230] sm:$0xff] %vm1436_vm0, %v1378_v14  ;;  %v1315_v16 = vsel %vm1059_vm14, %v749_v10, %v1187_v12  ;;  %v1347_v17 = vsel %vm1091_vm15, %v829_v11, %v1219_v13  ;;  %v1934_v10 = vld [vmem:[%s2085_s3 + $0x70] sm:$0xff] }
  0xe4   : > { %1539 = vst.msk [vmem:[%s2127_s7 + $0x330] sm:$0xff] %vm1436_vm0, %v1410_v15  ;;  %v1950_v13 = vld [vmem:[%s2085_s3 + $0xf0] sm:$0xff] }
  0xe5   : > { %1444 = vst.msk [vmem:[%s2127_s7 + $0x38] sm:$0xff] %vm1436_vm0, %v1315_v16  ;;  %v1966_v14 = vld [vmem:[%s2085_s3 + $0x170] sm:$0xff] }
  0xe6   : > { %1476 = vst.msk [vmem:[%s2127_s7 + $0x138] sm:$0xff] %vm1436_vm0, %v1347_v17  ;;  %v1982_v15 = vld [vmem:[%s2085_s3 + $0x1f0] sm:$0xff] }
  0xe7   : > { %v909_v19 = vpop.f32.mrf.mxu2  ;;  %v989_v20 = vpop.f32.mrf.mxu3 }
  0xe8   : > { %vm1123_vm1 = vcmp.ge.f32.partialorder %v909_v19, 0.0  ;;  %v1251_v24 = vmul.f32 0.2, %v909_v19  ;;  %vm1155_vm2 = vcmp.ge.f32.partialorder %v989_v20, 0.0  ;;  %v1283_v25 = vmul.f32 0.2, %v989_v20  ;;  %v752_v26 = vpop.f32.mrf.mxu0  ;;  %v832_v27 = vpop.f32.mrf.mxu1 }
  0xe9   : > { %vm1060_vm3 = vcmp.ge.f32.partialorder %v752_v26, 0.0  ;;  %v1188_v28 = vmul.f32 0.2, %v752_v26  ;;  %vm1092_vm4 = vcmp.ge.f32.partialorder %v832_v27, 0.0  ;;  %v1220_v29 = vmul.f32 0.2, %v832_v27 }
  0xea   : > { %v1379_v30 = vsel %vm1123_vm1, %v909_v19, %v1251_v24  ;;  %v1411_v31 = vsel %vm1155_vm2, %v989_v20, %v1283_v25 }
  0xeb   : > { %1508 = vst.msk [vmem:[%s2127_s7 + $0x238] sm:$0xff] %vm1436_vm0, %v1379_v30  ;;  %v1316_v32 = vsel %vm1060_vm3, %v752_v26, %v1188_v28  ;;  %v1348_v33 = vsel %vm1092_vm4, %v832_v27, %v1220_v29  ;;  %791 = vmatmul.bf16.gmra.mxu0 %v1932_v18  ;;  %871 = vmatmul.bf16.gmra.mxu1 %v1948_v21 }
  0xec   : > { %1540 = vst.msk [vmem:[%s2127_s7 + $0x338] sm:$0xff] %vm1436_vm0, %v1411_v31  ;;  %951 = vmatmul.bf16.gmra.mxu2 %v1964_v22  ;;  %1031 = vmatmul.bf16.gmra.mxu3 %v1980_v23 }
  0xed   : > { %1445 = vst.msk [vmem:[%s2127_s7 + $0x40] sm:$0xff] %vm1436_vm0, %v1316_v32 }
  0xee   : > { %1477 = vst.msk [vmem:[%s2127_s7 + $0x140] sm:$0xff] %vm1436_vm0, %v1348_v33 }
  0xef   : > { %v912_v34 = vpop.f32.mrf.mxu2  ;;  %v992_v35 = vpop.f32.mrf.mxu3 }
  0xf0   : > { %vm1124_vm5 = vcmp.ge.f32.partialorder %v912_v34, 0.0  ;;  %v1252_v36 = vmul.f32 0.2, %v912_v34  ;;  %vm1156_vm6 = vcmp.ge.f32.partialorder %v992_v35, 0.0  ;;  %v1284_v37 = vmul.f32 0.2, %v992_v35  ;;  %v754_v38 = vpop.f32.mrf.mxu0  ;;  %v834_v39 = vpop.f32.mrf.mxu1 }
  0xf1   : > { %vm1061_vm7 = vcmp.ge.f32.partialorder %v754_v38, 0.0  ;;  %v1189_v40 = vmul.f32 0.2, %v754_v38  ;;  %vm1093_vm8 = vcmp.ge.f32.partialorder %v834_v39, 0.0  ;;  %v1221_v41 = vmul.f32 0.2, %v834_v39 }
  0xf2   : > { %v1380_v42 = vsel %vm1124_vm5, %v912_v34, %v1252_v36  ;;  %v1412_v43 = vsel %vm1156_vm6, %v992_v35, %v1284_v37 }
  0xf3   : > { %1509 = vst.msk [vmem:[%s2127_s7 + $0x240] sm:$0xff] %vm1436_vm0, %v1380_v42  ;;  %v1317_v44 = vsel %vm1061_vm7, %v754_v38, %v1189_v40  ;;  %v1349_v45 = vsel %vm1093_vm8, %v834_v39, %v1221_v41  ;;  %v1935_v38 = vld [vmem:[%s2085_s3 + $0x78] sm:$0xff] }
  0xf4   : > { %1541 = vst.msk [vmem:[%s2127_s7 + $0x340] sm:$0xff] %vm1436_vm0, %v1412_v43  ;;  %v1951_v41 = vld [vmem:[%s2085_s3 + $0xf8] sm:$0xff] }
  0xf5   : > { %1446 = vst.msk [vmem:[%s2127_s7 + $0x48] sm:$0xff] %vm1436_vm0, %v1317_v44  ;;  %v1967_v42 = vld [vmem:[%s2085_s3 + $0x178] sm:$0xff] }
  0xf6   : > { %1478 = vst.msk [vmem:[%s2127_s7 + $0x148] sm:$0xff] %vm1436_vm0, %v1349_v45  ;;  %v1983_v43 = vld [vmem:[%s2085_s3 + $0x1f8] sm:$0xff] }
  0xf7   : > { %v914_v47 = vpop.f32.mrf.mxu2  ;;  %v994_v48 = vpop.f32.mrf.mxu3 }
  0xf8   : > { %vm1125_vm9 = vcmp.ge.f32.partialorder %v914_v47, 0.0  ;;  %v1253_v52 = vmul.f32 0.2, %v914_v47  ;;  %vm1157_vm10 = vcmp.ge.f32.partialorder %v994_v48, 0.0  ;;  %v1285_v53 = vmul.f32 0.2, %v994_v48  ;;  %v757_v54 = vpop.f32.mrf.mxu0  ;;  %v837_v55 = vpop.f32.mrf.mxu1 }
  0xf9   : > { %vm1062_vm11 = vcmp.ge.f32.partialorder %v757_v54, 0.0  ;;  %v1190_v56 = vmul.f32 0.2, %v757_v54  ;;  %vm1094_vm12 = vcmp.ge.f32.partialorder %v837_v55, 0.0  ;;  %v1222_v57 = vmul.f32 0.2, %v837_v55 }
  0xfa   : > { %v1381_v58 = vsel %vm1125_vm9, %v914_v47, %v1253_v52  ;;  %v1413_v59 = vsel %vm1157_vm10, %v994_v48, %v1285_v53 }
  0xfb   : > { %1510 = vst.msk [vmem:[%s2127_s7 + $0x248] sm:$0xff] %vm1436_vm0, %v1381_v58  ;;  %v1318_v60 = vsel %vm1062_vm11, %v757_v54, %v1190_v56  ;;  %v1350_v61 = vsel %vm1094_vm12, %v837_v55, %v1222_v57  ;;  %796 = vmatmul.bf16.gmra.mxu0 %v1933_v46  ;;  %876 = vmatmul.bf16.gmra.mxu1 %v1949_v49 }
  0xfc   : > { %1542 = vst.msk [vmem:[%s2127_s7 + $0x348] sm:$0xff] %vm1436_vm0, %v1413_v59  ;;  %956 = vmatmul.bf16.gmra.mxu2 %v1965_v50  ;;  %1036 = vmatmul.bf16.gmra.mxu3 %v1981_v51 }
  0xfd   : > { %1447 = vst.msk [vmem:[%s2127_s7 + $0x50] sm:$0xff] %vm1436_vm0, %v1318_v60 }
  0xfe   : > { %1479 = vst.msk [vmem:[%s2127_s7 + $0x150] sm:$0xff] %vm1436_vm0, %v1350_v61 }
  0xff   : > { %v917_v62 = vpop.f32.mrf.mxu2  ;;  %v997_v63 = vpop.f32.mrf.mxu3 }
 0x100   : > { %vm1126_vm13 = vcmp.ge.f32.partialorder %v917_v62, 0.0  ;;  %v1254_v0 = vmul.f32 0.2, %v917_v62  ;;  %vm1158_vm14 = vcmp.ge.f32.partialorder %v997_v63, 0.0  ;;  %v1286_v1 = vmul.f32 0.2, %v997_v63  ;;  %v759_v2 = vpop.f32.mrf.mxu0  ;;  %v839_v3 = vpop.f32.mrf.mxu1 }
 0x101   : > { %vm1063_vm15 = vcmp.ge.f32.partialorder %v759_v2, 0.0  ;;  %v1191_v4 = vmul.f32 0.2, %v759_v2  ;;  %vm1095_vm1 = vcmp.ge.f32.partialorder %v839_v3, 0.0  ;;  %v1223_v5 = vmul.f32 0.2, %v839_v3 }
 0x102   : > { %v1382_v6 = vsel %vm1126_vm13, %v917_v62, %v1254_v0  ;;  %v1414_v7 = vsel %vm1158_vm14, %v997_v63, %v1286_v1 }
 0x103   : > { %1511 = vst.msk [vmem:[%s2127_s7 + $0x250] sm:$0xff] %vm1436_vm0, %v1382_v6  ;;  %v1319_v8 = vsel %vm1063_vm15, %v759_v2, %v1191_v4  ;;  %v1351_v9 = vsel %vm1095_vm1, %v839_v3, %v1223_v5 }
 0x104   : > { %1543 = vst.msk [vmem:[%s2127_s7 + $0x350] sm:$0xff] %vm1436_vm0, %v1414_v7 }
 0x105   : > { %1448 = vst.msk [vmem:[%s2127_s7 + $0x58] sm:$0xff] %vm1436_vm0, %v1319_v8 }
 0x106   : > { %1480 = vst.msk [vmem:[%s2127_s7 + $0x158] sm:$0xff] %vm1436_vm0, %v1351_v9 }
 0x107   : > { %v919_v11 = vpop.f32.mrf.mxu2  ;;  %v999_v12 = vpop.f32.mrf.mxu3 }
 0x108   : > { %vm1127_vm2 = vcmp.ge.f32.partialorder %v919_v11, 0.0  ;;  %v1255_v16 = vmul.f32 0.2, %v919_v11  ;;  %vm1159_vm3 = vcmp.ge.f32.partialorder %v999_v12, 0.0  ;;  %v1287_v17 = vmul.f32 0.2, %v999_v12  ;;  %v762_v18 = vpop.f32.mrf.mxu0  ;;  %v842_v19 = vpop.f32.mrf.mxu1 }
 0x109   : > { %vm1064_vm4 = vcmp.ge.f32.partialorder %v762_v18, 0.0  ;;  %v1192_v20 = vmul.f32 0.2, %v762_v18  ;;  %vm1096_vm5 = vcmp.ge.f32.partialorder %v842_v19, 0.0  ;;  %v1224_v21 = vmul.f32 0.2, %v842_v19 }
 0x10a   : > { %v1383_v22 = vsel %vm1127_vm2, %v919_v11, %v1255_v16  ;;  %v1415_v23 = vsel %vm1159_vm3, %v999_v12, %v1287_v17 }
 0x10b   : > { %1512 = vst.msk [vmem:[%s2127_s7 + $0x258] sm:$0xff] %vm1436_vm0, %v1383_v22  ;;  %v1320_v24 = vsel %vm1064_vm4, %v762_v18, %v1192_v20  ;;  %v1352_v25 = vsel %vm1096_vm5, %v842_v19, %v1224_v21  ;;  %801 = vmatmul.bf16.gmra.mxu0 %v1934_v10  ;;  %881 = vmatmul.bf16.gmra.mxu1 %v1950_v13 }
 0x10c   : > { %1544 = vst.msk [vmem:[%s2127_s7 + $0x358] sm:$0xff] %vm1436_vm0, %v1415_v23  ;;  %961 = vmatmul.bf16.gmra.mxu2 %v1966_v14  ;;  %1041 = vmatmul.bf16.gmra.mxu3 %v1982_v15 }
 0x10d   : > { %1449 = vst.msk [vmem:[%s2127_s7 + $0x60] sm:$0xff] %vm1436_vm0, %v1320_v24 }
 0x10e   : > { %1481 = vst.msk [vmem:[%s2127_s7 + $0x160] sm:$0xff] %vm1436_vm0, %v1352_v25 }
 0x10f   : > { %v922_v26 = vpop.f32.mrf.mxu2  ;;  %v1002_v27 = vpop.f32.mrf.mxu3 }
 0x110   : > { %vm1128_vm6 = vcmp.ge.f32.partialorder %v922_v26, 0.0  ;;  %v1256_v28 = vmul.f32 0.2, %v922_v26  ;;  %vm1160_vm7 = vcmp.ge.f32.partialorder %v1002_v27, 0.0  ;;  %v1288_v29 = vmul.f32 0.2, %v1002_v27  ;;  %v764_v30 = vpop.f32.mrf.mxu0  ;;  %v844_v31 = vpop.f32.mrf.mxu1 }
 0x111   : > { %vm1065_vm8 = vcmp.ge.f32.partialorder %v764_v30, 0.0  ;;  %v1193_v32 = vmul.f32 0.2, %v764_v30  ;;  %vm1097_vm9 = vcmp.ge.f32.partialorder %v844_v31, 0.0  ;;  %v1225_v33 = vmul.f32 0.2, %v844_v31 }
 0x112   : > { %v1384_v34 = vsel %vm1128_vm6, %v922_v26, %v1256_v28  ;;  %v1416_v35 = vsel %vm1160_vm7, %v1002_v27, %v1288_v29 }
 0x113   : > { %1513 = vst.msk [vmem:[%s2127_s7 + $0x260] sm:$0xff] %vm1436_vm0, %v1384_v34  ;;  %v1321_v36 = vsel %vm1065_vm8, %v764_v30, %v1193_v32  ;;  %v1353_v37 = vsel %vm1097_vm9, %v844_v31, %v1225_v33 }
 0x114   : > { %1545 = vst.msk [vmem:[%s2127_s7 + $0x360] sm:$0xff] %vm1436_vm0, %v1416_v35 }
 0x115   : > { %1450 = vst.msk [vmem:[%s2127_s7 + $0x68] sm:$0xff] %vm1436_vm0, %v1321_v36 }
 0x116   : > { %1482 = vst.msk [vmem:[%s2127_s7 + $0x168] sm:$0xff] %vm1436_vm0, %v1353_v37 }
 0x117   : > { %v924_v39 = vpop.f32.mrf.mxu2  ;;  %v1004_v40 = vpop.f32.mrf.mxu3 }
 0x118   : > { %vm1129_vm10 = vcmp.ge.f32.partialorder %v924_v39, 0.0  ;;  %v1257_v44 = vmul.f32 0.2, %v924_v39  ;;  %vm1161_vm11 = vcmp.ge.f32.partialorder %v1004_v40, 0.0  ;;  %v1289_v45 = vmul.f32 0.2, %v1004_v40  ;;  %v767_v46 = vpop.f32.mrf.mxu0  ;;  %v847_v47 = vpop.f32.mrf.mxu1 }
 0x119   : > { %vm1066_vm12 = vcmp.ge.f32.partialorder %v767_v46, 0.0  ;;  %v1194_v48 = vmul.f32 0.2, %v767_v46  ;;  %vm1098_vm13 = vcmp.ge.f32.partialorder %v847_v47, 0.0  ;;  %v1226_v49 = vmul.f32 0.2, %v847_v47 }
 0x11a   : > { %v1385_v50 = vsel %vm1129_vm10, %v924_v39, %v1257_v44  ;;  %v1417_v51 = vsel %vm1161_vm11, %v1004_v40, %v1289_v45 }
 0x11b   : > { %1514 = vst.msk [vmem:[%s2127_s7 + $0x268] sm:$0xff] %vm1436_vm0, %v1385_v50  ;;  %v1322_v52 = vsel %vm1066_vm12, %v767_v46, %v1194_v48  ;;  %v1354_v53 = vsel %vm1098_vm13, %v847_v47, %v1226_v49  ;;  %806 = vmatmul.bf16.gmra.mxu0 %v1935_v38  ;;  %886 = vmatmul.bf16.gmra.mxu1 %v1951_v41 }
 0x11c   : > { %1546 = vst.msk [vmem:[%s2127_s7 + $0x368] sm:$0xff] %vm1436_vm0, %v1417_v51  ;;  %966 = vmatmul.bf16.gmra.mxu2 %v1967_v42  ;;  %1046 = vmatmul.bf16.gmra.mxu3 %v1983_v43 }
 0x11d   : > { %1451 = vst.msk [vmem:[%s2127_s7 + $0x70] sm:$0xff] %vm1436_vm0, %v1322_v52 }
 0x11e   : > { %1483 = vst.msk [vmem:[%s2127_s7 + $0x170] sm:$0xff] %vm1436_vm0, %v1354_v53 }
 0x11f   : > { %v927_v54 = vpop.f32.mrf.mxu2  ;;  %v1007_v55 = vpop.f32.mrf.mxu3 }
 0x120   : > { %vm1130_vm14 = vcmp.ge.f32.partialorder %v927_v54, 0.0  ;;  %v1258_v56 = vmul.f32 0.2, %v927_v54  ;;  %vm1162_vm15 = vcmp.ge.f32.partialorder %v1007_v55, 0.0  ;;  %v1290_v57 = vmul.f32 0.2, %v1007_v55  ;;  %v769_v58 = vpop.f32.mrf.mxu0  ;;  %v849_v59 = vpop.f32.mrf.mxu1 }
 0x121   : > { %vm1067_vm1 = vcmp.ge.f32.partialorder %v769_v58, 0.0  ;;  %v1195_v60 = vmul.f32 0.2, %v769_v58  ;;  %vm1099_vm2 = vcmp.ge.f32.partialorder %v849_v59, 0.0  ;;  %v1227_v61 = vmul.f32 0.2, %v849_v59 }
 0x122   : > { %v1386_v62 = vsel %vm1130_vm14, %v927_v54, %v1258_v56  ;;  %v1418_v63 = vsel %vm1162_vm15, %v1007_v55, %v1290_v57 }
 0x123   : > { %1515 = vst.msk [vmem:[%s2127_s7 + $0x270] sm:$0xff] %vm1436_vm0, %v1386_v62  ;;  %v1323_v0 = vsel %vm1067_vm1, %v769_v58, %v1195_v60  ;;  %v1355_v1 = vsel %vm1099_vm2, %v849_v59, %v1227_v61 }
 0x124   : > { %1547 = vst.msk [vmem:[%s2127_s7 + $0x370] sm:$0xff] %vm1436_vm0, %v1418_v63 }
 0x125   : > { %1452 = vst.msk [vmem:[%s2127_s7 + $0x78] sm:$0xff] %vm1436_vm0, %v1323_v0 }
 0x126   : > { %1484 = vst.msk [vmem:[%s2127_s7 + $0x178] sm:$0xff] %vm1436_vm0, %v1355_v1 }
 0x127   : > { %v929_v2 = vpop.f32.mrf.mxu2  ;;  %v1009_v3 = vpop.f32.mrf.mxu3 }
 0x128   : > { %vm1131_vm3 = vcmp.ge.f32.partialorder %v929_v2, 0.0  ;;  %v1259_v4 = vmul.f32 0.2, %v929_v2  ;;  %vm1163_vm4 = vcmp.ge.f32.partialorder %v1009_v3, 0.0  ;;  %v1291_v5 = vmul.f32 0.2, %v1009_v3  ;;  %v772_v6 = vpop.f32.mrf.mxu0  ;;  %v852_v7 = vpop.f32.mrf.mxu1 }
 0x129   : > { %vm1068_vm5 = vcmp.ge.f32.partialorder %v772_v6, 0.0  ;;  %v1196_v8 = vmul.f32 0.2, %v772_v6  ;;  %vm1100_vm6 = vcmp.ge.f32.partialorder %v852_v7, 0.0  ;;  %v1228_v9 = vmul.f32 0.2, %v852_v7 }
 0x12a   : > { %v1387_v10 = vsel %vm1131_vm3, %v929_v2, %v1259_v4  ;;  %v1419_v11 = vsel %vm1163_vm4, %v1009_v3, %v1291_v5 }
 0x12b   : > { %1516 = vst.msk [vmem:[%s2127_s7 + $0x278] sm:$0xff] %vm1436_vm0, %v1387_v10  ;;  %v1324_v12 = vsel %vm1068_vm5, %v772_v6, %v1196_v8  ;;  %v1356_v13 = vsel %vm1100_vm6, %v852_v7, %v1228_v9 }
 0x12c   : > { %1548 = vst.msk [vmem:[%s2127_s7 + $0x378] sm:$0xff] %vm1436_vm0, %v1419_v11 }
 0x12d   : > { %1453 = vst.msk [vmem:[%s2127_s7 + $0x80] sm:$0xff] %vm1436_vm0, %v1324_v12 }
 0x12e   : > { %1485 = vst.msk [vmem:[%s2127_s7 + $0x180] sm:$0xff] %vm1436_vm0, %v1356_v13 }
 0x12f   : > { %v932_v14 = vpop.f32.mrf.mxu2  ;;  %v1012_v15 = vpop.f32.mrf.mxu3 }
 0x130   : > { %vm1132_vm7 = vcmp.ge.f32.partialorder %v932_v14, 0.0  ;;  %v1260_v16 = vmul.f32 0.2, %v932_v14  ;;  %vm1164_vm8 = vcmp.ge.f32.partialorder %v1012_v15, 0.0  ;;  %v1292_v17 = vmul.f32 0.2, %v1012_v15  ;;  %v774_v18 = vpop.f32.mrf.mxu0  ;;  %v854_v19 = vpop.f32.mrf.mxu1 }
 0x131   : > { %vm1069_vm9 = vcmp.ge.f32.partialorder %v774_v18, 0.0  ;;  %v1197_v20 = vmul.f32 0.2, %v774_v18  ;;  %vm1101_vm10 = vcmp.ge.f32.partialorder %v854_v19, 0.0  ;;  %v1229_v21 = vmul.f32 0.2, %v854_v19 }
 0x132   : > { %v1388_v22 = vsel %vm1132_vm7, %v932_v14, %v1260_v16  ;;  %v1420_v23 = vsel %vm1164_vm8, %v1012_v15, %v1292_v17 }
 0x133   : > { %1517 = vst.msk [vmem:[%s2127_s7 + $0x280] sm:$0xff] %vm1436_vm0, %v1388_v22  ;;  %v1325_v24 = vsel %vm1069_vm9, %v774_v18, %v1197_v20  ;;  %v1357_v25 = vsel %vm1101_vm10, %v854_v19, %v1229_v21 }
 0x134   : > { %1549 = vst.msk [vmem:[%s2127_s7 + $0x380] sm:$0xff] %vm1436_vm0, %v1420_v23 }
 0x135   : > { %1454 = vst.msk [vmem:[%s2127_s7 + $0x88] sm:$0xff] %vm1436_vm0, %v1325_v24 }
 0x136   : > { %1486 = vst.msk [vmem:[%s2127_s7 + $0x188] sm:$0xff] %vm1436_vm0, %v1357_v25 }
 0x137   : > { %v934_v26 = vpop.f32.mrf.mxu2  ;;  %v1014_v27 = vpop.f32.mrf.mxu3 }
 0x138   : > { %vm1133_vm11 = vcmp.ge.f32.partialorder %v934_v26, 0.0  ;;  %v1261_v28 = vmul.f32 0.2, %v934_v26  ;;  %vm1165_vm12 = vcmp.ge.f32.partialorder %v1014_v27, 0.0  ;;  %v1293_v29 = vmul.f32 0.2, %v1014_v27  ;;  %v777_v30 = vpop.f32.mrf.mxu0  ;;  %v857_v31 = vpop.f32.mrf.mxu1 }
 0x139   : > { %vm1070_vm13 = vcmp.ge.f32.partialorder %v777_v30, 0.0  ;;  %v1198_v32 = vmul.f32 0.2, %v777_v30  ;;  %vm1102_vm14 = vcmp.ge.f32.partialorder %v857_v31, 0.0  ;;  %v1230_v33 = vmul.f32 0.2, %v857_v31 }
 0x13a   : > { %v1389_v34 = vsel %vm1133_vm11, %v934_v26, %v1261_v28  ;;  %v1421_v35 = vsel %vm1165_vm12, %v1014_v27, %v1293_v29 }
 0x13b   : > { %1518 = vst.msk [vmem:[%s2127_s7 + $0x288] sm:$0xff] %vm1436_vm0, %v1389_v34  ;;  %v1326_v36 = vsel %vm1070_vm13, %v777_v30, %v1198_v32  ;;  %v1358_v37 = vsel %vm1102_vm14, %v857_v31, %v1230_v33 }
 0x13c   : > { %1550 = vst.msk [vmem:[%s2127_s7 + $0x388] sm:$0xff] %vm1436_vm0, %v1421_v35 }
 0x13d   : > { %1455 = vst.msk [vmem:[%s2127_s7 + $0x90] sm:$0xff] %vm1436_vm0, %v1326_v36 }
 0x13e   : > { %1487 = vst.msk [vmem:[%s2127_s7 + $0x190] sm:$0xff] %vm1436_vm0, %v1358_v37 }
 0x13f   : > { %v937_v38 = vpop.f32.mrf.mxu2  ;;  %v1017_v39 = vpop.f32.mrf.mxu3 }
 0x140   : > { %vm1134_vm15 = vcmp.ge.f32.partialorder %v937_v38, 0.0  ;;  %v1262_v40 = vmul.f32 0.2, %v937_v38  ;;  %vm1166_vm1 = vcmp.ge.f32.partialorder %v1017_v39, 0.0  ;;  %v1294_v41 = vmul.f32 0.2, %v1017_v39  ;;  %v779_v42 = vpop.f32.mrf.mxu0  ;;  %v859_v43 = vpop.f32.mrf.mxu1 }
 0x141   : > { %vm1071_vm2 = vcmp.ge.f32.partialorder %v779_v42, 0.0  ;;  %v1199_v44 = vmul.f32 0.2, %v779_v42  ;;  %vm1103_vm3 = vcmp.ge.f32.partialorder %v859_v43, 0.0  ;;  %v1231_v45 = vmul.f32 0.2, %v859_v43 }
 0x142   : > { %v1390_v46 = vsel %vm1134_vm15, %v937_v38, %v1262_v40  ;;  %v1422_v47 = vsel %vm1166_vm1, %v1017_v39, %v1294_v41 }
 0x143   : > { %1519 = vst.msk [vmem:[%s2127_s7 + $0x290] sm:$0xff] %vm1436_vm0, %v1390_v46  ;;  %v1327_v48 = vsel %vm1071_vm2, %v779_v42, %v1199_v44  ;;  %v1359_v49 = vsel %vm1103_vm3, %v859_v43, %v1231_v45 }
 0x144   : > { %1551 = vst.msk [vmem:[%s2127_s7 + $0x390] sm:$0xff] %vm1436_vm0, %v1422_v47 }
 0x145   : > { %1456 = vst.msk [vmem:[%s2127_s7 + $0x98] sm:$0xff] %vm1436_vm0, %v1327_v48 }
 0x146   : > { %1488 = vst.msk [vmem:[%s2127_s7 + $0x198] sm:$0xff] %vm1436_vm0, %v1359_v49 }
 0x147   : > { %v939_v50 = vpop.f32.mrf.mxu2  ;;  %v1019_v51 = vpop.f32.mrf.mxu3 }
 0x148   : > { %vm1135_vm4 = vcmp.ge.f32.partialorder %v939_v50, 0.0  ;;  %v1263_v52 = vmul.f32 0.2, %v939_v50  ;;  %vm1167_vm5 = vcmp.ge.f32.partialorder %v1019_v51, 0.0  ;;  %v1295_v53 = vmul.f32 0.2, %v1019_v51  ;;  %v782_v54 = vpop.f32.mrf.mxu0  ;;  %v862_v55 = vpop.f32.mrf.mxu1 }
 0x149   : > { %vm1072_vm6 = vcmp.ge.f32.partialorder %v782_v54, 0.0  ;;  %v1200_v56 = vmul.f32 0.2, %v782_v54  ;;  %vm1104_vm7 = vcmp.ge.f32.partialorder %v862_v55, 0.0  ;;  %v1232_v57 = vmul.f32 0.2, %v862_v55 }
 0x14a   : > { %v1391_v58 = vsel %vm1135_vm4, %v939_v50, %v1263_v52  ;;  %v1423_v59 = vsel %vm1167_vm5, %v1019_v51, %v1295_v53 }
 0x14b   : > { %1520 = vst.msk [vmem:[%s2127_s7 + $0x298] sm:$0xff] %vm1436_vm0, %v1391_v58  ;;  %v1328_v60 = vsel %vm1072_vm6, %v782_v54, %v1200_v56  ;;  %v1360_v61 = vsel %vm1104_vm7, %v862_v55, %v1232_v57 }
 0x14c   : > { %1552 = vst.msk [vmem:[%s2127_s7 + $0x398] sm:$0xff] %vm1436_vm0, %v1423_v59 }
 0x14d   : > { %1457 = vst.msk [vmem:[%s2127_s7 + $0xa0] sm:$0xff] %vm1436_vm0, %v1328_v60 }
 0x14e   : > { %1489 = vst.msk [vmem:[%s2127_s7 + $0x1a0] sm:$0xff] %vm1436_vm0, %v1360_v61 }
 0x14f   : > { %v942_v62 = vpop.f32.mrf.mxu2  ;;  %v1022_v63 = vpop.f32.mrf.mxu3 }
 0x150   : > { %vm1136_vm8 = vcmp.ge.f32.partialorder %v942_v62, 0.0  ;;  %v1264_v0 = vmul.f32 0.2, %v942_v62  ;;  %vm1168_vm9 = vcmp.ge.f32.partialorder %v1022_v63, 0.0  ;;  %v1296_v1 = vmul.f32 0.2, %v1022_v63  ;;  %v784_v2 = vpop.f32.mrf.mxu0  ;;  %v864_v3 = vpop.f32.mrf.mxu1 }
 0x151   : > { %vm1073_vm10 = vcmp.ge.f32.partialorder %v784_v2, 0.0  ;;  %v1201_v4 = vmul.f32 0.2, %v784_v2  ;;  %vm1105_vm11 = vcmp.ge.f32.partialorder %v864_v3, 0.0  ;;  %v1233_v5 = vmul.f32 0.2, %v864_v3 }
 0x152   : > { %v1392_v6 = vsel %vm1136_vm8, %v942_v62, %v1264_v0  ;;  %v1424_v7 = vsel %vm1168_vm9, %v1022_v63, %v1296_v1 }
 0x153   : > { %1521 = vst.msk [vmem:[%s2127_s7 + $0x2a0] sm:$0xff] %vm1436_vm0, %v1392_v6  ;;  %v1329_v8 = vsel %vm1073_vm10, %v784_v2, %v1201_v4  ;;  %v1361_v9 = vsel %vm1105_vm11, %v864_v3, %v1233_v5 }
 0x154   : > { %1553 = vst.msk [vmem:[%s2127_s7 + $0x3a0] sm:$0xff] %vm1436_vm0, %v1424_v7 }
 0x155   : > { %1458 = vst.msk [vmem:[%s2127_s7 + $0xa8] sm:$0xff] %vm1436_vm0, %v1329_v8 }
 0x156   : > { %1490 = vst.msk [vmem:[%s2127_s7 + $0x1a8] sm:$0xff] %vm1436_vm0, %v1361_v9 }
 0x157   : > { %v944_v10 = vpop.f32.mrf.mxu2  ;;  %v1024_v11 = vpop.f32.mrf.mxu3 }
 0x158   : > { %vm1137_vm12 = vcmp.ge.f32.partialorder %v944_v10, 0.0  ;;  %v1265_v12 = vmul.f32 0.2, %v944_v10  ;;  %vm1169_vm13 = vcmp.ge.f32.partialorder %v1024_v11, 0.0  ;;  %v1297_v13 = vmul.f32 0.2, %v1024_v11  ;;  %v787_v14 = vpop.f32.mrf.mxu0  ;;  %v867_v15 = vpop.f32.mrf.mxu1 }
 0x159   : > { %vm1074_vm14 = vcmp.ge.f32.partialorder %v787_v14, 0.0  ;;  %v1202_v16 = vmul.f32 0.2, %v787_v14  ;;  %vm1106_vm15 = vcmp.ge.f32.partialorder %v867_v15, 0.0  ;;  %v1234_v17 = vmul.f32 0.2, %v867_v15 }
 0x15a   : > { %v1393_v18 = vsel %vm1137_vm12, %v944_v10, %v1265_v12  ;;  %v1425_v19 = vsel %vm1169_vm13, %v1024_v11, %v1297_v13 }
 0x15b   : > { %1522 = vst.msk [vmem:[%s2127_s7 + $0x2a8] sm:$0xff] %vm1436_vm0, %v1393_v18  ;;  %v1330_v20 = vsel %vm1074_vm14, %v787_v14, %v1202_v16  ;;  %v1362_v21 = vsel %vm1106_vm15, %v867_v15, %v1234_v17 }
 0x15c   : > { %1554 = vst.msk [vmem:[%s2127_s7 + $0x3a8] sm:$0xff] %vm1436_vm0, %v1425_v19 }
 0x15d   : > { %1459 = vst.msk [vmem:[%s2127_s7 + $0xb0] sm:$0xff] %vm1436_vm0, %v1330_v20 }
 0x15e   : > { %1491 = vst.msk [vmem:[%s2127_s7 + $0x1b0] sm:$0xff] %vm1436_vm0, %v1362_v21 }
 0x15f   : > { %v947_v22 = vpop.f32.mrf.mxu2  ;;  %v1027_v23 = vpop.f32.mrf.mxu3 }
 0x160   : > { %vm1138_vm1 = vcmp.ge.f32.partialorder %v947_v22, 0.0  ;;  %v1266_v24 = vmul.f32 0.2, %v947_v22  ;;  %vm1170_vm2 = vcmp.ge.f32.partialorder %v1027_v23, 0.0  ;;  %v1298_v25 = vmul.f32 0.2, %v1027_v23  ;;  %v789_v26 = vpop.f32.mrf.mxu0  ;;  %v869_v27 = vpop.f32.mrf.mxu1 }
 0x161   : > { %vm1075_vm3 = vcmp.ge.f32.partialorder %v789_v26, 0.0  ;;  %v1203_v28 = vmul.f32 0.2, %v789_v26  ;;  %vm1107_vm4 = vcmp.ge.f32.partialorder %v869_v27, 0.0  ;;  %v1235_v29 = vmul.f32 0.2, %v869_v27 }
 0x162   : > { %v1394_v30 = vsel %vm1138_vm1, %v947_v22, %v1266_v24  ;;  %v1426_v31 = vsel %vm1170_vm2, %v1027_v23, %v1298_v25 }
 0x163   : > { %1523 = vst.msk [vmem:[%s2127_s7 + $0x2b0] sm:$0xff] %vm1436_vm0, %v1394_v30  ;;  %v1331_v32 = vsel %vm1075_vm3, %v789_v26, %v1203_v28  ;;  %v1363_v33 = vsel %vm1107_vm4, %v869_v27, %v1235_v29 }
 0x164   : > { %1555 = vst.msk [vmem:[%s2127_s7 + $0x3b0] sm:$0xff] %vm1436_vm0, %v1426_v31 }
 0x165   : > { %1460 = vst.msk [vmem:[%s2127_s7 + $0xb8] sm:$0xff] %vm1436_vm0, %v1331_v32 }
 0x166   : > { %1492 = vst.msk [vmem:[%s2127_s7 + $0x1b8] sm:$0xff] %vm1436_vm0, %v1363_v33 }
 0x167   : > { %v949_v34 = vpop.f32.mrf.mxu2  ;;  %v1029_v35 = vpop.f32.mrf.mxu3 }
 0x168   : > { %vm1139_vm5 = vcmp.ge.f32.partialorder %v949_v34, 0.0  ;;  %v1267_v36 = vmul.f32 0.2, %v949_v34  ;;  %vm1171_vm6 = vcmp.ge.f32.partialorder %v1029_v35, 0.0  ;;  %v1299_v37 = vmul.f32 0.2, %v1029_v35  ;;  %v792_v38 = vpop.f32.mrf.mxu0  ;;  %v872_v39 = vpop.f32.mrf.mxu1 }
 0x169   : > { %vm1076_vm7 = vcmp.ge.f32.partialorder %v792_v38, 0.0  ;;  %v1204_v40 = vmul.f32 0.2, %v792_v38  ;;  %vm1108_vm8 = vcmp.ge.f32.partialorder %v872_v39, 0.0  ;;  %v1236_v41 = vmul.f32 0.2, %v872_v39 }
 0x16a   : > { %v1395_v42 = vsel %vm1139_vm5, %v949_v34, %v1267_v36  ;;  %v1427_v43 = vsel %vm1171_vm6, %v1029_v35, %v1299_v37 }
 0x16b   : > { %1524 = vst.msk [vmem:[%s2127_s7 + $0x2b8] sm:$0xff] %vm1436_vm0, %v1395_v42  ;;  %v1332_v44 = vsel %vm1076_vm7, %v792_v38, %v1204_v40  ;;  %v1364_v45 = vsel %vm1108_vm8, %v872_v39, %v1236_v41 }
 0x16c   : > { %1556 = vst.msk [vmem:[%s2127_s7 + $0x3b8] sm:$0xff] %vm1436_vm0, %v1427_v43 }
 0x16d   : > { %1461 = vst.msk [vmem:[%s2127_s7 + $0xc0] sm:$0xff] %vm1436_vm0, %v1332_v44 }
 0x16e   : > { %1493 = vst.msk [vmem:[%s2127_s7 + $0x1c0] sm:$0xff] %vm1436_vm0, %v1364_v45 }
 0x16f   : > { %v952_v46 = vpop.f32.mrf.mxu2  ;;  %v1032_v47 = vpop.f32.mrf.mxu3 }
 0x170   : > { %vm1140_vm9 = vcmp.ge.f32.partialorder %v952_v46, 0.0  ;;  %v1268_v48 = vmul.f32 0.2, %v952_v46  ;;  %vm1172_vm10 = vcmp.ge.f32.partialorder %v1032_v47, 0.0  ;;  %v1300_v49 = vmul.f32 0.2, %v1032_v47  ;;  %v794_v50 = vpop.f32.mrf.mxu0  ;;  %v874_v51 = vpop.f32.mrf.mxu1 }
 0x171   : > { %vm1077_vm11 = vcmp.ge.f32.partialorder %v794_v50, 0.0  ;;  %v1205_v52 = vmul.f32 0.2, %v794_v50  ;;  %vm1109_vm12 = vcmp.ge.f32.partialorder %v874_v51, 0.0  ;;  %v1237_v53 = vmul.f32 0.2, %v874_v51 }
 0x172   : > { %v1396_v54 = vsel %vm1140_vm9, %v952_v46, %v1268_v48  ;;  %v1428_v55 = vsel %vm1172_vm10, %v1032_v47, %v1300_v49 }
 0x173   : > { %1525 = vst.msk [vmem:[%s2127_s7 + $0x2c0] sm:$0xff] %vm1436_vm0, %v1396_v54  ;;  %v1333_v56 = vsel %vm1077_vm11, %v794_v50, %v1205_v52  ;;  %v1365_v57 = vsel %vm1109_vm12, %v874_v51, %v1237_v53 }
 0x174   : > { %1557 = vst.msk [vmem:[%s2127_s7 + $0x3c0] sm:$0xff] %vm1436_vm0, %v1428_v55 }
 0x175   : > { %1462 = vst.msk [vmem:[%s2127_s7 + $0xc8] sm:$0xff] %vm1436_vm0, %v1333_v56 }
 0x176   : > { %1494 = vst.msk [vmem:[%s2127_s7 + $0x1c8] sm:$0xff] %vm1436_vm0, %v1365_v57 }
 0x177   : > { %v954_v58 = vpop.f32.mrf.mxu2  ;;  %v1034_v59 = vpop.f32.mrf.mxu3 }
 0x178   : > { %vm1141_vm13 = vcmp.ge.f32.partialorder %v954_v58, 0.0  ;;  %v1269_v60 = vmul.f32 0.2, %v954_v58  ;;  %vm1173_vm14 = vcmp.ge.f32.partialorder %v1034_v59, 0.0  ;;  %v1301_v61 = vmul.f32 0.2, %v1034_v59  ;;  %v797_v62 = vpop.f32.mrf.mxu0  ;;  %v877_v63 = vpop.f32.mrf.mxu1 }
 0x179   : > { %vm1078_vm15 = vcmp.ge.f32.partialorder %v797_v62, 0.0  ;;  %v1206_v0 = vmul.f32 0.2, %v797_v62  ;;  %vm1110_vm1 = vcmp.ge.f32.partialorder %v877_v63, 0.0  ;;  %v1238_v1 = vmul.f32 0.2, %v877_v63 }
 0x17a   : > { %v1397_v2 = vsel %vm1141_vm13, %v954_v58, %v1269_v60  ;;  %v1429_v3 = vsel %vm1173_vm14, %v1034_v59, %v1301_v61 }
 0x17b   : > { %1526 = vst.msk [vmem:[%s2127_s7 + $0x2c8] sm:$0xff] %vm1436_vm0, %v1397_v2  ;;  %v1334_v4 = vsel %vm1078_vm15, %v797_v62, %v1206_v0  ;;  %v1366_v5 = vsel %vm1110_vm1, %v877_v63, %v1238_v1 }
 0x17c   : > { %1558 = vst.msk [vmem:[%s2127_s7 + $0x3c8] sm:$0xff] %vm1436_vm0, %v1429_v3 }
 0x17d   : > { %1463 = vst.msk [vmem:[%s2127_s7 + $0xd0] sm:$0xff] %vm1436_vm0, %v1334_v4 }
 0x17e   : > { %1495 = vst.msk [vmem:[%s2127_s7 + $0x1d0] sm:$0xff] %vm1436_vm0, %v1366_v5 }
 0x17f   : > { %v957_v6 = vpop.f32.mrf.mxu2  ;;  %v1037_v7 = vpop.f32.mrf.mxu3 }
 0x180   : > { %vm1142_vm2 = vcmp.ge.f32.partialorder %v957_v6, 0.0  ;;  %v1270_v8 = vmul.f32 0.2, %v957_v6  ;;  %vm1174_vm3 = vcmp.ge.f32.partialorder %v1037_v7, 0.0  ;;  %v1302_v9 = vmul.f32 0.2, %v1037_v7  ;;  %v799_v10 = vpop.f32.mrf.mxu0  ;;  %v879_v11 = vpop.f32.mrf.mxu1 }
 0x181   : > { %vm1079_vm4 = vcmp.ge.f32.partialorder %v799_v10, 0.0  ;;  %v1207_v12 = vmul.f32 0.2, %v799_v10  ;;  %vm1111_vm5 = vcmp.ge.f32.partialorder %v879_v11, 0.0  ;;  %v1239_v13 = vmul.f32 0.2, %v879_v11 }
 0x182   : > { %v1398_v14 = vsel %vm1142_vm2, %v957_v6, %v1270_v8  ;;  %v1430_v15 = vsel %vm1174_vm3, %v1037_v7, %v1302_v9 }
 0x183   : > { %1527 = vst.msk [vmem:[%s2127_s7 + $0x2d0] sm:$0xff] %vm1436_vm0, %v1398_v14  ;;  %v1335_v16 = vsel %vm1079_vm4, %v799_v10, %v1207_v12  ;;  %v1367_v17 = vsel %vm1111_vm5, %v879_v11, %v1239_v13 }
 0x184   : > { %1559 = vst.msk [vmem:[%s2127_s7 + $0x3d0] sm:$0xff] %vm1436_vm0, %v1430_v15 }
 0x185   : > { %1464 = vst.msk [vmem:[%s2127_s7 + $0xd8] sm:$0xff] %vm1436_vm0, %v1335_v16 }
 0x186   : > { %1496 = vst.msk [vmem:[%s2127_s7 + $0x1d8] sm:$0xff] %vm1436_vm0, %v1367_v17 }
 0x187   : > { %v959_v18 = vpop.f32.mrf.mxu2  ;;  %v1039_v19 = vpop.f32.mrf.mxu3 }
 0x188   : > { %vm1143_vm6 = vcmp.ge.f32.partialorder %v959_v18, 0.0  ;;  %v1271_v20 = vmul.f32 0.2, %v959_v18  ;;  %vm1175_vm7 = vcmp.ge.f32.partialorder %v1039_v19, 0.0  ;;  %v1303_v21 = vmul.f32 0.2, %v1039_v19  ;;  %v802_v22 = vpop.f32.mrf.mxu0  ;;  %v882_v23 = vpop.f32.mrf.mxu1 }
 0x189   : > { %vm1080_vm8 = vcmp.ge.f32.partialorder %v802_v22, 0.0  ;;  %v1208_v24 = vmul.f32 0.2, %v802_v22  ;;  %vm1112_vm9 = vcmp.ge.f32.partialorder %v882_v23, 0.0  ;;  %v1240_v25 = vmul.f32 0.2, %v882_v23 }
 0x18a   : > { %v1399_v26 = vsel %vm1143_vm6, %v959_v18, %v1271_v20  ;;  %v1431_v27 = vsel %vm1175_vm7, %v1039_v19, %v1303_v21 }
 0x18b   : > { %1528 = vst.msk [vmem:[%s2127_s7 + $0x2d8] sm:$0xff] %vm1436_vm0, %v1399_v26  ;;  %v1336_v28 = vsel %vm1080_vm8, %v802_v22, %v1208_v24  ;;  %v1368_v29 = vsel %vm1112_vm9, %v882_v23, %v1240_v25 }
 0x18c   : > { %1560 = vst.msk [vmem:[%s2127_s7 + $0x3d8] sm:$0xff] %vm1436_vm0, %v1431_v27 }
 0x18d   : > { %1465 = vst.msk [vmem:[%s2127_s7 + $0xe0] sm:$0xff] %vm1436_vm0, %v1336_v28 }
 0x18e   : > { %1497 = vst.msk [vmem:[%s2127_s7 + $0x1e0] sm:$0xff] %vm1436_vm0, %v1368_v29 }
 0x18f   : > { %v962_v30 = vpop.f32.mrf.mxu2  ;;  %v1042_v31 = vpop.f32.mrf.mxu3 }
 0x190   : > { %vm1144_vm10 = vcmp.ge.f32.partialorder %v962_v30, 0.0  ;;  %v1272_v32 = vmul.f32 0.2, %v962_v30  ;;  %vm1176_vm11 = vcmp.ge.f32.partialorder %v1042_v31, 0.0  ;;  %v1304_v33 = vmul.f32 0.2, %v1042_v31  ;;  %v804_v34 = vpop.f32.mrf.mxu0  ;;  %v884_v35 = vpop.f32.mrf.mxu1 }
 0x191   : > { %vm1081_vm12 = vcmp.ge.f32.partialorder %v804_v34, 0.0  ;;  %v1209_v36 = vmul.f32 0.2, %v804_v34  ;;  %vm1113_vm13 = vcmp.ge.f32.partialorder %v884_v35, 0.0  ;;  %v1241_v37 = vmul.f32 0.2, %v884_v35 }
 0x192   : > { %v1400_v38 = vsel %vm1144_vm10, %v962_v30, %v1272_v32  ;;  %v1432_v39 = vsel %vm1176_vm11, %v1042_v31, %v1304_v33 }
 0x193   : > { %1529 = vst.msk [vmem:[%s2127_s7 + $0x2e0] sm:$0xff] %vm1436_vm0, %v1400_v38  ;;  %v1337_v40 = vsel %vm1081_vm12, %v804_v34, %v1209_v36  ;;  %v1369_v41 = vsel %vm1113_vm13, %v884_v35, %v1241_v37 }
 0x194   : > { %1561 = vst.msk [vmem:[%s2127_s7 + $0x3e0] sm:$0xff] %vm1436_vm0, %v1432_v39 }
 0x195   : > { %1466 = vst.msk [vmem:[%s2127_s7 + $0xe8] sm:$0xff] %vm1436_vm0, %v1337_v40 }
 0x196   : > { %1498 = vst.msk [vmem:[%s2127_s7 + $0x1e8] sm:$0xff] %vm1436_vm0, %v1369_v41 }
 0x197   : > { %v964_v42 = vpop.f32.mrf.mxu2  ;;  %v1044_v43 = vpop.f32.mrf.mxu3 }
 0x198   : > { %vm1145_vm14 = vcmp.ge.f32.partialorder %v964_v42, 0.0  ;;  %v1273_v44 = vmul.f32 0.2, %v964_v42  ;;  %vm1177_vm15 = vcmp.ge.f32.partialorder %v1044_v43, 0.0  ;;  %v1305_v45 = vmul.f32 0.2, %v1044_v43  ;;  %v807_v46 = vpop.f32.mrf.mxu0  ;;  %v887_v47 = vpop.f32.mrf.mxu1 }
 0x199   : > { %vm1082_vm1 = vcmp.ge.f32.partialorder %v807_v46, 0.0  ;;  %v1210_v48 = vmul.f32 0.2, %v807_v46  ;;  %vm1114_vm2 = vcmp.ge.f32.partialorder %v887_v47, 0.0  ;;  %v1242_v49 = vmul.f32 0.2, %v887_v47 }
 0x19a   : > { %v1401_v50 = vsel %vm1145_vm14, %v964_v42, %v1273_v44  ;;  %v1433_v51 = vsel %vm1177_vm15, %v1044_v43, %v1305_v45 }
 0x19b   : > { %1530 = vst.msk [vmem:[%s2127_s7 + $0x2e8] sm:$0xff] %vm1436_vm0, %v1401_v50  ;;  %v1338_v52 = vsel %vm1082_vm1, %v807_v46, %v1210_v48  ;;  %v1370_v53 = vsel %vm1114_vm2, %v887_v47, %v1242_v49 }
 0x19c   : > { %1562 = vst.msk [vmem:[%s2127_s7 + $0x3e8] sm:$0xff] %vm1436_vm0, %v1433_v51 }
 0x19d   : > { %1467 = vst.msk [vmem:[%s2127_s7 + $0xf0] sm:$0xff] %vm1436_vm0, %v1338_v52 }
 0x19e   : > { %1499 = vst.msk [vmem:[%s2127_s7 + $0x1f0] sm:$0xff] %vm1436_vm0, %v1370_v53 }
 0x19f   : > { %v967_v54 = vpop.f32.mrf.mxu2  ;;  %v1047_v55 = vpop.f32.mrf.mxu3 }
 0x1a0   : > { %vm1146_vm3 = vcmp.ge.f32.partialorder %v967_v54, 0.0  ;;  %v1274_v56 = vmul.f32 0.2, %v967_v54  ;;  %vm1178_vm4 = vcmp.ge.f32.partialorder %v1047_v55, 0.0  ;;  %v1306_v57 = vmul.f32 0.2, %v1047_v55  ;;  %v809_v58 = vpop.f32.mrf.mxu0  ;;  %v889_v59 = vpop.f32.mrf.mxu1 }
 0x1a1   : > { %vm1083_vm5 = vcmp.ge.f32.partialorder %v809_v58, 0.0  ;;  %v1211_v60 = vmul.f32 0.2, %v809_v58  ;;  %vm1115_vm6 = vcmp.ge.f32.partialorder %v889_v59, 0.0  ;;  %v1243_v61 = vmul.f32 0.2, %v889_v59 }
 0x1a2   : > { %v1402_v62 = vsel %vm1146_vm3, %v967_v54, %v1274_v56  ;;  %v1434_v63 = vsel %vm1178_vm4, %v1047_v55, %v1306_v57 }
 0x1a3   : > { %1531 = vst.msk [vmem:[%s2127_s7 + $0x2f0] sm:$0xff] %vm1436_vm0, %v1402_v62  ;;  %v1339_v0 = vsel %vm1083_vm5, %v809_v58, %v1211_v60  ;;  %v1371_v1 = vsel %vm1115_vm6, %v889_v59, %v1243_v61 }
 0x1a4   : > { %1563 = vst.msk [vmem:[%s2127_s7 + $0x3f0] sm:$0xff] %vm1436_vm0, %v1434_v63 }
 0x1a5   : > { %1468 = vst.msk [vmem:[%s2127_s7 + $0xf8] sm:$0xff] %vm1436_vm0, %v1339_v0 }
 0x1a6   : > { %1500 = vst.msk [vmem:[%s2127_s7 + $0x1f8] sm:$0xff] %vm1436_vm0, %v1371_v1 }
 0x1a7   : > { %v969_v2 = vpop.f32.mrf.mxu2  ;;  %v1049_v3 = vpop.f32.mrf.mxu3 }
 0x1a8   : > { %vm1147_vm7 = vcmp.ge.f32.partialorder %v969_v2, 0.0  ;;  %v1275_v4 = vmul.f32 0.2, %v969_v2  ;;  %vm1179_vm8 = vcmp.ge.f32.partialorder %v1049_v3, 0.0  ;;  %v1307_v5 = vmul.f32 0.2, %v1049_v3 }
 0x1aa   : > { %v1403_v6 = vsel %vm1147_vm7, %v969_v2, %v1275_v4  ;;  %v1435_v7 = vsel %vm1179_vm8, %v1049_v3, %v1307_v5 }
 0x1ab   : > { %1532 = vst.msk [vmem:[%s2127_s7 + $0x2f8] sm:$0xff] %vm1436_vm0, %v1403_v6 }
 0x1ac   : > { %1564 = vst.msk [vmem:[%s2127_s7 + $0x3f8] sm:$0xff] %vm1436_vm0, %v1435_v7 }
 0x1ad PF: > { %s12_s9 = sadd.s32 1, %s2030_s9  }
 0x1ae   : > { %p9_p4 = scmp.ge.s32.totalorder %s12_s9, 4  }
 0x1b0   :  { %11 = sbr.rel (!%p9_p4) target bundleno = 1 (0x1), region = 58 }

// kernel: discriminator_forward.5
= control target key start
LH: loop header
LB: loop body
LE: loop exit
PB: predicated region body
PF: predicated region fallthrough
CT: control target
= control target key end

     0   :  { %vm1717_vm0 = vcmask 523264   ;;  %s5973_s1 = inlined_call_operand.vmem [shape: bf16[512,64], index: 1, kind: input, shape index: {}]   ;;  %s5974_s0 = inlined_call_operand.vmem [shape: bf16[512,512], index: 0, kind: input, shape index: {}]   ;;  %s5975_s2 = inlined_call_operand.vmem [shape: f32[1,64], index: 2, kind: input, shape index: {}]   ;;  %s5976_s3 = inlined_call_operand.vmem [shape: f32[1,64], index: 3, kind: input, shape index: {}]   ;;  %s5977_s4 = inlined_call_operand.vmem [shape: f32[512,64], index: 4, kind: output, shape index: {}]  }
   0x1   :  { %v3367_v0 = vld [vmem:[%s5973_s1 + $0x38] sm:$0xff]  ;;  %v3366_v4 = vld [vmem:[%s5973_s1 + $0x30] sm:$0xff]  ;;  %v3365_v8 = vld [vmem:[%s5973_s1 + $0x28] sm:$0xff] }
   0x2   :  { %v3375_v1 = vld [vmem:[%s5973_s1 + $0x78] sm:$0xff]  ;;  %1041 = vmatpush.bf16.msra.mxu0 %v3367_v0  ;;  %v3374_v5 = vld [vmem:[%s5973_s1 + $0x70] sm:$0xff]  ;;  %v3373_v9 = vld [vmem:[%s5973_s1 + $0x68] sm:$0xff] }
   0x3   :  { %v3383_v2 = vld [vmem:[%s5973_s1 + $0xb8] sm:$0xff]  ;;  %1210 = vmatpush.bf16.msra.mxu1 %v3375_v1  ;;  %v3382_v6 = vld [vmem:[%s5973_s1 + $0xb0] sm:$0xff]  ;;  %v3381_v10 = vld [vmem:[%s5973_s1 + $0xa8] sm:$0xff] }
   0x4   :  { %v3391_v3 = vld [vmem:[%s5973_s1 + $0xf8] sm:$0xff]  ;;  %1379 = vmatpush.bf16.msra.mxu2 %v3383_v2  ;;  %v3390_v7 = vld [vmem:[%s5973_s1 + $0xf0] sm:$0xff]  ;;  %v3389_v11 = vld [vmem:[%s5973_s1 + $0xe8] sm:$0xff] }
   0x5   :  { %1548 = vmatpush.bf16.msra.mxu3 %v3391_v3  ;;  %v3364_v12 = vld [vmem:[%s5973_s1 + $0x20] sm:$0xff]  ;;  %v3363_v16 = vld [vmem:[%s5973_s1 + $0x18] sm:$0xff]  ;;  %v3362_v20 = vld [vmem:[%s5973_s1 + $0x10] sm:$0xff] }
   0x6   :  { %1042 = vmatpush.bf16.msra.mxu0 %v3366_v4  ;;  %v3372_v13 = vld [vmem:[%s5973_s1 + $0x60] sm:$0xff]  ;;  %v3371_v17 = vld [vmem:[%s5973_s1 + $0x58] sm:$0xff]  ;;  %v3370_v21 = vld [vmem:[%s5973_s1 + $0x50] sm:$0xff] }
   0x7   :  { %1211 = vmatpush.bf16.msra.mxu1 %v3374_v5  ;;  %v3380_v14 = vld [vmem:[%s5973_s1 + $0xa0] sm:$0xff]  ;;  %v3379_v18 = vld [vmem:[%s5973_s1 + $0x98] sm:$0xff]  ;;  %v3378_v22 = vld [vmem:[%s5973_s1 + $0x90] sm:$0xff] }
   0x8   :  { %1380 = vmatpush.bf16.msra.mxu2 %v3382_v6  ;;  %v3388_v15 = vld [vmem:[%s5973_s1 + $0xe0] sm:$0xff]  ;;  %v3387_v19 = vld [vmem:[%s5973_s1 + $0xd8] sm:$0xff]  ;;  %v3386_v23 = vld [vmem:[%s5973_s1 + $0xd0] sm:$0xff] }
   0x9   :  { %1549 = vmatpush.bf16.msra.mxu3 %v3390_v7  ;;  %v3361_v24 = vld [vmem:[%s5973_s1 + $0x8] sm:$0xff]  ;;  %v3360_v28 = vld [vmem:[%s5973_s1] sm:$0xff]  ;;  %v3234_v33 = vld [vmem:[%s5974_s0 + $0xc] sm:$0xf0] }
   0xa   :  { %1043 = vmatpush.bf16.msra.mxu0 %v3365_v8  ;;  %v3369_v25 = vld [vmem:[%s5973_s1 + $0x48] sm:$0xff]  ;;  %v3368_v29 = vld [vmem:[%s5973_s1 + $0x40] sm:$0xff]  ;;  %v2596_v35 = vld [vmem:[%s5974_s0 + $0x10] sm:$0xf0] }
   0xb   :  { %1212 = vmatpush.bf16.msra.mxu1 %v3373_v9  ;;  %v3377_v26 = vld [vmem:[%s5973_s1 + $0x88] sm:$0xff]  ;;  %v3376_v30 = vld [vmem:[%s5973_s1 + $0x80] sm:$0xff]  ;;  %v3235_v37 = vld [vmem:[%s5974_s0 + $0x14] sm:$0xf0] }
   0xc   :  { %1381 = vmatpush.bf16.msra.mxu2 %v3381_v10  ;;  %v3385_v27 = vld [vmem:[%s5973_s1 + $0xc8] sm:$0xff]  ;;  %v3384_v31 = vld [vmem:[%s5973_s1 + $0xc0] sm:$0xff]  ;;  %v2604_v39 = vld [vmem:[%s5974_s0 + $0x18] sm:$0xf0] }
   0xd   :  { %1550 = vmatpush.bf16.msra.mxu3 %v3389_v11  ;;  %v2594_v32 = vld [vmem:[%s5974_s0] sm:$0xf]  ;;  %v3232_v34 = vld [vmem:[%s5974_s0 + $0x4] sm:$0xf]  ;;  %v2602_v36 = vld [vmem:[%s5974_s0 + $0x8] sm:$0xf] }
   0xe   :  { %1044 = vmatpush.bf16.msra.mxu0 %v3364_v12  ;;  %v3233_v38 = vld [vmem:[%s5974_s0 + $0xc] sm:$0xf]  ;;  %v2595_v40 = vor.u32 %v3234_v33, %v2594_v32  ;;  %v2599_v41 = vor.u32 %v3232_v34, %v2596_v35  ;;  %v2603_v42 = vor.u32 %v3235_v37, %v2602_v36  ;;  %v2610_v44 = vld [vmem:[%s5974_s0 + $0x20] sm:$0xf]  ;;  %v3238_v45 = vld [vmem:[%s5974_s0 + $0x2c] sm:$0xf0] }
   0xf   :  { %1213 = vmatpush.bf16.msra.mxu1 %v3372_v13  ;;  %v2607_v43 = vor.u32 %v3233_v38, %v2604_v39  ;;  %v3236_v46 = vld [vmem:[%s5974_s0 + $0x24] sm:$0xf]  ;;  %v2612_v47 = vld [vmem:[%s5974_s0 + $0x30] sm:$0xf0]  ;;  %v2618_v48 = vld [vmem:[%s5974_s0 + $0x28] sm:$0xf]  ;;  %v2611_v52 = vor.u32 %v3238_v45, %v2610_v44 }
  0x10   :  { %1382 = vmatpush.bf16.msra.mxu2 %v3380_v14  ;;  %v3239_v49 = vld [vmem:[%s5974_s0 + $0x34] sm:$0xf0]  ;;  %v3237_v50 = vld [vmem:[%s5974_s0 + $0x2c] sm:$0xf]  ;;  %v2620_v51 = vld [vmem:[%s5974_s0 + $0x38] sm:$0xf0]  ;;  %v2615_v53 = vor.u32 %v3236_v46, %v2612_v47 }
  0x11   :  { %1551 = vmatpush.bf16.msra.mxu3 %v3388_v15  ;;  %v2619_v54 = vor.u32 %v3239_v49, %v2618_v48  ;;  %v2623_v55 = vor.u32 %v3237_v50, %v2620_v51  ;;  %v2626_v56 = vld [vmem:[%s5974_s0 + $0x40] sm:$0xf]  ;;  %v3242_v57 = vld [vmem:[%s5974_s0 + $0x4c] sm:$0xf0]  ;;  %v3240_v58 = vld [vmem:[%s5974_s0 + $0x44] sm:$0xf] }
  0x12   :  { %1045 = vmatpush.bf16.msra.mxu0 %v3363_v16  ;;  %v2628_v59 = vld [vmem:[%s5974_s0 + $0x50] sm:$0xf0]  ;;  %v2634_v60 = vld [vmem:[%s5974_s0 + $0x48] sm:$0xf]  ;;  %v3243_v61 = vld [vmem:[%s5974_s0 + $0x54] sm:$0xf0]  ;;  %v2627_v0 = vor.u32 %v3242_v57, %v2626_v56 }
  0x13   :  { %1214 = vmatpush.bf16.msra.mxu1 %v3371_v17  ;;  %v3241_v62 = vld [vmem:[%s5974_s0 + $0x4c] sm:$0xf]  ;;  %v2636_v63 = vld [vmem:[%s5974_s0 + $0x58] sm:$0xf0]  ;;  %v2631_v1 = vor.u32 %v3240_v58, %v2628_v59  ;;  %v2635_v2 = vor.u32 %v3243_v61, %v2634_v60  ;;  %v2642_v4 = vld [vmem:[%s5974_s0 + $0x60] sm:$0xf] }
  0x14   :  { %1383 = vmatpush.bf16.msra.mxu2 %v3379_v18  ;;  %v2639_v3 = vor.u32 %v3241_v62, %v2636_v63  ;;  %v3246_v5 = vld [vmem:[%s5974_s0 + $0x6c] sm:$0xf0]  ;;  %v3244_v6 = vld [vmem:[%s5974_s0 + $0x64] sm:$0xf]  ;;  %v2644_v7 = vld [vmem:[%s5974_s0 + $0x70] sm:$0xf0] }
  0x15   :  { %1552 = vmatpush.bf16.msra.mxu3 %v3387_v19  ;;  %v2650_v8 = vld [vmem:[%s5974_s0 + $0x68] sm:$0xf]  ;;  %v3247_v9 = vld [vmem:[%s5974_s0 + $0x74] sm:$0xf0]  ;;  %v3245_v10 = vld [vmem:[%s5974_s0 + $0x6c] sm:$0xf]  ;;  %v2643_v12 = vor.u32 %v3246_v5, %v2642_v4  ;;  %v2647_v13 = vor.u32 %v3244_v6, %v2644_v7 }
  0x16   :  { %1046 = vmatpush.bf16.msra.mxu0 %v3362_v20  ;;  %v2652_v11 = vld [vmem:[%s5974_s0 + $0x78] sm:$0xf0]  ;;  %v2651_v14 = vor.u32 %v3247_v9, %v2650_v8  ;;  %v2658_v16 = vld [vmem:[%s5974_s0 + $0x80] sm:$0xf]  ;;  %v3250_v17 = vld [vmem:[%s5974_s0 + $0x8c] sm:$0xf0] }
  0x17   :  { %1215 = vmatpush.bf16.msra.mxu1 %v3370_v21  ;;  %v2655_v15 = vor.u32 %v3245_v10, %v2652_v11  ;;  %v3248_v18 = vld [vmem:[%s5974_s0 + $0x84] sm:$0xf]  ;;  %v2660_v19 = vld [vmem:[%s5974_s0 + $0x90] sm:$0xf0]  ;;  %v2666_v20 = vld [vmem:[%s5974_s0 + $0x88] sm:$0xf] }
  0x18   :  { %1384 = vmatpush.bf16.msra.mxu2 %v3378_v22  ;;  %v3251_v21 = vld [vmem:[%s5974_s0 + $0x94] sm:$0xf0]  ;;  %v3249_v22 = vld [vmem:[%s5974_s0 + $0x8c] sm:$0xf]  ;;  %v2682_v32 = vld [vmem:[%s5974_s0 + $0xa8] sm:$0xf] }
  0x19   :  { %1553 = vmatpush.bf16.msra.mxu3 %v3386_v23  ;;  %v2668_v23 = vld [vmem:[%s5974_s0 + $0x98] sm:$0xf0]  ;;  %v3255_v33 = vld [vmem:[%s5974_s0 + $0xb4] sm:$0xf0]  ;;  %v3253_v34 = vld [vmem:[%s5974_s0 + $0xac] sm:$0xf] }
  0x1a   :  { %1047 = vmatpush.bf16.msra.mxu0 %v3361_v24  ;;  %v2659_v24 = vor.u32 %v3250_v17, %v2658_v16  ;;  %v2684_v35 = vld [vmem:[%s5974_s0 + $0xb8] sm:$0xf0]  ;;  %v2683_v38 = vor.u32 %v3255_v33, %v2682_v32  ;;  %v2698_v44 = vld [vmem:[%s5974_s0 + $0xc8] sm:$0xf]  ;;  %v3259_v45 = vld [vmem:[%s5974_s0 + $0xd4] sm:$0xf0] }
  0x1b   :  { %1216 = vmatpush.bf16.msra.mxu1 %v3369_v25  ;;  %v2663_v25 = vor.u32 %v3248_v18, %v2660_v19  ;;  %v2687_v39 = vor.u32 %v3253_v34, %v2684_v35  ;;  %v3257_v46 = vld [vmem:[%s5974_s0 + $0xcc] sm:$0xf]  ;;  %v2700_v47 = vld [vmem:[%s5974_s0 + $0xd8] sm:$0xf0]  ;;  %v2699_v50 = vor.u32 %v3259_v45, %v2698_v44  ;;  %v2714_v56 = vld [vmem:[%s5974_s0 + $0xe8] sm:$0xf] }
  0x1c   :  { %1385 = vmatpush.bf16.msra.mxu2 %v3377_v26  ;;  %v2667_v26 = vor.u32 %v3251_v21, %v2666_v20  ;;  %v2703_v51 = vor.u32 %v3257_v46, %v2700_v47  ;;  %v3263_v57 = vld [vmem:[%s5974_s0 + $0xf4] sm:$0xf0]  ;;  %v3261_v58 = vld [vmem:[%s5974_s0 + $0xec] sm:$0xf]  ;;  %v2716_v59 = vld [vmem:[%s5974_s0 + $0xf8] sm:$0xf0] }
  0x1d   :  { %1554 = vmatpush.bf16.msra.mxu3 %v3385_v27  ;;  %v2671_v27 = vor.u32 %v3249_v22, %v2668_v23  ;;  %v2715_v62 = vor.u32 %v3263_v57, %v2714_v56  ;;  %v2719_v63 = vor.u32 %v3261_v58, %v2716_v59  ;;  %v2730_v4 = vld [vmem:[%s5974_s0 + $0x108] sm:$0xf]  ;;  %v3267_v5 = vld [vmem:[%s5974_s0 + $0x114] sm:$0xf0]  ;;  %v3265_v6 = vld [vmem:[%s5974_s0 + $0x10c] sm:$0xf] }
  0x1e   :  { %1048 = vmatpush.bf16.msra.mxu0 %v3360_v28  ;;  %v2674_v28 = vld [vmem:[%s5974_s0 + $0xa0] sm:$0xf]  ;;  %v2732_v7 = vld [vmem:[%s5974_s0 + $0x118] sm:$0xf0]  ;;  %v3270_v23 = vld [vmem:[%s5974_s0 + $0x12c] sm:$0xf0] }
  0x1f   :  { %1217 = vmatpush.bf16.msra.mxu1 %v3368_v29  ;;  %v3254_v29 = vld [vmem:[%s5974_s0 + $0xac] sm:$0xf0]  ;;  %v2738_v22 = vld [vmem:[%s5974_s0 + $0x120] sm:$0xf] }
  0x20   :  { %1386 = vmatpush.bf16.msra.mxu2 %v3376_v30  ;;  %v3252_v30 = vld [vmem:[%s5974_s0 + $0xa4] sm:$0xf]  ;;  %v2675_v36 = vor.u32 %v3254_v29, %v2674_v28  ;;  %v3269_v28 = vld [vmem:[%s5974_s0 + $0x12c] sm:$0xf]  ;;  %v2748_v29 = vld [vmem:[%s5974_s0 + $0x138] sm:$0xf0]  ;;  %v2739_v32 = vor.u32 %v3270_v23, %v2738_v22 }
  0x21   :  { %1555 = vmatpush.bf16.msra.mxu3 %v3384_v31  ;;  %1049 = vmatmul.bf16.vlgmr.msra.gmra.mxu0 %v2595_v40  ;;  %v2676_v31 = vld [vmem:[%s5974_s0 + $0xb0] sm:$0xf0]  ;;  %v2690_v40 = vld [vmem:[%s5974_s0 + $0xc0] sm:$0xf] }
  0x22   :  { %1218 = vmatmul.bf16.vlgmr.msra.gmra.mxu1 %v2599_v41  ;;  %v2679_v37 = vor.u32 %v3252_v30, %v2676_v31  ;;  %v3258_v41 = vld [vmem:[%s5974_s0 + $0xcc] sm:$0xf0] }
  0x23   :  { %1387 = vmatmul.bf16.vlgmr.msra.gmra.mxu2 %v2603_v42  ;;  %v3256_v42 = vld [vmem:[%s5974_s0 + $0xc4] sm:$0xf]  ;;  %v2691_v48 = vor.u32 %v3258_v41, %v2690_v40 }
  0x24   :  { %1556 = vmatmul.bf16.vlgmr.msra.gmra.mxu3 %v2607_v43  ;;  %v2692_v43 = vld [vmem:[%s5974_s0 + $0xd0] sm:$0xf0] }
  0x25   :  { %v2695_v49 = vor.u32 %v3256_v42, %v2692_v43 }
  0x31   :  { %1054 = vmatmul.bf16.gmra.mxu0 %v2611_v52  ;;  %v2706_v52 = vld [vmem:[%s5974_s0 + $0xe0] sm:$0xf] }
  0x32   :  { %1223 = vmatmul.bf16.gmra.mxu1 %v2615_v53  ;;  %v3262_v53 = vld [vmem:[%s5974_s0 + $0xec] sm:$0xf0] }
  0x33   :  { %1392 = vmatmul.bf16.gmra.mxu2 %v2619_v54  ;;  %v3260_v54 = vld [vmem:[%s5974_s0 + $0xe4] sm:$0xf]  ;;  %v2707_v60 = vor.u32 %v3262_v53, %v2706_v52  ;;  %v2762_v52 = vld [vmem:[%s5974_s0 + $0x148] sm:$0xf]  ;;  %v3275_v53 = vld [vmem:[%s5974_s0 + $0x154] sm:$0xf0] }
  0x34   :  { %1561 = vmatmul.bf16.gmra.mxu3 %v2623_v55  ;;  %v2708_v55 = vld [vmem:[%s5974_s0 + $0xf0] sm:$0xf0] }
  0x35   :  { %v2711_v61 = vor.u32 %v3260_v54, %v2708_v55  ;;  %v3273_v54 = vld [vmem:[%s5974_s0 + $0x14c] sm:$0xf]  ;;  %v2764_v55 = vld [vmem:[%s5974_s0 + $0x158] sm:$0xf0] }
  0x41   :  { %1059 = vmatmul.bf16.gmra.mxu0 %v2627_v0  ;;  %v2722_v0 = vld [vmem:[%s5974_s0 + $0x100] sm:$0xf] }
  0x42   :  { %1228 = vmatmul.bf16.gmra.mxu1 %v2631_v1  ;;  %v3266_v1 = vld [vmem:[%s5974_s0 + $0x10c] sm:$0xf0] }
  0x43   :  { %1397 = vmatmul.bf16.gmra.mxu2 %v2635_v2  ;;  %v3264_v2 = vld [vmem:[%s5974_s0 + $0x104] sm:$0xf]  ;;  %v2723_v8 = vor.u32 %v3266_v1, %v2722_v0  ;;  %v2767_v0 = vor.u32 %v3273_v54, %v2764_v55 }
  0x44   :  { %1566 = vmatmul.bf16.gmra.mxu3 %v2639_v3  ;;  %v2724_v3 = vld [vmem:[%s5974_s0 + $0x110] sm:$0xf0] }
  0x45   :  { %v2727_v9 = vor.u32 %v3264_v2, %v2724_v3 }
  0x51   :  { %1064 = vmatmul.bf16.gmra.mxu0 %v2643_v12  ;;  %v2731_v12 = vor.u32 %v3267_v5, %v2730_v4 }
  0x52   :  { %1233 = vmatmul.bf16.gmra.mxu1 %v2647_v13  ;;  %v2735_v13 = vor.u32 %v3265_v6, %v2732_v7 }
  0x53   :  { %1402 = vmatmul.bf16.gmra.mxu2 %v2651_v14 }
  0x54   :  { %1571 = vmatmul.bf16.gmra.mxu3 %v2655_v15 }
  0x61   :  { %1069 = vmatmul.bf16.gmra.mxu0 %v2659_v24  ;;  %v3268_v24 = vld [vmem:[%s5974_s0 + $0x124] sm:$0xf] }
  0x62   :  { %1238 = vmatmul.bf16.gmra.mxu1 %v2663_v25  ;;  %v2740_v25 = vld [vmem:[%s5974_s0 + $0x130] sm:$0xf0] }
  0x63   :  { %1407 = vmatmul.bf16.gmra.mxu2 %v2667_v26  ;;  %v2746_v26 = vld [vmem:[%s5974_s0 + $0x128] sm:$0xf]  ;;  %v2743_v33 = vor.u32 %v3268_v24, %v2740_v25 }
  0x64   :  { %1576 = vmatmul.bf16.gmra.mxu3 %v2671_v27  ;;  %v3271_v27 = vld [vmem:[%s5974_s0 + $0x134] sm:$0xf0] }
  0x71   :  { %1074 = vmatmul.bf16.gmra.mxu0 %v2675_v36 }
  0x72   :  { %1243 = vmatmul.bf16.gmra.mxu1 %v2679_v37  ;;  %v2747_v37 = vor.u32 %v3271_v27, %v2746_v26 }
  0x73   :  { %1412 = vmatmul.bf16.gmra.mxu2 %v2683_v38  ;;  %v2751_v38 = vor.u32 %v3269_v28, %v2748_v29 }
  0x74   :  { %1581 = vmatmul.bf16.gmra.mxu3 %v2687_v39 }
  0x81   :  { %1079 = vmatmul.bf16.gmra.mxu0 %v2691_v48  ;;  %v2754_v48 = vld [vmem:[%s5974_s0 + $0x140] sm:$0xf] }
  0x82   :  { %1248 = vmatmul.bf16.gmra.mxu1 %v2695_v49  ;;  %v3274_v49 = vld [vmem:[%s5974_s0 + $0x14c] sm:$0xf0] }
  0x83   :  { %1417 = vmatmul.bf16.gmra.mxu2 %v2699_v50  ;;  %v3272_v50 = vld [vmem:[%s5974_s0 + $0x144] sm:$0xf]  ;;  %v2755_v58 = vor.u32 %v3274_v49, %v2754_v48 }
  0x84   :  { %1586 = vmatmul.bf16.gmra.mxu3 %v2703_v51  ;;  %v2756_v51 = vld [vmem:[%s5974_s0 + $0x150] sm:$0xf0] }
  0x85   :  { %v2759_v59 = vor.u32 %v3272_v50, %v2756_v51 }
  0x91   :  { %1084 = vmatmul.bf16.gmra.mxu0 %v2707_v60 }
  0x92   :  { %1253 = vmatmul.bf16.gmra.mxu1 %v2711_v61 }
  0x93   :  { %1422 = vmatmul.bf16.gmra.mxu2 %v2715_v62 }
  0x94   :  { %1591 = vmatmul.bf16.gmra.mxu3 %v2719_v63  ;;  %v2763_v63 = vor.u32 %v3275_v53, %v2762_v52 }
  0x9e   :  { %v1050_v10 = vpop.f32.mrf.mxu0 }
  0x9f   :  { %v1219_v11 = vpop.f32.mrf.mxu1 }
  0xa0   :  { %v1220_v14 = vadd.f32 %v1219_v11, %v1050_v10  ;;  %v2770_v10 = vld [vmem:[%s5974_s0 + $0x160] sm:$0xf]  ;;  %v3278_v11 = vld [vmem:[%s5974_s0 + $0x16c] sm:$0xf0] }
  0xa1   :  { %1089 = vmatmul.bf16.gmra.mxu0 %v2723_v8 }
  0xa2   :  { %1258 = vmatmul.bf16.gmra.mxu1 %v2727_v9 }
  0xa3   :  { %1427 = vmatmul.bf16.gmra.mxu2 %v2731_v12  ;;  %v3276_v12 = vld [vmem:[%s5974_s0 + $0x164] sm:$0xf] }
  0xa4   :  { %1596 = vmatmul.bf16.gmra.mxu3 %v2735_v13  ;;  %v2772_v13 = vld [vmem:[%s5974_s0 + $0x170] sm:$0xf0] }
  0xa5   :  { %v2775_v22 = vor.u32 %v3276_v12, %v2772_v13 }
  0xa6   :  { %v1388_v15 = vpop.f32.mrf.mxu2  ;;  %v1052_v18 = vpop.f32.mrf.mxu0 }
  0xa7   :  { %v1557_v16 = vpop.f32.mrf.mxu3  ;;  %v1389_v17 = vadd.f32 %v1388_v15, %v1220_v14  ;;  %v1221_v19 = vpop.f32.mrf.mxu1  ;;  %v2778_v14 = vld [vmem:[%s5974_s0 + $0x168] sm:$0xf]  ;;  %v3279_v15 = vld [vmem:[%s5974_s0 + $0x174] sm:$0xf0] }
  0xa8   :  { %v1222_v20 = vadd.f32 %v1221_v19, %v1052_v18  ;;  %v2779_v26 = vor.u32 %v3279_v15, %v2778_v14 }
  0xa9   :  { %v3737_v21 = vadd.f32 %v1557_v16, %v1389_v17  ;;  %v3277_v16 = vld [vmem:[%s5974_s0 + $0x16c] sm:$0xf]  ;;  %v2780_v17 = vld [vmem:[%s5974_s0 + $0x178] sm:$0xf0] }
  0xaa   :  { %v2783_v27 = vor.u32 %v3277_v16, %v2780_v17 }
  0xae   :  { %v1390_v30 = vpop.f32.mrf.mxu2  ;;  %v1055_v35 = vpop.f32.mrf.mxu0 }
  0xaf   :  { %v1559_v31 = vpop.f32.mrf.mxu3  ;;  %v1391_v34 = vadd.f32 %v1390_v30, %v1222_v20  ;;  %v1224_v36 = vpop.f32.mrf.mxu1  ;;  %v2771_v20 = vor.u32 %v3278_v11, %v2770_v10  ;;  %v2812_v10 = vld [vmem:[%s5974_s0 + $0x1b8] sm:$0xf0] }
  0xb0   :  { %v1225_v39 = vadd.f32 %v1224_v36, %v1055_v35 }
  0xb1   :  { %v3763_v40 = vadd.f32 %v1559_v31, %v1391_v34  ;;  %1094 = vmatmul.bf16.gmra.mxu0 %v2739_v32 }
  0xb2   :  { %1263 = vmatmul.bf16.gmra.mxu1 %v2743_v33 }
  0xb3   :  { %1432 = vmatmul.bf16.gmra.mxu2 %v2747_v37  ;;  %v2786_v37 = vld [vmem:[%s5974_s0 + $0x180] sm:$0xf] }
  0xb4   :  { %1601 = vmatmul.bf16.gmra.mxu3 %v2751_v38  ;;  %v3282_v38 = vld [vmem:[%s5974_s0 + $0x18c] sm:$0xf0] }
  0xb5   :  { %v2787_v49 = vor.u32 %v3282_v38, %v2786_v37  ;;  %v3291_v37 = vld [vmem:[%s5974_s0 + $0x1d4] sm:$0xf0]  ;;  %v3289_v38 = vld [vmem:[%s5974_s0 + $0x1cc] sm:$0xf] }
  0xb6   :  { %v1393_v41 = vpop.f32.mrf.mxu2  ;;  %v1057_v44 = vpop.f32.mrf.mxu0 }
  0xb7   :  { %v1562_v42 = vpop.f32.mrf.mxu3  ;;  %v1394_v43 = vadd.f32 %v1393_v41, %v1225_v39  ;;  %v1226_v45 = vpop.f32.mrf.mxu1  ;;  %v3280_v39 = vld [vmem:[%s5974_s0 + $0x184] sm:$0xf]  ;;  %v2788_v41 = vld [vmem:[%s5974_s0 + $0x190] sm:$0xf0] }
  0xb8   :  { %v1227_v46 = vadd.f32 %v1226_v45, %v1057_v44  ;;  %v3281_v44 = vld [vmem:[%s5974_s0 + $0x18c] sm:$0xf]  ;;  %v2796_v45 = vld [vmem:[%s5974_s0 + $0x198] sm:$0xf0]  ;;  %v2791_v50 = vor.u32 %v3280_v39, %v2788_v41 }
  0xb9   :  { %v3765_v47 = vadd.f32 %v1562_v42, %v1394_v43  ;;  %v2794_v42 = vld [vmem:[%s5974_s0 + $0x188] sm:$0xf]  ;;  %v3283_v43 = vld [vmem:[%s5974_s0 + $0x194] sm:$0xf0]  ;;  %v2799_v55 = vor.u32 %v3281_v44, %v2796_v45  ;;  %v2828_v39 = vld [vmem:[%s5974_s0 + $0x1d8] sm:$0xf0] }
  0xba   :  { %v2795_v54 = vor.u32 %v3283_v43, %v2794_v42 }
  0xbe   :  { %v1395_v56 = vpop.f32.mrf.mxu2  ;;  %v1060_v61 = vpop.f32.mrf.mxu0 }
  0xbf   :  { %v1564_v57 = vpop.f32.mrf.mxu3  ;;  %v1396_v60 = vadd.f32 %v1395_v56, %v1227_v46  ;;  %v1229_v62 = vpop.f32.mrf.mxu1 }
  0xc0   :  { %v1230_v1 = vadd.f32 %v1229_v62, %v1060_v61 }
  0xc1   :  { %v3791_v2 = vadd.f32 %v1564_v57, %v1396_v60  ;;  %1099 = vmatmul.bf16.gmra.mxu0 %v2755_v58 }
  0xc2   :  { %1268 = vmatmul.bf16.gmra.mxu1 %v2759_v59 }
  0xc3   :  { %1437 = vmatmul.bf16.gmra.mxu2 %v2763_v63 }
  0xc4   :  { %1606 = vmatmul.bf16.gmra.mxu3 %v2767_v0 }
  0xc6   :  { %v1398_v3 = vpop.f32.mrf.mxu2  ;;  %v1062_v6 = vpop.f32.mrf.mxu0 }
  0xc7   :  { %v1567_v4 = vpop.f32.mrf.mxu3  ;;  %v1399_v5 = vadd.f32 %v1398_v3, %v1230_v1  ;;  %v1231_v7 = vpop.f32.mrf.mxu1  ;;  %v2802_v1 = vld [vmem:[%s5974_s0 + $0x1a0] sm:$0xf]  ;;  %v3286_v3 = vld [vmem:[%s5974_s0 + $0x1ac] sm:$0xf0] }
  0xc8   :  { %v1232_v8 = vadd.f32 %v1231_v7, %v1062_v6  ;;  %v2810_v6 = vld [vmem:[%s5974_s0 + $0x1a8] sm:$0xf]  ;;  %v3287_v7 = vld [vmem:[%s5974_s0 + $0x1b4] sm:$0xf0]  ;;  %v2803_v13 = vor.u32 %v3286_v3, %v2802_v1  ;;  %v2836_v1 = vld [vmem:[%s5974_s0 + $0x1f0] sm:$0xf0] }
  0xc9   :  { %v3793_v9 = vadd.f32 %v1567_v4, %v1399_v5  ;;  %v3284_v4 = vld [vmem:[%s5974_s0 + $0x1a4] sm:$0xf]  ;;  %v2804_v5 = vld [vmem:[%s5974_s0 + $0x1b0] sm:$0xf0]  ;;  %v2842_v3 = vld [vmem:[%s5974_s0 + $0x1e8] sm:$0xf] }
  0xca   :  { %v2807_v14 = vor.u32 %v3284_v4, %v2804_v5  ;;  %v3295_v4 = vld [vmem:[%s5974_s0 + $0x1f4] sm:$0xf0]  ;;  %v3293_v5 = vld [vmem:[%s5974_s0 + $0x1ec] sm:$0xf] }
  0xce   :  { %v1400_v18 = vpop.f32.mrf.mxu2  ;;  %v1065_v24 = vpop.f32.mrf.mxu0 }
  0xcf   :  { %v1569_v19 = vpop.f32.mrf.mxu3  ;;  %v1401_v23 = vadd.f32 %v1400_v18, %v1232_v8  ;;  %v1234_v25 = vpop.f32.mrf.mxu1  ;;  %v3285_v8 = vld [vmem:[%s5974_s0 + $0x1ac] sm:$0xf]  ;;  %v2811_v18 = vor.u32 %v3287_v7, %v2810_v6  ;;  %v2844_v6 = vld [vmem:[%s5974_s0 + $0x1f8] sm:$0xf0] }
  0xd0   :  { %v1235_v28 = vadd.f32 %v1234_v25, %v1065_v24 }
  0xd1   :  { %v3819_v29 = vadd.f32 %v1569_v19, %v1401_v23  ;;  %1104 = vmatmul.bf16.gmra.mxu0 %v2771_v20  ;;  %v2815_v19 = vor.u32 %v3285_v8, %v2812_v10 }
  0xd2   :  { %1273 = vmatmul.bf16.gmra.mxu1 %v2775_v22 }
  0xd3   :  { %1442 = vmatmul.bf16.gmra.mxu2 %v2779_v26 }
  0xd4   :  { %1611 = vmatmul.bf16.gmra.mxu3 %v2783_v27 }
  0xd6   :  { %v1403_v30 = vpop.f32.mrf.mxu2  ;;  %v1067_v33 = vpop.f32.mrf.mxu0 }
  0xd7   :  { %v1572_v31 = vpop.f32.mrf.mxu3  ;;  %v1404_v32 = vadd.f32 %v1403_v30, %v1235_v28  ;;  %v1236_v34 = vpop.f32.mrf.mxu1 }
  0xd8   :  { %v1237_v35 = vadd.f32 %v1236_v34, %v1067_v33  ;;  %v3288_v33 = vld [vmem:[%s5974_s0 + $0x1c4] sm:$0xf]  ;;  %v2820_v34 = vld [vmem:[%s5974_s0 + $0x1d0] sm:$0xf0] }
  0xd9   :  { %v3821_v36 = vadd.f32 %v1572_v31, %v1404_v32  ;;  %v2818_v31 = vld [vmem:[%s5974_s0 + $0x1c0] sm:$0xf]  ;;  %v3290_v32 = vld [vmem:[%s5974_s0 + $0x1cc] sm:$0xf0]  ;;  %v2823_v44 = vor.u32 %v3288_v33, %v2820_v34  ;;  %v2852_v33 = vld [vmem:[%s5974_s0 + $0x210] sm:$0xf0] }
  0xda   :  { %v2819_v43 = vor.u32 %v3290_v32, %v2818_v31  ;;  %v3298_v31 = vld [vmem:[%s5974_s0 + $0x20c] sm:$0xf0]  ;;  %v3296_v32 = vld [vmem:[%s5974_s0 + $0x204] sm:$0xf]  ;;  %v2858_v34 = vld [vmem:[%s5974_s0 + $0x208] sm:$0xf] }
  0xde   :  { %v1405_v46 = vpop.f32.mrf.mxu2  ;;  %v1070_v52 = vpop.f32.mrf.mxu0 }
  0xdf   :  { %v1574_v48 = vpop.f32.mrf.mxu3  ;;  %v1406_v51 = vadd.f32 %v1405_v46, %v1237_v35  ;;  %v1239_v53 = vpop.f32.mrf.mxu1  ;;  %v2826_v35 = vld [vmem:[%s5974_s0 + $0x1c8] sm:$0xf] }
  0xe0   :  { %v1240_v56 = vadd.f32 %v1239_v53, %v1070_v52 }
  0xe1   :  { %v3847_v57 = vadd.f32 %v1574_v48, %v1406_v51  ;;  %1109 = vmatmul.bf16.gmra.mxu0 %v2787_v49  ;;  %v2827_v49 = vor.u32 %v3291_v37, %v2826_v35  ;;  %v3299_v35 = vld [vmem:[%s5974_s0 + $0x214] sm:$0xf0]  ;;  %v3297_v37 = vld [vmem:[%s5974_s0 + $0x20c] sm:$0xf] }
  0xe2   :  { %1278 = vmatmul.bf16.gmra.mxu1 %v2791_v50  ;;  %v2831_v50 = vor.u32 %v3289_v38, %v2828_v39  ;;  %v2860_v38 = vld [vmem:[%s5974_s0 + $0x218] sm:$0xf0] }
  0xe3   :  { %1447 = vmatmul.bf16.gmra.mxu2 %v2795_v54 }
  0xe4   :  { %1616 = vmatmul.bf16.gmra.mxu3 %v2799_v55 }
  0xe6   :  { %v1408_v58 = vpop.f32.mrf.mxu2  ;;  %v1072_v61 = vpop.f32.mrf.mxu0 }
  0xe7   :  { %v1577_v59 = vpop.f32.mrf.mxu3  ;;  %v1409_v60 = vadd.f32 %v1408_v58, %v1240_v56  ;;  %v1241_v62 = vpop.f32.mrf.mxu1 }
  0xe8   :  { %v1242_v63 = vadd.f32 %v1241_v62, %v1072_v61  ;;  %v2834_v61 = vld [vmem:[%s5974_s0 + $0x1e0] sm:$0xf]  ;;  %v3294_v62 = vld [vmem:[%s5974_s0 + $0x1ec] sm:$0xf0] }
  0xe9   :  { %v3849_v0 = vadd.f32 %v1577_v59, %v1409_v60  ;;  %v2835_v10 = vor.u32 %v3294_v62, %v2834_v61  ;;  %v2866_v62 = vld [vmem:[%s5974_s0 + $0x220] sm:$0xf] }
  0xee   :  { %v1410_v11 = vpop.f32.mrf.mxu2  ;;  %v1075_v16 = vpop.f32.mrf.mxu0 }
  0xef   :  { %v1579_v12 = vpop.f32.mrf.mxu3  ;;  %v1411_v15 = vadd.f32 %v1410_v11, %v1242_v63  ;;  %v1244_v17 = vpop.f32.mrf.mxu1  ;;  %v3292_v63 = vld [vmem:[%s5974_s0 + $0x1e4] sm:$0xf] }
  0xf0   :  { %v1245_v20 = vadd.f32 %v1244_v17, %v1075_v16  ;;  %v2839_v11 = vor.u32 %v3292_v63, %v2836_v1  ;;  %v2847_v16 = vor.u32 %v3293_v5, %v2844_v6  ;;  %v3302_v63 = vld [vmem:[%s5974_s0 + $0x22c] sm:$0xf0]  ;;  %v3300_v1 = vld [vmem:[%s5974_s0 + $0x224] sm:$0xf]  ;;  %v3303_v5 = vld [vmem:[%s5974_s0 + $0x234] sm:$0xf0] }
  0xf1   :  { %v3875_v22 = vadd.f32 %v1579_v12, %v1411_v15  ;;  %1114 = vmatmul.bf16.gmra.mxu0 %v2803_v13  ;;  %v2843_v15 = vor.u32 %v3295_v4, %v2842_v3  ;;  %v2868_v3 = vld [vmem:[%s5974_s0 + $0x230] sm:$0xf0]  ;;  %v2874_v4 = vld [vmem:[%s5974_s0 + $0x228] sm:$0xf]  ;;  %v3301_v6 = vld [vmem:[%s5974_s0 + $0x22c] sm:$0xf] }
  0xf2   :  { %1283 = vmatmul.bf16.gmra.mxu1 %v2807_v14 }
  0xf3   :  { %1452 = vmatmul.bf16.gmra.mxu2 %v2811_v18 }
  0xf4   :  { %1621 = vmatmul.bf16.gmra.mxu3 %v2815_v19 }
  0xf6   :  { %v1413_v23 = vpop.f32.mrf.mxu2  ;;  %v1077_v26 = vpop.f32.mrf.mxu0 }
  0xf7   :  { %v1582_v24 = vpop.f32.mrf.mxu3  ;;  %v1414_v25 = vadd.f32 %v1413_v23, %v1245_v20  ;;  %v1246_v27 = vpop.f32.mrf.mxu1 }
  0xf8   :  { %v1247_v28 = vadd.f32 %v1246_v27, %v1077_v26 }
  0xf9   :  { %v3877_v30 = vadd.f32 %v1582_v24, %v1414_v25 }
  0xfe   :  { %v1415_v41 = vpop.f32.mrf.mxu2  ;;  %v1080_v46 = vpop.f32.mrf.mxu0 }
  0xff   :  { %v1584_v42 = vpop.f32.mrf.mxu3  ;;  %v1416_v45 = vadd.f32 %v1415_v41, %v1247_v28  ;;  %v1249_v48 = vpop.f32.mrf.mxu1  ;;  %v2850_v28 = vld [vmem:[%s5974_s0 + $0x200] sm:$0xf] }
 0x100   :  { %v1250_v51 = vadd.f32 %v1249_v48, %v1080_v46  ;;  %v2859_v48 = vor.u32 %v3299_v35, %v2858_v34  ;;  %v3306_v34 = vld [vmem:[%s5974_s0 + $0x24c] sm:$0xf0]  ;;  %v3304_v35 = vld [vmem:[%s5974_s0 + $0x244] sm:$0xf] }
 0x101   :  { %v3903_v52 = vadd.f32 %v1584_v42, %v1416_v45  ;;  %1119 = vmatmul.bf16.gmra.mxu0 %v2819_v43  ;;  %v2851_v42 = vor.u32 %v3298_v31, %v2850_v28  ;;  %v2855_v43 = vor.u32 %v3296_v32, %v2852_v33  ;;  %v2882_v33 = vld [vmem:[%s5974_s0 + $0x240] sm:$0xf] }
 0x102   :  { %1288 = vmatmul.bf16.gmra.mxu1 %v2823_v44 }
 0x103   :  { %1457 = vmatmul.bf16.gmra.mxu2 %v2827_v49  ;;  %v2863_v49 = vor.u32 %v3297_v37, %v2860_v38  ;;  %v2884_v37 = vld [vmem:[%s5974_s0 + $0x250] sm:$0xf0]  ;;  %v2890_v38 = vld [vmem:[%s5974_s0 + $0x248] sm:$0xf] }
 0x104   :  { %1626 = vmatmul.bf16.gmra.mxu3 %v2831_v50 }
 0x106   :  { %v1418_v53 = vpop.f32.mrf.mxu2  ;;  %v1082_v56 = vpop.f32.mrf.mxu0 }
 0x107   :  { %v1587_v54 = vpop.f32.mrf.mxu3  ;;  %v1419_v55 = vadd.f32 %v1418_v53, %v1250_v51  ;;  %v1251_v58 = vpop.f32.mrf.mxu1 }
 0x108   :  { %v1252_v59 = vadd.f32 %v1251_v58, %v1082_v56 }
 0x109   :  { %v3905_v60 = vadd.f32 %v1587_v54, %v1419_v55 }
 0x10e   :  { %v1420_v7 = vpop.f32.mrf.mxu2  ;;  %v1085_v13 = vpop.f32.mrf.mxu0 }
 0x10f   :  { %v1589_v8 = vpop.f32.mrf.mxu3  ;;  %v1421_v12 = vadd.f32 %v1420_v7, %v1252_v59  ;;  %v1254_v14 = vpop.f32.mrf.mxu1  ;;  %v2876_v7 = vld [vmem:[%s5974_s0 + $0x238] sm:$0xf0] }
 0x110   :  { %v1255_v17 = vadd.f32 %v1254_v14, %v1085_v13 }
 0x111   :  { %v3931_v18 = vadd.f32 %v1589_v8, %v1421_v12  ;;  %1124 = vmatmul.bf16.gmra.mxu0 %v2835_v10  ;;  %v2871_v12 = vor.u32 %v3300_v1, %v2868_v3 }
 0x112   :  { %1293 = vmatmul.bf16.gmra.mxu1 %v2839_v11  ;;  %v2867_v11 = vor.u32 %v3302_v63, %v2866_v62 }
 0x113   :  { %6037 = vst [vmem:[#allocation2_spill] sm:$0xff] %v3931_v18  ;;  %1462 = vmatmul.bf16.gmra.mxu2 %v2843_v15 }
 0x114   :  { %1631 = vmatmul.bf16.gmra.mxu3 %v2847_v16  ;;  %v2875_v16 = vor.u32 %v3303_v5, %v2874_v4  ;;  %v2898_v5 = vld [vmem:[%s5974_s0 + $0x260] sm:$0xf] }
 0x116   :  { %v1423_v19 = vpop.f32.mrf.mxu2  ;;  %v1087_v24 = vpop.f32.mrf.mxu0 }
 0x117   :  { %v1592_v20 = vpop.f32.mrf.mxu3  ;;  %v1424_v23 = vadd.f32 %v1423_v19, %v1255_v17  ;;  %v1256_v25 = vpop.f32.mrf.mxu1  ;;  %v2879_v17 = vor.u32 %v3301_v6, %v2876_v7  ;;  %v3310_v6 = vld [vmem:[%s5974_s0 + $0x26c] sm:$0xf0]  ;;  %v3308_v7 = vld [vmem:[%s5974_s0 + $0x264] sm:$0xf] }
 0x118   :  { %v1257_v26 = vadd.f32 %v1256_v25, %v1087_v24 }
 0x119   :  { %v3933_v27 = vadd.f32 %v1592_v20, %v1424_v23 }
 0x11b   :  { %6038 = vst [vmem:[#allocation3_spill] sm:$0xff] %v3933_v27 }
 0x11e   :  { %v1425_v39 = vpop.f32.mrf.mxu2  ;;  %v1090_v45 = vpop.f32.mrf.mxu0 }
 0x11f   :  { %v1594_v41 = vpop.f32.mrf.mxu3  ;;  %v1426_v44 = vadd.f32 %v1425_v39, %v1257_v26  ;;  %v1259_v46 = vpop.f32.mrf.mxu1  ;;  %v3307_v39 = vld [vmem:[%s5974_s0 + $0x254] sm:$0xf0] }
 0x120   :  { %v1260_v50 = vadd.f32 %v1259_v46, %v1090_v45  ;;  %v2883_v45 = vor.u32 %v3306_v34, %v2882_v33  ;;  %v2887_v46 = vor.u32 %v3304_v35, %v2884_v37 }
 0x121   :  { %v3959_v51 = vadd.f32 %v1594_v41, %v1426_v44  ;;  %1129 = vmatmul.bf16.gmra.mxu0 %v2851_v42  ;;  %v3305_v41 = vld [vmem:[%s5974_s0 + $0x24c] sm:$0xf]  ;;  %v2892_v42 = vld [vmem:[%s5974_s0 + $0x258] sm:$0xf0] }
 0x122   :  { %1298 = vmatmul.bf16.gmra.mxu1 %v2855_v43 }
 0x123   :  { %6039 = vst [vmem:[#allocation4_spill] sm:$0xff] %v3959_v51  ;;  %1467 = vmatmul.bf16.gmra.mxu2 %v2859_v48 }
 0x124   :  { %1636 = vmatmul.bf16.gmra.mxu3 %v2863_v49 }
 0x126   :  { %v1428_v53 = vpop.f32.mrf.mxu2  ;;  %v1092_v56 = vpop.f32.mrf.mxu0 }
 0x127   :  { %v1597_v54 = vpop.f32.mrf.mxu3  ;;  %v1429_v55 = vadd.f32 %v1428_v53, %v1260_v50  ;;  %v1261_v58 = vpop.f32.mrf.mxu1  ;;  %v2891_v53 = vor.u32 %v3307_v39, %v2890_v38 }
 0x128   :  { %v1262_v59 = vadd.f32 %v1261_v58, %v1092_v56 }
 0x129   :  { %v3961_v61 = vadd.f32 %v1597_v54, %v1429_v55  ;;  %v2895_v54 = vor.u32 %v3305_v41, %v2892_v42  ;;  %v2914_v42 = vld [vmem:[%s5974_s0 + $0x280] sm:$0xf] }
 0x12b   :  { %6040 = vst [vmem:[#allocation5_spill] sm:$0xff] %v3961_v61 }
 0x12e   :  { %v1430_v8 = vpop.f32.mrf.mxu2  ;;  %v1095_v14 = vpop.f32.mrf.mxu0 }
 0x12f   :  { %v1599_v10 = vpop.f32.mrf.mxu3  ;;  %v1431_v13 = vadd.f32 %v1430_v8, %v1262_v59  ;;  %v1264_v15 = vpop.f32.mrf.mxu1  ;;  %v2900_v8 = vld [vmem:[%s5974_s0 + $0x270] sm:$0xf0] }
 0x130   :  { %v1265_v19 = vadd.f32 %v1264_v15, %v1095_v14 }
 0x131   :  { %v3987_v20 = vadd.f32 %v1599_v10, %v1431_v13  ;;  %1134 = vmatmul.bf16.gmra.mxu0 %v2867_v11  ;;  %v2906_v10 = vld [vmem:[%s5974_s0 + $0x268] sm:$0xf]  ;;  %v3311_v11 = vld [vmem:[%s5974_s0 + $0x274] sm:$0xf0]  ;;  %v2908_v13 = vld [vmem:[%s5974_s0 + $0x278] sm:$0xf0] }
 0x132   :  { %1303 = vmatmul.bf16.gmra.mxu1 %v2871_v12  ;;  %v3309_v12 = vld [vmem:[%s5974_s0 + $0x26c] sm:$0xf] }
 0x133   :  { %6041 = vst [vmem:[#allocation6_spill] sm:$0xff] %v3987_v20  ;;  %1472 = vmatmul.bf16.gmra.mxu2 %v2875_v16  ;;  %v2899_v16 = vor.u32 %v3310_v6, %v2898_v5 }
 0x134   :  { %1641 = vmatmul.bf16.gmra.mxu3 %v2879_v17  ;;  %v2903_v17 = vor.u32 %v3308_v7, %v2900_v8 }
 0x136   :  { %v1433_v23 = vpop.f32.mrf.mxu2  ;;  %v1097_v26 = vpop.f32.mrf.mxu0 }
 0x137   :  { %v1602_v24 = vpop.f32.mrf.mxu3  ;;  %v1434_v25 = vadd.f32 %v1433_v23, %v1265_v19  ;;  %v1266_v28 = vpop.f32.mrf.mxu1 }
 0x138   :  { %v1267_v31 = vadd.f32 %v1266_v28, %v1097_v26  ;;  %v2911_v26 = vor.u32 %v3309_v12, %v2908_v13 }
 0x139   :  { %v3989_v32 = vadd.f32 %v1602_v24, %v1434_v25  ;;  %v2907_v25 = vor.u32 %v3311_v11, %v2906_v10 }
 0x13b   :  { %6042 = vst [vmem:[#allocation7_spill] sm:$0xff] %v3989_v32 }
 0x13e   :  { %v1435_v43 = vpop.f32.mrf.mxu2  ;;  %v1100_v49 = vpop.f32.mrf.mxu0 }
 0x13f   :  { %v1604_v44 = vpop.f32.mrf.mxu3  ;;  %v1436_v48 = vadd.f32 %v1435_v43, %v1267_v31  ;;  %v1269_v50 = vpop.f32.mrf.mxu1  ;;  %v3314_v43 = vld [vmem:[%s5974_s0 + $0x28c] sm:$0xf0] }
 0x140   :  { %v1270_v55 = vadd.f32 %v1269_v50, %v1100_v49  ;;  %v3313_v49 = vld [vmem:[%s5974_s0 + $0x28c] sm:$0xf]  ;;  %v2924_v50 = vld [vmem:[%s5974_s0 + $0x298] sm:$0xf0] }
 0x141   :  { %v4015_v56 = vadd.f32 %v1604_v44, %v1436_v48  ;;  %1139 = vmatmul.bf16.gmra.mxu0 %v2883_v45  ;;  %v3312_v44 = vld [vmem:[%s5974_s0 + $0x284] sm:$0xf]  ;;  %v2916_v45 = vld [vmem:[%s5974_s0 + $0x290] sm:$0xf0]  ;;  %v3315_v48 = vld [vmem:[%s5974_s0 + $0x294] sm:$0xf0] }
 0x142   :  { %1308 = vmatmul.bf16.gmra.mxu1 %v2887_v46  ;;  %v2922_v46 = vld [vmem:[%s5974_s0 + $0x288] sm:$0xf] }
 0x143   :  { %6043 = vst [vmem:[#allocation8_spill] sm:$0xff] %v4015_v56  ;;  %1477 = vmatmul.bf16.gmra.mxu2 %v2891_v53 }
 0x144   :  { %1646 = vmatmul.bf16.gmra.mxu3 %v2895_v54 }
 0x146   :  { %v1438_v58 = vpop.f32.mrf.mxu2  ;;  %v1102_v63 = vpop.f32.mrf.mxu0 }
 0x147   :  { %v1607_v59 = vpop.f32.mrf.mxu3  ;;  %v1439_v62 = vadd.f32 %v1438_v58, %v1270_v55  ;;  %v1271_v1 = vpop.f32.mrf.mxu1  ;;  %v2915_v55 = vor.u32 %v3314_v43, %v2914_v42  ;;  %v2919_v58 = vor.u32 %v3312_v44, %v2916_v45 }
 0x148   :  { %v1272_v3 = vadd.f32 %v1271_v1, %v1102_v63  ;;  %v2923_v1 = vor.u32 %v3315_v48, %v2922_v46 }
 0x149   :  { %v4017_v4 = vadd.f32 %v1607_v59, %v1439_v62 }
 0x14b   :  { %6044 = vst [vmem:[#allocation9_spill] sm:$0xff] %v4017_v4 }
 0x14e   :  { %v1440_v14 = vpop.f32.mrf.mxu2  ;;  %v1105_v23 = vpop.f32.mrf.mxu0 }
 0x14f   :  { %v1609_v15 = vpop.f32.mrf.mxu3  ;;  %v1441_v19 = vadd.f32 %v1440_v14, %v1272_v3  ;;  %v1274_v24 = vpop.f32.mrf.mxu1  ;;  %v2927_v3 = vor.u32 %v3313_v49, %v2924_v50 }
 0x150   :  { %v1275_v28 = vadd.f32 %v1274_v24, %v1105_v23  ;;  %v2938_v23 = vld [vmem:[%s5974_s0 + $0x2a8] sm:$0xf]  ;;  %v3319_v24 = vld [vmem:[%s5974_s0 + $0x2b4] sm:$0xf0] }
 0x151   :  { %v4043_v31 = vadd.f32 %v1609_v15, %v1441_v19  ;;  %1144 = vmatmul.bf16.gmra.mxu0 %v2899_v16  ;;  %v2930_v15 = vld [vmem:[%s5974_s0 + $0x2a0] sm:$0xf]  ;;  %v3318_v16 = vld [vmem:[%s5974_s0 + $0x2ac] sm:$0xf0]  ;;  %v2932_v19 = vld [vmem:[%s5974_s0 + $0x2b0] sm:$0xf0]  ;;  %v2939_v42 = vor.u32 %v3319_v24, %v2938_v23 }
 0x152   :  { %1313 = vmatmul.bf16.gmra.mxu1 %v2903_v17  ;;  %v3316_v17 = vld [vmem:[%s5974_s0 + $0x2a4] sm:$0xf] }
 0x153   :  { %6045 = vst [vmem:[#allocation10_spill] sm:$0xff] %v4043_v31  ;;  %1482 = vmatmul.bf16.gmra.mxu2 %v2907_v25  ;;  %v3317_v25 = vld [vmem:[%s5974_s0 + $0x2ac] sm:$0xf] }
 0x154   :  { %1651 = vmatmul.bf16.gmra.mxu3 %v2911_v26  ;;  %v2940_v26 = vld [vmem:[%s5974_s0 + $0x2b8] sm:$0xf0] }
 0x155   :  { %v2943_v43 = vor.u32 %v3317_v25, %v2940_v26 }
 0x156   :  { %v1443_v33 = vpop.f32.mrf.mxu2  ;;  %v1107_v37 = vpop.f32.mrf.mxu0 }
 0x157   :  { %v1612_v34 = vpop.f32.mrf.mxu3  ;;  %v1444_v35 = vadd.f32 %v1443_v33, %v1275_v28  ;;  %v1276_v38 = vpop.f32.mrf.mxu1 }
 0x158   :  { %v1277_v39 = vadd.f32 %v1276_v38, %v1107_v37 }
 0x159   :  { %v4045_v41 = vadd.f32 %v1612_v34, %v1444_v35  ;;  %v2931_v34 = vor.u32 %v3318_v16, %v2930_v15  ;;  %v2935_v35 = vor.u32 %v3316_v17, %v2932_v19 }
 0x15b   :  { %6046 = vst [vmem:[#allocation11_spill] sm:$0xff] %v4045_v41 }
 0x15e   :  { %v1445_v53 = vpop.f32.mrf.mxu2  ;;  %v1110_v62 = vpop.f32.mrf.mxu0 }
 0x15f   :  { %v1614_v54 = vpop.f32.mrf.mxu3  ;;  %v1446_v59 = vadd.f32 %v1445_v53, %v1277_v39  ;;  %v1279_v63 = vpop.f32.mrf.mxu1 }
 0x160   :  { %v1280_v5 = vadd.f32 %v1279_v63, %v1110_v62  ;;  %v3320_v62 = vld [vmem:[%s5974_s0 + $0x2c4] sm:$0xf]  ;;  %v2948_v63 = vld [vmem:[%s5974_s0 + $0x2d0] sm:$0xf0] }
 0x161   :  { %v4071_v6 = vadd.f32 %v1614_v54, %v1446_v59  ;;  %1149 = vmatmul.bf16.gmra.mxu0 %v2915_v55  ;;  %v3322_v59 = vld [vmem:[%s5974_s0 + $0x2cc] sm:$0xf0] }
 0x162   :  { %1318 = vmatmul.bf16.gmra.mxu1 %v2919_v58  ;;  %v2946_v58 = vld [vmem:[%s5974_s0 + $0x2c0] sm:$0xf] }
 0x163   :  { %6047 = vst [vmem:[#allocation12_spill] sm:$0xff] %v4071_v6  ;;  %1487 = vmatmul.bf16.gmra.mxu2 %v2923_v1  ;;  %v2954_v1 = vld [vmem:[%s5974_s0 + $0x2c8] sm:$0xf] }
 0x164   :  { %1656 = vmatmul.bf16.gmra.mxu3 %v2927_v3  ;;  %v3323_v3 = vld [vmem:[%s5974_s0 + $0x2d4] sm:$0xf0] }
 0x165   :  { %v2955_v17 = vor.u32 %v3323_v3, %v2954_v1 }
 0x166   :  { %v1448_v7 = vpop.f32.mrf.mxu2  ;;  %v1112_v11 = vpop.f32.mrf.mxu0 }
 0x167   :  { %v1617_v8 = vpop.f32.mrf.mxu3  ;;  %v1449_v10 = vadd.f32 %v1448_v7, %v1280_v5  ;;  %v1281_v12 = vpop.f32.mrf.mxu1  ;;  %v3321_v5 = vld [vmem:[%s5974_s0 + $0x2cc] sm:$0xf]  ;;  %v2956_v7 = vld [vmem:[%s5974_s0 + $0x2d8] sm:$0xf0] }
 0x168   :  { %v1282_v13 = vadd.f32 %v1281_v12, %v1112_v11  ;;  %v2947_v11 = vor.u32 %v3322_v59, %v2946_v58  ;;  %v2951_v12 = vor.u32 %v3320_v62, %v2948_v63  ;;  %v2959_v19 = vor.u32 %v3321_v5, %v2956_v7 }
 0x169   :  { %v4073_v14 = vadd.f32 %v1617_v8, %v1449_v10 }
 0x16b   :  { %6048 = vst [vmem:[#allocation13_spill] sm:$0xff] %v4073_v14 }
 0x16e   :  { %v1450_v28 = vpop.f32.mrf.mxu2  ;;  %v1115_v38 = vpop.f32.mrf.mxu0 }
 0x16f   :  { %v1619_v33 = vpop.f32.mrf.mxu3  ;;  %v1451_v37 = vadd.f32 %v1450_v28, %v1282_v13  ;;  %v1284_v39 = vpop.f32.mrf.mxu1 }
 0x170   :  { %v1285_v44 = vadd.f32 %v1284_v39, %v1115_v38  ;;  %v2962_v38 = vld [vmem:[%s5974_s0 + $0x2e0] sm:$0xf]  ;;  %v3326_v39 = vld [vmem:[%s5974_s0 + $0x2ec] sm:$0xf0] }
 0x171   :  { %v4099_v45 = vadd.f32 %v1619_v33, %v1451_v37  ;;  %1154 = vmatmul.bf16.gmra.mxu0 %v2931_v34 }
 0x172   :  { %1323 = vmatmul.bf16.gmra.mxu1 %v2935_v35 }
 0x173   :  { %6049 = vst [vmem:[#allocation14_spill] sm:$0xff] %v4099_v45  ;;  %1492 = vmatmul.bf16.gmra.mxu2 %v2939_v42  ;;  %v3324_v42 = vld [vmem:[%s5974_s0 + $0x2e4] sm:$0xf] }
 0x174   :  { %1661 = vmatmul.bf16.gmra.mxu3 %v2943_v43  ;;  %v2964_v43 = vld [vmem:[%s5974_s0 + $0x2f0] sm:$0xf0] }
 0x175   :  { %v2967_v58 = vor.u32 %v3324_v42, %v2964_v43 }
 0x176   :  { %v1453_v46 = vpop.f32.mrf.mxu2  ;;  %v1117_v50 = vpop.f32.mrf.mxu0 }
 0x177   :  { %v1622_v48 = vpop.f32.mrf.mxu3  ;;  %v1454_v49 = vadd.f32 %v1453_v46, %v1285_v44  ;;  %v1286_v53 = vpop.f32.mrf.mxu1  ;;  %v2970_v44 = vld [vmem:[%s5974_s0 + $0x2e8] sm:$0xf]  ;;  %v3327_v46 = vld [vmem:[%s5974_s0 + $0x2f4] sm:$0xf0] }
 0x178   :  { %v1287_v54 = vadd.f32 %v1286_v53, %v1117_v50  ;;  %v2971_v1 = vor.u32 %v3327_v46, %v2970_v44 }
 0x179   :  { %v4101_v55 = vadd.f32 %v1622_v48, %v1454_v49  ;;  %v3325_v48 = vld [vmem:[%s5974_s0 + $0x2ec] sm:$0xf]  ;;  %v2972_v49 = vld [vmem:[%s5974_s0 + $0x2f8] sm:$0xf0] }
 0x17a   :  { %v2975_v3 = vor.u32 %v3325_v48, %v2972_v49 }
 0x17b   :  { %6050 = vst [vmem:[#allocation15_spill] sm:$0xff] %v4101_v55 }
 0x17e   :  { %v1455_v8 = vpop.f32.mrf.mxu2  ;;  %v1120_v15 = vpop.f32.mrf.mxu0 }
 0x17f   :  { %v1624_v10 = vpop.f32.mrf.mxu3  ;;  %v1456_v13 = vadd.f32 %v1455_v8, %v1287_v54  ;;  %v1289_v16 = vpop.f32.mrf.mxu1  ;;  %v2963_v54 = vor.u32 %v3326_v39, %v2962_v38 }
 0x180   :  { %v1290_v23 = vadd.f32 %v1289_v16, %v1120_v15 }
 0x181   :  { %v4127_v24 = vadd.f32 %v1624_v10, %v1456_v13  ;;  %1159 = vmatmul.bf16.gmra.mxu0 %v2947_v11 }
 0x182   :  { %1328 = vmatmul.bf16.gmra.mxu1 %v2951_v12 }
 0x183   :  { %6051 = vst [vmem:[#allocation16_spill] sm:$0xff] %v4127_v24  ;;  %1497 = vmatmul.bf16.gmra.mxu2 %v2955_v17  ;;  %v2978_v17 = vld [vmem:[%s5974_s0 + $0x300] sm:$0xf] }
 0x184   :  { %1666 = vmatmul.bf16.gmra.mxu3 %v2959_v19  ;;  %v3330_v19 = vld [vmem:[%s5974_s0 + $0x30c] sm:$0xf0] }
 0x185   :  { %v2979_v39 = vor.u32 %v3330_v19, %v2978_v17  ;;  %v3004_v17 = vld [vmem:[%s5974_s0 + $0x338] sm:$0xf0] }
 0x186   :  { %v1458_v25 = vpop.f32.mrf.mxu2  ;;  %v1122_v33 = vpop.f32.mrf.mxu0 }
 0x187   :  { %v1627_v26 = vpop.f32.mrf.mxu3  ;;  %v1459_v28 = vadd.f32 %v1458_v25, %v1290_v23  ;;  %v1291_v34 = vpop.f32.mrf.mxu1  ;;  %v3328_v23 = vld [vmem:[%s5974_s0 + $0x304] sm:$0xf]  ;;  %v2980_v25 = vld [vmem:[%s5974_s0 + $0x310] sm:$0xf0] }
 0x188   :  { %v1292_v35 = vadd.f32 %v1291_v34, %v1122_v33  ;;  %v3329_v33 = vld [vmem:[%s5974_s0 + $0x30c] sm:$0xf]  ;;  %v2988_v34 = vld [vmem:[%s5974_s0 + $0x318] sm:$0xf0]  ;;  %v2983_v42 = vor.u32 %v3328_v23, %v2980_v25 }
 0x189   :  { %v4129_v37 = vadd.f32 %v1627_v26, %v1459_v28  ;;  %v2986_v26 = vld [vmem:[%s5974_s0 + $0x308] sm:$0xf]  ;;  %v3331_v28 = vld [vmem:[%s5974_s0 + $0x314] sm:$0xf0]  ;;  %v2991_v49 = vor.u32 %v3329_v33, %v2988_v34 }
 0x18a   :  { %v2987_v48 = vor.u32 %v3331_v28, %v2986_v26 }
 0x18b   :  { %6052 = vst [vmem:[#allocation17_spill] sm:$0xff] %v4129_v37 }
 0x18e   :  { %v1460_v50 = vpop.f32.mrf.mxu2  ;;  %v1125_v62 = vpop.f32.mrf.mxu0 }
 0x18f   :  { %v1629_v53 = vpop.f32.mrf.mxu3  ;;  %v1461_v59 = vadd.f32 %v1460_v50, %v1292_v35  ;;  %v1294_v63 = vpop.f32.mrf.mxu1 }
 0x190   :  { %v1295_v5 = vadd.f32 %v1294_v63, %v1125_v62 }
 0x191   :  { %v4155_v7 = vadd.f32 %v1629_v53, %v1461_v59  ;;  %1164 = vmatmul.bf16.gmra.mxu0 %v2963_v54 }
 0x192   :  { %1333 = vmatmul.bf16.gmra.mxu1 %v2967_v58 }
 0x193   :  { %6053 = vst [vmem:[#allocation18_spill] sm:$0xff] %v4155_v7  ;;  %1502 = vmatmul.bf16.gmra.mxu2 %v2971_v1 }
 0x194   :  { %1671 = vmatmul.bf16.gmra.mxu3 %v2975_v3 }
 0x196   :  { %v1463_v8 = vpop.f32.mrf.mxu2  ;;  %v1127_v12 = vpop.f32.mrf.mxu0 }
 0x197   :  { %v1632_v10 = vpop.f32.mrf.mxu3  ;;  %v1464_v11 = vadd.f32 %v1463_v8, %v1295_v5  ;;  %v1296_v13 = vpop.f32.mrf.mxu1  ;;  %v2994_v5 = vld [vmem:[%s5974_s0 + $0x320] sm:$0xf]  ;;  %v3334_v8 = vld [vmem:[%s5974_s0 + $0x32c] sm:$0xf0] }
 0x198   :  { %v1297_v15 = vadd.f32 %v1296_v13, %v1127_v12  ;;  %v3002_v12 = vld [vmem:[%s5974_s0 + $0x328] sm:$0xf]  ;;  %v3335_v13 = vld [vmem:[%s5974_s0 + $0x334] sm:$0xf0]  ;;  %v2995_v25 = vor.u32 %v3334_v8, %v2994_v5  ;;  %v3337_v8 = vld [vmem:[%s5974_s0 + $0x34c] sm:$0xf] }
 0x199   :  { %v4157_v16 = vadd.f32 %v1632_v10, %v1464_v11  ;;  %v3332_v10 = vld [vmem:[%s5974_s0 + $0x324] sm:$0xf]  ;;  %v2996_v11 = vld [vmem:[%s5974_s0 + $0x330] sm:$0xf0]  ;;  %v3339_v5 = vld [vmem:[%s5974_s0 + $0x354] sm:$0xf0] }
 0x19a   :  { %v2999_v26 = vor.u32 %v3332_v10, %v2996_v11  ;;  %v3020_v10 = vld [vmem:[%s5974_s0 + $0x358] sm:$0xf0] }
 0x19b   :  { %6054 = vst [vmem:[#allocation19_spill] sm:$0xff] %v4157_v16 }
 0x19e   :  { %v1465_v35 = vpop.f32.mrf.mxu2  ;;  %v1130_v44 = vpop.f32.mrf.mxu0 }
 0x19f   :  { %v1634_v38 = vpop.f32.mrf.mxu3  ;;  %v1466_v43 = vadd.f32 %v1465_v35, %v1297_v15  ;;  %v1299_v46 = vpop.f32.mrf.mxu1  ;;  %v3333_v15 = vld [vmem:[%s5974_s0 + $0x32c] sm:$0xf]  ;;  %v3003_v35 = vor.u32 %v3335_v13, %v3002_v12 }
 0x1a0   :  { %v1300_v50 = vadd.f32 %v1299_v46, %v1130_v44 }
 0x1a1   :  { %v4183_v53 = vadd.f32 %v1634_v38, %v1466_v43  ;;  %1169 = vmatmul.bf16.gmra.mxu0 %v2979_v39  ;;  %v3007_v38 = vor.u32 %v3333_v15, %v3004_v17 }
 0x1a2   :  { %1338 = vmatmul.bf16.gmra.mxu1 %v2983_v42 }
 0x1a3   :  { %6055 = vst [vmem:[#allocation20_spill] sm:$0xff] %v4183_v53  ;;  %1507 = vmatmul.bf16.gmra.mxu2 %v2987_v48 }
 0x1a4   :  { %1676 = vmatmul.bf16.gmra.mxu3 %v2991_v49 }
 0x1a6   :  { %v1468_v54 = vpop.f32.mrf.mxu2  ;;  %v1132_v62 = vpop.f32.mrf.mxu0 }
 0x1a7   :  { %v1637_v58 = vpop.f32.mrf.mxu3  ;;  %v1469_v59 = vadd.f32 %v1468_v54, %v1300_v50  ;;  %v1301_v63 = vpop.f32.mrf.mxu1 }
 0x1a8   :  { %v1302_v1 = vadd.f32 %v1301_v63, %v1132_v62  ;;  %v3336_v62 = vld [vmem:[%s5974_s0 + $0x344] sm:$0xf]  ;;  %v3012_v63 = vld [vmem:[%s5974_s0 + $0x350] sm:$0xf0] }
 0x1a9   :  { %v4185_v3 = vadd.f32 %v1637_v58, %v1469_v59  ;;  %v3010_v58 = vld [vmem:[%s5974_s0 + $0x340] sm:$0xf]  ;;  %v3338_v59 = vld [vmem:[%s5974_s0 + $0x34c] sm:$0xf0]  ;;  %v3015_v15 = vor.u32 %v3336_v62, %v3012_v63  ;;  %v3343_v62 = vld [vmem:[%s5974_s0 + $0x374] sm:$0xf0] }
 0x1aa   :  { %v3011_v13 = vor.u32 %v3338_v59, %v3010_v58  ;;  %v3028_v58 = vld [vmem:[%s5974_s0 + $0x370] sm:$0xf0]  ;;  %v3034_v59 = vld [vmem:[%s5974_s0 + $0x368] sm:$0xf]  ;;  %v3341_v63 = vld [vmem:[%s5974_s0 + $0x36c] sm:$0xf] }
 0x1ab   :  { %6056 = vst [vmem:[#allocation21_spill] sm:$0xff] %v4185_v3 }
 0x1ae   :  { %v1470_v19 = vpop.f32.mrf.mxu2  ;;  %v1135_v33 = vpop.f32.mrf.mxu0 }
 0x1af   :  { %v1639_v23 = vpop.f32.mrf.mxu3  ;;  %v1471_v28 = vadd.f32 %v1470_v19, %v1302_v1  ;;  %v1304_v34 = vpop.f32.mrf.mxu1  ;;  %v3018_v1 = vld [vmem:[%s5974_s0 + $0x348] sm:$0xf] }
 0x1b0   :  { %v1305_v39 = vadd.f32 %v1304_v34, %v1135_v33 }
 0x1b1   :  { %v4211_v42 = vadd.f32 %v1639_v23, %v1471_v28  ;;  %1174 = vmatmul.bf16.gmra.mxu0 %v2995_v25  ;;  %v3019_v25 = vor.u32 %v3339_v5, %v3018_v1  ;;  %v3036_v1 = vld [vmem:[%s5974_s0 + $0x378] sm:$0xf0] }
 0x1b2   :  { %1343 = vmatmul.bf16.gmra.mxu1 %v2999_v26  ;;  %v3023_v26 = vor.u32 %v3337_v8, %v3020_v10 }
 0x1b3   :  { %6057 = vst [vmem:[#allocation22_spill] sm:$0xff] %v4211_v42  ;;  %1512 = vmatmul.bf16.gmra.mxu2 %v3003_v35 }
 0x1b4   :  { %1681 = vmatmul.bf16.gmra.mxu3 %v3007_v38 }
 0x1b6   :  { %v1473_v43 = vpop.f32.mrf.mxu2  ;;  %v1137_v48 = vpop.f32.mrf.mxu0 }
 0x1b7   :  { %v1642_v44 = vpop.f32.mrf.mxu3  ;;  %v1474_v46 = vadd.f32 %v1473_v43, %v1305_v39  ;;  %v1306_v49 = vpop.f32.mrf.mxu1 }
 0x1b8   :  { %v1307_v50 = vadd.f32 %v1306_v49, %v1137_v48  ;;  %v3026_v48 = vld [vmem:[%s5974_s0 + $0x360] sm:$0xf]  ;;  %v3342_v49 = vld [vmem:[%s5974_s0 + $0x36c] sm:$0xf0] }
 0x1b9   :  { %v4213_v54 = vadd.f32 %v1642_v44, %v1474_v46  ;;  %v3027_v10 = vor.u32 %v3342_v49, %v3026_v48  ;;  %v3346_v48 = vld [vmem:[%s5974_s0 + $0x38c] sm:$0xf0]  ;;  %v3344_v49 = vld [vmem:[%s5974_s0 + $0x384] sm:$0xf] }
 0x1bb   :  { %6058 = vst [vmem:[#allocation23_spill] sm:$0xff] %v4213_v54 }
 0x1be   :  { %v1475_v11 = vpop.f32.mrf.mxu2  ;;  %v1140_v19 = vpop.f32.mrf.mxu0 }
 0x1bf   :  { %v1644_v12 = vpop.f32.mrf.mxu3  ;;  %v1476_v17 = vadd.f32 %v1475_v11, %v1307_v50  ;;  %v1309_v23 = vpop.f32.mrf.mxu1  ;;  %v3340_v50 = vld [vmem:[%s5974_s0 + $0x364] sm:$0xf] }
 0x1c0   :  { %v1310_v28 = vadd.f32 %v1309_v23, %v1140_v19  ;;  %v3031_v11 = vor.u32 %v3340_v50, %v3028_v58  ;;  %v3039_v19 = vor.u32 %v3341_v63, %v3036_v1  ;;  %v3044_v50 = vld [vmem:[%s5974_s0 + $0x390] sm:$0xf0]  ;;  %v3050_v58 = vld [vmem:[%s5974_s0 + $0x388] sm:$0xf]  ;;  %v3052_v63 = vld [vmem:[%s5974_s0 + $0x398] sm:$0xf0] }
 0x1c1   :  { %v4239_v33 = vadd.f32 %v1644_v12, %v1476_v17  ;;  %1179 = vmatmul.bf16.gmra.mxu0 %v3011_v13  ;;  %v3035_v17 = vor.u32 %v3343_v62, %v3034_v59  ;;  %v3347_v59 = vld [vmem:[%s5974_s0 + $0x394] sm:$0xf0]  ;;  %v3345_v62 = vld [vmem:[%s5974_s0 + $0x38c] sm:$0xf] }
 0x1c2   :  { %1348 = vmatmul.bf16.gmra.mxu1 %v3015_v15 }
 0x1c3   :  { %6059 = vst [vmem:[#allocation24_spill] sm:$0xff] %v4239_v33  ;;  %1517 = vmatmul.bf16.gmra.mxu2 %v3019_v25 }
 0x1c4   :  { %1686 = vmatmul.bf16.gmra.mxu3 %v3023_v26 }
 0x1c6   :  { %v1478_v34 = vpop.f32.mrf.mxu2  ;;  %v1142_v39 = vpop.f32.mrf.mxu0 }
 0x1c7   :  { %v1647_v35 = vpop.f32.mrf.mxu3  ;;  %v1479_v38 = vadd.f32 %v1478_v34, %v1310_v28  ;;  %v1311_v43 = vpop.f32.mrf.mxu1 }
 0x1c8   :  { %v1312_v44 = vadd.f32 %v1311_v43, %v1142_v39 }
 0x1c9   :  { %v4241_v46 = vadd.f32 %v1647_v35, %v1479_v38 }
 0x1cb   :  { %6060 = vst [vmem:[#allocation25_spill] sm:$0xff] %v4241_v46 }
 0x1ce   :  { %v1480_v5 = vpop.f32.mrf.mxu2  ;;  %v1145_v13 = vpop.f32.mrf.mxu0 }
 0x1cf   :  { %v1649_v8 = vpop.f32.mrf.mxu3  ;;  %v1481_v12 = vadd.f32 %v1480_v5, %v1312_v44  ;;  %v1314_v15 = vpop.f32.mrf.mxu1  ;;  %v3042_v44 = vld [vmem:[%s5974_s0 + $0x380] sm:$0xf] }
 0x1d0   :  { %v1315_v23 = vadd.f32 %v1314_v15, %v1145_v13  ;;  %v3051_v15 = vor.u32 %v3347_v59, %v3050_v58  ;;  %v3066_v58 = vld [vmem:[%s5974_s0 + $0x3a8] sm:$0xf]  ;;  %v3351_v59 = vld [vmem:[%s5974_s0 + $0x3b4] sm:$0xf0] }
 0x1d1   :  { %v4267_v25 = vadd.f32 %v1649_v8, %v1481_v12  ;;  %1184 = vmatmul.bf16.gmra.mxu0 %v3027_v10  ;;  %v3043_v8 = vor.u32 %v3346_v48, %v3042_v44  ;;  %v3047_v10 = vor.u32 %v3344_v49, %v3044_v50  ;;  %v3350_v48 = vld [vmem:[%s5974_s0 + $0x3ac] sm:$0xf0]  ;;  %v3348_v49 = vld [vmem:[%s5974_s0 + $0x3a4] sm:$0xf]  ;;  %v3060_v50 = vld [vmem:[%s5974_s0 + $0x3b0] sm:$0xf0] }
 0x1d2   :  { %1353 = vmatmul.bf16.gmra.mxu1 %v3031_v11 }
 0x1d3   :  { %6061 = vst [vmem:[#allocation26_spill] sm:$0xff] %v4267_v25  ;;  %1522 = vmatmul.bf16.gmra.mxu2 %v3035_v17  ;;  %v3055_v17 = vor.u32 %v3345_v62, %v3052_v63  ;;  %v3349_v62 = vld [vmem:[%s5974_s0 + $0x3ac] sm:$0xf]  ;;  %v3068_v63 = vld [vmem:[%s5974_s0 + $0x3b8] sm:$0xf0] }
 0x1d4   :  { %1691 = vmatmul.bf16.gmra.mxu3 %v3039_v19 }
 0x1d6   :  { %v1483_v26 = vpop.f32.mrf.mxu2  ;;  %v1147_v35 = vpop.f32.mrf.mxu0 }
 0x1d7   :  { %v1652_v28 = vpop.f32.mrf.mxu3  ;;  %v1484_v34 = vadd.f32 %v1483_v26, %v1315_v23  ;;  %v1316_v38 = vpop.f32.mrf.mxu1 }
 0x1d8   :  { %v1317_v39 = vadd.f32 %v1316_v38, %v1147_v35 }
 0x1d9   :  { %v4269_v43 = vadd.f32 %v1652_v28, %v1484_v34 }
 0x1db   :  { %6062 = vst [vmem:[#allocation27_spill] sm:$0xff] %v4269_v43 }
 0x1de   :  { %v1485_v1 = vpop.f32.mrf.mxu2  ;;  %v1150_v12 = vpop.f32.mrf.mxu0 }
 0x1df   :  { %v1654_v5 = vpop.f32.mrf.mxu3  ;;  %v1486_v11 = vadd.f32 %v1485_v1, %v1317_v39  ;;  %v1319_v13 = vpop.f32.mrf.mxu1  ;;  %v3058_v39 = vld [vmem:[%s5974_s0 + $0x3a0] sm:$0xf] }
 0x1e0   :  { %v1320_v19 = vadd.f32 %v1319_v13, %v1150_v12 }
 0x1e1   :  { %v4295_v23 = vadd.f32 %v1654_v5, %v1486_v11  ;;  %1189 = vmatmul.bf16.gmra.mxu0 %v3043_v8  ;;  %v3059_v8 = vor.u32 %v3350_v48, %v3058_v39  ;;  %v3354_v48 = vld [vmem:[%s5974_s0 + $0x3cc] sm:$0xf0] }
 0x1e2   :  { %1358 = vmatmul.bf16.gmra.mxu1 %v3047_v10  ;;  %v3063_v10 = vor.u32 %v3348_v49, %v3060_v50  ;;  %v3352_v49 = vld [vmem:[%s5974_s0 + $0x3c4] sm:$0xf]  ;;  %v3076_v50 = vld [vmem:[%s5974_s0 + $0x3d0] sm:$0xf0] }
 0x1e3   :  { %6063 = vst [vmem:[#allocation28_spill] sm:$0xff] %v4295_v23  ;;  %1527 = vmatmul.bf16.gmra.mxu2 %v3051_v15  ;;  %v3067_v15 = vor.u32 %v3351_v59, %v3066_v58  ;;  %v3355_v58 = vld [vmem:[%s5974_s0 + $0x3d4] sm:$0xf0]  ;;  %v3353_v59 = vld [vmem:[%s5974_s0 + $0x3cc] sm:$0xf] }
 0x1e4   :  { %1696 = vmatmul.bf16.gmra.mxu3 %v3055_v17  ;;  %v3071_v17 = vor.u32 %v3349_v62, %v3068_v63  ;;  %v3084_v62 = vld [vmem:[%s5974_s0 + $0x3d8] sm:$0xf0] }
 0x1e6   :  { %v1488_v26 = vpop.f32.mrf.mxu2  ;;  %v1152_v35 = vpop.f32.mrf.mxu0 }
 0x1e7   :  { %v1657_v28 = vpop.f32.mrf.mxu3  ;;  %v1489_v34 = vadd.f32 %v1488_v26, %v1320_v19  ;;  %v1321_v38 = vpop.f32.mrf.mxu1 }
 0x1e8   :  { %v1322_v43 = vadd.f32 %v1321_v38, %v1152_v35 }
 0x1e9   :  { %v4297_v44 = vadd.f32 %v1657_v28, %v1489_v34 }
 0x1eb   :  { %6064 = vst [vmem:[#allocation29_spill] sm:$0xff] %v4297_v44 }
 0x1ee   :  { %v1490_v1 = vpop.f32.mrf.mxu2  ;;  %v1155_v12 = vpop.f32.mrf.mxu0 }
 0x1ef   :  { %v1659_v5 = vpop.f32.mrf.mxu3  ;;  %v1491_v11 = vadd.f32 %v1490_v1, %v1322_v43  ;;  %v1324_v13 = vpop.f32.mrf.mxu1  ;;  %v3074_v43 = vld [vmem:[%s5974_s0 + $0x3c0] sm:$0xf] }
 0x1f0   :  { %v1325_v19 = vadd.f32 %v1324_v13, %v1155_v12 }
 0x1f1   :  { %v4323_v26 = vadd.f32 %v1659_v5, %v1491_v11  ;;  %1194 = vmatmul.bf16.gmra.mxu0 %v3059_v8  ;;  %v3075_v5 = vor.u32 %v3354_v48, %v3074_v43  ;;  %v3079_v8 = vor.u32 %v3352_v49, %v3076_v50  ;;  %v3358_v48 = vld [vmem:[%s5974_s0 + $0x3ec] sm:$0xf0]  ;;  %v3356_v49 = vld [vmem:[%s5974_s0 + $0x3e4] sm:$0xf]  ;;  %v3092_v50 = vld [vmem:[%s5974_s0 + $0x3f0] sm:$0xf0] }
 0x1f2   :  { %1363 = vmatmul.bf16.gmra.mxu1 %v3063_v10 }
 0x1f3   :  { %6065 = vst [vmem:[#allocation30_spill] sm:$0xff] %v4323_v26  ;;  %1532 = vmatmul.bf16.gmra.mxu2 %v3067_v15  ;;  %v3087_v15 = vor.u32 %v3353_v59, %v3084_v62  ;;  %v3100_v59 = vld [vmem:[%s5974_s0 + $0x3f8] sm:$0xf0] }
 0x1f4   :  { %1701 = vmatmul.bf16.gmra.mxu3 %v3071_v17 }
 0x1f6   :  { %v1493_v28 = vpop.f32.mrf.mxu2  ;;  %v1157_v38 = vpop.f32.mrf.mxu0 }
 0x1f7   :  { %v1662_v34 = vpop.f32.mrf.mxu3  ;;  %v1494_v35 = vadd.f32 %v1493_v28, %v1325_v19  ;;  %v1326_v44 = vpop.f32.mrf.mxu1 }
 0x1f8   :  { %v1327_v23 = vadd.f32 %v1326_v44, %v1157_v38  ;;  %v3082_v44 = vld [vmem:[%s5974_s0 + $0x3c8] sm:$0xf] }
 0x1f9   :  { %v4325_v39 = vadd.f32 %v1662_v34, %v1494_v35  ;;  %v3083_v13 = vor.u32 %v3355_v58, %v3082_v44  ;;  %v3359_v44 = vld [vmem:[%s5974_s0 + $0x3f4] sm:$0xf0]  ;;  %v3357_v58 = vld [vmem:[%s5974_s0 + $0x3ec] sm:$0xf] }
 0x1fb   :  { %6066 = vst [vmem:[#allocation31_spill] sm:$0xff] %v4325_v39 }
 0x1fe   :  { %v1495_v63 = vpop.f32.mrf.mxu2  ;;  %v1160_v11 = vpop.f32.mrf.mxu0 }
 0x1ff   :  { %v1664_v1 = vpop.f32.mrf.mxu3  ;;  %v1496_v10 = vadd.f32 %v1495_v63, %v1327_v23  ;;  %v1329_v12 = vpop.f32.mrf.mxu1  ;;  %v3090_v23 = vld [vmem:[%s5974_s0 + $0x3e0] sm:$0xf] }
 0x200   :  { %v1330_v17 = vadd.f32 %v1329_v12, %v1160_v11 }
 0x201   :  { %v4351_v19 = vadd.f32 %v1664_v1, %v1496_v10  ;;  %1199 = vmatmul.bf16.gmra.mxu0 %v3075_v5  ;;  %v3091_v1 = vor.u32 %v3358_v48, %v3090_v23  ;;  %v3095_v5 = vor.u32 %v3356_v49, %v3092_v50 }
 0x202   :  { %1368 = vmatmul.bf16.gmra.mxu1 %v3079_v8 }
 0x203   :  { %6067 = vst [vmem:[#allocation32_spill] sm:$0xff] %v4351_v19  ;;  %1537 = vmatmul.bf16.gmra.mxu2 %v3083_v13  ;;  %v3103_v13 = vor.u32 %v3357_v58, %v3100_v59  ;;  %v1719_v59 = vsel %vm1717_vm0, %v3763_v40, 0.0 }
 0x204   :  { %1706 = vmatmul.bf16.gmra.mxu3 %v3087_v15 }
 0x206   :  { %v1498_v28 = vpop.f32.mrf.mxu2  ;;  %v1162_v38 = vpop.f32.mrf.mxu0 }
 0x207   :  { %v1667_v34 = vpop.f32.mrf.mxu3  ;;  %v1499_v35 = vadd.f32 %v1498_v28, %v1330_v17  ;;  %v1331_v39 = vpop.f32.mrf.mxu1 }
 0x208   :  { %v1332_v26 = vadd.f32 %v1331_v39, %v1162_v38  ;;  %v3098_v39 = vld [vmem:[%s5974_s0 + $0x3e8] sm:$0xf] }
 0x209   :  { %v4353_v43 = vadd.f32 %v1667_v34, %v1499_v35  ;;  %v3099_v12 = vor.u32 %v3359_v44, %v3098_v39 }
 0x20b   :  { %6068 = vst [vmem:[#allocation33_spill] sm:$0xff] %v4353_v43 }
 0x20e   :  { %v1500_v62 = vpop.f32.mrf.mxu2  ;;  %v1165_v10 = vpop.f32.mrf.mxu0 }
 0x20f   :  { %v1669_v63 = vpop.f32.mrf.mxu3  ;;  %v1501_v8 = vadd.f32 %v1500_v62, %v1332_v26  ;;  %v1334_v11 = vpop.f32.mrf.mxu1 }
 0x210   :  { %v1335_v15 = vadd.f32 %v1334_v11, %v1165_v10 }
 0x211   :  { %v4379_v17 = vadd.f32 %v1669_v63, %v1501_v8  ;;  %1204 = vmatmul.bf16.gmra.mxu0 %v3091_v1  ;;  %v1718_v1 = vsel %vm1717_vm0, %v3737_v21, 0.0 }
 0x212   :  { %1373 = vmatmul.bf16.gmra.mxu1 %v3095_v5  ;;  %v1720_v10 = vadd.f32 %v1719_v59, %v1718_v1 }
 0x213   :  { %6069 = vst [vmem:[#allocation34_spill] sm:$0xff] %v4379_v17  ;;  %1542 = vmatmul.bf16.gmra.mxu2 %v3099_v12  ;;  %v1723_v12 = vsel %vm1717_vm0, %v3791_v2, 0.0 }
 0x214   :  { %1711 = vmatmul.bf16.gmra.mxu3 %v3103_v13 }
 0x216   :  { %v1503_v28 = vpop.f32.mrf.mxu2  ;;  %v1167_v38 = vpop.f32.mrf.mxu0 }
 0x217   :  { %v1672_v34 = vpop.f32.mrf.mxu3  ;;  %v1504_v35 = vadd.f32 %v1503_v28, %v1335_v15  ;;  %v1336_v43 = vpop.f32.mrf.mxu1  ;;  %v1725_v28 = vsel %vm1717_vm0, %v3793_v9, 0.0 }
 0x218   :  { %v1337_v19 = vadd.f32 %v1336_v43, %v1167_v38  ;;  %v1721_v43 = vsel %vm1717_vm0, %v3765_v47, 0.0 }
 0x219   :  { %v4381_v23 = vadd.f32 %v1672_v34, %v1504_v35  ;;  %v1722_v15 = vadd.f32 %v1721_v43, %v1720_v10  ;;  %v1727_v35 = vsel %vm1717_vm0, %v3819_v29, 0.0 }
 0x21b   :  { %6070 = vst [vmem:[#allocation35_spill] sm:$0xff] %v4381_v23  ;;  %v1724_v34 = vadd.f32 %v1723_v12, %v1722_v15  ;;  %v1737_v15 = vsel %vm1717_vm0, %v3877_v30, 0.0 }
 0x21d   :  { %v1726_v38 = vadd.f32 %v1725_v28, %v1724_v34 }
 0x21e   :  { %v1505_v26 = vpop.f32.mrf.mxu2  ;;  %v1170_v50 = vpop.f32.mrf.mxu0 }
 0x21f   :  { %v1674_v48 = vpop.f32.mrf.mxu3  ;;  %v1506_v49 = vadd.f32 %v1505_v26, %v1337_v19  ;;  %v1339_v39 = vpop.f32.mrf.mxu1  ;;  %v1728_v59 = vadd.f32 %v1727_v35, %v1726_v38 }
 0x220   :  { %v1340_v44 = vadd.f32 %v1339_v39, %v1170_v50 }
 0x221   :  { %v4383_v58 = vadd.f32 %v1674_v48, %v1506_v49  ;;  %v1729_v49 = vsel %vm1717_vm0, %v3821_v36, 0.0 }
 0x222   :  { %v1730_v43 = vadd.f32 %v1729_v49, %v1728_v59  ;;  %v1743_v59 = vsel %vm1717_vm0, %v3931_v18, 0.0 }
 0x223   :  { %6071 = vst [vmem:[#allocation36_spill] sm:$0xff] %v4383_v58 }
 0x226   :  { %v1508_v62 = vpop.f32.mrf.mxu2  ;;  %v1172_v8 = vpop.f32.mrf.mxu0 }
 0x227   :  { %v1677_v63 = vpop.f32.mrf.mxu3  ;;  %v1509_v5 = vadd.f32 %v1508_v62, %v1340_v44  ;;  %v1341_v19 = vpop.f32.mrf.mxu1 }
 0x228   :  { %v1342_v11 = vadd.f32 %v1341_v19, %v1172_v8  ;;  %v1735_v19 = vsel %vm1717_vm0, %v3875_v22, 0.0 }
 0x229   :  { %v4393_v13 = vadd.f32 %v1677_v63, %v1509_v5  ;;  %v1731_v63 = vsel %vm1717_vm0, %v3847_v57, 0.0  ;;  %v1733_v5 = vsel %vm1717_vm0, %v3849_v0, 0.0 }
 0x22a   :  { %v1732_v8 = vadd.f32 %v1731_v63, %v1730_v43 }
 0x22c   :  { %v1734_v10 = vadd.f32 %v1733_v5, %v1732_v8  ;;  %v1745_v5 = vsel %vm1717_vm0, %v3933_v27, 0.0 }
 0x22e   :  { %v1510_v26 = vpop.f32.mrf.mxu2  ;;  %v1175_v39 = vpop.f32.mrf.mxu0  ;;  %v1736_v38 = vadd.f32 %v1735_v19, %v1734_v10 }
 0x22f   :  { %v1679_v48 = vpop.f32.mrf.mxu3  ;;  %v1511_v50 = vadd.f32 %v1510_v26, %v1342_v11  ;;  %v1344_v44 = vpop.f32.mrf.mxu1 }
 0x230   :  { %v1345_v62 = vadd.f32 %v1344_v44, %v1175_v39  ;;  %v1741_v39 = vsel %vm1717_vm0, %v3905_v60, 0.0 }
 0x231   :  { %v4403_v1 = vadd.f32 %v1679_v48, %v1511_v50  ;;  %v1739_v48 = vsel %vm1717_vm0, %v3903_v52, 0.0  ;;  %v1738_v50 = vadd.f32 %v1737_v15, %v1736_v38  ;;  %v1747_v15 = vsel %vm1717_vm0, %v3959_v51, 0.0  ;;  %v6077_v51 = vld [vmem:[#allocation32_spill] sm:$0xff] }
 0x233   :  { %v1740_v44 = vadd.f32 %v1739_v48, %v1738_v50  ;;  %v1751_v48 = vsel %vm1717_vm0, %v3987_v20, 0.0  ;;  %v6076_v20 = vld [vmem:[#allocation31_spill] sm:$0xff] }
 0x235   :  { %v1742_v63 = vadd.f32 %v1741_v39, %v1740_v44  ;;  %v1753_v44 = vsel %vm1717_vm0, %v3989_v32, 0.0 }
 0x236   :  { %v1513_v12 = vpop.f32.mrf.mxu2  ;;  %v1177_v34 = vpop.f32.mrf.mxu0 }
 0x237   :  { %v1682_v11 = vpop.f32.mrf.mxu3  ;;  %v1514_v28 = vadd.f32 %v1513_v12, %v1345_v62  ;;  %v1346_v35 = vpop.f32.mrf.mxu1  ;;  %v1744_v12 = vadd.f32 %v1743_v59, %v1742_v63 }
 0x238   :  { %v1347_v26 = vadd.f32 %v1346_v35, %v1177_v34  ;;  %v1749_v35 = vsel %vm1717_vm0, %v3961_v61, 0.0 }
 0x239   :  { %v4413_v49 = vadd.f32 %v1682_v11, %v1514_v28  ;;  %v1746_v34 = vadd.f32 %v1745_v5, %v1744_v12  ;;  %v1755_v5 = vsel %vm1717_vm0, %v4015_v56, 0.0  ;;  %v6073_v56 = vld [vmem:[#allocation28_spill] sm:$0xff] }
 0x23b   :  { %v1748_v38 = vadd.f32 %v1747_v15, %v1746_v34  ;;  %v1759_v15 = vsel %vm1717_vm0, %v4043_v31, 0.0 }
 0x23d   :  { %v1750_v50 = vadd.f32 %v1749_v35, %v1748_v38  ;;  %v1761_v38 = vsel %vm1717_vm0, %v4045_v41, 0.0  ;;  %v1769_v41 = vsel %vm1717_vm0, %v4101_v55, 0.0 }
 0x23e   :  { %v1515_v43 = vpop.f32.mrf.mxu2  ;;  %v1180_v19 = vpop.f32.mrf.mxu0 }
 0x23f   :  { %v1684_v62 = vpop.f32.mrf.mxu3  ;;  %v1516_v8 = vadd.f32 %v1515_v43, %v1347_v26  ;;  %v1349_v10 = vpop.f32.mrf.mxu1 }
 0x240   :  { %v1350_v11 = vadd.f32 %v1349_v10, %v1180_v19  ;;  %v1757_v10 = vsel %vm1717_vm0, %v4017_v4, 0.0 }
 0x241   :  { %v4423_v28 = vadd.f32 %v1684_v62, %v1516_v8  ;;  %v1752_v62 = vadd.f32 %v1751_v48, %v1750_v50 }
 0x243   :  { %v1754_v19 = vadd.f32 %v1753_v44, %v1752_v62 }
 0x245   :  { %v1756_v12 = vadd.f32 %v1755_v5, %v1754_v19  ;;  %v1767_v5 = vsel %vm1717_vm0, %v4099_v45, 0.0 }
 0x246   :  { %v1518_v39 = vpop.f32.mrf.mxu2  ;;  %v4431_v63 = vpop.f32.mrf.mxu0 }
 0x247   :  { %v1687_v26 = vpop.f32.mrf.mxu3  ;;  %v1519_v59 = vadd.f32 %v1518_v39, %v1350_v11  ;;  %v4433_v43 = vpop.f32.mrf.mxu1  ;;  %v1758_v34 = vadd.f32 %v1757_v10, %v1756_v12 }
 0x249   :  { %v4437_v8 = vadd.f32 %v1687_v26, %v1519_v59  ;;  %v1760_v39 = vadd.f32 %v1759_v15, %v1758_v34  ;;  %v1763_v26 = vsel %vm1717_vm0, %v4071_v6, 0.0  ;;  %v1765_v59 = vsel %vm1717_vm0, %v4073_v14, 0.0 }
 0x24a   :  { %v1777_v6 = vsel %vm1717_vm0, %v4157_v16, 0.0  ;;  %v1785_v16 = vsel %vm1717_vm0, %v4213_v54, 0.0  ;;  %v6072_v54 = vld [vmem:[#allocation27_spill] sm:$0xff] }
 0x24b   :  { %v1762_v44 = vadd.f32 %v1761_v38, %v1760_v39  ;;  %v1771_v39 = vsel %vm1717_vm0, %v4127_v24, 0.0  ;;  %v1793_v24 = vsel %vm1717_vm0, %v6072_v54, 0.0  ;;  %v1801_v54 = vsel %vm1717_vm0, %v6076_v20, 0.0 }
 0x24c   :  { %v1809_v20 = vsel %vm1717_vm0, %v4381_v23, 0.0 }
 0x24d   :  { %v1764_v62 = vadd.f32 %v1763_v26, %v1762_v44  ;;  %v1773_v44 = vsel %vm1717_vm0, %v4129_v37, 0.0 }
 0x24e   :  { %v4443_v11 = vpop.f32.mrf.mxu2  ;;  %v4449_v48 = vpop.f32.mrf.mxu0 }
 0x24f   :  { %v4445_v35 = vpop.f32.mrf.mxu3  ;;  %v4451_v50 = vpop.f32.mrf.mxu1  ;;  %v1766_v19 = vadd.f32 %v1765_v59, %v1764_v62  ;;  %v1775_v62 = vsel %vm1717_vm0, %v4155_v7, 0.0 }
 0x251   :  { %v1768_v38 = vadd.f32 %v1767_v5, %v1766_v19 }
 0x253   :  { %v1770_v26 = vadd.f32 %v1769_v41, %v1768_v38  ;;  %v1779_v41 = vsel %vm1717_vm0, %v4183_v53, 0.0 }
 0x255   :  { %v1772_v59 = vadd.f32 %v1771_v39, %v1770_v26  ;;  %v1781_v39 = vsel %vm1717_vm0, %v4185_v3, 0.0 }
 0x256   :  { %v4459_v10 = vpop.f32.mrf.mxu2  ;;  %v4465_v15 = vpop.f32.mrf.mxu0 }
 0x257   :  { %v4461_v12 = vpop.f32.mrf.mxu3  ;;  %v4467_v34 = vpop.f32.mrf.mxu1  ;;  %v1774_v45 = vadd.f32 %v1773_v44, %v1772_v59  ;;  %v1783_v44 = vsel %vm1717_vm0, %v4211_v42, 0.0 }
 0x259   :  { %v1776_v31 = vadd.f32 %v1775_v62, %v1774_v45 }
 0x25b   :  { %v1778_v38 = vadd.f32 %v1777_v6, %v1776_v31  ;;  %v1787_v6 = vsel %vm1717_vm0, %v4239_v33, 0.0  ;;  %v6074_v33 = vld [vmem:[#allocation29_spill] sm:$0xff] }
 0x25d   :  { %v1780_v26 = vadd.f32 %v1779_v41, %v1778_v38  ;;  %v1789_v38 = vsel %vm1717_vm0, %v4241_v46, 0.0  ;;  %v6075_v46 = vld [vmem:[#allocation30_spill] sm:$0xff] }
 0x25e   :  { %v4475_v14 = vpop.f32.mrf.mxu2  ;;  %v1190_v5 = vpop.f32.mrf.mxu0 }
 0x25f   :  { %v4477_v55 = vpop.f32.mrf.mxu3  ;;  %v1359_v19 = vpop.f32.mrf.mxu1  ;;  %v1782_v59 = vadd.f32 %v1781_v39, %v1780_v26  ;;  %v1791_v26 = vsel %vm1717_vm0, %v4267_v25, 0.0 }
 0x261   :  { %v1784_v31 = vadd.f32 %v1783_v44, %v1782_v59 }
 0x263   :  { %v1786_v41 = vadd.f32 %v1785_v16, %v1784_v31  ;;  %v1795_v16 = vsel %vm1717_vm0, %v6073_v56, 0.0  ;;  %v6078_v56 = vld [vmem:[#allocation33_spill] sm:$0xff] }
 0x265   :  { %v1788_v39 = vadd.f32 %v1787_v6, %v1786_v41  ;;  %v1797_v6 = vsel %vm1717_vm0, %v6074_v33, 0.0 }
 0x266   :  { %v4487_v7 = vpop.f32.mrf.mxu2  ;;  %v4493_v45 = vpop.f32.mrf.mxu0 }
 0x267   :  { %v4489_v37 = vpop.f32.mrf.mxu3  ;;  %v4495_v62 = vpop.f32.mrf.mxu1  ;;  %v1790_v42 = vadd.f32 %v1789_v38, %v1788_v39  ;;  %v1799_v38 = vsel %vm1717_vm0, %v6075_v46, 0.0 }
 0x269   :  { %v1792_v59 = vadd.f32 %v1791_v26, %v1790_v42 }
 0x26b   :  { %v1794_v31 = vadd.f32 %v1793_v24, %v1792_v59  ;;  %v1803_v24 = vsel %vm1717_vm0, %v6077_v51, 0.0 }
 0x26d   :  { %v1796_v41 = vadd.f32 %v1795_v16, %v1794_v31  ;;  %v1805_v16 = vsel %vm1717_vm0, %v6078_v56, 0.0 }
 0x26e   :  { %v1530_v3 = vpop.f32.mrf.mxu2  ;;  %v1195_v4 = vpop.f32.mrf.mxu0 }
 0x26f   :  { %v4503_v53 = vpop.f32.mrf.mxu3  ;;  %v1364_v44 = vpop.f32.mrf.mxu1  ;;  %v1798_v39 = vadd.f32 %v1797_v6, %v1796_v41  ;;  %v1807_v6 = vsel %vm1717_vm0, %v4379_v17, 0.0 }
 0x271   :  { %v1800_v26 = vadd.f32 %v1799_v38, %v1798_v39  ;;  %v1811_v39 = vsel %vm1717_vm0, %v4383_v58, 0.0 }
 0x273   :  { %v1802_v59 = vadd.f32 %v1801_v54, %v1800_v26  ;;  %v1813_v26 = vsel %vm1717_vm0, %v4393_v13, 0.0 }
 0x275   :  { %v1804_v31 = vadd.f32 %v1803_v24, %v1802_v59  ;;  %v1352_v24 = vadd.f32 %v4433_v43, %v4431_v63  ;;  %v1355_v59 = vadd.f32 %v4451_v50, %v4449_v48  ;;  %v1357_v63 = vadd.f32 %v4467_v34, %v4465_v15 }
 0x276   :  { %v1533_v25 = vpop.f32.mrf.mxu2  ;;  %v1197_v61 = vpop.f32.mrf.mxu0  ;;  %v1362_v15 = vadd.f32 %v4495_v62, %v4493_v45  ;;  %v1365_v34 = vadd.f32 %v1364_v44, %v1195_v4 }
 0x277   :  { %v4513_v32 = vpop.f32.mrf.mxu3  ;;  %v1366_v42 = vpop.f32.mrf.mxu1  ;;  %v1806_v41 = vadd.f32 %v1805_v16, %v1804_v31  ;;  %v1815_v31 = vsel %vm1717_vm0, %v4403_v1, 0.0  ;;  %v1521_v23 = vadd.f32 %v4443_v11, %v1352_v24 }
 0x278   :  { %v1367_v45 = vadd.f32 %v1366_v42, %v1197_v61 }
 0x279   :  { %v1808_v38 = vadd.f32 %v1807_v6, %v1806_v41  ;;  %v1360_v41 = vadd.f32 %v1359_v19, %v1190_v5  ;;  %v4544_v11 = vadd.f32 %v4445_v35, %v1521_v23  ;;  %v1526_v5 = vadd.f32 %v4475_v14, %v1357_v63 }
 0x27a   :  { %v1531_v14 = vadd.f32 %v1530_v3, %v1362_v15 }
 0x27b   :  { %v1810_v54 = vadd.f32 %v1809_v20, %v1808_v38  ;;  %v1817_v20 = vsel %vm1717_vm0, %v4413_v49, 0.0  ;;  %v1524_v38 = vadd.f32 %v4459_v10, %v1355_v59  ;;  %v1821_v10 = vsel %vm1717_vm0, %v4437_v8, 0.0 }
 0x27c   :  { %v1823_v23 = vsel %vm1717_vm0, %v4544_v11, 0.0  ;;  %v4558_v35 = vadd.f32 %v4477_v55, %v1526_v5  ;;  %v4568_v3 = vadd.f32 %v4503_v53, %v1531_v14 }
 0x27d   :  { %v1812_v16 = vadd.f32 %v1811_v39, %v1810_v54  ;;  %v1819_v39 = vsel %vm1717_vm0, %v4423_v28, 0.0  ;;  %v1529_v54 = vadd.f32 %v4487_v7, %v1360_v41 }
 0x27e   :  { %v1535_v46 = vpop.f32.mrf.mxu2  ;;  %v1200_v27 = vpop.f32.mrf.mxu0  ;;  %v1827_v55 = vsel %vm1717_vm0, %v4558_v35, 0.0  ;;  %v1831_v42 = vsel %vm1717_vm0, %v4568_v3, 0.0 }
 0x27f   :  { %v1704_v33 = vpop.f32.mrf.mxu3  ;;  %v1369_v18 = vpop.f32.mrf.mxu1  ;;  %v1814_v6 = vadd.f32 %v1813_v26, %v1812_v16  ;;  %v4551_v26 = vadd.f32 %v4461_v12, %v1524_v38  ;;  %v4561_v7 = vadd.f32 %v4489_v37, %v1529_v54 }
 0x280   :  { %v1370_v4 = vadd.f32 %v1369_v18, %v1200_v27 }
 0x281   :  { %v1816_v50 = vadd.f32 %v1815_v31, %v1814_v6  ;;  %v1825_v12 = vsel %vm1717_vm0, %v4551_v26, 0.0  ;;  %v1534_v6 = vadd.f32 %v1533_v25, %v1365_v34  ;;  %v1829_v38 = vsel %vm1717_vm0, %v4561_v7, 0.0 }
 0x283   :  { %v1818_v19 = vadd.f32 %v1817_v20, %v1816_v50  ;;  %v1536_v20 = vadd.f32 %v1535_v46, %v1367_v45  ;;  %v4573_v63 = vadd.f32 %v4513_v32, %v1534_v6 }
 0x285   :  { %v1820_v24 = vadd.f32 %v1819_v39, %v1818_v19  ;;  %v1705_v50 = vadd.f32 %v1704_v33, %v1536_v20  ;;  %v1833_v46 = vsel %vm1717_vm0, %v4573_v63, 0.0 }
 0x286   :  { %v1538_v17 = vpop.f32.mrf.mxu2  ;;  %v1202_v43 = vpop.f32.mrf.mxu0 }
 0x287   :  { %v1707_v58 = vpop.f32.mrf.mxu3  ;;  %v1371_v48 = vpop.f32.mrf.mxu1  ;;  %v1822_v59 = vadd.f32 %v1821_v10, %v1820_v24  ;;  %v1539_v25 = vadd.f32 %v1538_v17, %v1370_v4  ;;  %v1835_v32 = vsel %vm1717_vm0, %v1705_v50, 0.0 }
 0x288   :  { %v1372_v61 = vadd.f32 %v1371_v48, %v1202_v43 }
 0x289   :  { %v1824_v62 = vadd.f32 %v1823_v23, %v1822_v59  ;;  %v1708_v54 = vadd.f32 %v1707_v58, %v1539_v25 }
 0x28b   :  { %v1826_v37 = vadd.f32 %v1825_v12, %v1824_v62  ;;  %v1837_v24 = vsel %vm1717_vm0, %v1708_v54, 0.0 }
 0x28d   :  { %v1828_v27 = vadd.f32 %v1827_v55, %v1826_v37 }
 0x28e   :  { %v1540_v16 = vpop.f32.mrf.mxu2  ;;  %v1205_v44 = vpop.f32.mrf.mxu0 }
 0x28f   :  { %v1709_v31 = vpop.f32.mrf.mxu3  ;;  %v1374_v41 = vpop.f32.mrf.mxu1  ;;  %v1541_v39 = vadd.f32 %v1540_v16, %v1372_v61  ;;  %v1830_v5 = vadd.f32 %v1829_v38, %v1828_v27 }
 0x290   :  { %v1375_v18 = vadd.f32 %v1374_v41, %v1205_v44 }
 0x291   :  { %v1832_v15 = vadd.f32 %v1831_v42, %v1830_v5  ;;  %v1710_v17 = vadd.f32 %v1709_v31, %v1541_v39  ;;  %v3399_v31 = vmov 512.0  }
 0x292   :  { %3395 = vrcp.f32 %v3399_v31 }
 0x293   :  { %v1834_v43 = vadd.f32 %v1833_v46, %v1832_v15  ;;  %v1839_v14 = vsel %vm1717_vm0, %v1710_v17, 0.0 }
 0x295   :  { %v1836_v33 = vadd.f32 %v1835_v32, %v1834_v43 }
 0x296   :  { %v1543_v53 = vpop.f32.mrf.mxu2  ;;  %v1207_v48 = vpop.f32.mrf.mxu0 }
 0x297   :  { %v1712_v19 = vpop.f32.mrf.mxu3  ;;  %v1544_v10 = vadd.f32 %v1543_v53, %v1375_v18  ;;  %v1376_v34 = vpop.f32.mrf.mxu1  ;;  %v1838_v16 = vadd.f32 %v1837_v24, %v1836_v33 }
 0x298   :  { %v1377_v59 = vadd.f32 %v1376_v34, %v1207_v48  ;;  %v3396_v37 = vpop.eup %3395 }
 0x299   :  { %v1713_v23 = vadd.f32 %v1712_v19, %v1544_v10  ;;  %v1840_v45 = vadd.f32 %v1839_v14, %v1838_v16  ;;  %v1852_v25 = vmul.f32 512.0, %v3396_v37  ;;  %vm1856_vm1 = vweird.f32 %v3396_v37 }
 0x29b   :  { %v1841_v6 = vsel %vm1717_vm0, %v1713_v23, 0.0  ;;  %v1853_v18 = vsub.f32 1.0, %v1852_v25 }
 0x29c   :  { %v1842_v44 = vadd.f32 %v1841_v6, %v1840_v45 }
 0x29d   :  { %v1854_v42 = vmul.f32 %v3396_v37, %v1853_v18 }
 0x29e   :  { %v1545_v12 = vpop.f32.mrf.mxu2 }
 0x29f   :  { %v1546_v58 = vadd.f32 %v1545_v12, %v1377_v59  ;;  %v1714_v4 = vpop.f32.mrf.mxu3  ;;  %v1855_v5 = vadd.f32 %v3396_v37, %v1854_v42 }
 0x2a1   :  { %v1715_v62 = vadd.f32 %v1714_v4, %v1546_v58  ;;  %v4584_v19 = vsel %vm1856_vm1, %v3396_v37, %v1855_v5 }
 0x2a3   :  { %v1843_v41 = vsel %vm1717_vm0, %v1715_v62, 0.0 }
 0x2a4   :  { %v1844_v55 = vadd.f32 %v1843_v41, %v1842_v44 }
 0x2a6   :  { %v1845_v20 = vrot.slane %v1844_v55, 4 }
 0x2a8   :  { %v1846_v38 = vadd.f32 %v1845_v20, %v1844_v55 }
 0x2aa   :  { %v1847_v61 = vrot.slane %v1846_v38, 2 }
 0x2ac   :  { %v1848_v27 = vadd.f32 %v1847_v61, %v1846_v38 }
 0x2ae   :  { %v1849_v39 = vrot.slane %v1848_v27, 1 }
 0x2b0   :  { %v1850_v53 = vadd.f32 %v1849_v39, %v1848_v27 }
 0x2b2   :  { %v4587_v46 = vmul.f32 %v4584_v19, %v1850_v53  ;;  %v6083_v53 = vld [vmem:[#allocation2_spill] sm:$0xff] }
 0x2b4   :  { %v4590_v10 = vsub.f32 %v1705_v50, %v4587_v46  ;;  %v4593_v15 = vsub.f32 %v1708_v54, %v4587_v46  ;;  %v4596_v32 = vsub.f32 %v1710_v17, %v4587_v46  ;;  %v4599_v43 = vsub.f32 %v1713_v23, %v4587_v46 }
 0x2b5   :  { %v4602_v48 = vsub.f32 %v1715_v62, %v4587_v46  ;;  %v4606_v34 = vsub.f32 %v3737_v21, %v4587_v46  ;;  %v4610_v50 = vsub.f32 %v3763_v40, %v4587_v46  ;;  %v4614_v54 = vsub.f32 %v3765_v47, %v4587_v46 }
 0x2b6   :  { %6079 = vst [vmem:[#allocation32_spill] sm:$0xff] %v4590_v10  ;;  %v4618_v17 = vsub.f32 %v3791_v2, %v4587_v46  ;;  %v4626_v21 = vsub.f32 %v3793_v9, %v4587_v46  ;;  %v4632_v47 = vsub.f32 %v3819_v29, %v4587_v46  ;;  %v4640_v16 = vsub.f32 %v3821_v36, %v4587_v46 }
 0x2b7   :  { %6080 = vst [vmem:[#allocation33_spill] sm:$0xff] %v4593_v15  ;;  %v1923_v24 = vmul.f32 %v4606_v34, %v4606_v34  ;;  %v1924_v23 = vmul.f32 %v4610_v50, %v4610_v50  ;;  %v1925_v40 = vmul.f32 %v4614_v54, %v4614_v54  ;;  %v4647_v29 = vsub.f32 %v3847_v57, %v4587_v46 }
 0x2b8   :  { %6081 = vst [vmem:[#allocation37_spill] sm:$0xff] %v4596_v32  ;;  %v1926_v2 = vmul.f32 %v4618_v17, %v4618_v17  ;;  %v1927_v9 = vmul.f32 %v4626_v21, %v4626_v21  ;;  %v1928_v58 = vmul.f32 %v4632_v47, %v4632_v47  ;;  %v4654_v36 = vsub.f32 %v3849_v0, %v4587_v46 }
 0x2b9   :  { %6082 = vst [vmem:[#allocation38_spill] sm:$0xff] %v4599_v43  ;;  %v1987_v33 = vsel %vm1717_vm0, %v1923_v24, 0.0  ;;  %v1988_v14 = vsel %vm1717_vm0, %v1924_v23, 0.0  ;;  %v1990_v12 = vsel %vm1717_vm0, %v1925_v40, 0.0  ;;  %v1929_v62 = vmul.f32 %v4640_v16, %v4640_v16 }
 0x2ba   :  { %v1989_v59 = vadd.f32 %v1988_v14, %v1987_v33  ;;  %v1992_v45 = vsel %vm1717_vm0, %v1926_v2, 0.0  ;;  %v1994_v44 = vsel %vm1717_vm0, %v1927_v9, 0.0  ;;  %v4661_v57 = vsub.f32 %v3875_v22, %v4587_v46  ;;  %v6084_v2 = vld [vmem:[#allocation3_spill] sm:$0xff]  ;;  %v6085_v9 = vld [vmem:[#allocation4_spill] sm:$0xff] }
 0x2bb   :  { %v1930_v41 = vmul.f32 %v4647_v29, %v4647_v29  ;;  %v1996_v55 = vsel %vm1717_vm0, %v1928_v58, 0.0  ;;  %v4668_v0 = vsub.f32 %v3877_v30, %v4587_v46  ;;  %v1931_v37 = vmul.f32 %v4654_v36, %v4654_v36 }
 0x2bc   :  { %v1991_v6 = vadd.f32 %v1990_v12, %v1989_v59  ;;  %v1998_v38 = vsel %vm1717_vm0, %v1929_v62, 0.0  ;;  %v4675_v22 = vsub.f32 %v3903_v52, %v4587_v46  ;;  %v1932_v61 = vmul.f32 %v4661_v57, %v4661_v57 }
 0x2bd   :  { %v2000_v18 = vsel %vm1717_vm0, %v1930_v41, 0.0  ;;  %v4682_v30 = vsub.f32 %v3905_v60, %v4587_v46  ;;  %v1933_v42 = vmul.f32 %v4668_v0, %v4668_v0  ;;  %v2002_v39 = vsel %vm1717_vm0, %v1931_v37, 0.0 }
 0x2be   :  { %v1993_v4 = vadd.f32 %v1992_v45, %v1991_v6  ;;  %v4689_v52 = vsub.f32 %v6083_v53, %v4587_v46  ;;  %v1934_v24 = vmul.f32 %v4675_v22, %v4675_v22  ;;  %v2004_v23 = vsel %vm1717_vm0, %v1932_v61, 0.0  ;;  %v6088_v61 = vld [vmem:[#allocation7_spill] sm:$0xff] }
 0x2bf   :  { %v4696_v60 = vsub.f32 %v6084_v2, %v4587_v46  ;;  %v1935_v33 = vmul.f32 %v4682_v30, %v4682_v30  ;;  %v2006_v14 = vsel %vm1717_vm0, %v1933_v42, 0.0  ;;  %v4703_v12 = vsub.f32 %v6085_v9, %v4587_v46  ;;  %v6090_v2 = vld [vmem:[#allocation9_spill] sm:$0xff] }
 0x2c0   :  { %v1995_v31 = vadd.f32 %v1994_v44, %v1993_v4  ;;  %v1936_v6 = vmul.f32 %v4689_v52, %v4689_v52  ;;  %v2008_v58 = vsel %vm1717_vm0, %v1934_v24, 0.0  ;;  %v6086_v4 = vld [vmem:[#allocation5_spill] sm:$0xff] }
 0x2c1   :  { %v4710_v62 = vsub.f32 %v6086_v4, %v4587_v46  ;;  %v1937_v44 = vmul.f32 %v4696_v60, %v4696_v60  ;;  %v1938_v37 = vmul.f32 %v4703_v12, %v4703_v12 }
 0x2c2   :  { %v1997_v20 = vadd.f32 %v1996_v55, %v1995_v31  ;;  %v2010_v31 = vsel %vm1717_vm0, %v1935_v33, 0.0  ;;  %v6087_v55 = vld [vmem:[#allocation6_spill] sm:$0xff]  ;;  %v4738_v33 = vsub.f32 %v6090_v2, %v4587_v46 }
 0x2c3   :  { %v2014_v42 = vsel %vm1717_vm0, %v1937_v44, 0.0 }
 0x2c4   :  { %v1999_v25 = vadd.f32 %v1998_v38, %v1997_v20  ;;  %v4717_v20 = vsub.f32 %v6087_v55, %v4587_v46  ;;  %v2012_v38 = vsel %vm1717_vm0, %v1936_v6, 0.0  ;;  %v6091_v6 = vld [vmem:[#allocation10_spill] sm:$0xff]  ;;  %v1943_v55 = vmul.f32 %v4738_v33, %v4738_v33 }
 0x2c6   :  { %v2001_v27 = vadd.f32 %v2000_v18, %v1999_v25  ;;  %v4724_v18 = vsub.f32 %v6088_v61, %v4587_v46  ;;  %v1940_v24 = vmul.f32 %v4717_v20, %v4717_v20 }
 0x2c8   :  { %v2003_v5 = vadd.f32 %v2002_v39, %v2001_v27  ;;  %v1939_v27 = vmul.f32 %v4710_v62, %v4710_v62  ;;  %v2020_v4 = vsel %vm1717_vm0, %v1940_v24, 0.0 }
 0x2ca   :  { %v2005_v40 = vadd.f32 %v2004_v23, %v2003_v5  ;;  %v6089_v5 = vld [vmem:[#allocation8_spill] sm:$0xff]  ;;  %v2016_v23 = vsel %vm1717_vm0, %v1938_v37, 0.0 }
 0x2cb   :  { %v4731_v53 = vsub.f32 %v6089_v5, %v4587_v46  ;;  %v6094_v5 = vld [vmem:[#allocation13_spill] sm:$0xff] }
 0x2cc   :  { %v2007_v59 = vadd.f32 %v2006_v14, %v2005_v40  ;;  %v1941_v14 = vmul.f32 %v4724_v18, %v4724_v18  ;;  %v4766_v24 = vsub.f32 %v6094_v5, %v4587_v46  ;;  %v6098_v5 = vld [vmem:[#allocation17_spill] sm:$0xff] }
 0x2ce   :  { %v2009_v45 = vadd.f32 %v2008_v58, %v2007_v59  ;;  %v2018_v59 = vsel %vm1717_vm0, %v1939_v27, 0.0  ;;  %v4745_v58 = vsub.f32 %v6091_v6, %v4587_v46  ;;  %v2022_v37 = vsel %vm1717_vm0, %v1941_v14, 0.0  ;;  %v6095_v14 = vld [vmem:[#allocation14_spill] sm:$0xff] }
 0x2d0   :  { %v2011_v41 = vadd.f32 %v2010_v31, %v2009_v45  ;;  %v1942_v45 = vmul.f32 %v4731_v53, %v4731_v53  ;;  %v6092_v31 = vld [vmem:[#allocation11_spill] sm:$0xff]  ;;  %v1944_v27 = vmul.f32 %v4745_v58, %v4745_v58 }
 0x2d2   :  { %v2013_v25 = vadd.f32 %v2012_v38, %v2011_v41  ;;  %v4752_v41 = vsub.f32 %v6092_v31, %v4587_v46  ;;  %v2028_v6 = vsel %vm1717_vm0, %v1944_v27, 0.0  ;;  %v1947_v31 = vmul.f32 %v4766_v24, %v4766_v24 }
 0x2d4   :  { %v2015_v39 = vadd.f32 %v2014_v42, %v2013_v25  ;;  %v6093_v25 = vld [vmem:[#allocation12_spill] sm:$0xff]  ;;  %v2024_v42 = vsel %vm1717_vm0, %v1942_v45, 0.0 }
 0x2d5   :  { %v4759_v61 = vsub.f32 %v6093_v25, %v4587_v46 }
 0x2d6   :  { %v2017_v40 = vadd.f32 %v2016_v23, %v2015_v39  ;;  %v1945_v23 = vmul.f32 %v4752_v41, %v4752_v41 }
 0x2d8   :  { %v2019_v9 = vadd.f32 %v2018_v59, %v2017_v40  ;;  %v2026_v40 = vsel %vm1717_vm0, %v1943_v55, 0.0  ;;  %v4773_v59 = vsub.f32 %v6095_v14, %v4587_v46  ;;  %v2030_v55 = vsel %vm1717_vm0, %v1945_v23, 0.0 }
 0x2d9   :  { %v2034_v23 = vsel %vm1717_vm0, %v1947_v31, 0.0 }
 0x2da   :  { %v2021_v44 = vadd.f32 %v2020_v4, %v2019_v9  ;;  %v1946_v9 = vmul.f32 %v4759_v61, %v4759_v61  ;;  %v6096_v4 = vld [vmem:[#allocation15_spill] sm:$0xff] }
 0x2dc   :  { %v2023_v38 = vadd.f32 %v2022_v37, %v2021_v44  ;;  %v4780_v44 = vsub.f32 %v6096_v4, %v4587_v46  ;;  %v2032_v27 = vsel %vm1717_vm0, %v1946_v9, 0.0 }
 0x2de   :  { %v2025_v39 = vadd.f32 %v2024_v42, %v2023_v38  ;;  %v6097_v38 = vld [vmem:[#allocation16_spill] sm:$0xff]  ;;  %v1948_v42 = vmul.f32 %v4773_v59, %v4773_v59 }
 0x2df   :  { %v4787_v25 = vsub.f32 %v6097_v38, %v4587_v46 }
 0x2e0   :  { %v2027_v2 = vadd.f32 %v2026_v40, %v2025_v39  ;;  %v4794_v40 = vsub.f32 %v6098_v5, %v4587_v46  ;;  %v2036_v9 = vsel %vm1717_vm0, %v1948_v42, 0.0  ;;  %v6104_v5 = vld [vmem:[#allocation20_spill] sm:$0xff] }
 0x2e1   :  { %v1950_v4 = vmul.f32 %v4787_v25, %v4787_v25 }
 0x2e2   :  { %v2029_v45 = vadd.f32 %v2028_v6, %v2027_v2  ;;  %6099 = vst [vmem:[#allocation2_spill] sm:$0xff] %v4794_v40  ;;  %v1949_v2 = vmul.f32 %v4780_v44, %v4780_v44  ;;  %v6100_v6 = vld [vmem:[#allocation18_spill] sm:$0xff] }
 0x2e3   :  { %v2040_v42 = vsel %vm1717_vm0, %v1950_v4, 0.0 }
 0x2e4   :  { %v2031_v37 = vadd.f32 %v2030_v55, %v2029_v45  ;;  %v4801_v45 = vsub.f32 %v6100_v6, %v4587_v46  ;;  %v2038_v31 = vsel %vm1717_vm0, %v1949_v2, 0.0 }
 0x2e6   :  { %v2033_v39 = vadd.f32 %v2032_v27, %v2031_v37  ;;  %6101 = vst [vmem:[#allocation3_spill] sm:$0xff] %v4801_v45  ;;  %v6102_v37 = vld [vmem:[#allocation19_spill] sm:$0xff]  ;;  %v1951_v27 = vmul.f32 %v4794_v40, %v4794_v40  ;;  %v1952_v6 = vmul.f32 %v4801_v45, %v4801_v45 }
 0x2e7   :  { %v4808_v38 = vsub.f32 %v6102_v37, %v4587_v46 }
 0x2e8   :  { %v2035_v14 = vadd.f32 %v2034_v23, %v2033_v39  ;;  %v4815_v23 = vsub.f32 %v6104_v5, %v4587_v46  ;;  %v2042_v2 = vsel %vm1717_vm0, %v1951_v27, 0.0  ;;  %v2044_v4 = vsel %vm1717_vm0, %v1952_v6, 0.0 }
 0x2e9   :  { %6103 = vst [vmem:[#allocation4_spill] sm:$0xff] %v4808_v38  ;;  %v1953_v40 = vmul.f32 %v4808_v38, %v4808_v38 }
 0x2ea   :  { %v2037_v55 = vadd.f32 %v2036_v9, %v2035_v14  ;;  %6105 = vst [vmem:[#allocation5_spill] sm:$0xff] %v4815_v23  ;;  %v6106_v9 = vld [vmem:[#allocation21_spill] sm:$0xff]  ;;  %v1954_v45 = vmul.f32 %v4815_v23, %v4815_v23 }
 0x2eb   :  { %v4822_v37 = vsub.f32 %v6106_v9, %v4587_v46  ;;  %v2046_v27 = vsel %vm1717_vm0, %v1953_v40, 0.0 }
 0x2ec   :  { %v2039_v39 = vadd.f32 %v2038_v31, %v2037_v55  ;;  %v6108_v31 = vld [vmem:[#allocation22_spill] sm:$0xff]  ;;  %v2048_v6 = vsel %vm1717_vm0, %v1954_v45, 0.0 }
 0x2ed   :  { %6107 = vst [vmem:[#allocation6_spill] sm:$0xff] %v4822_v37  ;;  %v4829_v5 = vsub.f32 %v6108_v31, %v4587_v46  ;;  %v1955_v38 = vmul.f32 %v4822_v37, %v4822_v37 }
 0x2ee   :  { %v2041_v14 = vadd.f32 %v2040_v42, %v2039_v39  ;;  %v6110_v42 = vld [vmem:[#allocation23_spill] sm:$0xff] }
 0x2ef   :  { %6109 = vst [vmem:[#allocation7_spill] sm:$0xff] %v4829_v5  ;;  %v4836_v9 = vsub.f32 %v6110_v42, %v4587_v46  ;;  %v1956_v23 = vmul.f32 %v4829_v5, %v4829_v5  ;;  %v2050_v40 = vsel %vm1717_vm0, %v1955_v38, 0.0 }
 0x2f0   :  { %v2043_v55 = vadd.f32 %v2042_v2, %v2041_v14  ;;  %v6112_v2 = vld [vmem:[#allocation24_spill] sm:$0xff] }
 0x2f1   :  { %6111 = vst [vmem:[#allocation8_spill] sm:$0xff] %v4836_v9  ;;  %v4843_v31 = vsub.f32 %v6112_v2, %v4587_v46  ;;  %v1957_v37 = vmul.f32 %v4836_v9, %v4836_v9  ;;  %v2052_v45 = vsel %vm1717_vm0, %v1956_v23, 0.0 }
 0x2f2   :  { %v2045_v39 = vadd.f32 %v2044_v4, %v2043_v55  ;;  %v6114_v4 = vld [vmem:[#allocation25_spill] sm:$0xff] }
 0x2f3   :  { %6113 = vst [vmem:[#allocation9_spill] sm:$0xff] %v4843_v31  ;;  %v4850_v42 = vsub.f32 %v6114_v4, %v4587_v46  ;;  %v1958_v5 = vmul.f32 %v4843_v31, %v4843_v31  ;;  %v2054_v38 = vsel %vm1717_vm0, %v1957_v37, 0.0 }
 0x2f4   :  { %v2047_v14 = vadd.f32 %v2046_v27, %v2045_v39  ;;  %v6116_v27 = vld [vmem:[#allocation26_spill] sm:$0xff] }
 0x2f5   :  { %6115 = vst [vmem:[#allocation10_spill] sm:$0xff] %v4850_v42  ;;  %v4857_v2 = vsub.f32 %v6116_v27, %v4587_v46  ;;  %v1959_v9 = vmul.f32 %v4850_v42, %v4850_v42  ;;  %v2056_v23 = vsel %vm1717_vm0, %v1958_v5, 0.0 }
 0x2f6   :  { %v2049_v55 = vadd.f32 %v2048_v6, %v2047_v14  ;;  %v6118_v6 = vld [vmem:[#allocation27_spill] sm:$0xff] }
 0x2f7   :  { %6117 = vst [vmem:[#allocation11_spill] sm:$0xff] %v4857_v2  ;;  %v4864_v4 = vsub.f32 %v6118_v6, %v4587_v46  ;;  %v1960_v31 = vmul.f32 %v4857_v2, %v4857_v2  ;;  %v2058_v37 = vsel %vm1717_vm0, %v1959_v9, 0.0 }
 0x2f8   :  { %v2051_v39 = vadd.f32 %v2050_v40, %v2049_v55  ;;  %v6120_v40 = vld [vmem:[#allocation28_spill] sm:$0xff] }
 0x2f9   :  { %6119 = vst [vmem:[#allocation12_spill] sm:$0xff] %v4864_v4  ;;  %v4871_v27 = vsub.f32 %v6120_v40, %v4587_v46  ;;  %v1961_v42 = vmul.f32 %v4864_v4, %v4864_v4  ;;  %v2060_v5 = vsel %vm1717_vm0, %v1960_v31, 0.0 }
 0x2fa   :  { %v2053_v14 = vadd.f32 %v2052_v45, %v2051_v39  ;;  %v6121_v45 = vld [vmem:[#allocation29_spill] sm:$0xff] }
 0x2fb   :  { %v4878_v6 = vsub.f32 %v6121_v45, %v4587_v46  ;;  %v1962_v2 = vmul.f32 %v4871_v27, %v4871_v27  ;;  %v2062_v9 = vsel %vm1717_vm0, %v1961_v42, 0.0 }
 0x2fc   :  { %v2055_v55 = vadd.f32 %v2054_v38, %v2053_v14  ;;  %v6122_v38 = vld [vmem:[#allocation30_spill] sm:$0xff] }
 0x2fd   :  { %v4885_v40 = vsub.f32 %v6122_v38, %v4587_v46  ;;  %v1963_v4 = vmul.f32 %v4878_v6, %v4878_v6  ;;  %v2064_v31 = vsel %vm1717_vm0, %v1962_v2, 0.0 }
 0x2fe   :  { %v2057_v39 = vadd.f32 %v2056_v23, %v2055_v55  ;;  %v6124_v23 = vld [vmem:[#allocation31_spill] sm:$0xff] }
 0x2ff   :  { %6123 = vst [vmem:[#allocation13_spill] sm:$0xff] %v4885_v40  ;;  %v4892_v45 = vsub.f32 %v6124_v23, %v4587_v46  ;;  %v1964_v38 = vmul.f32 %v4885_v40, %v4885_v40  ;;  %v2066_v42 = vsel %vm1717_vm0, %v1963_v4, 0.0 }
 0x300   :  { %v2059_v14 = vadd.f32 %v2058_v37, %v2057_v39  ;;  %v4899_v37 = vsub.f32 %v6077_v51, %v4587_v46 }
 0x301   :  { %6125 = vst [vmem:[#allocation14_spill] sm:$0xff] %v4892_v45  ;;  %v1965_v23 = vmul.f32 %v4892_v45, %v4892_v45  ;;  %v2068_v2 = vsel %vm1717_vm0, %v1964_v38, 0.0 }
 0x302   :  { %v2061_v55 = vadd.f32 %v2060_v5, %v2059_v14  ;;  %6126 = vst [vmem:[#allocation15_spill] sm:$0xff] %v4899_v37  ;;  %v4906_v5 = vsub.f32 %v6078_v56, %v4587_v46  ;;  %v1966_v40 = vmul.f32 %v4899_v37, %v4899_v37 }
 0x303   :  { %v2070_v4 = vsel %vm1717_vm0, %v1965_v23, 0.0 }
 0x304   :  { %v2063_v39 = vadd.f32 %v2062_v9, %v2061_v55  ;;  %v6127_v9 = vld [vmem:[#allocation34_spill] sm:$0xff]  ;;  %v1967_v45 = vmul.f32 %v4906_v5, %v4906_v5  ;;  %v2072_v38 = vsel %vm1717_vm0, %v1966_v40, 0.0 }
 0x305   :  { %v4913_v51 = vsub.f32 %v6127_v9, %v4587_v46 }
 0x306   :  { %v2065_v14 = vadd.f32 %v2064_v31, %v2063_v39  ;;  %v6128_v31 = vld [vmem:[#allocation35_spill] sm:$0xff]  ;;  %v2074_v23 = vsel %vm1717_vm0, %v1967_v45, 0.0 }
 0x307   :  { %v4920_v56 = vsub.f32 %v6128_v31, %v4587_v46  ;;  %v1968_v37 = vmul.f32 %v4913_v51, %v4913_v51 }
 0x308   :  { %v2067_v55 = vadd.f32 %v2066_v42, %v2065_v14  ;;  %v6129_v42 = vld [vmem:[#allocation36_spill] sm:$0xff] }
 0x309   :  { %v4927_v9 = vsub.f32 %v6129_v42, %v4587_v46  ;;  %v1969_v31 = vmul.f32 %v4920_v56, %v4920_v56  ;;  %v2076_v40 = vsel %vm1717_vm0, %v1968_v37, 0.0 }
 0x30a   :  { %v2069_v39 = vadd.f32 %v2068_v2, %v2067_v55  ;;  %v4934_v2 = vsub.f32 %v4393_v13, %v4587_v46  ;;  %v4948_v13 = vsub.f32 %v4413_v49, %v4587_v46  ;;  %v4962_v49 = vsub.f32 %v4437_v8, %v4587_v46 }
 0x30b   :  { %v1970_v42 = vmul.f32 %v4927_v9, %v4927_v9  ;;  %v2078_v45 = vsel %vm1717_vm0, %v1969_v31, 0.0  ;;  %v4976_v8 = vsub.f32 %v4551_v26, %v4587_v46  ;;  %v4990_v26 = vsub.f32 %v4561_v7, %v4587_v46 }
 0x30c   :  { %v2071_v14 = vadd.f32 %v2070_v4, %v2069_v39  ;;  %v4941_v4 = vsub.f32 %v4403_v1, %v4587_v46  ;;  %v4955_v1 = vsub.f32 %v4423_v28, %v4587_v46  ;;  %v4969_v28 = vsub.f32 %v4544_v11, %v4587_v46 }
 0x30d   :  { %v2080_v37 = vsel %vm1717_vm0, %v1970_v42, 0.0  ;;  %6130 = vst [vmem:[#allocation16_spill] sm:$0xff] %v4976_v8  ;;  %v4983_v11 = vsub.f32 %v4558_v35, %v4587_v46  ;;  %v4997_v35 = vsub.f32 %v4568_v3, %v4587_v46  ;;  %v5004_v7 = vsub.f32 %v4573_v63, %v4587_v46 }
 0x30e   :  { %v2073_v55 = vadd.f32 %v2072_v38, %v2071_v14  ;;  %v1971_v38 = vmul.f32 %v4934_v2, %v4934_v2  ;;  %6131 = vst [vmem:[#allocation17_spill] sm:$0xff] %v4990_v26  ;;  %v1982_v63 = vmul.f32 %v4590_v10, %v4590_v10 }
 0x30f   :  { %6132 = vst [vmem:[#allocation18_spill] sm:$0xff] %v5004_v7  ;;  %v1980_v3 = vmul.f32 %v4997_v35, %v4997_v35 }
 0x310   :  { %v2075_v39 = vadd.f32 %v2074_v23, %v2073_v55  ;;  %v1972_v23 = vmul.f32 %v4941_v4, %v4941_v4  ;;  %v2082_v31 = vsel %vm1717_vm0, %v1971_v38, 0.0 }
 0x311   :  { %v2100_v46 = vsel %vm1717_vm0, %v1980_v3, 0.0 }
 0x312   :  { %v2077_v14 = vadd.f32 %v2076_v40, %v2075_v39  ;;  %v1973_v40 = vmul.f32 %v4948_v13, %v4948_v13  ;;  %v2084_v42 = vsel %vm1717_vm0, %v1972_v23, 0.0 }
 0x314   :  { %v2079_v55 = vadd.f32 %v2078_v45, %v2077_v14  ;;  %v1974_v45 = vmul.f32 %v4955_v1, %v4955_v1  ;;  %v2086_v38 = vsel %vm1717_vm0, %v1973_v40, 0.0 }
 0x316   :  { %v2081_v39 = vadd.f32 %v2080_v37, %v2079_v55  ;;  %v1975_v37 = vmul.f32 %v4962_v49, %v4962_v49  ;;  %v2088_v23 = vsel %vm1717_vm0, %v1974_v45, 0.0 }
 0x318   :  { %v2083_v14 = vadd.f32 %v2082_v31, %v2081_v39  ;;  %v1976_v31 = vmul.f32 %v4969_v28, %v4969_v28  ;;  %v2090_v40 = vsel %vm1717_vm0, %v1975_v37, 0.0 }
 0x31a   :  { %v2085_v55 = vadd.f32 %v2084_v42, %v2083_v14  ;;  %v1977_v42 = vmul.f32 %v4976_v8, %v4976_v8  ;;  %v2092_v45 = vsel %vm1717_vm0, %v1976_v31, 0.0  ;;  %v1981_v31 = vmul.f32 %v5004_v7, %v5004_v7 }
 0x31c   :  { %v2087_v39 = vadd.f32 %v2086_v38, %v2085_v55  ;;  %v1978_v38 = vmul.f32 %v4983_v11, %v4983_v11  ;;  %v2094_v37 = vsel %vm1717_vm0, %v1977_v42, 0.0  ;;  %v2102_v42 = vsel %vm1717_vm0, %v1981_v31, 0.0 }
 0x31d   :  { %v1986_v31 = vmul.f32 %v4602_v48, %v4602_v48 }
 0x31e   :  { %v2089_v14 = vadd.f32 %v2088_v23, %v2087_v39  ;;  %v1979_v23 = vmul.f32 %v4990_v26, %v4990_v26 }
 0x320   :  { %v2091_v55 = vadd.f32 %v2090_v40, %v2089_v14  ;;  %v2096_v40 = vsel %vm1717_vm0, %v1978_v38, 0.0  ;;  %v2104_v38 = vsel %vm1717_vm0, %v1982_v63, 0.0  ;;  %v2112_v63 = vsel %vm1717_vm0, %v1986_v31, 0.0 }
 0x322   :  { %v2093_v39 = vadd.f32 %v2092_v45, %v2091_v55  ;;  %v2098_v55 = vsel %vm1717_vm0, %v1979_v23, 0.0 }
 0x324   :  { %v2095_v14 = vadd.f32 %v2094_v37, %v2093_v39  ;;  %v1983_v39 = vmul.f32 %v4593_v15, %v4593_v15 }
 0x326   :  { %v2097_v8 = vadd.f32 %v2096_v40, %v2095_v14  ;;  %v1984_v40 = vmul.f32 %v4596_v32, %v4596_v32 }
 0x328   :  { %v2099_v45 = vadd.f32 %v2098_v55, %v2097_v8  ;;  %v2106_v8 = vsel %vm1717_vm0, %v1983_v39, 0.0  ;;  %v1985_v55 = vmul.f32 %v4599_v43, %v4599_v43  ;;  %v2108_v3 = vsel %vm1717_vm0, %v1984_v40, 0.0 }
 0x32a   :  { %v2101_v26 = vadd.f32 %v2100_v46, %v2099_v45 }
 0x32c   :  { %v2103_v37 = vadd.f32 %v2102_v42, %v2101_v26  ;;  %v2110_v26 = vsel %vm1717_vm0, %v1985_v55, 0.0 }
 0x32e   :  { %v2105_v14 = vadd.f32 %v2104_v38, %v2103_v37 }
 0x330   :  { %v2107_v23 = vadd.f32 %v2106_v8, %v2105_v14 }
 0x332   :  { %v2109_v45 = vadd.f32 %v2108_v3, %v2107_v23 }
 0x334   :  { %v2111_v46 = vadd.f32 %v2110_v26, %v2109_v45 }
 0x336   :  { %v2113_v42 = vadd.f32 %v2112_v63, %v2111_v46  ;;  %v6135_v63 = vld [vmem:[#allocation2_spill] sm:$0xff] }
 0x338   :  { %v2114_v37 = vrot.slane %v2113_v42, 4 }
 0x33a   :  { %v2115_v38 = vadd.f32 %v2114_v37, %v2113_v42  ;;  %v6136_v42 = vld [vmem:[#allocation3_spill] sm:$0xff]  ;;  %v6137_v37 = vld [vmem:[#allocation4_spill] sm:$0xff] }
 0x33c   :  { %v2116_v32 = vrot.slane %v2115_v38, 2 }
 0x33e   :  { %v2117_v39 = vadd.f32 %v2116_v32, %v2115_v38  ;;  %v6138_v38 = vld [vmem:[#allocation5_spill] sm:$0xff] }
 0x340   :  { %v2118_v14 = vrot.slane %v2117_v39, 1 }
 0x342   :  { %v2119_v8 = vadd.f32 %v2118_v14, %v2117_v39  ;;  %v6139_v39 = vld [vmem:[#allocation6_spill] sm:$0xff]  ;;  %v6140_v14 = vld [vmem:[#allocation7_spill] sm:$0xff] }
 0x344   :  { %v2120_v43 = vmul.f32 %v2119_v8, %v4584_v19  ;;  %v5040_v19 = vld [vmem:[%s5975_s2] ss:$0 sm:$0xff] }
 0x346   :  { %v2122_v15 = vadd.f32 1e-05, %v2120_v43 }
 0x348   :  { %3397 = vrsqrt.f32 %v2122_v15  ;;  %vm2129_vm3 = vweird.f32 %v2122_v15 }
 0x34e   :  { %v3398_v40 = vpop.eup %3397 }
 0x34f   :  { %v2124_v23 = vmul.f32 %v3398_v40, %v2122_v15  ;;  %vm2130_vm2 = vweird.f32 %v3398_v40 }
 0x350   :  { %vm2131_vm4 = vmor %vm2129_vm3, %vm2130_vm2 }
 0x351   :  { %v2125_v3 = vmul.f32 %v3398_v40, %v2124_v23 }
 0x353   :  { %v2126_v10 = vmul.f32 0.5, %v2125_v3  ;;  %v6142_v3 = vld [vmem:[#allocation9_spill] sm:$0xff] }
 0x355   :  { %v2127_v7 = vsub.f32 1.5, %v2126_v10  ;;  %v5046_v10 = vld [vmem:[%s5976_s3] ss:$0 sm:$0xff] }
 0x356   :  { %6133 = vst [vmem:[#allocation19_spill] sm:$0xff] %v5046_v10 }
 0x357   :  { %v2128_v55 = vmul.f32 %v3398_v40, %v2127_v7 }
 0x359   :  { %v5033_v45 = vsel %vm2131_vm4, %v3398_v40, %v2128_v55  ;;  %v6141_v40 = vld [vmem:[#allocation8_spill] sm:$0xff] }
 0x35a   :  { %v2196_v32 = vmul.f32 %v5033_v45, %v4602_v48  ;;  %v5050_v15 = vmul.f32 %v5033_v45, %v4606_v34  ;;  %v5054_v7 = vmul.f32 %v5033_v45, %v4610_v50  ;;  %v5058_v48 = vmul.f32 %v5033_v45, %v4614_v54 }
 0x35b   :  { %v5062_v31 = vmul.f32 %v5033_v45, %v4618_v17  ;;  %v5066_v26 = vmul.f32 %v5033_v45, %v4626_v21  ;;  %v5073_v34 = vmul.f32 %v5033_v45, %v4632_v47  ;;  %v5077_v50 = vmul.f32 %v5033_v45, %v4640_v16 }
 0x35c   :  { %v2263_v43 = vmul.f32 %v5040_v19, %v2196_v32  ;;  %v5081_v54 = vmul.f32 %v5033_v45, %v4647_v29  ;;  %v5085_v17 = vmul.f32 %v5033_v45, %v4654_v36  ;;  %v5089_v21 = vmul.f32 %v5033_v45, %v4661_v57  ;;  %v6143_v32 = vld [vmem:[#allocation10_spill] sm:$0xff] }
 0x35d   :  { %v5093_v47 = vmul.f32 %v5033_v45, %v4668_v0  ;;  %v5097_v16 = vmul.f32 %v5033_v45, %v4675_v22  ;;  %v5101_v29 = vmul.f32 %v5033_v45, %v4682_v30  ;;  %v5105_v36 = vmul.f32 %v5033_v45, %v4689_v52 }
 0x35e   :  { %v5069_v46 = vadd.f32 %v5046_v10, %v2263_v43  ;;  %v5109_v57 = vmul.f32 %v5033_v45, %v4696_v60  ;;  %v5113_v0 = vmul.f32 %v5033_v45, %v4703_v12  ;;  %v5117_v22 = vmul.f32 %v5033_v45, %v4710_v62  ;;  %v6152_v10 = vld [vmem:[#allocation16_spill] sm:$0xff] }
 0x35f   :  { %v5121_v30 = vmul.f32 %v5033_v45, %v4717_v20  ;;  %v5125_v52 = vmul.f32 %v5033_v45, %v4724_v18  ;;  %v5129_v60 = vmul.f32 %v5033_v45, %v4731_v53  ;;  %v5133_v12 = vmul.f32 %v5033_v45, %v4738_v33 }
 0x360   :  { %6134 = vst [vmem:[#allocation20_spill] sm:$0xff] %v5069_v46  ;;  %v5137_v62 = vmul.f32 %v5033_v45, %v4745_v58  ;;  %v5141_v20 = vmul.f32 %v5033_v45, %v4752_v41  ;;  %v5145_v18 = vmul.f32 %v5033_v45, %v4759_v61  ;;  %v5149_v53 = vmul.f32 %v5033_v45, %v4766_v24  ;;  %v6148_v46 = vld [vmem:[#allocation15_spill] sm:$0xff] }
 0x361   :  { %v5153_v33 = vmul.f32 %v5033_v45, %v4773_v59  ;;  %v5157_v58 = vmul.f32 %v5033_v45, %v4780_v44  ;;  %v5161_v41 = vmul.f32 %v5033_v45, %v4787_v25  ;;  %v5165_v61 = vmul.f32 %v5033_v45, %v6135_v63  ;;  %v6144_v63 = vld [vmem:[#allocation11_spill] sm:$0xff] }
 0x362   :  { %v5169_v24 = vmul.f32 %v5033_v45, %v6136_v42  ;;  %v5173_v59 = vmul.f32 %v5033_v45, %v6137_v37  ;;  %v5177_v44 = vmul.f32 %v5033_v45, %v6138_v38  ;;  %v5181_v25 = vmul.f32 %v5033_v45, %v6139_v39  ;;  %v6145_v37 = vld [vmem:[#allocation12_spill] sm:$0xff] }
 0x363   :  { %v5185_v8 = vmul.f32 %v5033_v45, %v6140_v14  ;;  %v5189_v23 = vmul.f32 %v5033_v45, %v6141_v40  ;;  %v5193_v55 = vmul.f32 %v5033_v45, %v6142_v3  ;;  %v5197_v43 = vmul.f32 %v5033_v45, %v6143_v32  ;;  %v6146_v40 = vld [vmem:[#allocation13_spill] sm:$0xff]  ;;  %v6147_v32 = vld [vmem:[#allocation14_spill] sm:$0xff] }
 0x364   :  { %v5201_v42 = vmul.f32 %v5033_v45, %v6144_v63  ;;  %v5205_v38 = vmul.f32 %v5033_v45, %v6145_v37  ;;  %v5209_v39 = vmul.f32 %v5033_v45, %v4871_v27  ;;  %v5213_v14 = vmul.f32 %v5033_v45, %v4878_v6 }
 0x365   :  { %v5217_v3 = vmul.f32 %v5033_v45, %v6146_v40  ;;  %v5221_v63 = vmul.f32 %v5033_v45, %v6147_v32  ;;  %v5225_v37 = vmul.f32 %v5033_v45, %v6148_v46  ;;  %v5229_v27 = vmul.f32 %v5033_v45, %v4906_v5 }
 0x366   :  { %v5233_v6 = vmul.f32 %v5033_v45, %v4913_v51  ;;  %v5237_v40 = vmul.f32 %v5033_v45, %v4920_v56  ;;  %v5241_v32 = vmul.f32 %v5033_v45, %v4927_v9  ;;  %v5245_v46 = vmul.f32 %v5033_v45, %v4934_v2 }
 0x367   :  { %v5249_v5 = vmul.f32 %v5033_v45, %v4941_v4  ;;  %v5253_v51 = vmul.f32 %v5033_v45, %v4948_v13  ;;  %v5257_v56 = vmul.f32 %v5033_v45, %v4955_v1  ;;  %v5261_v9 = vmul.f32 %v5033_v45, %v4962_v49 }
 0x368   :  { %v5265_v2 = vmul.f32 %v5033_v45, %v4969_v28  ;;  %v5269_v4 = vmul.f32 %v5033_v45, %v6152_v10  ;;  %v5273_v13 = vmul.f32 %v5033_v45, %v4983_v11  ;;  %v5281_v49 = vmul.f32 %v5033_v45, %v4997_v35 }
 0x369   :  { %6149 = vst [vmem:[#allocation21_spill] sm:$0xff] %v5253_v51  ;;  %v6155_v51 = vld [vmem:[#allocation17_spill] sm:$0xff] }
 0x36a   :  { %6150 = vst [vmem:[#allocation22_spill] sm:$0xff] %v5261_v9  ;;  %v5277_v1 = vmul.f32 %v5033_v45, %v6155_v51  ;;  %v6157_v9 = vld [vmem:[#allocation18_spill] sm:$0xff] }
 0x36b   :  { %6151 = vst [vmem:[#allocation23_spill] sm:$0xff] %v5265_v2  ;;  %v5285_v28 = vmul.f32 %v5033_v45, %v6157_v9  ;;  %v6159_v2 = vld [vmem:[#allocation32_spill] sm:$0xff]  ;;  %v2200_v9 = vmul.f32 %v5040_v19, %v5050_v15  ;;  %v5321_v15 = vmul.f32 %v5040_v19, %v5081_v54  ;;  %v5349_v54 = vmul.f32 %v5040_v19, %v5109_v57 }
 0x36c   :  { %6153 = vst [vmem:[#allocation24_spill] sm:$0xff] %v5269_v4  ;;  %v5289_v10 = vmul.f32 %v5033_v45, %v6159_v2  ;;  %v6160_v4 = vld [vmem:[#allocation33_spill] sm:$0xff]  ;;  %v2202_v2 = vmul.f32 %v5040_v19, %v5058_v48  ;;  %v5329_v48 = vmul.f32 %v5040_v19, %v5089_v21  ;;  %v5357_v21 = vmul.f32 %v5040_v19, %v5117_v22 }
 0x36d   :  { %6154 = vst [vmem:[#allocation25_spill] sm:$0xff] %v5273_v13  ;;  %v5293_v11 = vmul.f32 %v5033_v45, %v6160_v4  ;;  %v6161_v13 = vld [vmem:[#allocation37_spill] sm:$0xff]  ;;  %v2203_v4 = vmul.f32 %v5040_v19, %v5062_v31  ;;  %v5333_v31 = vmul.f32 %v5040_v19, %v5093_v47  ;;  %v5361_v47 = vmul.f32 %v5040_v19, %v5121_v30 }
 0x36e   :  { %6156 = vst [vmem:[#allocation26_spill] sm:$0xff] %v5277_v1  ;;  %v5297_v51 = vmul.f32 %v5033_v45, %v6161_v13  ;;  %v6163_v1 = vld [vmem:[#allocation38_spill] sm:$0xff]  ;;  %v2204_v13 = vmul.f32 %v5040_v19, %v5066_v26  ;;  %v5337_v26 = vmul.f32 %v5040_v19, %v5097_v16  ;;  %v5365_v16 = vmul.f32 %v5040_v19, %v5125_v52 }
 0x36f   :  { %6158 = vst [vmem:[#allocation27_spill] sm:$0xff] %v5285_v28  ;;  %v5301_v35 = vmul.f32 %v5033_v45, %v6163_v1  ;;  %v2201_v28 = vmul.f32 %v5040_v19, %v5054_v7  ;;  %v5317_v45 = vmul.f32 %v5040_v19, %v5077_v50  ;;  %v5325_v7 = vmul.f32 %v5040_v19, %v5085_v17 }
 0x370   :  { %6162 = vst [vmem:[#allocation28_spill] sm:$0xff] %v5297_v51  ;;  %v2205_v51 = vmul.f32 %v5040_v19, %v5073_v34  ;;  %v5341_v34 = vmul.f32 %v5040_v19, %v5101_v29  ;;  %v5345_v50 = vmul.f32 %v5040_v19, %v5105_v36  ;;  %v5353_v17 = vmul.f32 %v5040_v19, %v5113_v0 }
 0x371   :  { %v5369_v29 = vmul.f32 %v5040_v19, %v5129_v60  ;;  %v5373_v36 = vmul.f32 %v5040_v19, %v5133_v12  ;;  %v5377_v57 = vmul.f32 %v5040_v19, %v5137_v62  ;;  %v5381_v0 = vmul.f32 %v5040_v19, %v5141_v20 }
 0x372   :  { %v5385_v22 = vmul.f32 %v5040_v19, %v5145_v18  ;;  %v5389_v30 = vmul.f32 %v5040_v19, %v5149_v53  ;;  %v5393_v52 = vmul.f32 %v5040_v19, %v5153_v33  ;;  %v5397_v60 = vmul.f32 %v5040_v19, %v5157_v58 }
 0x373   :  { %v5401_v12 = vmul.f32 %v5040_v19, %v5161_v41  ;;  %v5405_v62 = vmul.f32 %v5040_v19, %v5165_v61  ;;  %v5409_v20 = vmul.f32 %v5040_v19, %v5169_v24  ;;  %v5413_v18 = vmul.f32 %v5040_v19, %v5173_v59 }
 0x374   :  { %v5417_v53 = vmul.f32 %v5040_v19, %v5177_v44  ;;  %v5421_v33 = vmul.f32 %v5040_v19, %v5181_v25  ;;  %v5425_v58 = vmul.f32 %v5040_v19, %v5185_v8  ;;  %v5429_v41 = vmul.f32 %v5040_v19, %v5189_v23 }
 0x375   :  { %v5433_v61 = vmul.f32 %v5040_v19, %v5193_v55  ;;  %v5437_v24 = vmul.f32 %v5040_v19, %v5197_v43  ;;  %v5441_v59 = vmul.f32 %v5040_v19, %v5201_v42  ;;  %v5445_v44 = vmul.f32 %v5040_v19, %v5205_v38 }
 0x376   :  { %v5449_v25 = vmul.f32 %v5040_v19, %v5209_v39  ;;  %v5453_v8 = vmul.f32 %v5040_v19, %v5213_v14  ;;  %v5457_v23 = vmul.f32 %v5040_v19, %v5217_v3  ;;  %v5461_v55 = vmul.f32 %v5040_v19, %v5221_v63  ;;  %v6166_v63 = vld [vmem:[#allocation19_spill] sm:$0xff] }
 0x377   :  { %v5465_v43 = vmul.f32 %v5040_v19, %v5225_v37  ;;  %v5469_v42 = vmul.f32 %v5040_v19, %v5229_v27  ;;  %v5473_v38 = vmul.f32 %v5040_v19, %v5233_v6  ;;  %v5477_v39 = vmul.f32 %v5040_v19, %v5237_v40  ;;  %v6168_v6 = vld [vmem:[#allocation21_spill] sm:$0xff] }
 0x378   :  { %v5481_v14 = vmul.f32 %v5040_v19, %v5241_v32  ;;  %v5485_v3 = vmul.f32 %v5040_v19, %v5245_v46  ;;  %v2268_v37 = vadd.f32 %v6166_v63, %v2200_v9  ;;  %v5490_v27 = vmul.f32 %v5040_v19, %v5249_v5  ;;  %v6174_v5 = vld [vmem:[#allocation24_spill] sm:$0xff] }
 0x379   :  { %v5494_v1 = vmul.f32 %v5040_v19, %v6168_v6  ;;  %v5498_v40 = vmul.f32 %v5040_v19, %v5257_v56  ;;  %v2269_v32 = vadd.f32 %v6166_v63, %v2201_v28  ;;  %v2270_v6 = vadd.f32 %v6166_v63, %v2202_v2 }
 0x37a   :  { %6164 = vst [vmem:[#allocation29_spill] sm:$0xff] %v5481_v14  ;;  %v6171_v14 = vld [vmem:[#allocation22_spill] sm:$0xff]  ;;  %v5533_v2 = vmul.f32 %v5040_v19, %v5289_v10  ;;  %vm2332_vm5 = vcmp.ge.f32.partialorder %v2268_v37, 0.0 }
 0x37b   :  { %6165 = vst [vmem:[#allocation30_spill] sm:$0xff] %v5485_v3  ;;  %v5503_v46 = vmul.f32 %v5040_v19, %v6171_v14  ;;  %v6172_v3 = vld [vmem:[#allocation23_spill] sm:$0xff]  ;;  %v5524_v14 = vmul.f32 %v5040_v19, %v5281_v49  ;;  %v2273_v49 = vadd.f32 %v6166_v63, %v2205_v51  ;;  %vm2333_vm6 = vcmp.ge.f32.partialorder %v2269_v32, 0.0 }
 0x37c   :  { %6167 = vst [vmem:[#allocation31_spill] sm:$0xff] %v5490_v27  ;;  %v5507_v9 = vmul.f32 %v5040_v19, %v6172_v3  ;;  %v5511_v27 = vmul.f32 %v5040_v19, %v6174_v5  ;;  %v2271_v3 = vadd.f32 %v6166_v63, %v2203_v4  ;;  %v6185_v4 = vld [vmem:[#allocation28_spill] sm:$0xff]  ;;  %v2398_v10 = vmul.f32 0.2, %v2270_v6 }
 0x37d   :  { %6169 = vst [vmem:[#allocation34_spill] sm:$0xff] %v5494_v1  ;;  %v6176_v1 = vld [vmem:[#allocation25_spill] sm:$0xff]  ;;  %vm2334_vm7 = vcmp.ge.f32.partialorder %v2270_v6, 0.0  ;;  %vm2337_vm10 = vcmp.ge.f32.partialorder %v2273_v49, 0.0 }
 0x37e   :  { %6170 = vst [vmem:[#allocation35_spill] sm:$0xff] %v5498_v40  ;;  %v5516_v56 = vmul.f32 %v5040_v19, %v6176_v1  ;;  %v6178_v40 = vld [vmem:[#allocation26_spill] sm:$0xff]  ;;  %v2272_v1 = vadd.f32 %v6166_v63, %v2204_v13  ;;  %v5549_v13 = vmul.f32 %v5040_v19, %v5301_v35  ;;  %v2399_v51 = vmul.f32 0.2, %v2271_v3 }
 0x37f   :  { %6173 = vst [vmem:[#allocation36_spill] sm:$0xff] %v5507_v9  ;;  %v5520_v28 = vmul.f32 %v5040_v19, %v6178_v40  ;;  %v6181_v9 = vld [vmem:[#allocation27_spill] sm:$0xff]  ;;  %v5538_v40 = vmul.f32 %v5040_v19, %v5293_v11  ;;  %v2275_v11 = vadd.f32 %v6166_v63, %v5321_v15  ;;  %vm2335_vm8 = vcmp.ge.f32.partialorder %v2271_v3, 0.0 }
 0x380   :  { %6175 = vst [vmem:[#allocation2_spill] sm:$0xff] %v5511_v27  ;;  %v5529_v5 = vmul.f32 %v5040_v19, %v6181_v9  ;;  %v2274_v9 = vadd.f32 %v6166_v63, %v5317_v45  ;;  %v2277_v45 = vadd.f32 %v6166_v63, %v5329_v48  ;;  %vm2336_vm9 = vcmp.ge.f32.partialorder %v2272_v1, 0.0 }
 0x381   :  { %6177 = vst [vmem:[#allocation3_spill] sm:$0xff] %v5516_v56  ;;  %v2396_v56 = vmul.f32 0.2, %v2268_v37  ;;  %v2462_v15 = vsel %vm2334_vm7, %v2270_v6, %v2398_v10  ;;  %v2463_v27 = vsel %vm2335_vm8, %v2271_v3, %v2399_v51  ;;  %v2280_v48 = vadd.f32 %v6166_v63, %v5341_v34 }
 0x382   :  { %6179 = vst [vmem:[#allocation4_spill] sm:$0xff] %v5520_v28  ;;  %v5543_v28 = vmul.f32 %v5040_v19, %v6185_v4  ;;  %v2400_v4 = vmul.f32 0.2, %v2272_v1  ;;  %v2278_v19 = vadd.f32 %v6166_v63, %v5333_v31  ;;  %v2402_v35 = vmul.f32 0.2, %v2274_v9 }
 0x383   :  { %6180 = vst [vmem:[#allocation5_spill] sm:$0xff] %v5524_v14  ;;  %v2397_v14 = vmul.f32 0.2, %v2269_v32  ;;  %vm2338_vm11 = vcmp.ge.f32.partialorder %v2274_v9, 0.0  ;;  %vm2339_vm12 = vcmp.ge.f32.partialorder %v2275_v11, 0.0  ;;  %v2282_v34 = vadd.f32 %v6166_v63, %v5349_v54 }
 0x384   :  { %6182 = vst [vmem:[#allocation6_spill] sm:$0xff] %v5529_v5  ;;  %v2464_v31 = vsel %vm2336_vm9, %v2272_v1, %v2400_v4  ;;  %vm2341_vm14 = vcmp.ge.f32.partialorder %v2277_v45, 0.0  ;;  %vm2342_vm15 = vcmp.ge.f32.partialorder %v2278_v19, 0.0  ;;  %v2284_v54 = vadd.f32 %v6166_v63, %v5357_v21 }
 0x385   :  { %6183 = vst [vmem:[#allocation7_spill] sm:$0xff] %v5533_v2  ;;  %v2401_v2 = vmul.f32 0.2, %v2273_v49  ;;  %v2461_v5 = vsel %vm2333_vm6, %v2269_v32, %v2397_v14  ;;  %v2405_v32 = vmul.f32 0.2, %v2277_v45  ;;  %vm2344_vm2 = vcmp.ge.f32.partialorder %v2280_v48, 0.0 }
 0x386   :  { %6184 = vst [vmem:[#allocation8_spill] sm:$0xff] %v5538_v40  ;;  %v2276_v40 = vadd.f32 %v6166_v63, %v5325_v7  ;;  %v2403_v7 = vmul.f32 0.2, %v2275_v11  ;;  %v2286_v21 = vadd.f32 %v6166_v63, %v5365_v16  ;;  %vm2346_vm4 = vcmp.ge.f32.partialorder %v2282_v34, 0.0 }
 0x387   :  { %6186 = vst [vmem:[#allocation9_spill] sm:$0xff] %v5543_v28  ;;  %v2460_v28 = vsel %vm2332_vm5, %v2268_v37, %v2396_v56  ;;  %v2465_v6 = vsel %vm2337_vm10, %v2273_v49, %v2401_v2  ;;  %v2406_v56 = vmul.f32 0.2, %v2278_v19  ;;  %v2469_v1 = vsel %vm2341_vm14, %v2277_v45, %v2405_v32 }
 0x388   :  { %6187 = vst [vmem:[#allocation10_spill] sm:$0xff] %v5549_v13  ;;  %v2279_v13 = vadd.f32 %v6166_v63, %v5337_v26  ;;  %v2404_v37 = vmul.f32 0.2, %v2276_v40  ;;  %v2281_v26 = vadd.f32 %v6166_v63, %v5345_v50  ;;  %vm2340_vm13 = vcmp.ge.f32.partialorder %v2276_v40, 0.0 }
 0x389   :  { %2524 = vst.msk [vmem:[%s5977_s4] sm:$0xff] %vm1717_vm0, %v2460_v28  ;;  %v2466_v28 = vsel %vm2338_vm11, %v2274_v9, %v2402_v35  ;;  %v2283_v50 = vadd.f32 %v6166_v63, %v5353_v17  ;;  %v2467_v3 = vsel %vm2339_vm12, %v2275_v11, %v2403_v7  ;;  %v2285_v17 = vadd.f32 %v6166_v63, %v5361_v47 }
 0x38a   :  { %2525 = vst.msk [vmem:[%s5977_s4 + $0x8] sm:$0xff] %vm1717_vm0, %v2461_v5  ;;  %v2407_v14 = vmul.f32 0.2, %v2279_v13  ;;  %vm2343_vm1 = vcmp.ge.f32.partialorder %v2279_v13, 0.0  ;;  %v2408_v5 = vmul.f32 0.2, %v2280_v48  ;;  %v2468_v2 = vsel %vm2340_vm13, %v2276_v40, %v2404_v37 }
 0x38b   :  { %2526 = vst.msk [vmem:[%s5977_s4 + $0x10] sm:$0xff] %vm1717_vm0, %v2462_v15  ;;  %vm2345_vm3 = vcmp.ge.f32.partialorder %v2281_v26, 0.0  ;;  %v2410_v40 = vmul.f32 0.2, %v2282_v34  ;;  %v2470_v49 = vsel %vm2342_vm15, %v2278_v19, %v2406_v56  ;;  %v2287_v47 = vadd.f32 %v6166_v63, %v5369_v29 }
 0x38c   :  { %2527 = vst.msk [vmem:[%s5977_s4 + $0x18] sm:$0xff] %vm1717_vm0, %v2463_v27  ;;  %v2409_v27 = vmul.f32 0.2, %v2281_v26  ;;  %v2411_v9 = vmul.f32 0.2, %v2283_v50  ;;  %v2471_v10 = vsel %vm2343_vm1, %v2279_v13, %v2407_v14  ;;  %v2288_v16 = vadd.f32 %v6166_v63, %v5373_v36 }
 0x38d   :  { %2528 = vst.msk [vmem:[%s5977_s4 + $0x20] sm:$0xff] %vm1717_vm0, %v2464_v31  ;;  %vm2347_vm5 = vcmp.ge.f32.partialorder %v2283_v50, 0.0  ;;  %v2412_v11 = vmul.f32 0.2, %v2284_v54  ;;  %v2472_v51 = vsel %vm2344_vm2, %v2280_v48, %v2408_v5  ;;  %v2289_v29 = vadd.f32 %v6166_v63, %v5377_v57 }
 0x38e   :  { %2529 = vst.msk [vmem:[%s5977_s4 + $0x28] sm:$0xff] %vm1717_vm0, %v2465_v6  ;;  %vm2348_vm6 = vcmp.ge.f32.partialorder %v2284_v54, 0.0  ;;  %v2413_v13 = vmul.f32 0.2, %v2285_v17  ;;  %v2473_v4 = vsel %vm2345_vm3, %v2281_v26, %v2409_v27  ;;  %v2290_v36 = vadd.f32 %v6166_v63, %v5381_v0 }
 0x38f   :  { %2530 = vst.msk [vmem:[%s5977_s4 + $0x30] sm:$0xff] %vm1717_vm0, %v2466_v28  ;;  %vm2349_vm7 = vcmp.ge.f32.partialorder %v2285_v17, 0.0  ;;  %v2414_v45 = vmul.f32 0.2, %v2286_v21  ;;  %v2474_v19 = vsel %vm2346_vm4, %v2282_v34, %v2410_v40  ;;  %v2291_v57 = vadd.f32 %v6166_v63, %v5385_v22 }
 0x390   :  { %2531 = vst.msk [vmem:[%s5977_s4 + $0x38] sm:$0xff] %vm1717_vm0, %v2467_v3  ;;  %vm2350_vm8 = vcmp.ge.f32.partialorder %v2286_v21, 0.0  ;;  %v2415_v35 = vmul.f32 0.2, %v2287_v47  ;;  %v2475_v15 = vsel %vm2347_vm5, %v2283_v50, %v2411_v9  ;;  %v2292_v0 = vadd.f32 %v6166_v63, %v5389_v30 }
 0x391   :  { %2532 = vst.msk [vmem:[%s5977_s4 + $0x40] sm:$0xff] %vm1717_vm0, %v2468_v2  ;;  %vm2351_vm9 = vcmp.ge.f32.partialorder %v2287_v47, 0.0  ;;  %v2416_v7 = vmul.f32 0.2, %v2288_v16  ;;  %v2476_v48 = vsel %vm2348_vm6, %v2284_v54, %v2412_v11  ;;  %v2293_v22 = vadd.f32 %v6166_v63, %v5393_v52 }
 0x392   :  { %2533 = vst.msk [vmem:[%s5977_s4 + $0x48] sm:$0xff] %vm1717_vm0, %v2469_v1  ;;  %vm2352_vm10 = vcmp.ge.f32.partialorder %v2288_v16, 0.0  ;;  %v2417_v37 = vmul.f32 0.2, %v2289_v29  ;;  %v2477_v31 = vsel %vm2349_vm7, %v2285_v17, %v2413_v13  ;;  %v2294_v30 = vadd.f32 %v6166_v63, %v5397_v60 }
 0x393   :  { %2534 = vst.msk [vmem:[%s5977_s4 + $0x50] sm:$0xff] %vm1717_vm0, %v2470_v49  ;;  %vm2353_vm11 = vcmp.ge.f32.partialorder %v2289_v29, 0.0  ;;  %v2418_v26 = vmul.f32 0.2, %v2290_v36  ;;  %v2478_v32 = vsel %vm2350_vm8, %v2286_v21, %v2414_v45  ;;  %v2295_v52 = vadd.f32 %v6166_v63, %v5401_v12 }
 0x394   :  { %2535 = vst.msk [vmem:[%s5977_s4 + $0x58] sm:$0xff] %vm1717_vm0, %v2471_v10  ;;  %vm2354_vm12 = vcmp.ge.f32.partialorder %v2290_v36, 0.0  ;;  %v2419_v6 = vmul.f32 0.2, %v2291_v57  ;;  %v2479_v34 = vsel %vm2351_vm9, %v2287_v47, %v2415_v35  ;;  %v2296_v60 = vadd.f32 %v6166_v63, %v5405_v62 }
 0x395   :  { %2536 = vst.msk [vmem:[%s5977_s4 + $0x60] sm:$0xff] %vm1717_vm0, %v2472_v51  ;;  %vm2355_vm13 = vcmp.ge.f32.partialorder %v2291_v57, 0.0  ;;  %v2420_v56 = vmul.f32 0.2, %v2292_v0  ;;  %v2480_v28 = vsel %vm2352_vm10, %v2288_v16, %v2416_v7  ;;  %v2297_v12 = vadd.f32 %v6166_v63, %v5409_v20 }
 0x396   :  { %2537 = vst.msk [vmem:[%s5977_s4 + $0x68] sm:$0xff] %vm1717_vm0, %v2473_v4  ;;  %vm2356_vm14 = vcmp.ge.f32.partialorder %v2292_v0, 0.0  ;;  %v2421_v50 = vmul.f32 0.2, %v2293_v22  ;;  %v2481_v14 = vsel %vm2353_vm11, %v2289_v29, %v2417_v37  ;;  %v2298_v62 = vadd.f32 %v6166_v63, %v5413_v18 }
 0x397   :  { %2538 = vst.msk [vmem:[%s5977_s4 + $0x70] sm:$0xff] %vm1717_vm0, %v2474_v19  ;;  %vm2357_vm15 = vcmp.ge.f32.partialorder %v2293_v22, 0.0  ;;  %v2422_v3 = vmul.f32 0.2, %v2294_v30  ;;  %v2482_v54 = vsel %vm2354_vm12, %v2290_v36, %v2418_v26  ;;  %v2299_v20 = vadd.f32 %v6166_v63, %v5417_v53 }
 0x398   :  { %2539 = vst.msk [vmem:[%s5977_s4 + $0x78] sm:$0xff] %vm1717_vm0, %v2475_v15  ;;  %vm2358_vm1 = vcmp.ge.f32.partialorder %v2294_v30, 0.0  ;;  %v2423_v5 = vmul.f32 0.2, %v2295_v52  ;;  %v2483_v2 = vsel %vm2355_vm13, %v2291_v57, %v2419_v6  ;;  %v2300_v18 = vadd.f32 %v6166_v63, %v5421_v33 }
 0x399   :  { %2540 = vst.msk [vmem:[%s5977_s4 + $0x80] sm:$0xff] %vm1717_vm0, %v2476_v48  ;;  %vm2359_vm2 = vcmp.ge.f32.partialorder %v2295_v52, 0.0  ;;  %v2424_v17 = vmul.f32 0.2, %v2296_v60  ;;  %v2484_v27 = vsel %vm2356_vm14, %v2292_v0, %v2420_v56  ;;  %v2301_v53 = vadd.f32 %v6166_v63, %v5425_v58 }
 0x39a   :  { %2541 = vst.msk [vmem:[%s5977_s4 + $0x88] sm:$0xff] %vm1717_vm0, %v2477_v31  ;;  %vm2360_vm3 = vcmp.ge.f32.partialorder %v2296_v60, 0.0  ;;  %v2425_v1 = vmul.f32 0.2, %v2297_v12  ;;  %v2485_v21 = vsel %vm2357_vm15, %v2293_v22, %v2421_v50  ;;  %v2302_v33 = vadd.f32 %v6166_v63, %v5429_v41 }
 0x39b   :  { %2542 = vst.msk [vmem:[%s5977_s4 + $0x90] sm:$0xff] %vm1717_vm0, %v2478_v32  ;;  %vm2361_vm4 = vcmp.ge.f32.partialorder %v2297_v12, 0.0  ;;  %v2426_v40 = vmul.f32 0.2, %v2298_v62  ;;  %v2486_v49 = vsel %vm2358_vm1, %v2294_v30, %v2422_v3  ;;  %v2303_v58 = vadd.f32 %v6166_v63, %v5433_v61  ;;  %v6191_v3 = vld [vmem:[#allocation34_spill] sm:$0xff] }
 0x39c   :  { %2543 = vst.msk [vmem:[%s5977_s4 + $0x98] sm:$0xff] %vm1717_vm0, %v2479_v34  ;;  %vm2362_vm5 = vcmp.ge.f32.partialorder %v2298_v62, 0.0  ;;  %v2427_v47 = vmul.f32 0.2, %v2299_v20  ;;  %v2487_v9 = vsel %vm2359_vm2, %v2295_v52, %v2423_v5  ;;  %v2304_v41 = vadd.f32 %v6166_v63, %v5437_v24 }
 0x39d   :  { %2544 = vst.msk [vmem:[%s5977_s4 + $0xa0] sm:$0xff] %vm1717_vm0, %v2480_v28  ;;  %vm2363_vm6 = vcmp.ge.f32.partialorder %v2299_v20, 0.0  ;;  %v2428_v10 = vmul.f32 0.2, %v2300_v18  ;;  %v2488_v16 = vsel %vm2360_vm3, %v2296_v60, %v2424_v17  ;;  %v2305_v61 = vadd.f32 %v6166_v63, %v5441_v59 }
 0x39e   :  { %2545 = vst.msk [vmem:[%s5977_s4 + $0xa8] sm:$0xff] %vm1717_vm0, %v2481_v14  ;;  %vm2364_vm7 = vcmp.ge.f32.partialorder %v2300_v18, 0.0  ;;  %v2429_v11 = vmul.f32 0.2, %v2301_v53  ;;  %v2489_v51 = vsel %vm2361_vm4, %v2297_v12, %v2425_v1  ;;  %v2306_v24 = vadd.f32 %v6166_v63, %v5445_v44  ;;  %v6190_v12 = vld [vmem:[#allocation31_spill] sm:$0xff] }
 0x39f   :  { %2546 = vst.msk [vmem:[%s5977_s4 + $0xb0] sm:$0xff] %vm1717_vm0, %v2482_v54  ;;  %vm2365_vm8 = vcmp.ge.f32.partialorder %v2301_v53, 0.0  ;;  %v2430_v29 = vmul.f32 0.2, %v2302_v33  ;;  %v2490_v13 = vsel %vm2362_vm5, %v2298_v62, %v2426_v40  ;;  %v2307_v59 = vadd.f32 %v6166_v63, %v5449_v25 }
 0x3a0   :  { %2547 = vst.msk [vmem:[%s5977_s4 + $0xb8] sm:$0xff] %vm1717_vm0, %v2483_v2  ;;  %vm2366_vm9 = vcmp.ge.f32.partialorder %v2302_v33, 0.0  ;;  %v2431_v4 = vmul.f32 0.2, %v2303_v58  ;;  %v2491_v36 = vsel %vm2363_vm6, %v2299_v20, %v2427_v47  ;;  %v2308_v44 = vadd.f32 %v6166_v63, %v5453_v8  ;;  %v6192_v2 = vld [vmem:[#allocation35_spill] sm:$0xff] }
 0x3a1   :  { %2548 = vst.msk [vmem:[%s5977_s4 + $0xc0] sm:$0xff] %vm1717_vm0, %v2484_v27  ;;  %vm2367_vm10 = vcmp.ge.f32.partialorder %v2303_v58, 0.0  ;;  %v2432_v45 = vmul.f32 0.2, %v2304_v41  ;;  %v2492_v19 = vsel %vm2364_vm7, %v2300_v18, %v2428_v10  ;;  %v2309_v25 = vadd.f32 %v6166_v63, %v5457_v23  ;;  %v6195_v10 = vld [vmem:[#allocation3_spill] sm:$0xff] }
 0x3a2   :  { %2549 = vst.msk [vmem:[%s5977_s4 + $0xc8] sm:$0xff] %vm1717_vm0, %v2485_v21  ;;  %vm2368_vm11 = vcmp.ge.f32.partialorder %v2304_v41, 0.0  ;;  %v2433_v57 = vmul.f32 0.2, %v2305_v61  ;;  %v2493_v35 = vsel %vm2365_vm8, %v2301_v53, %v2429_v11  ;;  %v2310_v8 = vadd.f32 %v6166_v63, %v5461_v55 }
 0x3a3   :  { %2550 = vst.msk [vmem:[%s5977_s4 + $0xd0] sm:$0xff] %vm1717_vm0, %v2486_v49  ;;  %vm2369_vm12 = vcmp.ge.f32.partialorder %v2305_v61, 0.0  ;;  %v2434_v15 = vmul.f32 0.2, %v2306_v24  ;;  %v2494_v0 = vsel %vm2366_vm9, %v2302_v33, %v2430_v29  ;;  %v2311_v23 = vadd.f32 %v6166_v63, %v5465_v43  ;;  %v6193_v33 = vld [vmem:[#allocation36_spill] sm:$0xff] }
 0x3a4   :  { %2551 = vst.msk [vmem:[%s5977_s4 + $0xd8] sm:$0xff] %vm1717_vm0, %v2487_v9  ;;  %vm2370_vm13 = vcmp.ge.f32.partialorder %v2306_v24, 0.0  ;;  %v2435_v7 = vmul.f32 0.2, %v2307_v59  ;;  %v2495_v48 = vsel %vm2367_vm10, %v2303_v58, %v2431_v4  ;;  %v2312_v55 = vadd.f32 %v6166_v63, %v5469_v42 }
 0x3a5   :  { %2552 = vst.msk [vmem:[%s5977_s4 + $0xe0] sm:$0xff] %vm1717_vm0, %v2488_v16  ;;  %vm2371_vm14 = vcmp.ge.f32.partialorder %v2307_v59, 0.0  ;;  %v2436_v22 = vmul.f32 0.2, %v2308_v44  ;;  %v2496_v37 = vsel %vm2368_vm11, %v2304_v41, %v2432_v45  ;;  %v2313_v43 = vadd.f32 %v6166_v63, %v5473_v38  ;;  %v6188_v38 = vld [vmem:[#allocation29_spill] sm:$0xff]  ;;  %v6198_v45 = vld [vmem:[#allocation6_spill] sm:$0xff] }
 0x3a6   :  { %2553 = vst.msk [vmem:[%s5977_s4 + $0xe8] sm:$0xff] %vm1717_vm0, %v2489_v51  ;;  %vm2372_vm15 = vcmp.ge.f32.partialorder %v2308_v44, 0.0  ;;  %v2437_v31 = vmul.f32 0.2, %v2309_v25  ;;  %v2497_v30 = vsel %vm2369_vm12, %v2305_v61, %v2433_v57  ;;  %v2314_v42 = vadd.f32 %v6166_v63, %v5477_v39  ;;  %v6189_v39 = vld [vmem:[#allocation30_spill] sm:$0xff]  ;;  %v6196_v51 = vld [vmem:[#allocation4_spill] sm:$0xff] }
 0x3a7   :  { %2554 = vst.msk [vmem:[%s5977_s4 + $0xf0] sm:$0xff] %vm1717_vm0, %v2490_v13  ;;  %vm2373_vm1 = vcmp.ge.f32.partialorder %v2309_v25, 0.0  ;;  %v2438_v26 = vmul.f32 0.2, %v2310_v8  ;;  %v2498_v32 = vsel %vm2370_vm13, %v2306_v24, %v2434_v15  ;;  %v2315_v52 = vadd.f32 %v6166_v63, %v6188_v38 }
 0x3a8   :  { %2555 = vst.msk [vmem:[%s5977_s4 + $0xf8] sm:$0xff] %vm1717_vm0, %v2491_v36  ;;  %vm2374_vm2 = vcmp.ge.f32.partialorder %v2310_v8, 0.0  ;;  %v2439_v6 = vmul.f32 0.2, %v2311_v23  ;;  %v2499_v34 = vsel %vm2371_vm14, %v2307_v59, %v2435_v7  ;;  %v2316_v60 = vadd.f32 %v6166_v63, %v6189_v39  ;;  %v6197_v59 = vld [vmem:[#allocation5_spill] sm:$0xff] }
 0x3a9   :  { %2556 = vst.msk [vmem:[%s5977_s4 + $0x100] sm:$0xff] %vm1717_vm0, %v2492_v19  ;;  %vm2375_vm3 = vcmp.ge.f32.partialorder %v2311_v23, 0.0  ;;  %v2440_v56 = vmul.f32 0.2, %v2312_v55  ;;  %v2500_v28 = vsel %vm2372_vm15, %v2308_v44, %v2436_v22  ;;  %v2317_v50 = vadd.f32 %v6166_v63, %v6190_v12  ;;  %v6201_v22 = vld [vmem:[#allocation9_spill] sm:$0xff] }
 0x3aa   :  { %2557 = vst.msk [vmem:[%s5977_s4 + $0x108] sm:$0xff] %vm1717_vm0, %v2493_v35  ;;  %vm2376_vm4 = vcmp.ge.f32.partialorder %v2312_v55, 0.0  ;;  %v2441_v14 = vmul.f32 0.2, %v2313_v43  ;;  %v2501_v62 = vsel %vm2373_vm1, %v2309_v25, %v2437_v31  ;;  %v2318_v54 = vadd.f32 %v6166_v63, %v6191_v3  ;;  %v6199_v35 = vld [vmem:[#allocation7_spill] sm:$0xff] }
 0x3ab   :  { %2558 = vst.msk [vmem:[%s5977_s4 + $0x110] sm:$0xff] %vm1717_vm0, %v2494_v0  ;;  %vm2377_vm5 = vcmp.ge.f32.partialorder %v2313_v43, 0.0  ;;  %v2442_v20 = vmul.f32 0.2, %v2314_v42  ;;  %v2502_v5 = vsel %vm2374_vm2, %v2310_v8, %v2438_v26  ;;  %v2319_v18 = vadd.f32 %v6166_v63, %v6192_v2 }
 0x3ac   :  { %2559 = vst.msk [vmem:[%s5977_s4 + $0x118] sm:$0xff] %vm1717_vm0, %v2495_v48  ;;  %vm2378_vm6 = vcmp.ge.f32.partialorder %v2314_v42, 0.0  ;;  %v2443_v17 = vmul.f32 0.2, %v2315_v52  ;;  %v2503_v27 = vsel %vm2375_vm3, %v2311_v23, %v2439_v6  ;;  %v2320_v53 = vadd.f32 %v6166_v63, %v5503_v46  ;;  %v6194_v46 = vld [vmem:[#allocation2_spill] sm:$0xff]  ;;  %v6200_v23 = vld [vmem:[#allocation8_spill] sm:$0xff] }
 0x3ad   :  { %2560 = vst.msk [vmem:[%s5977_s4 + $0x120] sm:$0xff] %vm1717_vm0, %v2496_v37  ;;  %vm2379_vm7 = vcmp.ge.f32.partialorder %v2315_v52, 0.0  ;;  %v2444_v1 = vmul.f32 0.2, %v2316_v60  ;;  %v2504_v21 = vsel %vm2376_vm4, %v2312_v55, %v2440_v56  ;;  %v2321_v40 = vadd.f32 %v6166_v63, %v6193_v33 }
 0x3ae   :  { %2561 = vst.msk [vmem:[%s5977_s4 + $0x128] sm:$0xff] %vm1717_vm0, %v2497_v30  ;;  %vm2380_vm8 = vcmp.ge.f32.partialorder %v2316_v60, 0.0  ;;  %v2445_v49 = vmul.f32 0.2, %v2317_v50  ;;  %v2505_v58 = vsel %vm2377_vm5, %v2313_v43, %v2441_v14  ;;  %v2322_v47 = vadd.f32 %v6166_v63, %v6194_v46  ;;  %v6202_v30 = vld [vmem:[#allocation10_spill] sm:$0xff] }
 0x3af   :  { %2562 = vst.msk [vmem:[%s5977_s4 + $0x130] sm:$0xff] %vm1717_vm0, %v2498_v32  ;;  %vm2381_vm9 = vcmp.ge.f32.partialorder %v2317_v50, 0.0  ;;  %v2446_v9 = vmul.f32 0.2, %v2318_v54  ;;  %v2506_v41 = vsel %vm2378_vm6, %v2314_v42, %v2442_v20  ;;  %v2323_v16 = vadd.f32 %v6166_v63, %v6195_v10 }
 0x3b0   :  { %2563 = vst.msk [vmem:[%s5977_s4 + $0x138] sm:$0xff] %vm1717_vm0, %v2499_v34  ;;  %vm2382_vm10 = vcmp.ge.f32.partialorder %v2318_v54, 0.0  ;;  %v2447_v61 = vmul.f32 0.2, %v2319_v18  ;;  %v2507_v11 = vsel %vm2379_vm7, %v2315_v52, %v2443_v17  ;;  %v2324_v24 = vadd.f32 %v6166_v63, %v6196_v51 }
 0x3b1   :  { %2564 = vst.msk [vmem:[%s5977_s4 + $0x140] sm:$0xff] %vm1717_vm0, %v2500_v28  ;;  %vm2383_vm11 = vcmp.ge.f32.partialorder %v2319_v18, 0.0  ;;  %v2448_v29 = vmul.f32 0.2, %v2320_v53  ;;  %v2508_v13 = vsel %vm2380_vm8, %v2316_v60, %v2444_v1  ;;  %v2325_v4 = vadd.f32 %v6166_v63, %v6197_v59  ;;  %v6203_v28 = vld [vmem:[#allocation20_spill] sm:$0xff] }
 0x3b2   :  { %2565 = vst.msk [vmem:[%s5977_s4 + $0x148] sm:$0xff] %vm1717_vm0, %v2501_v62  ;;  %vm2384_vm12 = vcmp.ge.f32.partialorder %v2320_v53, 0.0  ;;  %v2449_v36 = vmul.f32 0.2, %v2321_v40  ;;  %v2509_v44 = vsel %vm2381_vm9, %v2317_v50, %v2445_v49  ;;  %v2326_v19 = vadd.f32 %v6166_v63, %v6198_v45 }
 0x3b3   :  { %2566 = vst.msk [vmem:[%s5977_s4 + $0x150] sm:$0xff] %vm1717_vm0, %v2502_v5  ;;  %vm2385_vm13 = vcmp.ge.f32.partialorder %v2321_v40, 0.0  ;;  %v2450_v25 = vmul.f32 0.2, %v2322_v47  ;;  %v2510_v57 = vsel %vm2382_vm10, %v2318_v54, %v2446_v9  ;;  %v2327_v8 = vadd.f32 %v6166_v63, %v6199_v35 }
 0x3b4   :  { %2567 = vst.msk [vmem:[%s5977_s4 + $0x158] sm:$0xff] %vm1717_vm0, %v2503_v27  ;;  %vm2386_vm14 = vcmp.ge.f32.partialorder %v2322_v47, 0.0  ;;  %v2451_v15 = vmul.f32 0.2, %v2323_v16  ;;  %v2511_v0 = vsel %vm2383_vm11, %v2319_v18, %v2447_v61  ;;  %v2328_v7 = vadd.f32 %v6166_v63, %v6200_v23 }
 0x3b5   :  { %2568 = vst.msk [vmem:[%s5977_s4 + $0x160] sm:$0xff] %vm1717_vm0, %v2504_v21  ;;  %vm2387_vm15 = vcmp.ge.f32.partialorder %v2323_v16, 0.0  ;;  %v2452_v48 = vmul.f32 0.2, %v2324_v24  ;;  %v2512_v55 = vsel %vm2384_vm12, %v2320_v53, %v2448_v29  ;;  %v2329_v37 = vadd.f32 %v6166_v63, %v6201_v22 }
 0x3b6   :  { %2569 = vst.msk [vmem:[%s5977_s4 + $0x168] sm:$0xff] %vm1717_vm0, %v2505_v58  ;;  %vm2388_vm1 = vcmp.ge.f32.partialorder %v2324_v24, 0.0  ;;  %v2453_v43 = vmul.f32 0.2, %v2325_v4  ;;  %v2513_v31 = vsel %vm2385_vm13, %v2321_v40, %v2449_v36  ;;  %v2330_v42 = vadd.f32 %v6166_v63, %v6202_v30 }
 0x3b7   :  { %2570 = vst.msk [vmem:[%s5977_s4 + $0x170] sm:$0xff] %vm1717_vm0, %v2506_v41  ;;  %vm2389_vm2 = vcmp.ge.f32.partialorder %v2325_v4, 0.0  ;;  %v2454_v26 = vmul.f32 0.2, %v2326_v19  ;;  %v2514_v32 = vsel %vm2386_vm14, %v2322_v47, %v2450_v25  ;;  %vm2390_vm3 = vcmp.ge.f32.partialorder %v2326_v19, 0.0 }
 0x3b8   :  { %2571 = vst.msk [vmem:[%s5977_s4 + $0x178] sm:$0xff] %vm1717_vm0, %v2507_v11  ;;  %v2455_v38 = vmul.f32 0.2, %v2327_v8  ;;  %v2515_v52 = vsel %vm2387_vm15, %v2323_v16, %v2451_v15  ;;  %vm2391_vm4 = vcmp.ge.f32.partialorder %v2327_v8, 0.0  ;;  %v2456_v63 = vmul.f32 0.2, %v2328_v7 }
 0x3b9   :  { %2572 = vst.msk [vmem:[%s5977_s4 + $0x180] sm:$0xff] %vm1717_vm0, %v2508_v13  ;;  %v2516_v6 = vsel %vm2388_vm1, %v2324_v24, %v2452_v48  ;;  %vm2392_vm5 = vcmp.ge.f32.partialorder %v2328_v7, 0.0  ;;  %v2457_v34 = vmul.f32 0.2, %v2329_v37  ;;  %v2517_v39 = vsel %vm2389_vm2, %v2325_v4, %v2453_v43 }
 0x3ba   :  { %2573 = vst.msk [vmem:[%s5977_s4 + $0x188] sm:$0xff] %vm1717_vm0, %v2509_v44  ;;  %vm2393_vm6 = vcmp.ge.f32.partialorder %v2329_v37, 0.0  ;;  %v2458_v60 = vmul.f32 0.2, %v2330_v42  ;;  %v2518_v56 = vsel %vm2390_vm3, %v2326_v19, %v2454_v26  ;;  %vm2394_vm7 = vcmp.ge.f32.partialorder %v2330_v42, 0.0 }
 0x3bb   :  { %2574 = vst.msk [vmem:[%s5977_s4 + $0x190] sm:$0xff] %vm1717_vm0, %v2510_v57  ;;  %v2459_v12 = vmul.f32 0.2, %v6203_v28  ;;  %v2519_v50 = vsel %vm2391_vm4, %v2327_v8, %v2455_v38  ;;  %vm2395_vm8 = vcmp.ge.f32.partialorder %v6203_v28, 0.0  ;;  %v2520_v14 = vsel %vm2392_vm5, %v2328_v7, %v2456_v63 }
 0x3bc   :  { %2575 = vst.msk [vmem:[%s5977_s4 + $0x198] sm:$0xff] %vm1717_vm0, %v2511_v0  ;;  %v2521_v62 = vsel %vm2393_vm6, %v2329_v37, %v2457_v34  ;;  %v2522_v3 = vsel %vm2394_vm7, %v2330_v42, %v2458_v60 }
 0x3bd   :  { %2576 = vst.msk [vmem:[%s5977_s4 + $0x1a0] sm:$0xff] %vm1717_vm0, %v2512_v55  ;;  %v2523_v54 = vsel %vm2395_vm8, %v6203_v28, %v2459_v12 }
 0x3be   :  { %2577 = vst.msk [vmem:[%s5977_s4 + $0x1a8] sm:$0xff] %vm1717_vm0, %v2513_v31 }
 0x3bf   :  { %2578 = vst.msk [vmem:[%s5977_s4 + $0x1b0] sm:$0xff] %vm1717_vm0, %v2514_v32 }
 0x3c0   :  { %2579 = vst.msk [vmem:[%s5977_s4 + $0x1b8] sm:$0xff] %vm1717_vm0, %v2515_v52 }
 0x3c1   :  { %2580 = vst.msk [vmem:[%s5977_s4 + $0x1c0] sm:$0xff] %vm1717_vm0, %v2516_v6 }
 0x3c2   :  { %2581 = vst.msk [vmem:[%s5977_s4 + $0x1c8] sm:$0xff] %vm1717_vm0, %v2517_v39 }
 0x3c3   :  { %2582 = vst.msk [vmem:[%s5977_s4 + $0x1d0] sm:$0xff] %vm1717_vm0, %v2518_v56 }
 0x3c4   :  { %2583 = vst.msk [vmem:[%s5977_s4 + $0x1d8] sm:$0xff] %vm1717_vm0, %v2519_v50 }
 0x3c5   :  { %2584 = vst.msk [vmem:[%s5977_s4 + $0x1e0] sm:$0xff] %vm1717_vm0, %v2520_v14 }
 0x3c6   :  { %2585 = vst.msk [vmem:[%s5977_s4 + $0x1e8] sm:$0xff] %vm1717_vm0, %v2521_v62 }
 0x3c7   :  { %2586 = vst.msk [vmem:[%s5977_s4 + $0x1f0] sm:$0xff] %vm1717_vm0, %v2522_v3 }
 0x3c8   :  { %2587 = vst.msk [vmem:[%s5977_s4 + $0x1f8] sm:$0xff] %vm1717_vm0, %v2523_v54 }

// kernel: discriminator_forward.6
= control target key start
LH: loop header
LB: loop body
LE: loop exit
PB: predicated region body
PF: predicated region fallthrough
CT: control target
= control target key end

     0   :  { %s3025_s1 = inlined_call_operand.vmem [shape: bf16[1024,128], index: 1, kind: input, shape index: {}]   ;;  %s3026_s0 = inlined_call_operand.vmem [shape: bf16[128,1024], index: 0, kind: input, shape index: {}]   ;;  %s3027_s2 = inlined_call_operand.vmem [shape: f32[1,128], index: 2, kind: input, shape index: {}]   ;;  %s3028_s3 = inlined_call_operand.vmem [shape: f32[1,128], index: 3, kind: input, shape index: {}]   ;;  %s3029_s4 = inlined_call_operand.vmem [shape: f32[128,128], index: 4, kind: output, shape index: {}]  }
   0x1   :  { %v2106_v0 = vld [vmem:[%s3025_s1 + $0x38] sm:$0xff]  ;;  %v2105_v4 = vld [vmem:[%s3025_s1 + $0x30] sm:$0xff]  ;;  %v2104_v8 = vld [vmem:[%s3025_s1 + $0x28] sm:$0xff] }
   0x2   :  { %v2114_v1 = vld [vmem:[%s3025_s1 + $0x78] sm:$0xff]  ;;  %913 = vmatpush.bf16.msra.mxu0 %v2106_v0  ;;  %v2113_v5 = vld [vmem:[%s3025_s1 + $0x70] sm:$0xff]  ;;  %v2112_v9 = vld [vmem:[%s3025_s1 + $0x68] sm:$0xff] }
   0x3   :  { %v2122_v2 = vld [vmem:[%s3025_s1 + $0xb8] sm:$0xff]  ;;  %962 = vmatpush.bf16.msra.mxu1 %v2114_v1  ;;  %v2121_v6 = vld [vmem:[%s3025_s1 + $0xb0] sm:$0xff]  ;;  %v2120_v10 = vld [vmem:[%s3025_s1 + $0xa8] sm:$0xff] }
   0x4   :  { %v2130_v3 = vld [vmem:[%s3025_s1 + $0xf8] sm:$0xff]  ;;  %1011 = vmatpush.bf16.msra.mxu2 %v2122_v2  ;;  %v2129_v7 = vld [vmem:[%s3025_s1 + $0xf0] sm:$0xff]  ;;  %v2128_v11 = vld [vmem:[%s3025_s1 + $0xe8] sm:$0xff] }
   0x5   :  { %1060 = vmatpush.bf16.msra.mxu3 %v2130_v3  ;;  %v2103_v12 = vld [vmem:[%s3025_s1 + $0x20] sm:$0xff]  ;;  %v2102_v16 = vld [vmem:[%s3025_s1 + $0x18] sm:$0xff]  ;;  %v2101_v20 = vld [vmem:[%s3025_s1 + $0x10] sm:$0xff] }
   0x6   :  { %914 = vmatpush.bf16.msra.mxu0 %v2105_v4  ;;  %v2111_v13 = vld [vmem:[%s3025_s1 + $0x60] sm:$0xff]  ;;  %v2110_v17 = vld [vmem:[%s3025_s1 + $0x58] sm:$0xff]  ;;  %v2109_v21 = vld [vmem:[%s3025_s1 + $0x50] sm:$0xff] }
   0x7   :  { %963 = vmatpush.bf16.msra.mxu1 %v2113_v5  ;;  %v2119_v14 = vld [vmem:[%s3025_s1 + $0xa0] sm:$0xff]  ;;  %v2118_v18 = vld [vmem:[%s3025_s1 + $0x98] sm:$0xff]  ;;  %v2117_v22 = vld [vmem:[%s3025_s1 + $0x90] sm:$0xff] }
   0x8   :  { %1012 = vmatpush.bf16.msra.mxu2 %v2121_v6  ;;  %v2127_v15 = vld [vmem:[%s3025_s1 + $0xe0] sm:$0xff]  ;;  %v2126_v19 = vld [vmem:[%s3025_s1 + $0xd8] sm:$0xff]  ;;  %v2125_v23 = vld [vmem:[%s3025_s1 + $0xd0] sm:$0xff] }
   0x9   :  { %1061 = vmatpush.bf16.msra.mxu3 %v2129_v7  ;;  %v2100_v24 = vld [vmem:[%s3025_s1 + $0x8] sm:$0xff]  ;;  %v2099_v28 = vld [vmem:[%s3025_s1] sm:$0xff]  ;;  %v2154_v40 = vld [vmem:[%s3025_s1 + $0x1b8] sm:$0xff] }
   0xa   :  { %915 = vmatpush.bf16.msra.mxu0 %v2104_v8  ;;  %v2108_v25 = vld [vmem:[%s3025_s1 + $0x48] sm:$0xff]  ;;  %v2107_v29 = vld [vmem:[%s3025_s1 + $0x40] sm:$0xff]  ;;  %v2138_v41 = vld [vmem:[%s3025_s1 + $0x138] sm:$0xff] }
   0xb   :  { %964 = vmatpush.bf16.msra.mxu1 %v2112_v9  ;;  %v2116_v26 = vld [vmem:[%s3025_s1 + $0x88] sm:$0xff]  ;;  %v2115_v30 = vld [vmem:[%s3025_s1 + $0x80] sm:$0xff]  ;;  %v2162_v46 = vld [vmem:[%s3025_s1 + $0x1f8] sm:$0xff] }
   0xc   :  { %1013 = vmatpush.bf16.msra.mxu2 %v2120_v10  ;;  %v2124_v27 = vld [vmem:[%s3025_s1 + $0xc8] sm:$0xff]  ;;  %v2123_v31 = vld [vmem:[%s3025_s1 + $0xc0] sm:$0xff]  ;;  %v2146_v47 = vld [vmem:[%s3025_s1 + $0x178] sm:$0xff] }
   0xd   :  { %1062 = vmatpush.bf16.msra.mxu3 %v2128_v11  ;;  %v1525_v32 = vld [vmem:[%s3026_s0] sm:$0xf]  ;;  %v2035_v34 = vld [vmem:[%s3026_s0 + $0x4] sm:$0xf]  ;;  %v1533_v36 = vld [vmem:[%s3026_s0 + $0x8] sm:$0xf] }
   0xe   :  { %916 = vmatpush.bf16.msra.mxu0 %v2103_v12  ;;  %v2039_v33 = vld [vmem:[%s3026_s0 + $0x1c] sm:$0xf0]  ;;  %v1527_v35 = vld [vmem:[%s3026_s0 + $0x20] sm:$0xf0]  ;;  %v2040_v37 = vld [vmem:[%s3026_s0 + $0x24] sm:$0xf0] }
   0xf   :  { %965 = vmatpush.bf16.msra.mxu1 %v2111_v13  ;;  %v2036_v38 = vld [vmem:[%s3026_s0 + $0xc] sm:$0xf]  ;;  %v1526_v42 = vor.u32 %v2039_v33, %v1525_v32  ;;  %v1530_v43 = vor.u32 %v2035_v34, %v1527_v35  ;;  %v1534_v44 = vor.u32 %v2040_v37, %v1533_v36  ;;  %v2153_v48 = vld [vmem:[%s3025_s1 + $0x1b0] sm:$0xff]  ;;  %v1557_v56 = vld [vmem:[%s3026_s0 + $0x40] sm:$0xf] }
  0x10   :  { %1014 = vmatpush.bf16.msra.mxu2 %v2119_v14  ;;  %v1535_v39 = vld [vmem:[%s3026_s0 + $0x28] sm:$0xf0]  ;;  %v2137_v49 = vld [vmem:[%s3025_s1 + $0x130] sm:$0xff]  ;;  %v2047_v57 = vld [vmem:[%s3026_s0 + $0x5c] sm:$0xf0] }
  0x11   :  { %1063 = vmatpush.bf16.msra.mxu3 %v2127_v15  ;;  %v1538_v45 = vor.u32 %v2036_v38, %v1535_v39  ;;  %v2161_v50 = vld [vmem:[%s3025_s1 + $0x1f0] sm:$0xff]  ;;  %v2152_v52 = vld [vmem:[%s3025_s1 + $0x1a8] sm:$0xff]  ;;  %v2043_v58 = vld [vmem:[%s3026_s0 + $0x44] sm:$0xf]  ;;  %v1558_v0 = vor.u32 %v2047_v57, %v1557_v56 }
  0x12   :  { %917 = vmatpush.bf16.msra.mxu0 %v2102_v16  ;;  %v2145_v51 = vld [vmem:[%s3025_s1 + $0x170] sm:$0xff]  ;;  %v2136_v53 = vld [vmem:[%s3025_s1 + $0x128] sm:$0xff]  ;;  %v1559_v59 = vld [vmem:[%s3026_s0 + $0x60] sm:$0xf0] }
  0x13   :  { %966 = vmatpush.bf16.msra.mxu1 %v2110_v17  ;;  %v2160_v54 = vld [vmem:[%s3025_s1 + $0x1e8] sm:$0xff]  ;;  %v1562_v1 = vor.u32 %v2043_v58, %v1559_v59  ;;  %v2151_v4 = vld [vmem:[%s3025_s1 + $0x1a0] sm:$0xff]  ;;  %v2149_v36 = vld [vmem:[%s3025_s1 + $0x190] sm:$0xff] }
  0x14   :  { %1015 = vmatpush.bf16.msra.mxu2 %v2118_v18  ;;  %v2144_v55 = vld [vmem:[%s3025_s1 + $0x168] sm:$0xff]  ;;  %v2135_v5 = vld [vmem:[%s3025_s1 + $0x120] sm:$0xff]  ;;  %v2133_v37 = vld [vmem:[%s3025_s1 + $0x110] sm:$0xff] }
  0x15   :  { %1064 = vmatpush.bf16.msra.mxu3 %v2126_v19  ;;  %v1565_v60 = vld [vmem:[%s3026_s0 + $0x48] sm:$0xf]  ;;  %v2044_v62 = vld [vmem:[%s3026_s0 + $0x4c] sm:$0xf]  ;;  %v2159_v6 = vld [vmem:[%s3025_s1 + $0x1e0] sm:$0xff] }
  0x16   :  { %918 = vmatpush.bf16.msra.mxu0 %v2101_v20  ;;  %v2048_v61 = vld [vmem:[%s3026_s0 + $0x64] sm:$0xf0]  ;;  %v1567_v63 = vld [vmem:[%s3026_s0 + $0x68] sm:$0xf0]  ;;  %v2143_v7 = vld [vmem:[%s3025_s1 + $0x160] sm:$0xff] }
  0x17   :  { %967 = vmatpush.bf16.msra.mxu1 %v2109_v21  ;;  %v1566_v2 = vor.u32 %v2048_v61, %v1565_v60  ;;  %v1570_v3 = vor.u32 %v2044_v62, %v1567_v63  ;;  %v1589_v8 = vld [vmem:[%s3026_s0 + $0x80] sm:$0xf]  ;;  %v2051_v10 = vld [vmem:[%s3026_s0 + $0x84] sm:$0xf]  ;;  %v1597_v12 = vld [vmem:[%s3026_s0 + $0x88] sm:$0xf] }
  0x18   :  { %1016 = vmatpush.bf16.msra.mxu2 %v2117_v22  ;;  %v2055_v9 = vld [vmem:[%s3026_s0 + $0x9c] sm:$0xf0]  ;;  %v1591_v11 = vld [vmem:[%s3026_s0 + $0xa0] sm:$0xf0]  ;;  %v2056_v13 = vld [vmem:[%s3026_s0 + $0xa4] sm:$0xf0] }
  0x19   :  { %1065 = vmatpush.bf16.msra.mxu3 %v2125_v23  ;;  %v2052_v14 = vld [vmem:[%s3026_s0 + $0x8c] sm:$0xf]  ;;  %v1590_v16 = vor.u32 %v2055_v9, %v1589_v8  ;;  %v1594_v17 = vor.u32 %v2051_v10, %v1591_v11  ;;  %v1598_v18 = vor.u32 %v2056_v13, %v1597_v12  ;;  %v2150_v20 = vld [vmem:[%s3025_s1 + $0x198] sm:$0xff]  ;;  %v2157_v38 = vld [vmem:[%s3025_s1 + $0x1d0] sm:$0xff] }
  0x1a   :  { %919 = vmatpush.bf16.msra.mxu0 %v2100_v24  ;;  %v1599_v15 = vld [vmem:[%s3026_s0 + $0xa8] sm:$0xf0]  ;;  %v2134_v21 = vld [vmem:[%s3025_s1 + $0x118] sm:$0xff]  ;;  %v1621_v24 = vld [vmem:[%s3026_s0 + $0xc0] sm:$0xf] }
  0x1b   :  { %968 = vmatpush.bf16.msra.mxu1 %v2108_v25  ;;  %v1602_v19 = vor.u32 %v2052_v14, %v1599_v15  ;;  %v2158_v22 = vld [vmem:[%s3025_s1 + $0x1d8] sm:$0xff]  ;;  %v2063_v25 = vld [vmem:[%s3026_s0 + $0xdc] sm:$0xf0]  ;;  %v2141_v39 = vld [vmem:[%s3025_s1 + $0x150] sm:$0xff] }
  0x1c   :  { %1017 = vmatpush.bf16.msra.mxu2 %v2116_v26  ;;  %v2142_v23 = vld [vmem:[%s3025_s1 + $0x158] sm:$0xff]  ;;  %v2059_v26 = vld [vmem:[%s3026_s0 + $0xc4] sm:$0xf]  ;;  %v1622_v32 = vor.u32 %v2063_v25, %v1621_v24  ;;  %v1685_v56 = vld [vmem:[%s3026_s0 + $0x140] sm:$0xf] }
  0x1d   :  { %1066 = vmatpush.bf16.msra.mxu3 %v2124_v27  ;;  %v1623_v27 = vld [vmem:[%s3026_s0 + $0xe0] sm:$0xf0]  ;;  %v2079_v57 = vld [vmem:[%s3026_s0 + $0x15c] sm:$0xf0]  ;;  %v1693_v60 = vld [vmem:[%s3026_s0 + $0x148] sm:$0xf] }
  0x1e   :  { %920 = vmatpush.bf16.msra.mxu0 %v2099_v28  ;;  %v1629_v28 = vld [vmem:[%s3026_s0 + $0xc8] sm:$0xf]  ;;  %v1626_v33 = vor.u32 %v2059_v26, %v1623_v27  ;;  %v2075_v58 = vld [vmem:[%s3026_s0 + $0x144] sm:$0xf]  ;;  %v2076_v62 = vld [vmem:[%s3026_s0 + $0x14c] sm:$0xf] }
  0x1f   :  { %969 = vmatpush.bf16.msra.mxu1 %v2107_v29  ;;  %v2064_v29 = vld [vmem:[%s3026_s0 + $0xe4] sm:$0xf0]  ;;  %v1687_v59 = vld [vmem:[%s3026_s0 + $0x160] sm:$0xf0]  ;;  %v1695_v63 = vld [vmem:[%s3026_s0 + $0x168] sm:$0xf0] }
  0x20   :  { %1018 = vmatpush.bf16.msra.mxu2 %v2115_v30  ;;  %v2060_v30 = vld [vmem:[%s3026_s0 + $0xcc] sm:$0xf]  ;;  %v1630_v34 = vor.u32 %v2064_v29, %v1629_v28  ;;  %v2080_v61 = vld [vmem:[%s3026_s0 + $0x164] sm:$0xf0]  ;;  %v1717_v8 = vld [vmem:[%s3026_s0 + $0x180] sm:$0xf] }
  0x21   :  { %1067 = vmatpush.bf16.msra.mxu3 %v2123_v31  ;;  %921 = vmatmul.bf16.vlgmr.msra.gmra.mxu0 %v1526_v42  ;;  %v1631_v31 = vld [vmem:[%s3026_s0 + $0xe8] sm:$0xf0]  ;;  %v2067_v42 = vld [vmem:[%s3026_s0 + $0x104] sm:$0xf]  ;;  %v2087_v9 = vld [vmem:[%s3026_s0 + $0x19c] sm:$0xf0] }
  0x22   :  { %1109 = vmatpush.bf16.msrb.mxu0 %v2138_v41  ;;  %970 = vmatmul.bf16.vlgmr.msra.gmra.mxu1 %v1530_v43  ;;  %v1634_v35 = vor.u32 %v2060_v30, %v1631_v31  ;;  %v2071_v41 = vld [vmem:[%s3026_s0 + $0x11c] sm:$0xf0]  ;;  %v1655_v43 = vld [vmem:[%s3026_s0 + $0x120] sm:$0xf0]  ;;  %v1725_v12 = vld [vmem:[%s3026_s0 + $0x188] sm:$0xf] }
  0x23   :  { %1019 = vmatmul.bf16.vlgmr.msra.gmra.mxu2 %v1534_v44  ;;  %1158 = vmatpush.bf16.msrb.mxu1 %v2146_v47  ;;  %v1661_v44 = vld [vmem:[%s3026_s0 + $0x108] sm:$0xf]  ;;  %v1663_v47 = vld [vmem:[%s3026_s0 + $0x128] sm:$0xf0]  ;;  %v2083_v10 = vld [vmem:[%s3026_s0 + $0x184] sm:$0xf] }
  0x24   :  { %1207 = vmatpush.bf16.msrb.mxu2 %v2154_v40  ;;  %1068 = vmatmul.bf16.vlgmr.msra.gmra.mxu3 %v1538_v45  ;;  %v1653_v40 = vld [vmem:[%s3026_s0 + $0x100] sm:$0xf]  ;;  %v2072_v45 = vld [vmem:[%s3026_s0 + $0x124] sm:$0xf0]  ;;  %v1719_v11 = vld [vmem:[%s3026_s0 + $0x1a0] sm:$0xf0] }
  0x25   :  { %1256 = vmatpush.bf16.msrb.mxu3 %v2162_v46  ;;  %v2068_v46 = vld [vmem:[%s3026_s0 + $0x10c] sm:$0xf]  ;;  %v2088_v13 = vld [vmem:[%s3026_s0 + $0x1a4] sm:$0xf0] }
  0x26   :  { %1110 = vmatpush.bf16.msrb.mxu0 %v2137_v49  ;;  %v1658_v49 = vor.u32 %v2067_v42, %v1655_v43  ;;  %v2084_v14 = vld [vmem:[%s3026_s0 + $0x18c] sm:$0xf]  ;;  %v1757_v24 = vld [vmem:[%s3026_s0 + $0x1c8] sm:$0xf] }
  0x27   :  { %1159 = vmatpush.bf16.msrb.mxu1 %v2145_v51  ;;  %v1666_v51 = vor.u32 %v2068_v46, %v1663_v47  ;;  %v1727_v15 = vld [vmem:[%s3026_s0 + $0x1a8] sm:$0xf0]  ;;  %v2096_v25 = vld [vmem:[%s3026_s0 + $0x1e4] sm:$0xf0] }
  0x28   :  { %1208 = vmatpush.bf16.msrb.mxu2 %v2153_v48  ;;  %v1654_v48 = vor.u32 %v2071_v41, %v1653_v40  ;;  %v2092_v26 = vld [vmem:[%s3026_s0 + $0x1cc] sm:$0xf]  ;;  %v1758_v30 = vor.u32 %v2096_v25, %v1757_v24 }
  0x29   :  { %1257 = vmatpush.bf16.msrb.mxu3 %v2161_v50  ;;  %v1662_v50 = vor.u32 %v2072_v45, %v1661_v44  ;;  %v1759_v27 = vld [vmem:[%s3026_s0 + $0x1e8] sm:$0xf0] }
  0x2a   :  { %1111 = vmatpush.bf16.msrb.mxu0 %v2136_v53  ;;  %v2132_v53 = vld [vmem:[%s3025_s1 + $0x108] sm:$0xff]  ;;  %v1762_v31 = vor.u32 %v2092_v26, %v1759_v27 }
  0x2b   :  { %1160 = vmatpush.bf16.msrb.mxu1 %v2144_v55  ;;  %v2140_v55 = vld [vmem:[%s3025_s1 + $0x148] sm:$0xff] }
  0x2c   :  { %1209 = vmatpush.bf16.msrb.mxu2 %v2152_v52  ;;  %v2148_v52 = vld [vmem:[%s3025_s1 + $0x188] sm:$0xff] }
  0x2d   :  { %1258 = vmatpush.bf16.msrb.mxu3 %v2160_v54  ;;  %v2156_v54 = vld [vmem:[%s3025_s1 + $0x1c8] sm:$0xff] }
  0x2e   :  { %1112 = vmatpush.bf16.msrb.mxu0 %v2135_v5  ;;  %v2131_v5 = vld [vmem:[%s3025_s1 + $0x100] sm:$0xff] }
  0x2f   :  { %1161 = vmatpush.bf16.msrb.mxu1 %v2143_v7  ;;  %v2139_v7 = vld [vmem:[%s3025_s1 + $0x140] sm:$0xff] }
  0x30   :  { %1210 = vmatpush.bf16.msrb.mxu2 %v2151_v4  ;;  %v2147_v4 = vld [vmem:[%s3025_s1 + $0x180] sm:$0xff] }
  0x31   :  { %926 = vmatmul.bf16.gmra.mxu0 %v1558_v0  ;;  %1259 = vmatpush.bf16.msrb.mxu3 %v2159_v6  ;;  %v1686_v0 = vor.u32 %v2079_v57, %v1685_v56  ;;  %v2155_v6 = vld [vmem:[%s3025_s1 + $0x1c0] sm:$0xff]  ;;  %v2045_v56 = vld [vmem:[%s3026_s0 + $0x54] sm:$0xf] }
  0x32   :  { %975 = vmatmul.bf16.gmra.mxu1 %v1562_v1  ;;  %1113 = vmatpush.bf16.msrb.mxu0 %v2134_v21  ;;  %v1690_v1 = vor.u32 %v2075_v58, %v1687_v59  ;;  %v2095_v21 = vld [vmem:[%s3026_s0 + $0x1dc] sm:$0xf0]  ;;  %v1575_v57 = vld [vmem:[%s3026_s0 + $0x70] sm:$0xf0]  ;;  %v1581_v58 = vld [vmem:[%s3026_s0 + $0x58] sm:$0xf] }
  0x33   :  { %1024 = vmatmul.bf16.gmra.mxu2 %v1566_v2  ;;  %1162 = vmatpush.bf16.msrb.mxu1 %v2142_v23  ;;  %v1694_v2 = vor.u32 %v2080_v61, %v1693_v60  ;;  %v1751_v23 = vld [vmem:[%s3026_s0 + $0x1e0] sm:$0xf0]  ;;  %v2050_v59 = vld [vmem:[%s3026_s0 + $0x74] sm:$0xf0]  ;;  %v2046_v60 = vld [vmem:[%s3026_s0 + $0x5c] sm:$0xf] }
  0x34   :  { %1073 = vmatmul.bf16.gmra.mxu3 %v1570_v3  ;;  %1211 = vmatpush.bf16.msrb.mxu2 %v2150_v20  ;;  %v1698_v3 = vor.u32 %v2076_v62, %v1695_v63  ;;  %v1749_v20 = vld [vmem:[%s3026_s0 + $0x1c0] sm:$0xf]  ;;  %v1583_v61 = vld [vmem:[%s3026_s0 + $0x78] sm:$0xf0] }
  0x35   :  { %1260 = vmatpush.bf16.msrb.mxu3 %v2158_v22  ;;  %v2091_v22 = vld [vmem:[%s3026_s0 + $0x1c4] sm:$0xf]  ;;  %v1750_v28 = vor.u32 %v2095_v21, %v1749_v20  ;;  %v1613_v20 = vld [vmem:[%s3026_s0 + $0x98] sm:$0xf] }
  0x36   :  { %1114 = vmatpush.bf16.msrb.mxu0 %v2133_v37  ;;  %v1754_v29 = vor.u32 %v2091_v22, %v1751_v23  ;;  %v2042_v37 = vld [vmem:[%s3026_s0 + $0x34] sm:$0xf0]  ;;  %v2054_v22 = vld [vmem:[%s3026_s0 + $0x9c] sm:$0xf] }
  0x37   :  { %1163 = vmatpush.bf16.msrb.mxu1 %v2141_v39  ;;  %v1551_v39 = vld [vmem:[%s3026_s0 + $0x38] sm:$0xf0]  ;;  %v2058_v21 = vld [vmem:[%s3026_s0 + $0xb4] sm:$0xf0] }
  0x38   :  { %1212 = vmatpush.bf16.msrb.mxu2 %v2149_v36  ;;  %v1549_v36 = vld [vmem:[%s3026_s0 + $0x18] sm:$0xf]  ;;  %v1615_v23 = vld [vmem:[%s3026_s0 + $0xb8] sm:$0xf0] }
  0x39   :  { %1261 = vmatpush.bf16.msrb.mxu3 %v2157_v38  ;;  %v2038_v38 = vld [vmem:[%s3026_s0 + $0x1c] sm:$0xf]  ;;  %v1550_v44 = vor.u32 %v2042_v37, %v1549_v36 }
  0x3a   :  { %1115 = vmatpush.bf16.msrb.mxu0 %v2132_v53  ;;  %v1554_v45 = vor.u32 %v2038_v38, %v1551_v39 }
  0x3b   :  { %1164 = vmatpush.bf16.msrb.mxu1 %v2140_v55  ;;  %v2049_v55 = vld [vmem:[%s3026_s0 + $0x6c] sm:$0xf0] }
  0x3c   :  { %1213 = vmatpush.bf16.msrb.mxu2 %v2148_v52 }
  0x3d   :  { %1262 = vmatpush.bf16.msrb.mxu3 %v2156_v54  ;;  %v1573_v54 = vld [vmem:[%s3026_s0 + $0x50] sm:$0xf] }
  0x3e   :  { %1116 = vmatpush.bf16.msrb.mxu0 %v2131_v5  ;;  %v1582_v5 = vor.u32 %v2050_v59, %v1581_v58 }
  0x3f   :  { %1165 = vmatpush.bf16.msrb.mxu1 %v2139_v7 }
  0x40   :  { %1214 = vmatpush.bf16.msrb.mxu2 %v2147_v4 }
  0x41   :  { %931 = vmatmul.bf16.gmra.mxu0 %v1590_v16  ;;  %1263 = vmatpush.bf16.msrb.mxu3 %v2155_v6  ;;  %v1718_v16 = vor.u32 %v2087_v9, %v1717_v8  ;;  %v1586_v6 = vor.u32 %v2046_v60, %v1583_v61 }
  0x42   :  { %980 = vmatmul.bf16.gmra.mxu1 %v1594_v17  ;;  %v1722_v17 = vor.u32 %v2083_v10, %v1719_v11 }
  0x43   :  { %1029 = vmatmul.bf16.gmra.mxu2 %v1598_v18  ;;  %v1726_v18 = vor.u32 %v2088_v13, %v1725_v12 }
  0x44   :  { %1078 = vmatmul.bf16.gmra.mxu3 %v1602_v19  ;;  %v1730_v19 = vor.u32 %v2084_v14, %v1727_v15 }
  0x51   :  { %936 = vmatmul.bf16.gmra.mxu0 %v1622_v32  ;;  %v1541_v32 = vld [vmem:[%s3026_s0 + $0x10] sm:$0xf] }
  0x52   :  { %985 = vmatmul.bf16.gmra.mxu1 %v1626_v33  ;;  %v2041_v33 = vld [vmem:[%s3026_s0 + $0x2c] sm:$0xf0] }
  0x53   :  { %1034 = vmatmul.bf16.gmra.mxu2 %v1630_v34  ;;  %v2037_v34 = vld [vmem:[%s3026_s0 + $0x14] sm:$0xf]  ;;  %v1542_v40 = vor.u32 %v2041_v33, %v1541_v32  ;;  %v1618_v32 = vor.u32 %v2054_v22, %v1615_v23 }
  0x54   :  { %1083 = vmatmul.bf16.gmra.mxu3 %v1634_v35  ;;  %v1543_v35 = vld [vmem:[%s3026_s0 + $0x30] sm:$0xf0] }
  0x55   :  { %v1546_v41 = vor.u32 %v2037_v34, %v1543_v35 }
  0x61   :  { %941 = vmatmul.bf16.gmra.mxu0 %v1654_v48 }
  0x62   :  { %990 = vmatmul.bf16.gmra.mxu1 %v1658_v49 }
  0x63   :  { %1039 = vmatmul.bf16.gmra.mxu2 %v1662_v50 }
  0x64   :  { %1088 = vmatmul.bf16.gmra.mxu3 %v1666_v51 }
  0x71   :  { %946 = vmatmul.bf16.gmra.mxu0 %v1686_v0  ;;  %v1574_v0 = vor.u32 %v2049_v55, %v1573_v54 }
  0x72   :  { %995 = vmatmul.bf16.gmra.mxu1 %v1690_v1  ;;  %v1578_v1 = vor.u32 %v2045_v56, %v1575_v57 }
  0x73   :  { %1044 = vmatmul.bf16.gmra.mxu2 %v1694_v2 }
  0x74   :  { %1093 = vmatmul.bf16.gmra.mxu3 %v1698_v3 }
  0x81   :  { %951 = vmatmul.bf16.gmra.mxu0 %v1718_v16  ;;  %v1605_v16 = vld [vmem:[%s3026_s0 + $0x90] sm:$0xf] }
  0x82   :  { %1000 = vmatmul.bf16.gmra.mxu1 %v1722_v17  ;;  %v2057_v17 = vld [vmem:[%s3026_s0 + $0xac] sm:$0xf0] }
  0x83   :  { %1049 = vmatmul.bf16.gmra.mxu2 %v1726_v18  ;;  %v2053_v18 = vld [vmem:[%s3026_s0 + $0x94] sm:$0xf]  ;;  %v1606_v26 = vor.u32 %v2057_v17, %v1605_v16 }
  0x84   :  { %1098 = vmatmul.bf16.gmra.mxu3 %v1730_v19  ;;  %v1607_v19 = vld [vmem:[%s3026_s0 + $0xb0] sm:$0xf0] }
  0x85   :  { %v1610_v27 = vor.u32 %v2053_v18, %v1607_v19 }
  0x91   :  { %956 = vmatmul.bf16.gmra.mxu0 %v1750_v28 }
  0x92   :  { %1005 = vmatmul.bf16.gmra.mxu1 %v1754_v29 }
  0x93   :  { %1054 = vmatmul.bf16.gmra.mxu2 %v1758_v30 }
  0x94   :  { %1103 = vmatmul.bf16.gmra.mxu3 %v1762_v31  ;;  %v1614_v31 = vor.u32 %v2058_v21, %v1613_v20 }
  0x9e   :  { %v922_v42 = vpop.f32.mrf.mxu0 }
  0x9f   :  { %v971_v43 = vpop.f32.mrf.mxu1 }
  0xa0   :  { %v972_v46 = vadd.f32 %v971_v43, %v922_v42  ;;  %v1637_v42 = vld [vmem:[%s3026_s0 + $0xd0] sm:$0xf] }
  0xa1   :  { %1117 = vmatmul.bf16.vlgmr.msrb.gmra.mxu0 %v1542_v40  ;;  %v2065_v43 = vld [vmem:[%s3026_s0 + $0xec] sm:$0xf0] }
  0xa2   :  { %1166 = vmatmul.bf16.vlgmr.msrb.gmra.mxu1 %v1546_v41 }
  0xa3   :  { %1215 = vmatmul.bf16.vlgmr.msrb.gmra.mxu2 %v1550_v44  ;;  %v2061_v44 = vld [vmem:[%s3026_s0 + $0xd4] sm:$0xf] }
  0xa4   :  { %1264 = vmatmul.bf16.vlgmr.msrb.gmra.mxu3 %v1554_v45  ;;  %v1639_v45 = vld [vmem:[%s3026_s0 + $0xf0] sm:$0xf0] }
  0xa5   :  { %v1642_v54 = vor.u32 %v2061_v44, %v1639_v45 }
  0xa6   :  { %v1020_v47 = vpop.f32.mrf.mxu2  ;;  %v924_v50 = vpop.f32.mrf.mxu0 }
  0xa7   :  { %v1069_v48 = vpop.f32.mrf.mxu3  ;;  %v1021_v49 = vadd.f32 %v1020_v47, %v972_v46  ;;  %v973_v51 = vpop.f32.mrf.mxu1  ;;  %v1645_v46 = vld [vmem:[%s3026_s0 + $0xd8] sm:$0xf] }
  0xa8   :  { %v974_v52 = vadd.f32 %v973_v51, %v924_v50  ;;  %v2066_v47 = vld [vmem:[%s3026_s0 + $0xf4] sm:$0xf0] }
  0xa9   :  { %v2604_v53 = vadd.f32 %v1069_v48, %v1021_v49  ;;  %v2062_v48 = vld [vmem:[%s3026_s0 + $0xdc] sm:$0xf]  ;;  %v1646_v58 = vor.u32 %v2066_v47, %v1645_v46 }
  0xaa   :  { %v1647_v49 = vld [vmem:[%s3026_s0 + $0xf8] sm:$0xf0] }
  0xab   :  { %v1650_v59 = vor.u32 %v2062_v48, %v1647_v49 }
  0xae   :  { %v1022_v62 = vpop.f32.mrf.mxu2  ;;  %v927_v3 = vpop.f32.mrf.mxu0 }
  0xaf   :  { %v1071_v63 = vpop.f32.mrf.mxu3  ;;  %v1023_v2 = vadd.f32 %v1022_v62, %v974_v52  ;;  %v976_v4 = vpop.f32.mrf.mxu1  ;;  %v1638_v52 = vor.u32 %v2065_v43, %v1637_v42  ;;  %v1711_v42 = vld [vmem:[%s3026_s0 + $0x178] sm:$0xf0] }
  0xb0   :  { %v977_v7 = vadd.f32 %v976_v4, %v927_v3 }
  0xb1   :  { %v2630_v8 = vadd.f32 %v1071_v63, %v1023_v2  ;;  %1122 = vmatmul.bf16.gmra.mxu0 %v1574_v0 }
  0xb2   :  { %1171 = vmatmul.bf16.gmra.mxu1 %v1578_v1 }
  0xb3   :  { %1220 = vmatmul.bf16.gmra.mxu2 %v1582_v5  ;;  %v1669_v5 = vld [vmem:[%s3026_s0 + $0x110] sm:$0xf] }
  0xb4   :  { %1269 = vmatmul.bf16.gmra.mxu3 %v1586_v6  ;;  %v2073_v6 = vld [vmem:[%s3026_s0 + $0x12c] sm:$0xf0] }
  0xb5   :  { %v1670_v17 = vor.u32 %v2073_v6, %v1669_v5  ;;  %v2090_v5 = vld [vmem:[%s3026_s0 + $0x1b4] sm:$0xf0]  ;;  %v2086_v6 = vld [vmem:[%s3026_s0 + $0x19c] sm:$0xf] }
  0xb6   :  { %v1025_v9 = vpop.f32.mrf.mxu2  ;;  %v929_v12 = vpop.f32.mrf.mxu0 }
  0xb7   :  { %v1074_v10 = vpop.f32.mrf.mxu3  ;;  %v1026_v11 = vadd.f32 %v1025_v9, %v977_v7  ;;  %v978_v13 = vpop.f32.mrf.mxu1  ;;  %v2069_v7 = vld [vmem:[%s3026_s0 + $0x114] sm:$0xf] }
  0xb8   :  { %v979_v14 = vadd.f32 %v978_v13, %v929_v12  ;;  %v1671_v9 = vld [vmem:[%s3026_s0 + $0x130] sm:$0xf0]  ;;  %v2070_v12 = vld [vmem:[%s3026_s0 + $0x11c] sm:$0xf] }
  0xb9   :  { %v2632_v15 = vadd.f32 %v1074_v10, %v1026_v11  ;;  %v1677_v10 = vld [vmem:[%s3026_s0 + $0x118] sm:$0xf]  ;;  %v1679_v13 = vld [vmem:[%s3026_s0 + $0x138] sm:$0xf0]  ;;  %v1674_v18 = vor.u32 %v2069_v7, %v1671_v9 }
  0xba   :  { %v2074_v11 = vld [vmem:[%s3026_s0 + $0x134] sm:$0xf0]  ;;  %v1682_v23 = vor.u32 %v2070_v12, %v1679_v13  ;;  %v1743_v7 = vld [vmem:[%s3026_s0 + $0x1b8] sm:$0xf0] }
  0xbb   :  { %v1678_v22 = vor.u32 %v2074_v11, %v1677_v10 }
  0xbe   :  { %v1027_v24 = vpop.f32.mrf.mxu2  ;;  %v932_v29 = vpop.f32.mrf.mxu0 }
  0xbf   :  { %v1076_v25 = vpop.f32.mrf.mxu3  ;;  %v1028_v28 = vadd.f32 %v1027_v24, %v979_v14  ;;  %v981_v30 = vpop.f32.mrf.mxu1 }
  0xc0   :  { %v982_v33 = vadd.f32 %v981_v30, %v932_v29 }
  0xc1   :  { %v2658_v34 = vadd.f32 %v1076_v25, %v1028_v28  ;;  %1127 = vmatmul.bf16.gmra.mxu0 %v1606_v26 }
  0xc2   :  { %1176 = vmatmul.bf16.gmra.mxu1 %v1610_v27 }
  0xc3   :  { %1225 = vmatmul.bf16.gmra.mxu2 %v1614_v31 }
  0xc4   :  { %1274 = vmatmul.bf16.gmra.mxu3 %v1618_v32 }
  0xc6   :  { %v1030_v35 = vpop.f32.mrf.mxu2  ;;  %v934_v38 = vpop.f32.mrf.mxu0 }
  0xc7   :  { %v1079_v36 = vpop.f32.mrf.mxu3  ;;  %v1031_v37 = vadd.f32 %v1030_v35, %v982_v33  ;;  %v983_v39 = vpop.f32.mrf.mxu1  ;;  %v1701_v33 = vld [vmem:[%s3026_s0 + $0x150] sm:$0xf] }
  0xc8   :  { %v984_v40 = vadd.f32 %v983_v39, %v934_v38  ;;  %v2081_v35 = vld [vmem:[%s3026_s0 + $0x16c] sm:$0xf0]  ;;  %v1709_v38 = vld [vmem:[%s3026_s0 + $0x158] sm:$0xf] }
  0xc9   :  { %v2660_v41 = vadd.f32 %v1079_v36, %v1031_v37  ;;  %v2077_v36 = vld [vmem:[%s3026_s0 + $0x154] sm:$0xf]  ;;  %v2082_v39 = vld [vmem:[%s3026_s0 + $0x174] sm:$0xf0]  ;;  %v1702_v45 = vor.u32 %v2081_v35, %v1701_v33 }
  0xca   :  { %v1703_v37 = vld [vmem:[%s3026_s0 + $0x170] sm:$0xf0]  ;;  %v1773_v35 = vld [vmem:[%s3026_s0 + $0x1d8] sm:$0xf] }
  0xcb   :  { %v1706_v46 = vor.u32 %v2077_v36, %v1703_v37  ;;  %v1767_v33 = vld [vmem:[%s3026_s0 + $0x1f0] sm:$0xf0]  ;;  %v2098_v36 = vld [vmem:[%s3026_s0 + $0x1f4] sm:$0xf0]  ;;  %v2094_v37 = vld [vmem:[%s3026_s0 + $0x1dc] sm:$0xf] }
  0xce   :  { %v1032_v50 = vpop.f32.mrf.mxu2  ;;  %v937_v56 = vpop.f32.mrf.mxu0 }
  0xcf   :  { %v1081_v51 = vpop.f32.mrf.mxu3  ;;  %v1033_v55 = vadd.f32 %v1032_v50, %v984_v40  ;;  %v986_v57 = vpop.f32.mrf.mxu1  ;;  %v2078_v40 = vld [vmem:[%s3026_s0 + $0x15c] sm:$0xf]  ;;  %v1710_v50 = vor.u32 %v2082_v39, %v1709_v38 }
  0xd0   :  { %v987_v60 = vadd.f32 %v986_v57, %v937_v56  ;;  %v1775_v38 = vld [vmem:[%s3026_s0 + $0x1f8] sm:$0xf0] }
  0xd1   :  { %v2686_v61 = vadd.f32 %v1081_v51, %v1033_v55  ;;  %1132 = vmatmul.bf16.gmra.mxu0 %v1638_v52  ;;  %v1714_v51 = vor.u32 %v2078_v40, %v1711_v42 }
  0xd2   :  { %1181 = vmatmul.bf16.gmra.mxu1 %v1642_v54 }
  0xd3   :  { %1230 = vmatmul.bf16.gmra.mxu2 %v1646_v58 }
  0xd4   :  { %1279 = vmatmul.bf16.gmra.mxu3 %v1650_v59 }
  0xd6   :  { %v1035_v62 = vpop.f32.mrf.mxu2  ;;  %v939_v1 = vpop.f32.mrf.mxu0 }
  0xd7   :  { %v1084_v63 = vpop.f32.mrf.mxu3  ;;  %v1036_v0 = vadd.f32 %v1035_v62, %v987_v60  ;;  %v988_v2 = vpop.f32.mrf.mxu1 }
  0xd8   :  { %v989_v3 = vadd.f32 %v988_v2, %v939_v1  ;;  %v2085_v1 = vld [vmem:[%s3026_s0 + $0x194] sm:$0xf] }
  0xd9   :  { %v2688_v4 = vadd.f32 %v1084_v63, %v1036_v0  ;;  %v1733_v63 = vld [vmem:[%s3026_s0 + $0x190] sm:$0xf]  ;;  %v1735_v2 = vld [vmem:[%s3026_s0 + $0x1b0] sm:$0xf0] }
  0xda   :  { %v2089_v0 = vld [vmem:[%s3026_s0 + $0x1ac] sm:$0xf0]  ;;  %v1738_v12 = vor.u32 %v2085_v1, %v1735_v2 }
  0xdb   :  { %v1734_v11 = vor.u32 %v2089_v0, %v1733_v63 }
  0xde   :  { %v1037_v14 = vpop.f32.mrf.mxu2  ;;  %v942_v20 = vpop.f32.mrf.mxu0 }
  0xdf   :  { %v1086_v16 = vpop.f32.mrf.mxu3  ;;  %v1038_v19 = vadd.f32 %v1037_v14, %v989_v3  ;;  %v991_v21 = vpop.f32.mrf.mxu1  ;;  %v1741_v3 = vld [vmem:[%s3026_s0 + $0x198] sm:$0xf] }
  0xe0   :  { %v992_v24 = vadd.f32 %v991_v21, %v942_v20 }
  0xe1   :  { %v2714_v25 = vadd.f32 %v1086_v16, %v1038_v19  ;;  %1137 = vmatmul.bf16.gmra.mxu0 %v1670_v17  ;;  %v1742_v17 = vor.u32 %v2090_v5, %v1741_v3 }
  0xe2   :  { %1186 = vmatmul.bf16.gmra.mxu1 %v1674_v18  ;;  %v1746_v18 = vor.u32 %v2086_v6, %v1743_v7 }
  0xe3   :  { %1235 = vmatmul.bf16.gmra.mxu2 %v1678_v22 }
  0xe4   :  { %1284 = vmatmul.bf16.gmra.mxu3 %v1682_v23 }
  0xe6   :  { %v1040_v26 = vpop.f32.mrf.mxu2  ;;  %v944_v29 = vpop.f32.mrf.mxu0 }
  0xe7   :  { %v1089_v27 = vpop.f32.mrf.mxu3  ;;  %v1041_v28 = vadd.f32 %v1040_v26, %v992_v24  ;;  %v993_v30 = vpop.f32.mrf.mxu1 }
  0xe8   :  { %v994_v31 = vadd.f32 %v993_v30, %v944_v29  ;;  %v1765_v29 = vld [vmem:[%s3026_s0 + $0x1d0] sm:$0xf] }
  0xe9   :  { %v2716_v32 = vadd.f32 %v1089_v27, %v1041_v28  ;;  %v2097_v30 = vld [vmem:[%s3026_s0 + $0x1ec] sm:$0xf0] }
  0xea   :  { %v1766_v42 = vor.u32 %v2097_v30, %v1765_v29 }
  0xee   :  { %v1042_v43 = vpop.f32.mrf.mxu2  ;;  %v947_v48 = vpop.f32.mrf.mxu0 }
  0xef   :  { %v1091_v44 = vpop.f32.mrf.mxu3  ;;  %v1043_v47 = vadd.f32 %v1042_v43, %v994_v31  ;;  %v996_v49 = vpop.f32.mrf.mxu1  ;;  %v2093_v31 = vld [vmem:[%s3026_s0 + $0x1d4] sm:$0xf] }
  0xf0   :  { %v997_v52 = vadd.f32 %v996_v49, %v947_v48  ;;  %v1770_v43 = vor.u32 %v2093_v31, %v1767_v33  ;;  %v1778_v48 = vor.u32 %v2094_v37, %v1775_v38 }
  0xf1   :  { %v2742_v54 = vadd.f32 %v1091_v44, %v1043_v47  ;;  %1142 = vmatmul.bf16.gmra.mxu0 %v1702_v45  ;;  %v1774_v47 = vor.u32 %v2098_v36, %v1773_v35 }
  0xf2   :  { %1191 = vmatmul.bf16.gmra.mxu1 %v1706_v46 }
  0xf3   :  { %1240 = vmatmul.bf16.gmra.mxu2 %v1710_v50 }
  0xf4   :  { %1289 = vmatmul.bf16.gmra.mxu3 %v1714_v51 }
  0xf6   :  { %v1045_v55 = vpop.f32.mrf.mxu2  ;;  %v949_v58 = vpop.f32.mrf.mxu0 }
  0xf7   :  { %v1094_v56 = vpop.f32.mrf.mxu3  ;;  %v1046_v57 = vadd.f32 %v1045_v55, %v997_v52  ;;  %v998_v59 = vpop.f32.mrf.mxu1 }
  0xf8   :  { %v999_v60 = vadd.f32 %v998_v59, %v949_v58 }
  0xf9   :  { %v2744_v62 = vadd.f32 %v1094_v56, %v1046_v57 }
  0xfe   :  { %v1047_v9 = vpop.f32.mrf.mxu2  ;;  %v952_v14 = vpop.f32.mrf.mxu0 }
  0xff   :  { %v1096_v10 = vpop.f32.mrf.mxu3  ;;  %v1048_v13 = vadd.f32 %v1047_v9, %v999_v60  ;;  %v1001_v16 = vpop.f32.mrf.mxu1 }
 0x100   :  { %v1002_v19 = vadd.f32 %v1001_v16, %v952_v14 }
 0x101   :  { %v2770_v20 = vadd.f32 %v1096_v10, %v1048_v13  ;;  %1147 = vmatmul.bf16.gmra.mxu0 %v1734_v11 }
 0x102   :  { %1196 = vmatmul.bf16.gmra.mxu1 %v1738_v12 }
 0x103   :  { %1245 = vmatmul.bf16.gmra.mxu2 %v1742_v17 }
 0x104   :  { %1294 = vmatmul.bf16.gmra.mxu3 %v1746_v18 }
 0x106   :  { %v1050_v21 = vpop.f32.mrf.mxu2  ;;  %v954_v24 = vpop.f32.mrf.mxu0 }
 0x107   :  { %v1099_v22 = vpop.f32.mrf.mxu3  ;;  %v1051_v23 = vadd.f32 %v1050_v21, %v1002_v19  ;;  %v1003_v26 = vpop.f32.mrf.mxu1 }
 0x108   :  { %v1004_v27 = vadd.f32 %v1003_v26, %v954_v24 }
 0x109   :  { %v2772_v28 = vadd.f32 %v1099_v22, %v1051_v23 }
 0x10e   :  { %v1052_v39 = vpop.f32.mrf.mxu2  ;;  %v957_v45 = vpop.f32.mrf.mxu0 }
 0x10f   :  { %v1101_v40 = vpop.f32.mrf.mxu3  ;;  %v1053_v44 = vadd.f32 %v1052_v39, %v1004_v27  ;;  %v1006_v46 = vpop.f32.mrf.mxu1 }
 0x110   :  { %v1007_v49 = vadd.f32 %v1006_v46, %v957_v45 }
 0x111   :  { %v2798_v50 = vadd.f32 %v1101_v40, %v1053_v44  ;;  %1152 = vmatmul.bf16.gmra.mxu0 %v1766_v42 }
 0x112   :  { %1201 = vmatmul.bf16.gmra.mxu1 %v1770_v43 }
 0x113   :  { %1250 = vmatmul.bf16.gmra.mxu2 %v1774_v47 }
 0x114   :  { %1299 = vmatmul.bf16.gmra.mxu3 %v1778_v48 }
 0x116   :  { %v1055_v51 = vpop.f32.mrf.mxu2  ;;  %v959_v56 = vpop.f32.mrf.mxu0 }
 0x117   :  { %v1104_v52 = vpop.f32.mrf.mxu3  ;;  %v1056_v55 = vadd.f32 %v1055_v51, %v1007_v49  ;;  %v1008_v57 = vpop.f32.mrf.mxu1 }
 0x118   :  { %v1009_v58 = vadd.f32 %v1008_v57, %v959_v56 }
 0x119   :  { %v2800_v59 = vadd.f32 %v1104_v52, %v1056_v55 }
 0x11e   :  { %v1057_v60 = vpop.f32.mrf.mxu2  ;;  %v1118_v1 = vpop.f32.mrf.mxu0 }
 0x11f   :  { %v1106_v63 = vpop.f32.mrf.mxu3  ;;  %v1058_v0 = vadd.f32 %v1057_v60, %v1009_v58  ;;  %v1167_v2 = vpop.f32.mrf.mxu1  ;;  %v1119_v3 = vadd.f32 %v1118_v1, %v2604_v53 }
 0x121   :  { %v2803_v5 = vadd.f32 %v1106_v63, %v1058_v0  ;;  %v1168_v6 = vadd.f32 %v1167_v2, %v1119_v3 }
 0x126   :  { %v1216_v7 = vpop.f32.mrf.mxu2  ;;  %v1120_v11 = vpop.f32.mrf.mxu0 }
 0x127   :  { %v1265_v9 = vpop.f32.mrf.mxu3  ;;  %v1217_v10 = vadd.f32 %v1216_v7, %v1168_v6  ;;  %v1169_v12 = vpop.f32.mrf.mxu1  ;;  %v1121_v13 = vadd.f32 %v1120_v11, %v2630_v8 }
 0x129   :  { %v2806_v14 = vadd.f32 %v1265_v9, %v1217_v10  ;;  %v1170_v16 = vadd.f32 %v1169_v12, %v1121_v13 }
 0x12e   :  { %v1218_v17 = vpop.f32.mrf.mxu2  ;;  %v1123_v21 = vpop.f32.mrf.mxu0 }
 0x12f   :  { %v1267_v18 = vpop.f32.mrf.mxu3  ;;  %v1219_v19 = vadd.f32 %v1218_v17, %v1170_v16  ;;  %v1172_v22 = vpop.f32.mrf.mxu1  ;;  %v1124_v53 = vadd.f32 %v1123_v21, %v2632_v15 }
 0x131   :  { %v2809_v23 = vadd.f32 %v1267_v18, %v1219_v19  ;;  %v1173_v24 = vadd.f32 %v1172_v22, %v1124_v53 }
 0x133   :  { %v1305_v26 = vadd.f32 %v2809_v23, %v2806_v14 }
 0x136   :  { %v1221_v27 = vpop.f32.mrf.mxu2  ;;  %v1125_v8 = vpop.f32.mrf.mxu0 }
 0x137   :  { %v1270_v29 = vpop.f32.mrf.mxu3  ;;  %v1222_v30 = vadd.f32 %v1221_v27, %v1173_v24  ;;  %v1174_v31 = vpop.f32.mrf.mxu1  ;;  %v1126_v33 = vadd.f32 %v1125_v8, %v2658_v34 }
 0x139   :  { %v2814_v35 = vadd.f32 %v1270_v29, %v1222_v30  ;;  %v1175_v36 = vadd.f32 %v1174_v31, %v1126_v33 }
 0x13b   :  { %v1306_v37 = vadd.f32 %v1305_v26, %v2814_v35 }
 0x13e   :  { %v1223_v38 = vpop.f32.mrf.mxu2  ;;  %v1128_v40 = vpop.f32.mrf.mxu0 }
 0x13f   :  { %v1272_v15 = vpop.f32.mrf.mxu3  ;;  %v1224_v39 = vadd.f32 %v1223_v38, %v1175_v36  ;;  %v1177_v42 = vpop.f32.mrf.mxu1  ;;  %v1129_v43 = vadd.f32 %v1128_v40, %v2660_v41 }
 0x141   :  { %v2818_v44 = vadd.f32 %v1272_v15, %v1224_v39  ;;  %v1178_v45 = vadd.f32 %v1177_v42, %v1129_v43 }
 0x143   :  { %v1307_v46 = vadd.f32 %v1306_v37, %v2818_v44 }
 0x146   :  { %v1226_v47 = vpop.f32.mrf.mxu2  ;;  %v1130_v49 = vpop.f32.mrf.mxu0 }
 0x147   :  { %v1275_v48 = vpop.f32.mrf.mxu3  ;;  %v1227_v34 = vadd.f32 %v1226_v47, %v1178_v45  ;;  %v1179_v51 = vpop.f32.mrf.mxu1  ;;  %v1131_v55 = vadd.f32 %v1130_v49, %v2686_v61 }
 0x149   :  { %v2821_v52 = vadd.f32 %v1275_v48, %v1227_v34  ;;  %v1180_v57 = vadd.f32 %v1179_v51, %v1131_v55 }
 0x14b   :  { %v1308_v56 = vadd.f32 %v1307_v46, %v2821_v52 }
 0x14e   :  { %v1228_v58 = vpop.f32.mrf.mxu2  ;;  %v1133_v63 = vpop.f32.mrf.mxu0 }
 0x14f   :  { %v1277_v60 = vpop.f32.mrf.mxu3  ;;  %v1229_v41 = vadd.f32 %v1228_v58, %v1180_v57  ;;  %v1182_v0 = vpop.f32.mrf.mxu1  ;;  %v1134_v2 = vadd.f32 %v1133_v63, %v2688_v4 }
 0x151   :  { %v2825_v1 = vadd.f32 %v1277_v60, %v1229_v41  ;;  %v1183_v6 = vadd.f32 %v1182_v0, %v1134_v2 }
 0x153   :  { %v1309_v3 = vadd.f32 %v1308_v56, %v2825_v1 }
 0x156   :  { %v1231_v7 = vpop.f32.mrf.mxu2  ;;  %v1135_v11 = vpop.f32.mrf.mxu0 }
 0x157   :  { %v1280_v9 = vpop.f32.mrf.mxu3  ;;  %v1232_v10 = vadd.f32 %v1231_v7, %v1183_v6  ;;  %v1184_v61 = vpop.f32.mrf.mxu1  ;;  %v1136_v13 = vadd.f32 %v1135_v11, %v2714_v25 }
 0x159   :  { %v2829_v12 = vadd.f32 %v1280_v9, %v1232_v10  ;;  %v1185_v17 = vadd.f32 %v1184_v61, %v1136_v13 }
 0x15b   :  { %v1310_v16 = vadd.f32 %v1309_v3, %v2829_v12 }
 0x15e   :  { %v1233_v18 = vpop.f32.mrf.mxu2  ;;  %v1138_v22 = vpop.f32.mrf.mxu0 }
 0x15f   :  { %v1282_v19 = vpop.f32.mrf.mxu3  ;;  %v1234_v21 = vadd.f32 %v1233_v18, %v1185_v17  ;;  %v1187_v4 = vpop.f32.mrf.mxu1  ;;  %v1139_v24 = vadd.f32 %v1138_v22, %v2716_v32 }
 0x161   :  { %v2833_v53 = vadd.f32 %v1282_v19, %v1234_v21  ;;  %v1188_v27 = vadd.f32 %v1187_v4, %v1139_v24 }
 0x163   :  { %v1311_v26 = vadd.f32 %v1310_v16, %v2833_v53 }
 0x166   :  { %v1236_v29 = vpop.f32.mrf.mxu2  ;;  %v1140_v31 = vpop.f32.mrf.mxu0 }
 0x167   :  { %v1285_v30 = vpop.f32.mrf.mxu3  ;;  %v1237_v8 = vadd.f32 %v1236_v29, %v1188_v27  ;;  %v1189_v25 = vpop.f32.mrf.mxu1  ;;  %v1141_v36 = vadd.f32 %v1140_v31, %v2742_v54 }
 0x169   :  { %v2837_v33 = vadd.f32 %v1285_v30, %v1237_v8  ;;  %v1190_v38 = vadd.f32 %v1189_v25, %v1141_v36  ;;  %v2170_v30 = vmov 128.0  }
 0x16a   :  { %2166 = vrcp.f32 %v2170_v30 }
 0x16b   :  { %v1312_v37 = vadd.f32 %v1311_v26, %v2837_v33 }
 0x16e   :  { %v1238_v15 = vpop.f32.mrf.mxu2  ;;  %v1143_v42 = vpop.f32.mrf.mxu0 }
 0x16f   :  { %v1287_v39 = vpop.f32.mrf.mxu3  ;;  %v1239_v40 = vadd.f32 %v1238_v15, %v1190_v38  ;;  %v1192_v32 = vpop.f32.mrf.mxu1  ;;  %v1144_v45 = vadd.f32 %v1143_v42, %v2744_v62 }
 0x170   :  { %v2167_v38 = vpop.eup %2166 }
 0x171   :  { %v2841_v43 = vadd.f32 %v1287_v39, %v1239_v40  ;;  %v1193_v47 = vadd.f32 %v1192_v32, %v1144_v45  ;;  %v1327_v32 = vmul.f32 128.0, %v2167_v38  ;;  %vm1331_vm0 = vweird.f32 %v2167_v38 }
 0x173   :  { %v1313_v46 = vadd.f32 %v1312_v37, %v2841_v43 }
 0x176   :  { %v1241_v48 = vpop.f32.mrf.mxu2  ;;  %v1145_v51 = vpop.f32.mrf.mxu0 }
 0x177   :  { %v1290_v34 = vpop.f32.mrf.mxu3  ;;  %v1242_v49 = vadd.f32 %v1241_v48, %v1193_v47  ;;  %v1194_v54 = vpop.f32.mrf.mxu1  ;;  %v1146_v56 = vadd.f32 %v1145_v51, %v2770_v20  ;;  %v1328_v47 = vsub.f32 1.0, %v1327_v32 }
 0x179   :  { %v2845_v55 = vadd.f32 %v1290_v34, %v1242_v49  ;;  %v1195_v58 = vadd.f32 %v1194_v54, %v1146_v56  ;;  %v1329_v49 = vmul.f32 %v2167_v38, %v1328_v47 }
 0x17b   :  { %v1314_v57 = vadd.f32 %v1313_v46, %v2845_v55  ;;  %v1330_v56 = vadd.f32 %v2167_v38, %v1329_v49 }
 0x17e   :  { %v1243_v60 = vpop.f32.mrf.mxu2  ;;  %v1148_v0 = vpop.f32.mrf.mxu0 }
 0x17f   :  { %v1292_v41 = vpop.f32.mrf.mxu3  ;;  %v1244_v63 = vadd.f32 %v1243_v60, %v1195_v58  ;;  %v1197_v62 = vpop.f32.mrf.mxu1  ;;  %v1149_v3 = vadd.f32 %v1148_v0, %v2772_v28 }
 0x181   :  { %v2849_v2 = vadd.f32 %v1292_v41, %v1244_v63  ;;  %v1198_v7 = vadd.f32 %v1197_v62, %v1149_v3 }
 0x183   :  { %v1315_v6 = vadd.f32 %v1314_v57, %v2849_v2 }
 0x186   :  { %v1246_v9 = vpop.f32.mrf.mxu2  ;;  %v1150_v61 = vpop.f32.mrf.mxu0 }
 0x187   :  { %v1295_v10 = vpop.f32.mrf.mxu3  ;;  %v1247_v11 = vadd.f32 %v1246_v9, %v1198_v7  ;;  %v1199_v20 = vpop.f32.mrf.mxu1  ;;  %v1151_v16 = vadd.f32 %v1150_v61, %v2798_v50 }
 0x189   :  { %v1296_v13 = vadd.f32 %v1295_v10, %v1247_v11  ;;  %v1200_v18 = vadd.f32 %v1199_v20, %v1151_v16 }
 0x18b   :  { %v1316_v17 = vadd.f32 %v1315_v6, %v1296_v13 }
 0x18e   :  { %v1248_v19 = vpop.f32.mrf.mxu2  ;;  %v1153_v4 = vpop.f32.mrf.mxu0 }
 0x18f   :  { %v1297_v21 = vpop.f32.mrf.mxu3  ;;  %v1249_v22 = vadd.f32 %v1248_v19, %v1200_v18  ;;  %v1154_v28 = vadd.f32 %v1153_v4, %v2800_v59  ;;  %v1202_v26 = vpop.f32.mrf.mxu1 }
 0x191   :  { %v1298_v24 = vadd.f32 %v1297_v21, %v1249_v22  ;;  %v1203_v29 = vadd.f32 %v1202_v26, %v1154_v28 }
 0x193   :  { %v1317_v27 = vadd.f32 %v1316_v17, %v1298_v24 }
 0x196   :  { %v1251_v8 = vpop.f32.mrf.mxu2  ;;  %v1155_v36 = vpop.f32.mrf.mxu0 }
 0x197   :  { %v1300_v31 = vpop.f32.mrf.mxu3  ;;  %v1252_v25 = vadd.f32 %v1251_v8, %v1203_v29  ;;  %v1156_v50 = vadd.f32 %v1155_v36, %v2803_v5  ;;  %v1204_v39 = vpop.f32.mrf.mxu1  ;;  %v1332_v5 = vsel %vm1331_vm0, %v2167_v38, %v1330_v56 }
 0x199   :  { %v1301_v37 = vadd.f32 %v1300_v31, %v1252_v25  ;;  %v1205_v40 = vadd.f32 %v1204_v39, %v1156_v50 }
 0x19b   :  { %v1318_v15 = vadd.f32 %v1317_v27, %v1301_v37 }
 0x19e   :  { %v1253_v42 = vpop.f32.mrf.mxu2 }
 0x19f   :  { %v1254_v45 = vadd.f32 %v1253_v42, %v1205_v40  ;;  %v1302_v59 = vpop.f32.mrf.mxu3 }
 0x1a1   :  { %v1303_v46 = vadd.f32 %v1302_v59, %v1254_v45 }
 0x1a3   :  { %v1319_v48 = vadd.f32 %v1318_v15, %v1303_v46 }
 0x1a5   :  { %v1320_v34 = vrot.slane %v1319_v48, 4 }
 0x1a7   :  { %v1321_v51 = vadd.f32 %v1320_v34, %v1319_v48 }
 0x1a9   :  { %v1322_v54 = vrot.slane %v1321_v51, 2 }
 0x1ab   :  { %v1323_v57 = vadd.f32 %v1322_v54, %v1321_v51 }
 0x1ad   :  { %v1324_v58 = vrot.slane %v1323_v57, 1 }
 0x1af   :  { %v1325_v60 = vadd.f32 %v1324_v58, %v1323_v57 }
 0x1b1   :  { %v1333_v41 = vmul.f32 %v1332_v5, %v1325_v60 }
 0x1b3   :  { %v2857_v63 = vsub.f32 %v2806_v14, %v1333_v41  ;;  %v2860_v0 = vsub.f32 %v2809_v23, %v1333_v41  ;;  %v2863_v62 = vsub.f32 %v2814_v35, %v1333_v41  ;;  %v2866_v3 = vsub.f32 %v2818_v44, %v1333_v41 }
 0x1b4   :  { %v2869_v6 = vsub.f32 %v2821_v52, %v1333_v41  ;;  %v2872_v7 = vsub.f32 %v2825_v1, %v1333_v41  ;;  %v2875_v9 = vsub.f32 %v2829_v12, %v1333_v41  ;;  %v2878_v14 = vsub.f32 %v2833_v53, %v1333_v41 }
 0x1b5   :  { %v2881_v23 = vsub.f32 %v2837_v33, %v1333_v41  ;;  %v2884_v35 = vsub.f32 %v2841_v43, %v1333_v41  ;;  %v2887_v44 = vsub.f32 %v2845_v55, %v1333_v41  ;;  %v2890_v52 = vsub.f32 %v2849_v2, %v1333_v41 }
 0x1b6   :  { %v2892_v1 = vsub.f32 %v1296_v13, %v1333_v41  ;;  %v2894_v10 = vsub.f32 %v1298_v24, %v1333_v41  ;;  %v2896_v12 = vsub.f32 %v1301_v37, %v1333_v41  ;;  %v2898_v53 = vsub.f32 %v1303_v46, %v1333_v41 }
 0x1b7   :  { %v1350_v33 = vmul.f32 %v2857_v63, %v2857_v63  ;;  %v1351_v43 = vmul.f32 %v2860_v0, %v2860_v0  ;;  %v1352_v55 = vmul.f32 %v2863_v62, %v2863_v62  ;;  %v1353_v2 = vmul.f32 %v2866_v3, %v2866_v3 }
 0x1b8   :  { %v1354_v20 = vmul.f32 %v2869_v6, %v2869_v6  ;;  %v1355_v16 = vmul.f32 %v2872_v7, %v2872_v7  ;;  %v1356_v18 = vmul.f32 %v2875_v9, %v2875_v9  ;;  %v1357_v21 = vmul.f32 %v2878_v14, %v2878_v14 }
 0x1b9   :  { %v1366_v11 = vadd.f32 %v1351_v43, %v1350_v33  ;;  %v1358_v4 = vmul.f32 %v2881_v23, %v2881_v23  ;;  %v1359_v28 = vmul.f32 %v2884_v35, %v2884_v35  ;;  %v1360_v27 = vmul.f32 %v2887_v44, %v2887_v44 }
 0x1ba   :  { %v1361_v30 = vmul.f32 %v2890_v52, %v2890_v52  ;;  %v1362_v31 = vmul.f32 %v2892_v1, %v2892_v1  ;;  %v1363_v36 = vmul.f32 %v2894_v10, %v2894_v10  ;;  %v1364_v50 = vmul.f32 %v2896_v12, %v2896_v12 }
 0x1bb   :  { %v1367_v61 = vadd.f32 %v1366_v11, %v1352_v55  ;;  %v1365_v15 = vmul.f32 %v2898_v53, %v2898_v53 }
 0x1bd   :  { %v1368_v13 = vadd.f32 %v1367_v61, %v1353_v2 }
 0x1bf   :  { %v1369_v17 = vadd.f32 %v1368_v13, %v1354_v20 }
 0x1c1   :  { %v1370_v19 = vadd.f32 %v1369_v17, %v1355_v16 }
 0x1c3   :  { %v1371_v22 = vadd.f32 %v1370_v19, %v1356_v18 }
 0x1c5   :  { %v1372_v24 = vadd.f32 %v1371_v22, %v1357_v21 }
 0x1c7   :  { %v1373_v26 = vadd.f32 %v1372_v24, %v1358_v4 }
 0x1c9   :  { %v1374_v29 = vadd.f32 %v1373_v26, %v1359_v28 }
 0x1cb   :  { %v1375_v8 = vadd.f32 %v1374_v29, %v1360_v27 }
 0x1cd   :  { %v1376_v25 = vadd.f32 %v1375_v8, %v1361_v30 }
 0x1cf   :  { %v1377_v37 = vadd.f32 %v1376_v25, %v1362_v31 }
 0x1d1   :  { %v1378_v38 = vadd.f32 %v1377_v37, %v1363_v36 }
 0x1d3   :  { %v1379_v39 = vadd.f32 %v1378_v38, %v1364_v50 }
 0x1d5   :  { %v1380_v40 = vadd.f32 %v1379_v39, %v1365_v15 }
 0x1d7   :  { %v1381_v42 = vrot.slane %v1380_v40, 4 }
 0x1d9   :  { %v1382_v32 = vadd.f32 %v1381_v42, %v1380_v40 }
 0x1db   :  { %v1383_v45 = vrot.slane %v1382_v32, 2 }
 0x1dd   :  { %v1384_v59 = vadd.f32 %v1383_v45, %v1382_v32 }
 0x1df   :  { %v1385_v46 = vrot.slane %v1384_v59, 1 }
 0x1e1   :  { %v1386_v47 = vadd.f32 %v1385_v46, %v1384_v59 }
 0x1e3   :  { %v1387_v48 = vmul.f32 %v1386_v47, %v1332_v5 }
 0x1e5   :  { %v1389_v34 = vadd.f32 1e-05, %v1387_v48 }
 0x1e7   :  { %2168 = vrsqrt.f32 %v1389_v34  ;;  %vm1396_vm2 = vweird.f32 %v1389_v34 }
 0x1ed   :  { %v2169_v49 = vpop.eup %2168 }
 0x1ee   :  { %v1391_v51 = vmul.f32 %v2169_v49, %v1389_v34  ;;  %vm1397_vm1 = vweird.f32 %v2169_v49 }
 0x1ef   :  { %vm1398_vm3 = vmor %vm1396_vm2, %vm1397_vm1 }
 0x1f0   :  { %v1392_v54 = vmul.f32 %v2169_v49, %v1391_v51 }
 0x1f2   :  { %v1393_v56 = vmul.f32 0.5, %v1392_v54 }
 0x1f4   :  { %v1394_v57 = vsub.f32 1.5, %v1393_v56 }
 0x1f6   :  { %v1395_v58 = vmul.f32 %v2169_v49, %v1394_v57 }
 0x1f8   :  { %v1399_v60 = vsel %vm1398_vm3, %v2169_v49, %v1395_v58 }
 0x1f9   :  { %v1400_v41 = vmul.f32 %v1399_v60, %v2857_v63  ;;  %v1401_v33 = vmul.f32 %v1399_v60, %v2860_v0  ;;  %v1405_v43 = vmul.f32 %v1399_v60, %v2872_v7  ;;  %v1406_v5 = vmul.f32 %v1399_v60, %v2875_v9  ;;  %v2164_v9 = vld [vmem:[%s3027_s2] ss:$0 sm:$0xff] }
 0x1fa   :  { %v1407_v55 = vmul.f32 %v1399_v60, %v2878_v14  ;;  %v1408_v11 = vmul.f32 %v1399_v60, %v2881_v23  ;;  %v1409_v2 = vmul.f32 %v1399_v60, %v2884_v35  ;;  %v1410_v61 = vmul.f32 %v1399_v60, %v2887_v44 }
 0x1fb   :  { %v1411_v20 = vmul.f32 %v1399_v60, %v2890_v52  ;;  %v1412_v13 = vmul.f32 %v1399_v60, %v2892_v1  ;;  %v1413_v63 = vmul.f32 %v1399_v60, %v2894_v10  ;;  %v1414_v0 = vmul.f32 %v1399_v60, %v2896_v12  ;;  %v2954_v1 = vld [vmem:[%s3028_s3] ss:$0 sm:$0xff] }
 0x1fc   :  { %v1415_v7 = vmul.f32 %v1399_v60, %v2898_v53  ;;  %v1402_v14 = vmul.f32 %v1399_v60, %v2863_v62  ;;  %v1403_v23 = vmul.f32 %v1399_v60, %v2866_v3  ;;  %v1404_v35 = vmul.f32 %v1399_v60, %v2869_v6 }
 0x1fd   :  { %v1419_v44 = vmul.f32 %v2164_v9, %v1400_v41  ;;  %v1420_v52 = vmul.f32 %v2164_v9, %v1401_v33  ;;  %v1424_v16 = vmul.f32 %v2164_v9, %v1405_v43  ;;  %v1425_v17 = vmul.f32 %v2164_v9, %v1406_v5 }
 0x1fe   :  { %v1421_v10 = vmul.f32 %v2164_v9, %v1402_v14  ;;  %v1422_v12 = vmul.f32 %v2164_v9, %v1403_v23  ;;  %v1423_v53 = vmul.f32 %v2164_v9, %v1404_v35  ;;  %v1426_v18 = vmul.f32 %v2164_v9, %v1407_v55 }
 0x1ff   :  { %v1427_v19 = vmul.f32 %v2164_v9, %v1408_v11  ;;  %v1439_v62 = vadd.f32 %v2954_v1, %v1419_v44  ;;  %v1440_v3 = vadd.f32 %v2954_v1, %v1420_v52  ;;  %v1428_v21 = vmul.f32 %v2164_v9, %v1409_v2 }
 0x200   :  { %v1429_v6 = vmul.f32 %v2164_v9, %v1410_v61  ;;  %v1430_v22 = vmul.f32 %v2164_v9, %v1411_v20  ;;  %v1441_v4 = vadd.f32 %v2954_v1, %v1421_v10  ;;  %v1431_v24 = vmul.f32 %v2164_v9, %v1412_v13 }
 0x201   :  { %v1432_v28 = vmul.f32 %v2164_v9, %v1413_v63  ;;  %v1442_v26 = vadd.f32 %v2954_v1, %v1422_v12  ;;  %v1443_v27 = vadd.f32 %v2954_v1, %v1423_v53  ;;  %v1433_v29 = vmul.f32 %v2164_v9, %v1414_v0 }
 0x202   :  { %v1434_v30 = vmul.f32 %v2164_v9, %v1415_v7  ;;  %v1444_v8 = vadd.f32 %v2954_v1, %v1424_v16  ;;  %v1445_v31 = vadd.f32 %v2954_v1, %v1425_v17  ;;  %v1446_v25 = vadd.f32 %v2954_v1, %v1426_v18 }
 0x203   :  { %v1447_v36 = vadd.f32 %v2954_v1, %v1427_v19  ;;  %vm1455_vm4 = vcmp.ge.f32.partialorder %v1439_v62, 0.0  ;;  %vm1456_vm5 = vcmp.ge.f32.partialorder %v1440_v3, 0.0  ;;  %v1448_v37 = vadd.f32 %v2954_v1, %v1428_v21 }
 0x204   :  { %v1471_v50 = vmul.f32 0.2, %v1439_v62  ;;  %v1472_v38 = vmul.f32 0.2, %v1440_v3  ;;  %v1473_v15 = vmul.f32 0.2, %v1441_v4  ;;  %v1449_v39 = vadd.f32 %v2954_v1, %v1429_v6 }
 0x205   :  { %vm1457_vm6 = vcmp.ge.f32.partialorder %v1441_v4, 0.0  ;;  %v1474_v40 = vmul.f32 0.2, %v1442_v26  ;;  %v1475_v42 = vmul.f32 0.2, %v1443_v27  ;;  %vm1458_vm7 = vcmp.ge.f32.partialorder %v1442_v26, 0.0 }
 0x206   :  { %vm1459_vm8 = vcmp.ge.f32.partialorder %v1443_v27, 0.0  ;;  %v1476_v32 = vmul.f32 0.2, %v1444_v8  ;;  %v1487_v45 = vsel %vm1455_vm4, %v1439_v62, %v1471_v50  ;;  %v1450_v59 = vadd.f32 %v2954_v1, %v1430_v22 }
 0x207   :  { %vm1460_vm9 = vcmp.ge.f32.partialorder %v1444_v8, 0.0  ;;  %v1477_v46 = vmul.f32 0.2, %v1445_v31  ;;  %v1488_v47 = vsel %vm1456_vm5, %v1440_v3, %v1472_v38  ;;  %1503 = vst [vmem:[%s3029_s4] sm:$0xff] %v1487_v45  ;;  %v1451_v48 = vadd.f32 %v2954_v1, %v1431_v24 }
 0x208   :  { %vm1461_vm10 = vcmp.ge.f32.partialorder %v1445_v31, 0.0  ;;  %v1478_v34 = vmul.f32 0.2, %v1446_v25  ;;  %v1489_v49 = vsel %vm1457_vm6, %v1441_v4, %v1473_v15  ;;  %vm1462_vm11 = vcmp.ge.f32.partialorder %v1446_v25, 0.0  ;;  %1504 = vst [vmem:[%s3029_s4 + $0x8] sm:$0xff] %v1488_v47 }
 0x209   :  { %v1479_v51 = vmul.f32 0.2, %v1447_v36  ;;  %v1490_v54 = vsel %vm1458_vm7, %v1442_v26, %v1474_v40  ;;  %v1491_v56 = vsel %vm1459_vm8, %v1443_v27, %v1475_v42  ;;  %v1452_v57 = vadd.f32 %v2954_v1, %v1432_v28  ;;  %1505 = vst [vmem:[%s3029_s4 + $0x10] sm:$0xff] %v1489_v49 }
 0x20a   :  { %vm1463_vm12 = vcmp.ge.f32.partialorder %v1447_v36, 0.0  ;;  %v1480_v58 = vmul.f32 0.2, %v1448_v37  ;;  %v1492_v60 = vsel %vm1460_vm9, %v1444_v8, %v1476_v32  ;;  %v1453_v41 = vadd.f32 %v2954_v1, %v1433_v29  ;;  %1506 = vst [vmem:[%s3029_s4 + $0x18] sm:$0xff] %v1490_v54 }
 0x20b   :  { %vm1464_vm13 = vcmp.ge.f32.partialorder %v1448_v37, 0.0  ;;  %v1481_v33 = vmul.f32 0.2, %v1449_v39  ;;  %v1493_v43 = vsel %vm1461_vm10, %v1445_v31, %v1477_v46  ;;  %v1454_v5 = vadd.f32 %v2954_v1, %v1434_v30  ;;  %1507 = vst [vmem:[%s3029_s4 + $0x20] sm:$0xff] %v1491_v56 }
 0x20c   :  { %vm1465_vm14 = vcmp.ge.f32.partialorder %v1449_v39, 0.0  ;;  %v1482_v55 = vmul.f32 0.2, %v1450_v59  ;;  %v1494_v11 = vsel %vm1462_vm11, %v1446_v25, %v1478_v34  ;;  %vm1466_vm15 = vcmp.ge.f32.partialorder %v1450_v59, 0.0  ;;  %1508 = vst [vmem:[%s3029_s4 + $0x28] sm:$0xff] %v1492_v60 }
 0x20d   :  { %v1483_v2 = vmul.f32 0.2, %v1451_v48  ;;  %v1495_v61 = vsel %vm1463_vm12, %v1447_v36, %v1479_v51  ;;  %vm1467_vm0 = vcmp.ge.f32.partialorder %v1451_v48, 0.0  ;;  %v1484_v20 = vmul.f32 0.2, %v1452_v57  ;;  %1509 = vst [vmem:[%s3029_s4 + $0x30] sm:$0xff] %v1493_v43 }
 0x20e   :  { %v1496_v13 = vsel %vm1464_vm13, %v1448_v37, %v1480_v58  ;;  %vm1468_vm1 = vcmp.ge.f32.partialorder %v1452_v57, 0.0  ;;  %v1485_v63 = vmul.f32 0.2, %v1453_v41  ;;  %v1497_v0 = vsel %vm1465_vm14, %v1449_v39, %v1481_v33  ;;  %1510 = vst [vmem:[%s3029_s4 + $0x38] sm:$0xff] %v1494_v11 }
 0x20f   :  { %vm1469_vm2 = vcmp.ge.f32.partialorder %v1453_v41, 0.0  ;;  %v1486_v7 = vmul.f32 0.2, %v1454_v5  ;;  %v1498_v9 = vsel %vm1466_vm15, %v1450_v59, %v1482_v55  ;;  %1511 = vst [vmem:[%s3029_s4 + $0x40] sm:$0xff] %v1495_v61  ;;  %vm1470_vm3 = vcmp.ge.f32.partialorder %v1454_v5, 0.0 }
 0x210   :  { %v1499_v14 = vsel %vm1467_vm0, %v1451_v48, %v1483_v2  ;;  %1512 = vst [vmem:[%s3029_s4 + $0x48] sm:$0xff] %v1496_v13  ;;  %v1500_v23 = vsel %vm1468_vm1, %v1452_v57, %v1484_v20  ;;  %v1501_v35 = vsel %vm1469_vm2, %v1453_v41, %v1485_v63 }
 0x211   :  { %1513 = vst [vmem:[%s3029_s4 + $0x50] sm:$0xff] %v1497_v0  ;;  %v1502_v44 = vsel %vm1470_vm3, %v1454_v5, %v1486_v7 }
 0x212   :  { %1514 = vst [vmem:[%s3029_s4 + $0x58] sm:$0xff] %v1498_v9 }
 0x213   :  { %1515 = vst [vmem:[%s3029_s4 + $0x60] sm:$0xff] %v1499_v14 }
 0x214   :  { %1516 = vst [vmem:[%s3029_s4 + $0x68] sm:$0xff] %v1500_v23 }
 0x215   :  { %1517 = vst [vmem:[%s3029_s4 + $0x70] sm:$0xff] %v1501_v35 }
 0x216   :  { %1518 = vst [vmem:[%s3029_s4 + $0x78] sm:$0xff] %v1502_v44 }

// kernel: discriminator_forward.7
= control target key start
LH: loop header
LB: loop body
LE: loop exit
PB: predicated region body
PF: predicated region fallthrough
CT: control target
= control target key end

     0   :  { %vm2553_vm15 = vcmask 1040384   ;;  %s5967_s1 = inlined_call_operand.vmem [shape: bf16[2048,256], index: 1, kind: input, shape index: {}]   ;;  %s5968_s0 = inlined_call_operand.vmem [shape: bf16[32,2048], index: 0, kind: input, shape index: {}]   ;;  %s5969_s2 = inlined_call_operand.vmem [shape: f32[1,256], index: 2, kind: input, shape index: {}]   ;;  %s5970_s3 = inlined_call_operand.vmem [shape: f32[1,256], index: 3, kind: input, shape index: {}]   ;;  %s5971_s4 = inlined_call_operand.vmem [shape: bf16[16,256], index: 4, kind: input, shape index: {}]   ;;  %s5972_s5 = inlined_call_operand.vmem [shape: f32[2,1], index: 5, kind: output, shape index: {}]  }
   0x1   :  { %v2747_v0 = vld [vmem:[%s5967_s1 + $0x70] sm:$0xf]  ;;  %v3760_v1 = vld [vmem:[%s5967_s1 + $0x74] sm:$0xf0]  ;;  %v2739_v11 = vld [vmem:[%s5967_s1 + $0x60] sm:$0xf] }
   0x2   :  { %v2811_v2 = vld [vmem:[%s5967_s1 + $0xf0] sm:$0xf]  ;;  %v2748_v3 = vor.u32 %v3760_v1, %v2747_v0  ;;  %v3776_v4 = vld [vmem:[%s5967_s1 + $0xf4] sm:$0xf0]  ;;  %v3758_v13 = vld [vmem:[%s5967_s1 + $0x64] sm:$0xf0] }
   0x3   :  { %v2875_v5 = vld [vmem:[%s5967_s1 + $0x170] sm:$0xf]  ;;  %v3792_v6 = vld [vmem:[%s5967_s1 + $0x174] sm:$0xf0]  ;;  %v2812_v7 = vor.u32 %v3776_v4, %v2811_v2  ;;  %v2803_v14 = vld [vmem:[%s5967_s1 + $0xe0] sm:$0xf]  ;;  %v2740_v16 = vor.u32 %v3758_v13, %v2739_v11 }
   0x4   :  { %v2876_v8 = vor.u32 %v3792_v6, %v2875_v5  ;;  %v2939_v9 = vld [vmem:[%s5967_s1 + $0x1f0] sm:$0xf]  ;;  %v3808_v10 = vld [vmem:[%s5967_s1 + $0x1f4] sm:$0xf0]  ;;  %1748 = vmatpush.bf16.msra.mxu0 %v2748_v3  ;;  %v3774_v15 = vld [vmem:[%s5967_s1 + $0xe4] sm:$0xf0] }
   0x5   :  { %v2940_v12 = vor.u32 %v3808_v10, %v2939_v9  ;;  %1767 = vmatpush.bf16.msra.mxu1 %v2812_v7  ;;  %v2804_v17 = vor.u32 %v3774_v15, %v2803_v14  ;;  %v2867_v18 = vld [vmem:[%s5967_s1 + $0x160] sm:$0xf]  ;;  %v3790_v19 = vld [vmem:[%s5967_s1 + $0x164] sm:$0xf0]  ;;  %v2731_v23 = vld [vmem:[%s5967_s1 + $0x50] sm:$0xf] }
   0x6   :  { %1786 = vmatpush.bf16.msra.mxu2 %v2876_v8  ;;  %v2931_v20 = vld [vmem:[%s5967_s1 + $0x1e0] sm:$0xf]  ;;  %v2868_v21 = vor.u32 %v3790_v19, %v2867_v18  ;;  %v3806_v22 = vld [vmem:[%s5967_s1 + $0x1e4] sm:$0xf0]  ;;  %v3756_v24 = vld [vmem:[%s5967_s1 + $0x54] sm:$0xf0] }
   0x7   :  { %1805 = vmatpush.bf16.msra.mxu3 %v2940_v12  ;;  %v2932_v25 = vor.u32 %v3806_v22, %v2931_v20  ;;  %v2795_v26 = vld [vmem:[%s5967_s1 + $0xd0] sm:$0xf]  ;;  %v3772_v27 = vld [vmem:[%s5967_s1 + $0xd4] sm:$0xf0]  ;;  %v2732_v29 = vor.u32 %v3756_v24, %v2731_v23  ;;  %v2723_v35 = vld [vmem:[%s5967_s1 + $0x40] sm:$0xf] }
   0x8   :  { %v2859_v28 = vld [vmem:[%s5967_s1 + $0x150] sm:$0xf]  ;;  %1749 = vmatpush.bf16.msra.mxu0 %v2740_v16  ;;  %v3788_v30 = vld [vmem:[%s5967_s1 + $0x154] sm:$0xf0]  ;;  %v2796_v33 = vor.u32 %v3772_v27, %v2795_v26  ;;  %v3754_v36 = vld [vmem:[%s5967_s1 + $0x44] sm:$0xf0] }
   0x9   :  { %v2923_v31 = vld [vmem:[%s5967_s1 + $0x1d0] sm:$0xf]  ;;  %v3804_v32 = vld [vmem:[%s5967_s1 + $0x1d4] sm:$0xf0]  ;;  %1768 = vmatpush.bf16.msra.mxu1 %v2804_v17  ;;  %v2860_v34 = vor.u32 %v3788_v30, %v2859_v28  ;;  %v2787_v37 = vld [vmem:[%s5967_s1 + $0xc0] sm:$0xf]  ;;  %v2724_v44 = vor.u32 %v3754_v36, %v2723_v35 }
   0xa   :  { %1787 = vmatpush.bf16.msra.mxu2 %v2868_v21  ;;  %v2924_v38 = vor.u32 %v3804_v32, %v2923_v31  ;;  %v3770_v39 = vld [vmem:[%s5967_s1 + $0xc4] sm:$0xf0]  ;;  %v2851_v40 = vld [vmem:[%s5967_s1 + $0x140] sm:$0xf]  ;;  %v2715_v47 = vld [vmem:[%s5967_s1 + $0x30] sm:$0xf] }
   0xb   :  { %1806 = vmatpush.bf16.msra.mxu3 %v2932_v25  ;;  %v3786_v41 = vld [vmem:[%s5967_s1 + $0x144] sm:$0xf0]  ;;  %v2915_v42 = vld [vmem:[%s5967_s1 + $0x1c0] sm:$0xf]  ;;  %v2788_v45 = vor.u32 %v3770_v39, %v2787_v37  ;;  %v3752_v48 = vld [vmem:[%s5967_s1 + $0x34] sm:$0xf0] }
   0xc   :  { %v3802_v43 = vld [vmem:[%s5967_s1 + $0x1c4] sm:$0xf0]  ;;  %1750 = vmatpush.bf16.msra.mxu0 %v2732_v29  ;;  %v2852_v46 = vor.u32 %v3786_v41, %v2851_v40  ;;  %v2779_v49 = vld [vmem:[%s5967_s1 + $0xb0] sm:$0xf]  ;;  %v3768_v51 = vld [vmem:[%s5967_s1 + $0xb4] sm:$0xf0]  ;;  %v2716_v56 = vor.u32 %v3752_v48, %v2715_v47 }
   0xd   :  { %1769 = vmatpush.bf16.msra.mxu1 %v2796_v33  ;;  %v2916_v50 = vor.u32 %v3802_v43, %v2915_v42  ;;  %v2843_v52 = vld [vmem:[%s5967_s1 + $0x130] sm:$0xf]  ;;  %v3784_v53 = vld [vmem:[%s5967_s1 + $0x134] sm:$0xf0]  ;;  %v2780_v57 = vor.u32 %v3768_v51, %v2779_v49  ;;  %v2707_v59 = vld [vmem:[%s5967_s1 + $0x20] sm:$0xf] }
   0xe   :  { %1788 = vmatpush.bf16.msra.mxu2 %v2860_v34  ;;  %v2907_v54 = vld [vmem:[%s5967_s1 + $0x1b0] sm:$0xf]  ;;  %v3800_v55 = vld [vmem:[%s5967_s1 + $0x1b4] sm:$0xf0]  ;;  %v2844_v58 = vor.u32 %v3784_v53, %v2843_v52  ;;  %v3750_v60 = vld [vmem:[%s5967_s1 + $0x24] sm:$0xf0] }
   0xf   :  { %1807 = vmatpush.bf16.msra.mxu3 %v2924_v38  ;;  %v2771_v61 = vld [vmem:[%s5967_s1 + $0xa0] sm:$0xf]  ;;  %v2908_v62 = vor.u32 %v3800_v55, %v2907_v54  ;;  %v3766_v63 = vld [vmem:[%s5967_s1 + $0xa4] sm:$0xf0]  ;;  %v2708_v4 = vor.u32 %v3750_v60, %v2707_v59  ;;  %v2699_v7 = vld [vmem:[%s5967_s1 + $0x10] sm:$0xf] }
  0x10   :  { %1751 = vmatpush.bf16.msra.mxu0 %v2724_v44  ;;  %v2835_v0 = vld [vmem:[%s5967_s1 + $0x120] sm:$0xf]  ;;  %v3782_v1 = vld [vmem:[%s5967_s1 + $0x124] sm:$0xf0]  ;;  %v2772_v5 = vor.u32 %v3766_v63, %v2771_v61  ;;  %v3748_v8 = vld [vmem:[%s5967_s1 + $0x14] sm:$0xf0] }
  0x11   :  { %1770 = vmatpush.bf16.msra.mxu1 %v2788_v45  ;;  %v2899_v2 = vld [vmem:[%s5967_s1 + $0x1a0] sm:$0xf]  ;;  %v3798_v3 = vld [vmem:[%s5967_s1 + $0x1a4] sm:$0xf0]  ;;  %v2836_v6 = vor.u32 %v3782_v1, %v2835_v0  ;;  %v2763_v9 = vld [vmem:[%s5967_s1 + $0x90] sm:$0xf]  ;;  %v2700_v17 = vor.u32 %v3748_v8, %v2699_v7 }
  0x12   :  { %1789 = vmatpush.bf16.msra.mxu2 %v2852_v46  ;;  %v2900_v10 = vor.u32 %v3798_v3, %v2899_v2  ;;  %v3764_v11 = vld [vmem:[%s5967_s1 + $0x94] sm:$0xf0]  ;;  %v2827_v12 = vld [vmem:[%s5967_s1 + $0x110] sm:$0xf]  ;;  %v2691_v16 = vld [vmem:[%s5967_s1] sm:$0xf] }
  0x13   :  { %1808 = vmatpush.bf16.msra.mxu3 %v2916_v50  ;;  %v3780_v13 = vld [vmem:[%s5967_s1 + $0x114] sm:$0xf0]  ;;  %v2891_v14 = vld [vmem:[%s5967_s1 + $0x190] sm:$0xf]  ;;  %v3746_v18 = vld [vmem:[%s5967_s1 + $0x4] sm:$0xf0]  ;;  %v2764_v21 = vor.u32 %v3764_v11, %v2763_v9 }
  0x14   :  { %1752 = vmatpush.bf16.msra.mxu0 %v2716_v56  ;;  %v3796_v15 = vld [vmem:[%s5967_s1 + $0x194] sm:$0xf0]  ;;  %v2755_v19 = vld [vmem:[%s5967_s1 + $0x80] sm:$0xf]  ;;  %v3762_v20 = vld [vmem:[%s5967_s1 + $0x84] sm:$0xf0]  ;;  %v2828_v22 = vor.u32 %v3780_v13, %v2827_v12  ;;  %v2692_v34 = vor.u32 %v3746_v18, %v2691_v16 }
  0x15   :  { %1771 = vmatpush.bf16.msra.mxu1 %v2780_v57  ;;  %v2819_v23 = vld [vmem:[%s5967_s1 + $0x100] sm:$0xf]  ;;  %v3778_v24 = vld [vmem:[%s5967_s1 + $0x104] sm:$0xf0]  ;;  %v2892_v26 = vor.u32 %v3796_v15, %v2891_v14  ;;  %v3713_v30 = vld [vmem:[%s5968_s0 + $0x4] sm:$0xf]  ;;  %v2756_v38 = vor.u32 %v3762_v20, %v2755_v19 }
  0x16   :  { %1790 = vmatpush.bf16.msra.mxu2 %v2844_v58  ;;  %v2883_v25 = vld [vmem:[%s5967_s1 + $0x180] sm:$0xf]  ;;  %v3794_v27 = vld [vmem:[%s5967_s1 + $0x184] sm:$0xf0]  ;;  %v2565_v31 = vld [vmem:[%s5968_s0 + $0x40] sm:$0xf0]  ;;  %v2820_v39 = vor.u32 %v3778_v24, %v2819_v23 }
  0x17   :  { %1809 = vmatpush.bf16.msra.mxu3 %v2908_v62  ;;  %v2563_v28 = vld [vmem:[%s5968_s0] sm:$0xf]  ;;  %v3131_v32 = vld [vmem:[%s5967_s1 + $0x370] sm:$0xf]  ;;  %v3856_v33 = vld [vmem:[%s5967_s1 + $0x374] sm:$0xf0]  ;;  %v2884_v43 = vor.u32 %v3794_v27, %v2883_v25  ;;  %v4287_v53 = vor.u32 %v3713_v30, %v2565_v31 }
  0x18   :  { %1753 = vmatpush.bf16.msra.mxu0 %v2708_v4  ;;  %v3721_v29 = vld [vmem:[%s5968_s0 + $0x3c] sm:$0xf0]  ;;  %v2571_v35 = vld [vmem:[%s5968_s0 + $0x8] sm:$0xf]  ;;  %v3067_v36 = vld [vmem:[%s5967_s1 + $0x2f0] sm:$0xf]  ;;  %v3132_v44 = vor.u32 %v3856_v33, %v3131_v32 }
  0x19   :  { %1772 = vmatpush.bf16.msra.mxu1 %v2772_v5  ;;  %v3840_v37 = vld [vmem:[%s5967_s1 + $0x2f4] sm:$0xf0]  ;;  %v3722_v40 = vld [vmem:[%s5968_s0 + $0x44] sm:$0xf0]  ;;  %v3714_v41 = vld [vmem:[%s5968_s0 + $0xc] sm:$0xf]  ;;  %v4276_v48 = vor.u32 %v3721_v29, %v2563_v28 }
  0x1a   :  { %1791 = vmatpush.bf16.msra.mxu2 %v2836_v6  ;;  %v2573_v42 = vld [vmem:[%s5968_s0 + $0x48] sm:$0xf0]  ;;  %v3003_v45 = vld [vmem:[%s5967_s1 + $0x270] sm:$0xf]  ;;  %v3824_v46 = vld [vmem:[%s5967_s1 + $0x274] sm:$0xf0]  ;;  %v3068_v49 = vor.u32 %v3840_v37, %v3067_v36  ;;  %v4289_v54 = vor.u32 %v3722_v40, %v2571_v35 }
  0x1b   :  { %1810 = vmatpush.bf16.msra.mxu3 %v2900_v10  ;;  %v3195_v47 = vld [vmem:[%s5967_s1 + $0x3f0] sm:$0xf]  ;;  %v3872_v50 = vld [vmem:[%s5967_s1 + $0x3f4] sm:$0xf0]  ;;  %v3123_v51 = vld [vmem:[%s5967_s1 + $0x360] sm:$0xf]  ;;  %v4297_v57 = vor.u32 %v3714_v41, %v2573_v42  ;;  %v3004_v58 = vor.u32 %v3824_v46, %v3003_v45 }
  0x1c   :  { %1754 = vmatpush.bf16.msra.mxu0 %v2700_v17  ;;  %v3854_v52 = vld [vmem:[%s5967_s1 + $0x364] sm:$0xf0]  ;;  %v3059_v55 = vld [vmem:[%s5967_s1 + $0x2e0] sm:$0xf]  ;;  %v3196_v59 = vor.u32 %v3872_v50, %v3195_v47  ;;  %v3115_v2 = vld [vmem:[%s5967_s1 + $0x350] sm:$0xf] }
  0x1d   :  { %1773 = vmatpush.bf16.msra.mxu1 %v2764_v21  ;;  %v3838_v56 = vld [vmem:[%s5967_s1 + $0x2e4] sm:$0xf0]  ;;  %v3124_v60 = vor.u32 %v3854_v52, %v3123_v51  ;;  %v2995_v61 = vld [vmem:[%s5967_s1 + $0x260] sm:$0xf]  ;;  %v3852_v3 = vld [vmem:[%s5967_s1 + $0x354] sm:$0xf0] }
  0x1e   :  { %1792 = vmatpush.bf16.msra.mxu2 %v2828_v22  ;;  %v3822_v62 = vld [vmem:[%s5967_s1 + $0x264] sm:$0xf0]  ;;  %v3187_v63 = vld [vmem:[%s5967_s1 + $0x3e0] sm:$0xf]  ;;  %v3060_v0 = vor.u32 %v3838_v56, %v3059_v55  ;;  %v3051_v4 = vld [vmem:[%s5967_s1 + $0x2d0] sm:$0xf]  ;;  %v3116_v8 = vor.u32 %v3852_v3, %v3115_v2 }
  0x1f   :  { %1811 = vmatpush.bf16.msra.mxu3 %v2892_v26  ;;  %v3870_v1 = vld [vmem:[%s5967_s1 + $0x3e4] sm:$0xf0]  ;;  %v3836_v5 = vld [vmem:[%s5967_s1 + $0x2d4] sm:$0xf0]  ;;  %v2996_v6 = vor.u32 %v3822_v62, %v2995_v61  ;;  %v2987_v9 = vld [vmem:[%s5967_s1 + $0x250] sm:$0xf] }
  0x20   :  { %1755 = vmatpush.bf16.msra.mxu0 %v2692_v34  ;;  %v3188_v7 = vor.u32 %v3870_v1, %v3187_v63  ;;  %v3820_v10 = vld [vmem:[%s5967_s1 + $0x254] sm:$0xf0]  ;;  %v3179_v11 = vld [vmem:[%s5967_s1 + $0x3d0] sm:$0xf]  ;;  %v3052_v12 = vor.u32 %v3836_v5, %v3051_v4  ;;  %v3107_v14 = vld [vmem:[%s5967_s1 + $0x340] sm:$0xf] }
  0x21   :  { %1774 = vmatpush.bf16.msra.mxu1 %v2756_v38  ;;  %v3868_v13 = vld [vmem:[%s5967_s1 + $0x3d4] sm:$0xf0]  ;;  %v3850_v15 = vld [vmem:[%s5967_s1 + $0x344] sm:$0xf0]  ;;  %v3043_v16 = vld [vmem:[%s5967_s1 + $0x2c0] sm:$0xf]  ;;  %v2988_v18 = vor.u32 %v3820_v10, %v2987_v9 }
  0x22   :  { %1793 = vmatpush.bf16.msra.mxu2 %v2820_v39  ;;  %v3834_v17 = vld [vmem:[%s5967_s1 + $0x2c4] sm:$0xf0]  ;;  %v2979_v19 = vld [vmem:[%s5967_s1 + $0x240] sm:$0xf]  ;;  %v3180_v22 = vor.u32 %v3868_v13, %v3179_v11  ;;  %v3108_v23 = vor.u32 %v3850_v15, %v3107_v14  ;;  %v3729_v28 = vld [vmem:[%s5968_s0 + $0x84] sm:$0xf] }
  0x23   :  { %1812 = vmatpush.bf16.msra.mxu3 %v2884_v43  ;;  %1756 = vmatmul.bf16.vlgmr.msra.gmra.mxu0 %v4276_v48  ;;  %v3818_v20 = vld [vmem:[%s5967_s1 + $0x244] sm:$0xf0]  ;;  %v3171_v21 = vld [vmem:[%s5967_s1 + $0x3c0] sm:$0xf]  ;;  %v3044_v27 = vor.u32 %v3834_v17, %v3043_v16  ;;  %v2629_v29 = vld [vmem:[%s5968_s0 + $0xc0] sm:$0xf0] }
  0x24   :  { %1775 = vmatmul.bf16.vlgmr.msra.gmra.mxu1 %v4287_v53  ;;  %1824 = vmatpush.bf16.msrb.mxu0 %v3004_v58  ;;  %v3866_v24 = vld [vmem:[%s5967_s1 + $0x3c4] sm:$0xf0]  ;;  %v2627_v25 = vld [vmem:[%s5968_s0 + $0x80] sm:$0xf]  ;;  %v3099_v30 = vld [vmem:[%s5967_s1 + $0x330] sm:$0xf]  ;;  %v2980_v35 = vor.u32 %v3818_v20, %v2979_v19  ;;  %v4419_v50 = vor.u32 %v3729_v28, %v2629_v29 }
  0x25   :  { %1843 = vmatpush.bf16.msrb.mxu1 %v3068_v49  ;;  %1794 = vmatmul.bf16.vlgmr.msra.gmra.mxu2 %v4289_v54  ;;  %v3737_v26 = vld [vmem:[%s5968_s0 + $0xbc] sm:$0xf0]  ;;  %v3848_v31 = vld [vmem:[%s5967_s1 + $0x334] sm:$0xf0]  ;;  %v2635_v32 = vld [vmem:[%s5968_s0 + $0x88] sm:$0xf]  ;;  %v3172_v39 = vor.u32 %v3866_v24, %v3171_v21 }
  0x26   :  { %1862 = vmatpush.bf16.msrb.mxu2 %v3132_v44  ;;  %1813 = vmatmul.bf16.vlgmr.msra.gmra.mxu3 %v4297_v57  ;;  %v3035_v33 = vld [vmem:[%s5967_s1 + $0x2b0] sm:$0xf]  ;;  %v3832_v34 = vld [vmem:[%s5967_s1 + $0x2b4] sm:$0xf0]  ;;  %v3738_v36 = vld [vmem:[%s5968_s0 + $0xc4] sm:$0xf0]  ;;  %v3100_v40 = vor.u32 %v3848_v31, %v3099_v30  ;;  %v4408_v44 = vor.u32 %v3737_v26, %v2627_v25 }
  0x27   :  { %1881 = vmatpush.bf16.msrb.mxu3 %v3196_v59  ;;  %v3730_v37 = vld [vmem:[%s5968_s0 + $0x8c] sm:$0xf]  ;;  %v2971_v41 = vld [vmem:[%s5967_s1 + $0x230] sm:$0xf]  ;;  %v3816_v42 = vld [vmem:[%s5967_s1 + $0x234] sm:$0xf0]  ;;  %v3036_v45 = vor.u32 %v3832_v34, %v3035_v33  ;;  %v4421_v51 = vor.u32 %v3738_v36, %v2635_v32 }
  0x28   :  { %1825 = vmatpush.bf16.msrb.mxu0 %v2996_v6  ;;  %v2637_v38 = vld [vmem:[%s5968_s0 + $0xc8] sm:$0xf0]  ;;  %v3163_v43 = vld [vmem:[%s5967_s1 + $0x3b0] sm:$0xf]  ;;  %v3864_v46 = vld [vmem:[%s5967_s1 + $0x3b4] sm:$0xf0]  ;;  %v2972_v58 = vor.u32 %v3816_v42, %v2971_v41 }
  0x29   :  { %1844 = vmatpush.bf16.msrb.mxu1 %v3060_v0  ;;  %v3091_v47 = vld [vmem:[%s5967_s1 + $0x320] sm:$0xf]  ;;  %v3846_v49 = vld [vmem:[%s5967_s1 + $0x324] sm:$0xf0]  ;;  %v4429_v56 = vor.u32 %v3730_v37, %v2637_v38  ;;  %v3164_v59 = vor.u32 %v3864_v46, %v3163_v43  ;;  %v3083_v2 = vld [vmem:[%s5967_s1 + $0x310] sm:$0xf] }
  0x2a   :  { %1863 = vmatpush.bf16.msrb.mxu2 %v3124_v60  ;;  %v3027_v52 = vld [vmem:[%s5967_s1 + $0x2a0] sm:$0xf]  ;;  %v3830_v55 = vld [vmem:[%s5967_s1 + $0x2a4] sm:$0xf0]  ;;  %v3092_v60 = vor.u32 %v3846_v49, %v3091_v47  ;;  %v3844_v3 = vld [vmem:[%s5967_s1 + $0x314] sm:$0xf0] }
  0x2b   :  { %1882 = vmatpush.bf16.msrb.mxu3 %v3188_v7  ;;  %v2963_v61 = vld [vmem:[%s5967_s1 + $0x220] sm:$0xf]  ;;  %v3814_v62 = vld [vmem:[%s5967_s1 + $0x224] sm:$0xf0]  ;;  %v3028_v0 = vor.u32 %v3830_v55, %v3027_v52  ;;  %v3019_v4 = vld [vmem:[%s5967_s1 + $0x290] sm:$0xf]  ;;  %v3084_v9 = vor.u32 %v3844_v3, %v3083_v2 }
  0x2c   :  { %1826 = vmatpush.bf16.msrb.mxu0 %v2988_v18  ;;  %v3155_v63 = vld [vmem:[%s5967_s1 + $0x3a0] sm:$0xf]  ;;  %v3862_v1 = vld [vmem:[%s5967_s1 + $0x3a4] sm:$0xf0]  ;;  %v3828_v5 = vld [vmem:[%s5967_s1 + $0x294] sm:$0xf0]  ;;  %v2964_v6 = vor.u32 %v3814_v62, %v2963_v61 }
  0x2d   :  { %1845 = vmatpush.bf16.msrb.mxu1 %v3052_v12  ;;  %v2955_v7 = vld [vmem:[%s5967_s1 + $0x210] sm:$0xf]  ;;  %v3812_v10 = vld [vmem:[%s5967_s1 + $0x214] sm:$0xf0]  ;;  %v3020_v13 = vor.u32 %v3828_v5, %v3019_v4  ;;  %v3075_v14 = vld [vmem:[%s5967_s1 + $0x300] sm:$0xf] }
  0x2e   :  { %1864 = vmatpush.bf16.msrb.mxu2 %v3116_v8  ;;  %v3156_v8 = vor.u32 %v3862_v1, %v3155_v63  ;;  %v3147_v11 = vld [vmem:[%s5967_s1 + $0x390] sm:$0xf]  ;;  %v3860_v12 = vld [vmem:[%s5967_s1 + $0x394] sm:$0xf0]  ;;  %v3842_v15 = vld [vmem:[%s5967_s1 + $0x304] sm:$0xf0]  ;;  %v2956_v20 = vor.u32 %v3812_v10, %v2955_v7 }
  0x2f   :  { %1883 = vmatpush.bf16.msrb.mxu3 %v3180_v22  ;;  %v3011_v16 = vld [vmem:[%s5967_s1 + $0x280] sm:$0xf]  ;;  %v3826_v17 = vld [vmem:[%s5967_s1 + $0x284] sm:$0xf0]  ;;  %v3387_v18 = vld [vmem:[%s5967_s1 + $0x570] sm:$0xf]  ;;  %v3148_v24 = vor.u32 %v3860_v12, %v3147_v11  ;;  %v3076_v25 = vor.u32 %v3842_v15, %v3075_v14 }
  0x30   :  { %1827 = vmatpush.bf16.msrb.mxu0 %v2980_v35  ;;  %v3920_v19 = vld [vmem:[%s5967_s1 + $0x574] sm:$0xf0]  ;;  %v2947_v21 = vld [vmem:[%s5967_s1 + $0x200] sm:$0xf]  ;;  %v3323_v22 = vld [vmem:[%s5967_s1 + $0x4f0] sm:$0xf]  ;;  %v3012_v29 = vor.u32 %v3826_v17, %v3011_v16 }
  0x31   :  { %1846 = vmatpush.bf16.msrb.mxu1 %v3044_v27  ;;  %v3810_v26 = vld [vmem:[%s5967_s1 + $0x204] sm:$0xf0]  ;;  %v3139_v27 = vld [vmem:[%s5967_s1 + $0x380] sm:$0xf]  ;;  %v2579_v30 = vld [vmem:[%s5968_s0 + $0x10] sm:$0xf]  ;;  %v3388_v34 = vor.u32 %v3920_v19, %v3387_v18 }
  0x32   :  { %1865 = vmatpush.bf16.msrb.mxu2 %v3108_v23  ;;  %v3904_v23 = vld [vmem:[%s5967_s1 + $0x4f4] sm:$0xf0]  ;;  %v3858_v28 = vld [vmem:[%s5967_s1 + $0x384] sm:$0xf0]  ;;  %v3723_v31 = vld [vmem:[%s5968_s0 + $0x4c] sm:$0xf0]  ;;  %v2948_v42 = vor.u32 %v3810_v26, %v2947_v21 }
  0x33   :  { %1884 = vmatpush.bf16.msrb.mxu3 %v3172_v39  ;;  %1761 = vmatmul.bf16.gmra.mxu0 %v4408_v44  ;;  %v3715_v32 = vld [vmem:[%s5968_s0 + $0x14] sm:$0xf]  ;;  %v3259_v35 = vld [vmem:[%s5967_s1 + $0x470] sm:$0xf]  ;;  %v3888_v36 = vld [vmem:[%s5967_s1 + $0x474] sm:$0xf0]  ;;  %v3324_v38 = vor.u32 %v3904_v23, %v3323_v22  ;;  %v3140_v47 = vor.u32 %v3858_v28, %v3139_v27 }
  0x34   :  { %1780 = vmatmul.bf16.gmra.mxu1 %v4419_v50  ;;  %1828 = vmatpush.bf16.msrb.mxu0 %v2972_v58  ;;  %v2581_v33 = vld [vmem:[%s5968_s0 + $0x50] sm:$0xf0]  ;;  %v3451_v37 = vld [vmem:[%s5967_s1 + $0x5f0] sm:$0xf]  ;;  %v3936_v39 = vld [vmem:[%s5967_s1 + $0x5f4] sm:$0xf0]  ;;  %v3260_v52 = vor.u32 %v3888_v36, %v3259_v35 }
  0x35   :  { %1847 = vmatpush.bf16.msrb.mxu1 %v3036_v45  ;;  %1799 = vmatmul.bf16.gmra.mxu2 %v4421_v51  ;;  %v3918_v41 = vld [vmem:[%s5967_s1 + $0x564] sm:$0xf0]  ;;  %v2587_v43 = vld [vmem:[%s5968_s0 + $0x18] sm:$0xf]  ;;  %v3716_v46 = vld [vmem:[%s5968_s0 + $0x1c] sm:$0xf]  ;;  %v4566_v1 = vor.u32 %v3715_v32, %v2581_v33 }
  0x36   :  { %1866 = vmatpush.bf16.msrb.mxu2 %v3100_v40  ;;  %1818 = vmatmul.bf16.gmra.mxu3 %v4429_v56  ;;  %v3379_v40 = vld [vmem:[%s5967_s1 + $0x560] sm:$0xf]  ;;  %v3724_v45 = vld [vmem:[%s5968_s0 + $0x54] sm:$0xf0]  ;;  %v2589_v49 = vld [vmem:[%s5968_s0 + $0x58] sm:$0xf0] }
  0x37   :  { %1885 = vmatpush.bf16.msrb.mxu3 %v3164_v59  ;;  %v3251_v55 = vld [vmem:[%s5967_s1 + $0x460] sm:$0xf]  ;;  %v3886_v58 = vld [vmem:[%s5967_s1 + $0x464] sm:$0xf0]  ;;  %v3452_v59 = vor.u32 %v3936_v39, %v3451_v37  ;;  %v3371_v3 = vld [vmem:[%s5967_s1 + $0x550] sm:$0xf]  ;;  %v4577_v5 = vor.u32 %v3724_v45, %v2587_v43 }
  0x38   :  { %1829 = vmatpush.bf16.msrb.mxu0 %v2964_v6  ;;  %v3315_v61 = vld [vmem:[%s5967_s1 + $0x4e0] sm:$0xf]  ;;  %v3902_v62 = vld [vmem:[%s5967_s1 + $0x4e4] sm:$0xf0]  ;;  %v3916_v4 = vld [vmem:[%s5967_s1 + $0x554] sm:$0xf0]  ;;  %v4579_v6 = vor.u32 %v3716_v46, %v2589_v49  ;;  %v3252_v7 = vor.u32 %v3886_v58, %v3251_v55 }
  0x39   :  { %1848 = vmatpush.bf16.msrb.mxu1 %v3028_v0  ;;  %v3443_v63 = vld [vmem:[%s5967_s1 + $0x5e0] sm:$0xf]  ;;  %v4564_v0 = vor.u32 %v3723_v31, %v2579_v30  ;;  %v3934_v2 = vld [vmem:[%s5967_s1 + $0x5e4] sm:$0xf0]  ;;  %v3884_v10 = vld [vmem:[%s5967_s1 + $0x454] sm:$0xf0]  ;;  %v3372_v12 = vor.u32 %v3916_v4, %v3371_v3 }
  0x3a   :  { %1867 = vmatpush.bf16.msrb.mxu2 %v3092_v60  ;;  %v3380_v60 = vor.u32 %v3918_v41, %v3379_v40  ;;  %v3444_v11 = vor.u32 %v3934_v2, %v3443_v63  ;;  %v3900_v14 = vld [vmem:[%s5967_s1 + $0x4d4] sm:$0xf0]  ;;  %v3435_v15 = vld [vmem:[%s5967_s1 + $0x5d0] sm:$0xf]  ;;  %v3363_v17 = vld [vmem:[%s5967_s1 + $0x540] sm:$0xf] }
  0x3b   :  { %1886 = vmatpush.bf16.msrb.mxu3 %v3156_v8  ;;  %v3316_v8 = vor.u32 %v3902_v62, %v3315_v61  ;;  %v3932_v16 = vld [vmem:[%s5967_s1 + $0x5d4] sm:$0xf0]  ;;  %v3914_v18 = vld [vmem:[%s5967_s1 + $0x544] sm:$0xf0]  ;;  %v3235_v21 = vld [vmem:[%s5967_s1 + $0x440] sm:$0xf] }
  0x3c   :  { %1830 = vmatpush.bf16.msrb.mxu0 %v2956_v20  ;;  %v3882_v22 = vld [vmem:[%s5967_s1 + $0x444] sm:$0xf0]  ;;  %v3436_v23 = vor.u32 %v3932_v16, %v3435_v15  ;;  %v3427_v27 = vld [vmem:[%s5967_s1 + $0x5c0] sm:$0xf]  ;;  %v3912_v30 = vld [vmem:[%s5967_s1 + $0x534] sm:$0xf0] }
  0x3d   :  { %1849 = vmatpush.bf16.msrb.mxu1 %v3020_v13  ;;  %v3307_v13 = vld [vmem:[%s5967_s1 + $0x4d0] sm:$0xf]  ;;  %v3898_v26 = vld [vmem:[%s5967_s1 + $0x4c4] sm:$0xf0]  ;;  %v3236_v31 = vor.u32 %v3882_v22, %v3235_v21  ;;  %v2645_v39 = vld [vmem:[%s5968_s0 + $0xd0] sm:$0xf0] }
  0x3e   :  { %1868 = vmatpush.bf16.msrb.mxu2 %v3084_v9  ;;  %v3243_v9 = vld [vmem:[%s5967_s1 + $0x450] sm:$0xf]  ;;  %v3308_v20 = vor.u32 %v3900_v14, %v3307_v13  ;;  %v3930_v28 = vld [vmem:[%s5967_s1 + $0x5c4] sm:$0xf0]  ;;  %v3928_v45 = vld [vmem:[%s5967_s1 + $0x5b4] sm:$0xf0] }
  0x3f   :  { %1887 = vmatpush.bf16.msrb.mxu3 %v3148_v24  ;;  %v3244_v19 = vor.u32 %v3884_v10, %v3243_v9  ;;  %v3364_v24 = vor.u32 %v3914_v18, %v3363_v17  ;;  %v3227_v33 = vld [vmem:[%s5967_s1 + $0x430] sm:$0xf]  ;;  %v3428_v35 = vor.u32 %v3930_v28, %v3427_v27  ;;  %v3347_v46 = vld [vmem:[%s5967_s1 + $0x520] sm:$0xf]  ;;  %v2651_v49 = vld [vmem:[%s5968_s0 + $0x98] sm:$0xf] }
  0x40   :  { %1831 = vmatpush.bf16.msrb.mxu0 %v2948_v42  ;;  %v2643_v36 = vld [vmem:[%s5968_s0 + $0x90] sm:$0xf]  ;;  %v3896_v42 = vld [vmem:[%s5967_s1 + $0x4b4] sm:$0xf0]  ;;  %v3732_v55 = vld [vmem:[%s5968_s0 + $0x9c] sm:$0xf] }
  0x41   :  { %1850 = vmatpush.bf16.msrb.mxu1 %v3012_v29  ;;  %v3355_v29 = vld [vmem:[%s5967_s1 + $0x530] sm:$0xf]  ;;  %v2653_v58 = vld [vmem:[%s5968_s0 + $0xd8] sm:$0xf0]  ;;  %v3219_v61 = vld [vmem:[%s5967_s1 + $0x420] sm:$0xf] }
  0x42   :  { %1869 = vmatpush.bf16.msrb.mxu2 %v3076_v25  ;;  %v3299_v25 = vld [vmem:[%s5967_s1 + $0x4c0] sm:$0xf]  ;;  %v3739_v37 = vld [vmem:[%s5968_s0 + $0xcc] sm:$0xf0]  ;;  %v3356_v40 = vor.u32 %v3912_v30, %v3355_v29  ;;  %v3878_v62 = vld [vmem:[%s5967_s1 + $0x424] sm:$0xf0]  ;;  %v4711_v14 = vor.u32 %v3732_v55, %v2653_v58 }
  0x43   :  { %1888 = vmatpush.bf16.msrb.mxu3 %v3140_v47  ;;  %1832 = vmatmul.bf16.vlgmr.msrb.gmra.mxu0 %v4564_v0  ;;  %v3300_v32 = vor.u32 %v3898_v26, %v3299_v25  ;;  %v3291_v41 = vld [vmem:[%s5967_s1 + $0x4b0] sm:$0xf]  ;;  %v3910_v47 = vld [vmem:[%s5967_s1 + $0x524] sm:$0xf0]  ;;  %v3283_v3 = vld [vmem:[%s5967_s1 + $0x4a0] sm:$0xf]  ;;  %v3220_v15 = vor.u32 %v3878_v62, %v3219_v61 }
  0x44   :  { %1900 = vmatpush.bf16.msra.mxu0 %v3260_v52  ;;  %1851 = vmatmul.bf16.vlgmr.msrb.gmra.mxu1 %v4566_v1  ;;  %v3419_v43 = vld [vmem:[%s5967_s1 + $0x5b0] sm:$0xf]  ;;  %v3740_v52 = vld [vmem:[%s5968_s0 + $0xd4] sm:$0xf0]  ;;  %v3348_v2 = vor.u32 %v3910_v47, %v3347_v46  ;;  %v3894_v4 = vld [vmem:[%s5967_s1 + $0x4a4] sm:$0xf0] }
  0x45   :  { %1919 = vmatpush.bf16.msra.mxu1 %v3324_v38  ;;  %1870 = vmatmul.bf16.vlgmr.msrb.gmra.mxu2 %v4577_v5  ;;  %v3731_v38 = vld [vmem:[%s5968_s0 + $0x94] sm:$0xf]  ;;  %v3420_v63 = vor.u32 %v3928_v45, %v3419_v43  ;;  %v3926_v10 = vld [vmem:[%s5967_s1 + $0x5a4] sm:$0xf0]  ;;  %v4709_v13 = vor.u32 %v3740_v52, %v2651_v49  ;;  %v3284_v16 = vor.u32 %v3894_v4, %v3283_v3  ;;  %v3211_v17 = vld [vmem:[%s5967_s1 + $0x410] sm:$0xf] }
  0x46   :  { %1938 = vmatpush.bf16.msra.mxu2 %v3388_v34  ;;  %1889 = vmatmul.bf16.vlgmr.msrb.gmra.mxu3 %v4579_v6  ;;  %v3880_v34 = vld [vmem:[%s5967_s1 + $0x434] sm:$0xf0]  ;;  %v4698_v9 = vor.u32 %v3731_v38, %v2645_v39  ;;  %v3275_v21 = vld [vmem:[%s5967_s1 + $0x490] sm:$0xf]  ;;  %v3331_v25 = vld [vmem:[%s5967_s1 + $0x500] sm:$0xf] }
  0x47   :  { %1957 = vmatpush.bf16.msra.mxu3 %v3452_v59  ;;  %v3228_v59 = vor.u32 %v3880_v34, %v3227_v33  ;;  %v3876_v18 = vld [vmem:[%s5967_s1 + $0x414] sm:$0xf0]  ;;  %v3906_v26 = vld [vmem:[%s5967_s1 + $0x504] sm:$0xf0]  ;;  %v3643_v27 = vld [vmem:[%s5967_s1 + $0x770] sm:$0xf] }
  0x48   :  { %1901 = vmatpush.bf16.msra.mxu0 %v3252_v7  ;;  %v3411_v7 = vld [vmem:[%s5967_s1 + $0x5a0] sm:$0xf]  ;;  %v3892_v22 = vld [vmem:[%s5967_s1 + $0x494] sm:$0xf0]  ;;  %v3212_v29 = vor.u32 %v3876_v18, %v3211_v17  ;;  %v3922_v38 = vld [vmem:[%s5967_s1 + $0x584] sm:$0xf0] }
  0x49   :  { %1920 = vmatpush.bf16.msra.mxu1 %v3316_v8  ;;  %v4696_v8 = vor.u32 %v3739_v37, %v2643_v36  ;;  %v3984_v28 = vld [vmem:[%s5967_s1 + $0x774] sm:$0xf0]  ;;  %v3276_v30 = vor.u32 %v3892_v22, %v3275_v21  ;;  %v3267_v33 = vld [vmem:[%s5967_s1 + $0x480] sm:$0xf]  ;;  %v3890_v36 = vld [vmem:[%s5967_s1 + $0x484] sm:$0xf0] }
  0x4a   :  { %1939 = vmatpush.bf16.msra.mxu2 %v3380_v60  ;;  %v3292_v60 = vor.u32 %v3896_v42, %v3291_v41  ;;  %v3395_v37 = vld [vmem:[%s5967_s1 + $0x580] sm:$0xf]  ;;  %v3644_v39 = vor.u32 %v3984_v28, %v3643_v27  ;;  %v3952_v41 = vld [vmem:[%s5967_s1 + $0x674] sm:$0xf0]  ;;  %v3579_v42 = vld [vmem:[%s5967_s1 + $0x6f0] sm:$0xf]  ;;  %v3268_v49 = vor.u32 %v3890_v36, %v3267_v33 }
  0x4b   :  { %1958 = vmatpush.bf16.msra.mxu3 %v3444_v11  ;;  %v3339_v11 = vld [vmem:[%s5967_s1 + $0x510] sm:$0xf]  ;;  %v3968_v43 = vld [vmem:[%s5967_s1 + $0x6f4] sm:$0xf0]  ;;  %v3635_v52 = vld [vmem:[%s5967_s1 + $0x760] sm:$0xf]  ;;  %v3396_v58 = vor.u32 %v3922_v38, %v3395_v37 }
  0x4c   :  { %1902 = vmatpush.bf16.msra.mxu0 %v3244_v19  ;;  %v3412_v19 = vor.u32 %v3926_v10, %v3411_v7  ;;  %v3707_v45 = vld [vmem:[%s5967_s1 + $0x7f0] sm:$0xf]  ;;  %v4000_v46 = vld [vmem:[%s5967_s1 + $0x7f4] sm:$0xf0]  ;;  %v3982_v55 = vld [vmem:[%s5967_s1 + $0x764] sm:$0xf0] }
  0x4d   :  { %1921 = vmatpush.bf16.msra.mxu1 %v3308_v20  ;;  %v3717_v61 = vld [vmem:[%s5968_s0 + $0x24] sm:$0xf]  ;;  %v3708_v3 = vor.u32 %v4000_v46, %v3707_v45  ;;  %v3507_v4 = vld [vmem:[%s5967_s1 + $0x660] sm:$0xf]  ;;  %v3950_v7 = vld [vmem:[%s5967_s1 + $0x664] sm:$0xf0] }
  0x4e   :  { %1940 = vmatpush.bf16.msra.mxu2 %v3372_v12  ;;  %v3908_v12 = vld [vmem:[%s5967_s1 + $0x514] sm:$0xf0]  ;;  %v2603_v10 = vld [vmem:[%s5968_s0 + $0x28] sm:$0xf]  ;;  %v3571_v17 = vld [vmem:[%s5967_s1 + $0x6e0] sm:$0xf] }
  0x4f   :  { %1959 = vmatpush.bf16.msra.mxu3 %v3436_v23  ;;  %v3340_v20 = vor.u32 %v3908_v12, %v3339_v11  ;;  %v3403_v23 = vld [vmem:[%s5967_s1 + $0x590] sm:$0xf]  ;;  %v3726_v11 = vld [vmem:[%s5968_s0 + $0x64] sm:$0xf0]  ;;  %v3718_v12 = vld [vmem:[%s5968_s0 + $0x2c] sm:$0xf] }
  0x50   :  { %1903 = vmatpush.bf16.msra.mxu0 %v3236_v31  ;;  %v3203_v31 = vld [vmem:[%s5967_s1 + $0x400] sm:$0xf]  ;;  %v3966_v18 = vld [vmem:[%s5967_s1 + $0x6e4] sm:$0xf0]  ;;  %v3627_v22 = vld [vmem:[%s5967_s1 + $0x750] sm:$0xf]  ;;  %v4847_v28 = vor.u32 %v3726_v11, %v2603_v10 }
  0x51   :  { %1922 = vmatpush.bf16.msra.mxu1 %v3300_v32  ;;  %v3874_v32 = vld [vmem:[%s5967_s1 + $0x404] sm:$0xf0]  ;;  %v3948_v27 = vld [vmem:[%s5967_s1 + $0x654] sm:$0xf0]  ;;  %v3691_v36 = vld [vmem:[%s5967_s1 + $0x7d0] sm:$0xf] }
  0x52   :  { %1941 = vmatpush.bf16.msra.mxu2 %v3364_v24  ;;  %v3924_v24 = vld [vmem:[%s5967_s1 + $0x594] sm:$0xf0]  ;;  %v3204_v47 = vor.u32 %v3874_v32, %v3203_v31  ;;  %v3998_v21 = vld [vmem:[%s5967_s1 + $0x7e4] sm:$0xf0]  ;;  %v3563_v32 = vld [vmem:[%s5967_s1 + $0x6d0] sm:$0xf] }
  0x53   :  { %1960 = vmatpush.bf16.msra.mxu3 %v3428_v35  ;;  %1837 = vmatmul.bf16.gmra.mxu0 %v4696_v8  ;;  %v3404_v34 = vor.u32 %v3924_v24, %v3403_v23  ;;  %v3332_v35 = vor.u32 %v3906_v26, %v3331_v25  ;;  %v3980_v25 = vld [vmem:[%s5967_s1 + $0x754] sm:$0xf0]  ;;  %v3499_v26 = vld [vmem:[%s5967_s1 + $0x650] sm:$0xf]  ;;  %v3619_v38 = vld [vmem:[%s5967_s1 + $0x740] sm:$0xf] }
  0x54   :  { %1904 = vmatpush.bf16.msra.mxu0 %v3228_v59  ;;  %1856 = vmatmul.bf16.gmra.mxu1 %v4698_v9  ;;  %v2595_v59 = vld [vmem:[%s5968_s0 + $0x20] sm:$0xf]  ;;  %v3964_v33 = vld [vmem:[%s5967_s1 + $0x6d4] sm:$0xf0]  ;;  %v3962_v46 = vld [vmem:[%s5967_s1 + $0x6c4] sm:$0xf0] }
  0x55   :  { %1923 = vmatpush.bf16.msra.mxu1 %v3292_v60  ;;  %1875 = vmatmul.bf16.gmra.mxu2 %v4709_v13  ;;  %v3725_v60 = vld [vmem:[%s5968_s0 + $0x5c] sm:$0xf0]  ;;  %v3996_v37 = vld [vmem:[%s5967_s1 + $0x7d4] sm:$0xf0]  ;;  %v3733_v10 = vld [vmem:[%s5968_s0 + $0xa4] sm:$0xf] }
  0x56   :  { %1942 = vmatpush.bf16.msra.mxu2 %v3356_v40  ;;  %1894 = vmatmul.bf16.gmra.mxu3 %v4711_v14  ;;  %v3515_v40 = vld [vmem:[%s5967_s1 + $0x670] sm:$0xf]  ;;  %v4834_v23 = vor.u32 %v3725_v60, %v2595_v59  ;;  %v3555_v45 = vld [vmem:[%s5967_s1 + $0x6c0] sm:$0xf]  ;;  %v3976_v59 = vld [vmem:[%s5967_s1 + $0x734] sm:$0xf0] }
  0x57   :  { %1961 = vmatpush.bf16.msra.mxu3 %v3420_v63  ;;  %v3516_v62 = vor.u32 %v3952_v41, %v3515_v40  ;;  %v2597_v63 = vld [vmem:[%s5968_s0 + $0x60] sm:$0xf0]  ;;  %v3491_v40 = vld [vmem:[%s5967_s1 + $0x640] sm:$0xf]  ;;  %v3946_v41 = vld [vmem:[%s5967_s1 + $0x644] sm:$0xf0] }
  0x58   :  { %1905 = vmatpush.bf16.msra.mxu0 %v3220_v15  ;;  %v3636_v15 = vor.u32 %v3982_v55, %v3635_v52  ;;  %v4836_v24 = vor.u32 %v3717_v61, %v2597_v63  ;;  %v3683_v52 = vld [vmem:[%s5967_s1 + $0x7c0] sm:$0xf]  ;;  %v3994_v55 = vld [vmem:[%s5967_s1 + $0x7c4] sm:$0xf0]  ;;  %v3483_v60 = vld [vmem:[%s5967_s1 + $0x630] sm:$0xf] }
  0x59   :  { %1924 = vmatpush.bf16.msra.mxu1 %v3284_v16  ;;  %v2605_v16 = vld [vmem:[%s5968_s0 + $0x68] sm:$0xf0]  ;;  %v3944_v61 = vld [vmem:[%s5967_s1 + $0x634] sm:$0xf0]  ;;  %v3684_v63 = vor.u32 %v3994_v55, %v3683_v52  ;;  %v2661_v11 = vld [vmem:[%s5968_s0 + $0xe0] sm:$0xf0] }
  0x5a   :  { %1943 = vmatpush.bf16.msra.mxu2 %v3348_v2  ;;  %v3580_v2 = vor.u32 %v3968_v43, %v3579_v42  ;;  %v3564_v42 = vor.u32 %v3964_v33, %v3563_v32  ;;  %v3692_v43 = vor.u32 %v3996_v37, %v3691_v36  ;;  %v3539_v32 = vld [vmem:[%s5967_s1 + $0x6a0] sm:$0xf]  ;;  %v3958_v33 = vld [vmem:[%s5967_s1 + $0x6a4] sm:$0xf0]  ;;  %v3531_v52 = vld [vmem:[%s5967_s1 + $0x690] sm:$0xf] }
  0x5b   :  { %1962 = vmatpush.bf16.msra.mxu3 %v3412_v19  ;;  %v3508_v19 = vor.u32 %v3950_v7, %v3507_v4  ;;  %v2659_v4 = vld [vmem:[%s5968_s0 + $0xa0] sm:$0xf]  ;;  %v3990_v37 = vld [vmem:[%s5967_s1 + $0x7a4] sm:$0xf0]  ;;  %v3956_v55 = vld [vmem:[%s5967_s1 + $0x694] sm:$0xf0] }
  0x5c   :  { %1906 = vmatpush.bf16.msra.mxu0 %v3212_v29  ;;  %v4849_v29 = vor.u32 %v3718_v12, %v2605_v16  ;;  %v3741_v7 = vld [vmem:[%s5968_s0 + $0xdc] sm:$0xf0]  ;;  %v3675_v16 = vld [vmem:[%s5967_s1 + $0x7b0] sm:$0xf] }
  0x5d   :  { %1925 = vmatpush.bf16.msra.mxu1 %v3276_v30  ;;  %v3572_v30 = vor.u32 %v3966_v18, %v3571_v17  ;;  %v3992_v17 = vld [vmem:[%s5967_s1 + $0x7b4] sm:$0xf0]  ;;  %v3603_v18 = vld [vmem:[%s5967_s1 + $0x720] sm:$0xf] }
  0x5e   :  { %1944 = vmatpush.bf16.msra.mxu2 %v3340_v20  ;;  %v3699_v20 = vld [vmem:[%s5967_s1 + $0x7e0] sm:$0xf] }
  0x5f   :  { %1963 = vmatpush.bf16.msra.mxu3 %v3404_v34  ;;  %v3700_v31 = vor.u32 %v3998_v21, %v3699_v20  ;;  %v3628_v34 = vor.u32 %v3980_v25, %v3627_v22  ;;  %v3475_v20 = vld [vmem:[%s5967_s1 + $0x620] sm:$0xf]  ;;  %v3942_v21 = vld [vmem:[%s5967_s1 + $0x624] sm:$0xf0] }
  0x60   :  { %1907 = vmatpush.bf16.msra.mxu0 %v3204_v47  ;;  %v2667_v22 = vld [vmem:[%s5968_s0 + $0xa8] sm:$0xf]  ;;  %v3667_v36 = vld [vmem:[%s5967_s1 + $0x7a0] sm:$0xf] }
  0x61   :  { %1926 = vmatpush.bf16.msra.mxu1 %v3268_v49  ;;  %v3492_v49 = vor.u32 %v3946_v41, %v3491_v40  ;;  %v3742_v25 = vld [vmem:[%s5968_s0 + $0xe4] sm:$0xf0]  ;;  %v4968_v40 = vor.u32 %v3733_v10, %v2661_v11  ;;  %v3972_v41 = vld [vmem:[%s5967_s1 + $0x714] sm:$0xf0]  ;;  %v3759_v10 = vld [vmem:[%s5967_s1 + $0x74] sm:$0xf] }
  0x62   :  { %1945 = vmatpush.bf16.msra.mxu2 %v3332_v35  ;;  %v3500_v35 = vor.u32 %v3948_v27, %v3499_v26  ;;  %v3734_v26 = vld [vmem:[%s5968_s0 + $0xac] sm:$0xf]  ;;  %v2749_v11 = vld [vmem:[%s5967_s1 + $0x78] sm:$0xf0] }
  0x63   :  { %1964 = vmatpush.bf16.msra.mxu3 %v3396_v58  ;;  %1908 = vmatmul.bf16.vlgmr.msra.gmra.mxu0 %v4834_v23  ;;  %v3611_v58 = vld [vmem:[%s5967_s1 + $0x730] sm:$0xf]  ;;  %v2669_v27 = vld [vmem:[%s5968_s0 + $0xe8] sm:$0xf0] }
  0x64   :  { %1976 = vmatpush.bf16.msrb.mxu0 %v3516_v62  ;;  %1927 = vmatmul.bf16.vlgmr.msra.gmra.mxu1 %v4836_v24  ;;  %v3556_v62 = vor.u32 %v3962_v46, %v3555_v45  ;;  %v3612_v12 = vor.u32 %v3976_v59, %v3611_v58  ;;  %v4979_v45 = vor.u32 %v3742_v25, %v2667_v22  ;;  %v3659_v58 = vld [vmem:[%s5967_s1 + $0x790] sm:$0xf]  ;;  %v3775_v22 = vld [vmem:[%s5967_s1 + $0xf4] sm:$0xf]  ;;  %v2813_v25 = vld [vmem:[%s5967_s1 + $0xf8] sm:$0xf0] }
  0x65   :  { %1995 = vmatpush.bf16.msrb.mxu1 %v3580_v2  ;;  %1946 = vmatmul.bf16.vlgmr.msra.gmra.mxu2 %v4847_v28  ;;  %v3547_v2 = vld [vmem:[%s5967_s1 + $0x6b0] sm:$0xf]  ;;  %v4981_v46 = vor.u32 %v3734_v26, %v2669_v27  ;;  %v2752_v27 = vor.u32 %v3759_v10, %v2749_v11 }
  0x66   :  { %2014 = vmatpush.bf16.msrb.mxu2 %v3644_v39  ;;  %v3978_v39 = vld [vmem:[%s5967_s1 + $0x744] sm:$0xf0]  ;;  %1965 = vmatmul.bf16.vlgmr.msra.gmra.mxu3 %v4849_v29 }
  0x67   :  { %2033 = vmatpush.bf16.msrb.mxu3 %v3708_v3  ;;  %v3620_v47 = vor.u32 %v3978_v39, %v3619_v38  ;;  %v3960_v3 = vld [vmem:[%s5967_s1 + $0x6b4] sm:$0xf0]  ;;  %v3595_v38 = vld [vmem:[%s5967_s1 + $0x710] sm:$0xf]  ;;  %v4966_v39 = vor.u32 %v3741_v7, %v2659_v4  ;;  %v3791_v4 = vld [vmem:[%s5967_s1 + $0x174] sm:$0xf] }
  0x68   :  { %1977 = vmatpush.bf16.msrb.mxu0 %v3508_v19  ;;  %v3974_v19 = vld [vmem:[%s5967_s1 + $0x724] sm:$0xf0]  ;;  %v3596_v59 = vor.u32 %v3972_v41, %v3595_v38  ;;  %v2877_v7 = vld [vmem:[%s5967_s1 + $0x178] sm:$0xf0]  ;;  %v2611_v38 = vld [vmem:[%s5968_s0 + $0x30] sm:$0xf] }
  0x69   :  { %1996 = vmatpush.bf16.msrb.mxu1 %v3572_v30  ;;  %v3548_v30 = vor.u32 %v3960_v3, %v3547_v2  ;;  %v3459_v2 = vld [vmem:[%s5967_s1 + $0x600] sm:$0xf]  ;;  %v3938_v3 = vld [vmem:[%s5967_s1 + $0x604] sm:$0xf0]  ;;  %v2880_v26 = vor.u32 %v3791_v4, %v2877_v7  ;;  %v3727_v41 = vld [vmem:[%s5968_s0 + $0x6c] sm:$0xf0] }
  0x6a   :  { %2015 = vmatpush.bf16.msrb.mxu2 %v3636_v15  ;;  %v3484_v15 = vor.u32 %v3944_v61, %v3483_v60  ;;  %v3988_v61 = vld [vmem:[%s5967_s1 + $0x794] sm:$0xf0]  ;;  %v3787_v4 = vld [vmem:[%s5967_s1 + $0x154] sm:$0xf]  ;;  %v2861_v7 = vld [vmem:[%s5967_s1 + $0x158] sm:$0xf0] }
  0x6b   :  { %2034 = vmatpush.bf16.msrb.mxu3 %v3700_v31  ;;  %v3676_v31 = vor.u32 %v3992_v17, %v3675_v16  ;;  %v3523_v16 = vld [vmem:[%s5967_s1 + $0x680] sm:$0xf]  ;;  %v3954_v17 = vld [vmem:[%s5967_s1 + $0x684] sm:$0xf0] }
  0x6c   :  { %1978 = vmatpush.bf16.msrb.mxu0 %v3500_v35  ;;  %v3476_v35 = vor.u32 %v3942_v21, %v3475_v20  ;;  %v3460_v20 = vor.u32 %v3938_v3, %v3459_v2  ;;  %v3986_v21 = vld [vmem:[%s5967_s1 + $0x784] sm:$0xf0]  ;;  %v3720_v2 = vld [vmem:[%s5968_s0 + $0x3c] sm:$0xf] }
  0x6d   :  { %1997 = vmatpush.bf16.msrb.mxu1 %v3564_v42  ;;  %v3467_v42 = vld [vmem:[%s5967_s1 + $0x610] sm:$0xf]  ;;  %v2621_v3 = vld [vmem:[%s5968_s0 + $0x78] sm:$0xf0] }
  0x6e   :  { %2016 = vmatpush.bf16.msrb.mxu2 %v3628_v34  ;;  %v3604_v34 = vor.u32 %v3974_v19, %v3603_v18  ;;  %v3651_v18 = vld [vmem:[%s5967_s1 + $0x780] sm:$0xf] }
  0x6f   :  { %2035 = vmatpush.bf16.msrb.mxu3 %v3692_v43  ;;  %v3940_v43 = vld [vmem:[%s5967_s1 + $0x614] sm:$0xf0] }
  0x70   :  { %1979 = vmatpush.bf16.msrb.mxu0 %v3492_v49  ;;  %v3668_v49 = vor.u32 %v3990_v37, %v3667_v36  ;;  %v3468_v60 = vor.u32 %v3940_v43, %v3467_v42  ;;  %v3524_v36 = vor.u32 %v3954_v17, %v3523_v16  ;;  %v3652_v37 = vor.u32 %v3986_v21, %v3651_v18  ;;  %v3719_v42 = vld [vmem:[%s5968_s0 + $0x34] sm:$0xf]  ;;  %v2925_v21 = vld [vmem:[%s5967_s1 + $0x1d8] sm:$0xf0] }
  0x71   :  { %1998 = vmatpush.bf16.msrb.mxu1 %v3556_v62  ;;  %v3587_v62 = vld [vmem:[%s5967_s1 + $0x700] sm:$0xf]  ;;  %v2613_v43 = vld [vmem:[%s5968_s0 + $0x70] sm:$0xf0]  ;;  %v5110_v17 = vor.u32 %v3727_v41, %v2611_v38  ;;  %v3801_v38 = vld [vmem:[%s5967_s1 + $0x1c4] sm:$0xf] }
  0x72   :  { %2017 = vmatpush.bf16.msrb.mxu2 %v3620_v47  ;;  %v3540_v47 = vor.u32 %v3958_v33, %v3539_v32  ;;  %v3789_v32 = vld [vmem:[%s5967_s1 + $0x164] sm:$0xf]  ;;  %v2869_v33 = vld [vmem:[%s5967_s1 + $0x168] sm:$0xf0]  ;;  %v3771_v16 = vld [vmem:[%s5967_s1 + $0xd4] sm:$0xf]  ;;  %v5112_v18 = vor.u32 %v3719_v42, %v2613_v43 }
  0x73   :  { %2036 = vmatpush.bf16.msrb.mxu3 %v3684_v63  ;;  %v3970_v63 = vld [vmem:[%s5967_s1 + $0x704] sm:$0xf0]  ;;  %1913 = vmatmul.bf16.gmra.mxu0 %v4966_v39  ;;  %v2917_v41 = vld [vmem:[%s5967_s1 + $0x1c8] sm:$0xf0] }
  0x74   :  { %1980 = vmatpush.bf16.msrb.mxu0 %v3484_v15  ;;  %1932 = vmatmul.bf16.gmra.mxu1 %v4968_v40  ;;  %v3660_v15 = vor.u32 %v3988_v61, %v3659_v58  ;;  %v3588_v19 = vor.u32 %v3970_v63, %v3587_v62  ;;  %v2933_v61 = vld [vmem:[%s5967_s1 + $0x1e8] sm:$0xf0]  ;;  %v2619_v62 = vld [vmem:[%s5968_s0 + $0x38] sm:$0xf] }
  0x75   :  { %1999 = vmatpush.bf16.msrb.mxu1 %v3548_v30  ;;  %1951 = vmatmul.bf16.gmra.mxu2 %v4979_v45  ;;  %v3807_v30 = vld [vmem:[%s5967_s1 + $0x1f4] sm:$0xf]  ;;  %v3728_v63 = vld [vmem:[%s5968_s0 + $0x74] sm:$0xf0] }
  0x76   :  { %2018 = vmatpush.bf16.msrb.mxu2 %v3612_v12  ;;  %1970 = vmatmul.bf16.gmra.mxu3 %v4981_v46  ;;  %v3532_v12 = vor.u32 %v3956_v55, %v3531_v52  ;;  %v3773_v52 = vld [vmem:[%s5967_s1 + $0xe4] sm:$0xf]  ;;  %v2872_v55 = vor.u32 %v3789_v32, %v2869_v33 }
  0x77   :  { %2037 = vmatpush.bf16.msrb.mxu3 %v3676_v31  ;;  %v2941_v31 = vld [vmem:[%s5967_s1 + $0x1f8] sm:$0xf0] }
  0x78   :  { %1981 = vmatpush.bf16.msrb.mxu0 %v3476_v35  ;;  %v2741_v35 = vld [vmem:[%s5967_s1 + $0x68] sm:$0xf0] }
  0x79   :  { %2000 = vmatpush.bf16.msrb.mxu1 %v3540_v47  ;;  %v2816_v47 = vor.u32 %v3775_v22, %v2813_v25  ;;  %v5123_v22 = vor.u32 %v3728_v63, %v2619_v62  ;;  %v5125_v25 = vor.u32 %v3720_v2, %v2621_v3  ;;  %v3799_v62 = vld [vmem:[%s5967_s1 + $0x1b4] sm:$0xf]  ;;  %v2909_v63 = vld [vmem:[%s5967_s1 + $0x1b8] sm:$0xf0] }
  0x7a   :  { %2019 = vmatpush.bf16.msrb.mxu2 %v3604_v34  ;;  %v3757_v34 = vld [vmem:[%s5967_s1 + $0x64] sm:$0xf] }
  0x7b   :  { %2038 = vmatpush.bf16.msrb.mxu3 %v3668_v49  ;;  %v2944_v49 = vor.u32 %v3807_v30, %v2941_v31  ;;  %v2744_v58 = vor.u32 %v3757_v34, %v2741_v35  ;;  %v3785_v30 = vld [vmem:[%s5967_s1 + $0x144] sm:$0xf]  ;;  %v2853_v31 = vld [vmem:[%s5967_s1 + $0x148] sm:$0xf0] }
  0x7c   :  { %1982 = vmatpush.bf16.msrb.mxu0 %v3468_v60  ;;  %v3805_v60 = vld [vmem:[%s5967_s1 + $0x1e4] sm:$0xf]  ;;  %v2725_v35 = vld [vmem:[%s5967_s1 + $0x48] sm:$0xf0]  ;;  %v2856_v42 = vor.u32 %v3785_v30, %v2853_v31 }
  0x7d   :  { %2001 = vmatpush.bf16.msrb.mxu1 %v3532_v12  ;;  %v2936_v11 = vor.u32 %v3805_v60, %v2933_v61  ;;  %v3755_v12 = vld [vmem:[%s5967_s1 + $0x54] sm:$0xf]  ;;  %v3753_v34 = vld [vmem:[%s5967_s1 + $0x44] sm:$0xf]  ;;  %v2781_v61 = vld [vmem:[%s5967_s1 + $0xb8] sm:$0xf0] }
  0x7e   :  { %2020 = vmatpush.bf16.msrb.mxu2 %v3596_v59  ;;  %v2805_v59 = vld [vmem:[%s5967_s1 + $0xe8] sm:$0xf0]  ;;  %v2728_v43 = vor.u32 %v3753_v34, %v2725_v35  ;;  %v3767_v60 = vld [vmem:[%s5967_s1 + $0xb4] sm:$0xf]  ;;  %v3797_v30 = vld [vmem:[%s5967_s1 + $0x1a4] sm:$0xf] }
  0x7f   :  { %2039 = vmatpush.bf16.msrb.mxu3 %v3660_v15  ;;  %v2808_v10 = vor.u32 %v3773_v52, %v2805_v59  ;;  %v2733_v15 = vld [vmem:[%s5967_s1 + $0x58] sm:$0xf0]  ;;  %v2901_v31 = vld [vmem:[%s5967_s1 + $0x1a8] sm:$0xf0] }
  0x80   :  { %1983 = vmatpush.bf16.msrb.mxu0 %v3460_v20  ;;  %v3803_v20 = vld [vmem:[%s5967_s1 + $0x1d4] sm:$0xf]  ;;  %v2717_v59 = vld [vmem:[%s5967_s1 + $0x38] sm:$0xf0] }
  0x81   :  { %2002 = vmatpush.bf16.msrb.mxu1 %v3524_v36  ;;  %v2928_v33 = vor.u32 %v3803_v20, %v2925_v21  ;;  %v3769_v36 = vld [vmem:[%s5967_s1 + $0xc4] sm:$0xf]  ;;  %v2709_v21 = vld [vmem:[%s5967_s1 + $0x28] sm:$0xf0]  ;;  %v3736_v34 = vld [vmem:[%s5968_s0 + $0xbc] sm:$0xf] }
  0x82   :  { %2021 = vmatpush.bf16.msrb.mxu2 %v3588_v19  ;;  %v2797_v19 = vld [vmem:[%s5967_s1 + $0xd8] sm:$0xf0]  ;;  %v3749_v20 = vld [vmem:[%s5967_s1 + $0x24] sm:$0xf] }
  0x83   :  { %2040 = vmatpush.bf16.msrb.mxu3 %v3652_v37  ;;  %v2800_v32 = vor.u32 %v3771_v16, %v2797_v19  ;;  %1984 = vmatmul.bf16.vlgmr.msrb.gmra.mxu0 %v5110_v17  ;;  %v2789_v37 = vld [vmem:[%s5967_s1 + $0xc8] sm:$0xf0]  ;;  %v2784_v16 = vor.u32 %v3767_v60, %v2781_v61  ;;  %v2912_v19 = vor.u32 %v3799_v62, %v2909_v63  ;;  %v2685_v35 = vld [vmem:[%s5968_s0 + $0xf8] sm:$0xf0]  ;;  %v3795_v60 = vld [vmem:[%s5967_s1 + $0x194] sm:$0xf] }
  0x84   :  { %2052 = vmatpush.bf16.msra.mxu0 %v2752_v27  ;;  %v2736_v27 = vor.u32 %v3755_v12, %v2733_v15  ;;  %2003 = vmatmul.bf16.vlgmr.msrb.gmra.mxu1 %v5112_v18  ;;  %v2792_v52 = vor.u32 %v3769_v36, %v2789_v37  ;;  %v3735_v12 = vld [vmem:[%s5968_s0 + $0xb4] sm:$0xf]  ;;  %v2712_v37 = vor.u32 %v3749_v20, %v2709_v21  ;;  %v2893_v61 = vld [vmem:[%s5967_s1 + $0x198] sm:$0xf0]  ;;  %v3793_v20 = vld [vmem:[%s5967_s1 + $0x184] sm:$0xf] }
  0x85   :  { %2071 = vmatpush.bf16.msra.mxu1 %v2816_v47  ;;  %2022 = vmatmul.bf16.vlgmr.msrb.gmra.mxu2 %v5123_v22  ;;  %v3783_v47 = vld [vmem:[%s5967_s1 + $0x134] sm:$0xf]  ;;  %v5257_v63 = vor.u32 %v3736_v34, %v2685_v35  ;;  %v2885_v21 = vld [vmem:[%s5967_s1 + $0x188] sm:$0xf0]  ;;  %v3069_v35 = vld [vmem:[%s5967_s1 + $0x2f8] sm:$0xf0] }
  0x86   :  { %2090 = vmatpush.bf16.msra.mxu2 %v2880_v26  ;;  %v2864_v26 = vor.u32 %v3787_v4, %v2861_v7  ;;  %2041 = vmatmul.bf16.vlgmr.msrb.gmra.mxu3 %v5125_v25  ;;  %v3781_v4 = vld [vmem:[%s5967_s1 + $0x124] sm:$0xf]  ;;  %v2837_v7 = vld [vmem:[%s5967_s1 + $0x128] sm:$0xf0]  ;;  %v2677_v15 = vld [vmem:[%s5968_s0 + $0xf0] sm:$0xf0] }
  0x87   :  { %2109 = vmatpush.bf16.msra.mxu3 %v2944_v49  ;;  %v2845_v49 = vld [vmem:[%s5967_s1 + $0x138] sm:$0xf0]  ;;  %v2840_v36 = vor.u32 %v3781_v4, %v2837_v7  ;;  %v2821_v7 = vld [vmem:[%s5967_s1 + $0x108] sm:$0xf0] }
  0x88   :  { %2053 = vmatpush.bf16.msra.mxu0 %v2744_v58  ;;  %v3751_v58 = vld [vmem:[%s5967_s1 + $0x34] sm:$0xf]  ;;  %v2848_v2 = vor.u32 %v3783_v47, %v2845_v49  ;;  %v2701_v49 = vld [vmem:[%s5967_s1 + $0x18] sm:$0xf0] }
  0x89   :  { %2072 = vmatpush.bf16.msra.mxu1 %v2808_v10  ;;  %v2720_v3 = vor.u32 %v3751_v58, %v2717_v59  ;;  %v2675_v10 = vld [vmem:[%s5968_s0 + $0xb0] sm:$0xf]  ;;  %v3747_v47 = vld [vmem:[%s5967_s1 + $0x14] sm:$0xf]  ;;  %v5244_v58 = vor.u32 %v3735_v12, %v2677_v15  ;;  %v2765_v59 = vld [vmem:[%s5967_s1 + $0x98] sm:$0xf0]  ;;  %v2896_v15 = vor.u32 %v3795_v60, %v2893_v61 }
  0x8a   :  { %2091 = vmatpush.bf16.msra.mxu2 %v2872_v55  ;;  %v2920_v55 = vor.u32 %v3801_v38, %v2917_v41  ;;  %v3779_v38 = vld [vmem:[%s5967_s1 + $0x114] sm:$0xf]  ;;  %v2829_v41 = vld [vmem:[%s5967_s1 + $0x118] sm:$0xf0]  ;;  %v2704_v4 = vor.u32 %v3747_v47, %v2701_v49  ;;  %v3853_v47 = vld [vmem:[%s5967_s1 + $0x364] sm:$0xf] }
  0x8b   :  { %2110 = vmatpush.bf16.msra.mxu3 %v2936_v11  ;;  %v3743_v11 = vld [vmem:[%s5968_s0 + $0xec] sm:$0xf0]  ;;  %v3125_v49 = vld [vmem:[%s5967_s1 + $0x368] sm:$0xf0]  ;;  %v3821_v60 = vld [vmem:[%s5967_s1 + $0x264] sm:$0xf] }
  0x8c   :  { %2054 = vmatpush.bf16.msra.mxu0 %v2736_v27  ;;  %v2773_v27 = vld [vmem:[%s5967_s1 + $0xa8] sm:$0xf0] }
  0x8d   :  { %2073 = vmatpush.bf16.msra.mxu1 %v2800_v32  ;;  %v2683_v32 = vld [vmem:[%s5968_s0 + $0xb8] sm:$0xf]  ;;  %v2997_v61 = vld [vmem:[%s5967_s1 + $0x268] sm:$0xf0] }
  0x8e   :  { %2092 = vmatpush.bf16.msra.mxu2 %v2864_v26  ;;  %v3765_v26 = vld [vmem:[%s5967_s1 + $0xa4] sm:$0xf] }
  0x8f   :  { %2111 = vmatpush.bf16.msra.mxu3 %v2928_v33  ;;  %v3744_v33 = vld [vmem:[%s5968_s0 + $0xf4] sm:$0xf0] }
  0x90   :  { %2055 = vmatpush.bf16.msra.mxu0 %v2728_v43  ;;  %v2904_v43 = vor.u32 %v3797_v30, %v2901_v31  ;;  %v5255_v62 = vor.u32 %v3744_v33, %v2683_v32  ;;  %v3823_v30 = vld [vmem:[%s5967_s1 + $0x274] sm:$0xf]  ;;  %v3005_v31 = vld [vmem:[%s5967_s1 + $0x278] sm:$0xf0] }
  0x91   :  { %2074 = vmatpush.bf16.msra.mxu1 %v2792_v52  ;;  %v3763_v52 = vld [vmem:[%s5967_s1 + $0x94] sm:$0xf] }
  0x92   :  { %2093 = vmatpush.bf16.msra.mxu2 %v2856_v42  ;;  %v2776_v42 = vor.u32 %v3765_v26, %v2773_v27  ;;  %v2768_v12 = vor.u32 %v3763_v52, %v2765_v59  ;;  %v3855_v26 = vld [vmem:[%s5967_s1 + $0x374] sm:$0xf]  ;;  %v3133_v27 = vld [vmem:[%s5967_s1 + $0x378] sm:$0xf0] }
  0x93   :  { %2112 = vmatpush.bf16.msra.mxu3 %v2920_v55  ;;  %v5242_v55 = vor.u32 %v3743_v11, %v2675_v10  ;;  %v3745_v10 = vld [vmem:[%s5967_s1 + $0x4] sm:$0xf]  ;;  %v2693_v11 = vld [vmem:[%s5967_s1 + $0x8] sm:$0xf0]  ;;  %v3839_v32 = vld [vmem:[%s5967_s1 + $0x2f4] sm:$0xf] }
  0x94   :  { %2056 = vmatpush.bf16.msra.mxu0 %v2720_v3  ;;  %v2832_v3 = vor.u32 %v3779_v38, %v2829_v41  ;;  %2008 = vmatmul.bf16.gmra.mxu1 %v5244_v58  ;;  %v2696_v34 = vor.u32 %v3745_v10, %v2693_v11  ;;  %v2888_v41 = vor.u32 %v3793_v20, %v2885_v21  ;;  %v3819_v20 = vld [vmem:[%s5967_s1 + $0x254] sm:$0xf]  ;;  %v2989_v21 = vld [vmem:[%s5967_s1 + $0x258] sm:$0xf0] }
  0x95   :  { %2075 = vmatpush.bf16.msra.mxu1 %v2784_v16  ;;  %v3761_v16 = vld [vmem:[%s5967_s1 + $0x84] sm:$0xf]  ;;  %1989 = vmatmul.bf16.gmra.mxu0 %v5242_v55  ;;  %v3072_v52 = vor.u32 %v3839_v32, %v3069_v35  ;;  %v3128_v10 = vor.u32 %v3853_v47, %v3125_v49  ;;  %v3000_v11 = vor.u32 %v3821_v60, %v2997_v61  ;;  %v3181_v32 = vld [vmem:[%s5967_s1 + $0x3d8] sm:$0xf0]  ;;  %v2981_v47 = vld [vmem:[%s5967_s1 + $0x248] sm:$0xf0] }
  0x96   :  { %2094 = vmatpush.bf16.msra.mxu2 %v2848_v2  ;;  %v3777_v2 = vld [vmem:[%s5967_s1 + $0x104] sm:$0xf]  ;;  %2046 = vmatmul.bf16.gmra.mxu3 %v5257_v63  ;;  %v3173_v60 = vld [vmem:[%s5967_s1 + $0x3c8] sm:$0xf0]  ;;  %v3847_v61 = vld [vmem:[%s5967_s1 + $0x334] sm:$0xf] }
  0x97   :  { %2113 = vmatpush.bf16.msra.mxu3 %v2912_v19  ;;  %v2757_v19 = vld [vmem:[%s5967_s1 + $0x88] sm:$0xf0]  ;;  %2027 = vmatmul.bf16.gmra.mxu2 %v5255_v62  ;;  %v2824_v33 = vor.u32 %v3777_v2, %v2821_v7  ;;  %v3837_v2 = vld [vmem:[%s5967_s1 + $0x2e4] sm:$0xf] }
  0x98   :  { %2057 = vmatpush.bf16.msra.mxu0 %v2712_v37  ;;  %v3197_v37 = vld [vmem:[%s5967_s1 + $0x3f8] sm:$0xf0]  ;;  %v2760_v38 = vor.u32 %v3761_v16, %v2757_v19  ;;  %v3189_v7 = vld [vmem:[%s5967_s1 + $0x3e8] sm:$0xf0]  ;;  %v3851_v16 = vld [vmem:[%s5967_s1 + $0x354] sm:$0xf] }
  0x99   :  { %2076 = vmatpush.bf16.msra.mxu1 %v2776_v42  ;;  %v3136_v42 = vor.u32 %v3855_v26, %v3133_v27  ;;  %v3117_v19 = vld [vmem:[%s5967_s1 + $0x358] sm:$0xf0]  ;;  %v3835_v26 = vld [vmem:[%s5967_s1 + $0x2d4] sm:$0xf]  ;;  %v3833_v49 = vld [vmem:[%s5967_s1 + $0x2c4] sm:$0xf] }
  0x9a   :  { %2095 = vmatpush.bf16.msra.mxu2 %v2840_v36  ;;  %v3871_v36 = vld [vmem:[%s5967_s1 + $0x3f4] sm:$0xf]  ;;  %v3120_v35 = vor.u32 %v3851_v16, %v3117_v19  ;;  %v3037_v16 = vld [vmem:[%s5967_s1 + $0x2b8] sm:$0xf0] }
  0x9b   :  { %2114 = vmatpush.bf16.msra.mxu3 %v2904_v43  ;;  %v3008_v43 = vor.u32 %v3823_v30, %v3005_v31  ;;  %v3200_v59 = vor.u32 %v3871_v36, %v3197_v37  ;;  %v3053_v30 = vld [vmem:[%s5967_s1 + $0x2d8] sm:$0xf0]  ;;  %v3867_v31 = vld [vmem:[%s5967_s1 + $0x3d4] sm:$0xf]  ;;  %v2992_v36 = vor.u32 %v3819_v20, %v2989_v21  ;;  %v3849_v37 = vld [vmem:[%s5967_s1 + $0x344] sm:$0xf] }
  0x9c   :  { %2058 = vmatpush.bf16.msra.mxu0 %v2704_v4  ;;  %v3869_v4 = vld [vmem:[%s5967_s1 + $0x3e4] sm:$0xf]  ;;  %v3863_v19 = vld [vmem:[%s5967_s1 + $0x3b4] sm:$0xf]  ;;  %v3165_v20 = vld [vmem:[%s5967_s1 + $0x3b8] sm:$0xf0] }
  0x9d   :  { %2077 = vmatpush.bf16.msra.mxu1 %v2768_v12 }
  0x9e   :  { %2096 = vmatpush.bf16.msra.mxu2 %v2832_v3  ;;  %v3061_v3 = vld [vmem:[%s5967_s1 + $0x2e8] sm:$0xf0] }
  0x9f   :  { %2115 = vmatpush.bf16.msra.mxu3 %v2896_v15  ;;  %v3064_v12 = vor.u32 %v3837_v2, %v3061_v3  ;;  %v3192_v15 = vor.u32 %v3869_v4, %v3189_v7  ;;  %v3101_v2 = vld [vmem:[%s5967_s1 + $0x338] sm:$0xf0] }
  0xa0   :  { %2059 = vmatpush.bf16.msra.mxu0 %v2696_v34  ;;  %v1757_v27 = vpop.f32.mrf.mxu0 }
  0xa1   :  { %2078 = vmatpush.bf16.msra.mxu1 %v2760_v38  ;;  %v3109_v38 = vld [vmem:[%s5967_s1 + $0x348] sm:$0xf0] }
  0xa2   :  { %2097 = vmatpush.bf16.msra.mxu2 %v2824_v33  ;;  %v1776_v33 = vpop.f32.mrf.mxu1 }
  0xa3   :  { %2116 = vmatpush.bf16.msra.mxu3 %v2888_v41  ;;  %v1777_v34 = vadd.f32 %v1776_v33, %v1757_v27  ;;  %v3056_v41 = vor.u32 %v3835_v26, %v3053_v30  ;;  %v3104_v26 = vor.u32 %v3847_v61, %v3101_v2  ;;  %v3093_v33 = vld [vmem:[%s5967_s1 + $0x328] sm:$0xf0]  ;;  %v3811_v61 = vld [vmem:[%s5967_s1 + $0x214] sm:$0xf]  ;;  %v2957_v2 = vld [vmem:[%s5967_s1 + $0x218] sm:$0xf0] }
  0xa4   :  { %2128 = vmatpush.bf16.msrb.mxu0 %v3008_v43  ;;  %v3817_v43 = vld [vmem:[%s5967_s1 + $0x244] sm:$0xf]  ;;  %2079 = vmatmul.bf16.vlgmr.msra.gmra.mxu1 %v4287_v53 }
  0xa5   :  { %2147 = vmatpush.bf16.msrb.mxu1 %v3072_v52  ;;  %2060 = vmatmul.bf16.vlgmr.msra.gmra.mxu0 %v4276_v48  ;;  %v3045_v52 = vld [vmem:[%s5967_s1 + $0x2c8] sm:$0xf0]  ;;  %v3112_v48 = vor.u32 %v3849_v37, %v3109_v38  ;;  %v2984_v53 = vor.u32 %v3817_v43, %v2981_v47  ;;  %v3829_v38 = vld [vmem:[%s5967_s1 + $0x2a4] sm:$0xf] }
  0xa6   :  { %2166 = vmatpush.bf16.msrb.mxu2 %v3136_v42  ;;  %v3184_v42 = vor.u32 %v3867_v31, %v3181_v32  ;;  %2117 = vmatmul.bf16.vlgmr.msra.gmra.mxu3 %v4297_v57  ;;  %v3048_v4 = vor.u32 %v3833_v49, %v3045_v52  ;;  %v2973_v57 = vld [vmem:[%s5967_s1 + $0x238] sm:$0xf0]  ;;  %v3845_v32 = vld [vmem:[%s5967_s1 + $0x324] sm:$0xf]  ;;  %v2965_v37 = vld [vmem:[%s5967_s1 + $0x228] sm:$0xf0] }
  0xa7   :  { %2185 = vmatpush.bf16.msrb.mxu3 %v3200_v59  ;;  %v3865_v59 = vld [vmem:[%s5967_s1 + $0x3c4] sm:$0xf]  ;;  %2098 = vmatmul.bf16.vlgmr.msra.gmra.mxu2 %v4289_v54  ;;  %v3815_v54 = vld [vmem:[%s5967_s1 + $0x234] sm:$0xf]  ;;  %v3157_v43 = vld [vmem:[%s5967_s1 + $0x3a8] sm:$0xf0]  ;;  %v3096_v47 = vor.u32 %v3845_v32, %v3093_v33 }
  0xa8   :  { %2129 = vmatpush.bf16.msrb.mxu0 %v3000_v11  ;;  %v1795_v3 = vpop.f32.mrf.mxu2  ;;  %v3176_v7 = vor.u32 %v3865_v59, %v3173_v60  ;;  %v2976_v31 = vor.u32 %v3815_v54, %v2973_v57  ;;  %v3843_v52 = vld [vmem:[%s5967_s1 + $0x314] sm:$0xf]  ;;  %v3085_v59 = vld [vmem:[%s5967_s1 + $0x318] sm:$0xf0] }
  0xa9   :  { %2148 = vmatpush.bf16.msrb.mxu1 %v3064_v12  ;;  %v1796_v11 = vadd.f32 %v1795_v3, %v1777_v34  ;;  %v1814_v12 = vpop.f32.mrf.mxu3  ;;  %v3827_v3 = vld [vmem:[%s5967_s1 + $0x294] sm:$0xf]  ;;  %v3021_v57 = vld [vmem:[%s5967_s1 + $0x298] sm:$0xf0] }
  0xaa   :  { %2167 = vmatpush.bf16.msrb.mxu2 %v3128_v10  ;;  %v3831_v10 = vld [vmem:[%s5967_s1 + $0x2b4] sm:$0xf]  ;;  %v1778_v21 = vpop.f32.mrf.mxu1  ;;  %v3024_v32 = vor.u32 %v3827_v3, %v3021_v57 }
  0xab   :  { %2186 = vmatpush.bf16.msrb.mxu3 %v3192_v15  ;;  %v1759_v15 = vpop.f32.mrf.mxu0  ;;  %v5411_v27 = vadd.f32 %v1814_v12, %v1796_v11  ;;  %v3040_v34 = vor.u32 %v3831_v10, %v3037_v16  ;;  %v3859_v10 = vld [vmem:[%s5967_s1 + $0x394] sm:$0xf]  ;;  %v3149_v11 = vld [vmem:[%s5967_s1 + $0x398] sm:$0xf0]  ;;  %v3841_v16 = vld [vmem:[%s5967_s1 + $0x304] sm:$0xf] }
  0xac   :  { %2130 = vmatpush.bf16.msrb.mxu0 %v2992_v36  ;;  %v1779_v30 = vadd.f32 %v1778_v21, %v1759_v15  ;;  %v3813_v36 = vld [vmem:[%s5967_s1 + $0x224] sm:$0xf]  ;;  %v3088_v15 = vor.u32 %v3843_v52, %v3085_v59  ;;  %v2960_v21 = vor.u32 %v3811_v61, %v2957_v2  ;;  %v3152_v33 = vor.u32 %v3859_v10, %v3149_v11 }
  0xad   :  { %2149 = vmatpush.bf16.msrb.mxu1 %v3056_v41  ;;  %v3029_v41 = vld [vmem:[%s5967_s1 + $0x2a8] sm:$0xf0]  ;;  %v2968_v49 = vor.u32 %v3813_v36, %v2965_v37  ;;  %v3857_v36 = vld [vmem:[%s5967_s1 + $0x384] sm:$0xf] }
  0xae   :  { %2168 = vmatpush.bf16.msrb.mxu2 %v3120_v35  ;;  %v3168_v35 = vor.u32 %v3863_v19, %v3165_v20  ;;  %v3141_v37 = vld [vmem:[%s5967_s1 + $0x388] sm:$0xf0]  ;;  %v3885_v11 = vld [vmem:[%s5967_s1 + $0x464] sm:$0xf] }
  0xaf   :  { %2187 = vmatpush.bf16.msrb.mxu3 %v3184_v42  ;;  %v3861_v42 = vld [vmem:[%s5967_s1 + $0x3a4] sm:$0xf] }
  0xb0   :  { %2131 = vmatpush.bf16.msrb.mxu0 %v2984_v53  ;;  %v1797_v60 = vpop.f32.mrf.mxu2  ;;  %v3160_v53 = vor.u32 %v3861_v42, %v3157_v43  ;;  %v3903_v42 = vld [vmem:[%s5967_s1 + $0x4f4] sm:$0xf] }
  0xb1   :  { %2150 = vmatpush.bf16.msrb.mxu1 %v3048_v4  ;;  %v1798_v4 = vadd.f32 %v1797_v60, %v1779_v30  ;;  %v3809_v30 = vld [vmem:[%s5967_s1 + $0x204] sm:$0xf]  ;;  %v3144_v60 = vor.u32 %v3857_v36, %v3141_v37  ;;  %v3373_v36 = vld [vmem:[%s5967_s1 + $0x558] sm:$0xf0] }
  0xb2   :  { %2169 = vmatpush.bf16.msrb.mxu2 %v3112_v48  ;;  %v3032_v48 = vor.u32 %v3829_v38, %v3029_v41  ;;  %v1781_v12 = vpop.f32.mrf.mxu1  ;;  %v3919_v38 = vld [vmem:[%s5967_s1 + $0x574] sm:$0xf]  ;;  %v3389_v41 = vld [vmem:[%s5967_s1 + $0x578] sm:$0xf0] }
  0xb3   :  { %2188 = vmatpush.bf16.msrb.mxu3 %v3176_v7  ;;  %v1816_v7 = vpop.f32.mrf.mxu3  ;;  %v1762_v54 = vpop.f32.mrf.mxu0  ;;  %v3392_v2 = vor.u32 %v3919_v38, %v3389_v41  ;;  %v3883_v38 = vld [vmem:[%s5967_s1 + $0x454] sm:$0xf]  ;;  %v3245_v41 = vld [vmem:[%s5967_s1 + $0x458] sm:$0xf0] }
  0xb4   :  { %2132 = vmatpush.bf16.msrb.mxu0 %v2976_v31  ;;  %v5464_v19 = vadd.f32 %v1816_v7, %v1798_v4  ;;  %v1782_v20 = vadd.f32 %v1781_v12, %v1762_v54  ;;  %v2949_v31 = vld [vmem:[%s5967_s1 + $0x208] sm:$0xf0]  ;;  %2084 = vmatmul.bf16.gmra.mxu1 %v4419_v50  ;;  %v3261_v50 = vld [vmem:[%s5967_s1 + $0x478] sm:$0xf0]  ;;  %v3917_v4 = vld [vmem:[%s5967_s1 + $0x564] sm:$0xf] }
  0xb5   :  { %2151 = vmatpush.bf16.msrb.mxu1 %v3040_v34  ;;  %v3825_v34 = vld [vmem:[%s5967_s1 + $0x284] sm:$0xf]  ;;  %2065 = vmatmul.bf16.gmra.mxu0 %v4408_v44  ;;  %v3887_v44 = vld [vmem:[%s5967_s1 + $0x474] sm:$0xf]  ;;  %v3381_v7 = vld [vmem:[%s5967_s1 + $0x568] sm:$0xf0] }
  0xb6   :  { %2170 = vmatpush.bf16.msrb.mxu2 %v3104_v26  ;;  %v3077_v26 = vld [vmem:[%s5967_s1 + $0x308] sm:$0xf0]  ;;  %2122 = vmatmul.bf16.gmra.mxu3 %v4429_v56  ;;  %v3935_v56 = vld [vmem:[%s5967_s1 + $0x5f4] sm:$0xf]  ;;  %v3264_v3 = vor.u32 %v3887_v44, %v3261_v50 }
  0xb7   :  { %2189 = vmatpush.bf16.msrb.mxu3 %v3168_v35  ;;  %v3013_v35 = vld [vmem:[%s5967_s1 + $0x288] sm:$0xf0]  ;;  %2103 = vmatmul.bf16.gmra.mxu2 %v4421_v51  ;;  %v3080_v43 = vor.u32 %v3841_v16, %v3077_v26  ;;  %v3325_v51 = vld [vmem:[%s5967_s1 + $0x4f8] sm:$0xf0]  ;;  %v3933_v26 = vld [vmem:[%s5967_s1 + $0x5e4] sm:$0xf] }
  0xb8   :  { %2133 = vmatpush.bf16.msrb.mxu0 %v2968_v49  ;;  %v3453_v49 = vld [vmem:[%s5967_s1 + $0x5f8] sm:$0xf0]  ;;  %v1800_v52 = vpop.f32.mrf.mxu2  ;;  %v3016_v59 = vor.u32 %v3825_v34, %v3013_v35  ;;  %v3328_v57 = vor.u32 %v3903_v42, %v3325_v51  ;;  %v3253_v12 = vld [vmem:[%s5967_s1 + $0x468] sm:$0xf0]  ;;  %v3915_v35 = vld [vmem:[%s5967_s1 + $0x554] sm:$0xf] }
  0xb9   :  { %2152 = vmatpush.bf16.msrb.mxu1 %v3032_v48  ;;  %v1801_v48 = vadd.f32 %v1800_v52, %v1782_v20  ;;  %v3456_v10 = vor.u32 %v3935_v56, %v3453_v49  ;;  %v3899_v44 = vld [vmem:[%s5967_s1 + $0x4d4] sm:$0xf]  ;;  %v3437_v51 = vld [vmem:[%s5967_s1 + $0x5d8] sm:$0xf0] }
  0xba   :  { %2171 = vmatpush.bf16.msrb.mxu2 %v3096_v47  ;;  %v2952_v47 = vor.u32 %v3809_v30, %v2949_v31  ;;  %v1783_v54 = vpop.f32.mrf.mxu1  ;;  %v3445_v30 = vld [vmem:[%s5967_s1 + $0x5e8] sm:$0xf0]  ;;  %v3384_v31 = vor.u32 %v3917_v4, %v3381_v7  ;;  %v3881_v4 = vld [vmem:[%s5967_s1 + $0x444] sm:$0xf] }
  0xbb   :  { %2190 = vmatpush.bf16.msrb.mxu3 %v3160_v53  ;;  %v1819_v53 = vpop.f32.mrf.mxu3  ;;  %v1764_v61 = vpop.f32.mrf.mxu0  ;;  %v3448_v34 = vor.u32 %v3933_v26, %v3445_v30  ;;  %v3897_v7 = vld [vmem:[%s5967_s1 + $0x4c4] sm:$0xf]  ;;  %v3895_v26 = vld [vmem:[%s5967_s1 + $0x4b4] sm:$0xf] }
  0xbc   :  { %2134 = vmatpush.bf16.msrb.mxu0 %v2960_v21  ;;  %v5530_v16 = vadd.f32 %v1819_v53, %v1801_v48  ;;  %v1784_v20 = vadd.f32 %v1783_v54, %v1764_v61  ;;  %v3317_v21 = vld [vmem:[%s5967_s1 + $0x4e8] sm:$0xf0]  ;;  %v3248_v48 = vor.u32 %v3883_v38, %v3245_v41  ;;  %v3913_v53 = vld [vmem:[%s5967_s1 + $0x544] sm:$0xf] }
  0xbd   :  { %2153 = vmatpush.bf16.msrb.mxu1 %v3024_v32  ;;  %v3256_v32 = vor.u32 %v3885_v11, %v3253_v12  ;;  %v3365_v61 = vld [vmem:[%s5967_s1 + $0x548] sm:$0xf0]  ;;  %v3911_v12 = vld [vmem:[%s5967_s1 + $0x534] sm:$0xf] }
  0xbe   :  { %2172 = vmatpush.bf16.msrb.mxu2 %v3088_v15  ;;  %v3901_v15 = vld [vmem:[%s5967_s1 + $0x4e4] sm:$0xf]  ;;  %v3429_v11 = vld [vmem:[%s5967_s1 + $0x5c8] sm:$0xf0] }
  0xbf   :  { %2191 = vmatpush.bf16.msrb.mxu3 %v3152_v33  ;;  %v3320_v33 = vor.u32 %v3901_v15, %v3317_v21  ;;  %v3357_v15 = vld [vmem:[%s5967_s1 + $0x538] sm:$0xf0] }
  0xc0   :  { %2135 = vmatpush.bf16.msrb.mxu0 %v2952_v47  ;;  %v1802_v37 = vpop.f32.mrf.mxu2  ;;  %v3931_v47 = vld [vmem:[%s5967_s1 + $0x5d4] sm:$0xf]  ;;  %v3360_v41 = vor.u32 %v3911_v12, %v3357_v15  ;;  %v3405_v15 = vld [vmem:[%s5967_s1 + $0x598] sm:$0xf0] }
  0xc1   :  { %2154 = vmatpush.bf16.msrb.mxu1 %v3016_v59  ;;  %v1803_v50 = vadd.f32 %v1802_v37, %v1784_v20  ;;  %v3923_v12 = vld [vmem:[%s5967_s1 + $0x594] sm:$0xf] }
  0xc2   :  { %2173 = vmatpush.bf16.msrb.mxu2 %v3080_v43  ;;  %v3309_v43 = vld [vmem:[%s5967_s1 + $0x4d8] sm:$0xf0]  ;;  %v1852_v49 = vpop.f32.mrf.mxu1 }
  0xc3   :  { %2192 = vmatpush.bf16.msrb.mxu3 %v3144_v60  ;;  %v1821_v42 = vpop.f32.mrf.mxu3  ;;  %v1833_v56 = vpop.f32.mrf.mxu0  ;;  %v3376_v60 = vor.u32 %v3915_v35, %v3373_v36 }
  0xc4   :  { %2204 = vmatpush.bf16.msra.mxu0 %v3264_v3  ;;  %v5565_v52 = vadd.f32 %v1821_v42, %v1803_v50  ;;  %v1834_v59 = vadd.f32 %v1833_v56, %v5411_v27  ;;  %v3440_v3 = vor.u32 %v3931_v47, %v3437_v51  ;;  %v3237_v27 = vld [vmem:[%s5967_s1 + $0x448] sm:$0xf0]  ;;  %2155 = vmatmul.bf16.vlgmr.msrb.gmra.mxu1 %v4566_v1  ;;  %v3909_v50 = vld [vmem:[%s5967_s1 + $0x524] sm:$0xf] }
  0xc5   :  { %2223 = vmatpush.bf16.msra.mxu1 %v3328_v57  ;;  %2136 = vmatmul.bf16.vlgmr.msrb.gmra.mxu0 %v4564_v0  ;;  %v3301_v57 = vld [vmem:[%s5967_s1 + $0x4c8] sm:$0xf0]  ;;  %v3368_v0 = vor.u32 %v3913_v53, %v3365_v61  ;;  %v3240_v1 = vor.u32 %v3881_v4, %v3237_v27  ;;  %v3341_v4 = vld [vmem:[%s5967_s1 + $0x518] sm:$0xf0] }
  0xc6   :  { %2242 = vmatpush.bf16.msra.mxu2 %v3392_v2  ;;  %v3312_v2 = vor.u32 %v3899_v44, %v3309_v43  ;;  %v1853_v54 = vadd.f32 %v1852_v49, %v1834_v59  ;;  %2193 = vmatmul.bf16.vlgmr.msrb.gmra.mxu3 %v4579_v6  ;;  %v3304_v20 = vor.u32 %v3897_v7, %v3301_v57  ;;  %v3229_v6 = vld [vmem:[%s5967_s1 + $0x438] sm:$0xf0]  ;;  %v3349_v42 = vld [vmem:[%s5967_s1 + $0x528] sm:$0xf0]  ;;  %v3893_v49 = vld [vmem:[%s5967_s1 + $0x4a4] sm:$0xf] }
  0xc7   :  { %2261 = vmatpush.bf16.msra.mxu3 %v3456_v10  ;;  %v3929_v10 = vld [vmem:[%s5967_s1 + $0x5c4] sm:$0xf]  ;;  %2174 = vmatmul.bf16.vlgmr.msrb.gmra.mxu2 %v4577_v5  ;;  %v3879_v5 = vld [vmem:[%s5967_s1 + $0x434] sm:$0xf]  ;;  %v3221_v56 = vld [vmem:[%s5967_s1 + $0x428] sm:$0xf0]  ;;  %v3352_v61 = vor.u32 %v3909_v50, %v3349_v42 }
  0xc8   :  { %2205 = vmatpush.bf16.msra.mxu0 %v3256_v32  ;;  %v3432_v21 = vor.u32 %v3929_v10, %v3429_v11  ;;  %v1871_v30 = vpop.f32.mrf.mxu2  ;;  %v3293_v32 = vld [vmem:[%s5967_s1 + $0x4b8] sm:$0xf0]  ;;  %v3232_v44 = vor.u32 %v3879_v5, %v3229_v6  ;;  %v3413_v53 = vld [vmem:[%s5967_s1 + $0x5a8] sm:$0xf0]  ;;  %v3891_v10 = vld [vmem:[%s5967_s1 + $0x494] sm:$0xf] }
  0xc9   :  { %2224 = vmatpush.bf16.msra.mxu1 %v3320_v33  ;;  %v3927_v33 = vld [vmem:[%s5967_s1 + $0x5b4] sm:$0xf]  ;;  %v1872_v35 = vadd.f32 %v1871_v30, %v1853_v54  ;;  %v3296_v47 = vor.u32 %v3895_v26, %v3293_v32  ;;  %v3213_v57 = vld [vmem:[%s5967_s1 + $0x418] sm:$0xf0]  ;;  %v3905_v6 = vld [vmem:[%s5967_s1 + $0x504] sm:$0xf] }
  0xca   :  { %2243 = vmatpush.bf16.msra.mxu2 %v3384_v31  ;;  %v1854_v37 = vpop.f32.mrf.mxu1  ;;  %v3875_v54 = vld [vmem:[%s5967_s1 + $0x414] sm:$0xf]  ;;  %v3333_v32 = vld [vmem:[%s5967_s1 + $0x508] sm:$0xf0] }
  0xcb   :  { %2262 = vmatpush.bf16.msra.mxu3 %v3448_v34  ;;  %v1890_v31 = vpop.f32.mrf.mxu3  ;;  %v3421_v34 = vld [vmem:[%s5967_s1 + $0x5b8] sm:$0xf0]  ;;  %v1835_v36 = vpop.f32.mrf.mxu0  ;;  %v3397_v50 = vld [vmem:[%s5967_s1 + $0x588] sm:$0xf0]  ;;  %v3983_v42 = vld [vmem:[%s5967_s1 + $0x774] sm:$0xf] }
  0xcc   :  { %2206 = vmatpush.bf16.msra.mxu0 %v3248_v48  ;;  %v1836_v38 = vadd.f32 %v1835_v36, %v5464_v19  ;;  %v5627_v43 = vadd.f32 %v1890_v31, %v1872_v35  ;;  %v3424_v51 = vor.u32 %v3927_v33, %v3421_v34  ;;  %v3877_v19 = vld [vmem:[%s5967_s1 + $0x424] sm:$0xf]  ;;  %v3216_v31 = vor.u32 %v3875_v54, %v3213_v57  ;;  %v3205_v34 = vld [vmem:[%s5967_s1 + $0x408] sm:$0xf0] }
  0xcd   :  { %2225 = vmatpush.bf16.msra.mxu1 %v3312_v2  ;;  %v3925_v48 = vld [vmem:[%s5967_s1 + $0x5a4] sm:$0xf]  ;;  %v3224_v2 = vor.u32 %v3877_v19, %v3221_v56  ;;  %v3408_v36 = vor.u32 %v3923_v12, %v3405_v15  ;;  %v3336_v19 = vor.u32 %v3905_v6, %v3333_v32  ;;  %v3573_v15 = vld [vmem:[%s5967_s1 + $0x6e8] sm:$0xf0]  ;;  %v3979_v32 = vld [vmem:[%s5967_s1 + $0x754] sm:$0xf] }
  0xce   :  { %2244 = vmatpush.bf16.msra.mxu2 %v3376_v60  ;;  %v1855_v59 = vadd.f32 %v1854_v37, %v1836_v38  ;;  %v3285_v60 = vld [vmem:[%s5967_s1 + $0x4a8] sm:$0xf0]  ;;  %v3416_v7 = vor.u32 %v3925_v48, %v3413_v53  ;;  %v3873_v33 = vld [vmem:[%s5967_s1 + $0x404] sm:$0xf] }
  0xcf   :  { %2263 = vmatpush.bf16.msra.mxu3 %v3440_v3  ;;  %v3907_v3 = vld [vmem:[%s5967_s1 + $0x514] sm:$0xf]  ;;  %v3288_v27 = vor.u32 %v3893_v49, %v3285_v60  ;;  %v3889_v37 = vld [vmem:[%s5967_s1 + $0x484] sm:$0xf]  ;;  %v3269_v38 = vld [vmem:[%s5967_s1 + $0x488] sm:$0xf0]  ;;  %v3208_v56 = vor.u32 %v3873_v33, %v3205_v34 }
  0xd0   :  { %2207 = vmatpush.bf16.msra.mxu0 %v3240_v1  ;;  %v1873_v11 = vpop.f32.mrf.mxu2  ;;  %v3277_v1 = vld [vmem:[%s5967_s1 + $0x498] sm:$0xf0]  ;;  %v3344_v30 = vor.u32 %v3907_v3, %v3341_v4  ;;  %v3981_v3 = vld [vmem:[%s5967_s1 + $0x764] sm:$0xf]  ;;  %v3637_v4 = vld [vmem:[%s5967_s1 + $0x768] sm:$0xf0] }
  0xd1   :  { %2226 = vmatpush.bf16.msra.mxu1 %v3304_v20  ;;  %v1874_v20 = vadd.f32 %v1873_v11, %v1855_v59  ;;  %v3709_v49 = vld [vmem:[%s5967_s1 + $0x7f8] sm:$0xf0]  ;;  %v3272_v59 = vor.u32 %v3889_v37, %v3269_v38  ;;  %v3949_v11 = vld [vmem:[%s5967_s1 + $0x664] sm:$0xf]  ;;  %v3947_v34 = vld [vmem:[%s5967_s1 + $0x654] sm:$0xf] }
  0xd2   :  { %2245 = vmatpush.bf16.msra.mxu2 %v3368_v0  ;;  %v1857_v5 = vpop.f32.mrf.mxu1  ;;  %v3629_v33 = vld [vmem:[%s5967_s1 + $0x758] sm:$0xf0] }
  0xd3   :  { %2264 = vmatpush.bf16.msra.mxu3 %v3432_v21  ;;  %v1892_v0 = vpop.f32.mrf.mxu3  ;;  %v1838_v21 = vpop.f32.mrf.mxu0 }
  0xd4   :  { %2208 = vmatpush.bf16.msra.mxu0 %v3232_v44  ;;  %v1839_v26 = vadd.f32 %v1838_v21, %v5530_v16  ;;  %v5684_v35 = vadd.f32 %v1892_v0, %v1874_v20  ;;  %v3280_v16 = vor.u32 %v3891_v10, %v3277_v1  ;;  %2160 = vmatmul.bf16.gmra.mxu1 %v4698_v9  ;;  %v3517_v9 = vld [vmem:[%s5967_s1 + $0x678] sm:$0xf0]  ;;  %v3509_v0 = vld [vmem:[%s5967_s1 + $0x668] sm:$0xf0]  ;;  %v3965_v1 = vld [vmem:[%s5967_s1 + $0x6e4] sm:$0xf] }
  0xd5   :  { %2227 = vmatpush.bf16.msra.mxu1 %v3296_v47  ;;  %2141 = vmatmul.bf16.gmra.mxu0 %v4696_v8  ;;  %v3645_v47 = vld [vmem:[%s5967_s1 + $0x778] sm:$0xf0]  ;;  %v3951_v8 = vld [vmem:[%s5967_s1 + $0x674] sm:$0xf]  ;;  %v3997_v20 = vld [vmem:[%s5967_s1 + $0x7e4] sm:$0xf] }
  0xd6   :  { %2246 = vmatpush.bf16.msra.mxu2 %v3360_v41  ;;  %v3921_v41 = vld [vmem:[%s5967_s1 + $0x584] sm:$0xf]  ;;  %v1858_v44 = vadd.f32 %v1857_v5, %v1839_v26  ;;  %2198 = vmatmul.bf16.gmra.mxu3 %v4711_v14  ;;  %v3999_v14 = vld [vmem:[%s5967_s1 + $0x7f4] sm:$0xf]  ;;  %v3701_v21 = vld [vmem:[%s5967_s1 + $0x7e8] sm:$0xf0]  ;;  %v3512_v26 = vor.u32 %v3949_v11, %v3509_v0 }
  0xd7   :  { %2265 = vmatpush.bf16.msra.mxu3 %v3424_v51  ;;  %2179 = vmatmul.bf16.gmra.mxu2 %v4709_v13  ;;  %v3967_v51 = vld [vmem:[%s5967_s1 + $0x6f4] sm:$0xf]  ;;  %v3581_v13 = vld [vmem:[%s5967_s1 + $0x6f8] sm:$0xf0]  ;;  %v3400_v60 = vor.u32 %v3921_v41, %v3397_v50  ;;  %v3712_v10 = vor.u32 %v3999_v14, %v3709_v49 }
  0xd8   :  { %2209 = vmatpush.bf16.msra.mxu0 %v3224_v2  ;;  %v1876_v48 = vpop.f32.mrf.mxu2  ;;  %v3520_v2 = vor.u32 %v3951_v8, %v3517_v9  ;;  %v3584_v57 = vor.u32 %v3967_v51, %v3581_v13  ;;  %v3565_v41 = vld [vmem:[%s5967_s1 + $0x6d8] sm:$0xf0]  ;;  %v3632_v51 = vor.u32 %v3979_v32, %v3629_v33  ;;  %v3621_v13 = vld [vmem:[%s5967_s1 + $0x748] sm:$0xf0] }
  0xd9   :  { %2228 = vmatpush.bf16.msra.mxu1 %v3288_v27  ;;  %v1877_v27 = vadd.f32 %v1876_v48, %v1858_v44  ;;  %v3995_v44 = vld [vmem:[%s5967_s1 + $0x7d4] sm:$0xf]  ;;  %v3693_v50 = vld [vmem:[%s5967_s1 + $0x7d8] sm:$0xf0]  ;;  %v3961_v48 = vld [vmem:[%s5967_s1 + $0x6c4] sm:$0xf] }
  0xda   :  { %2247 = vmatpush.bf16.msra.mxu2 %v3352_v61  ;;  %v3648_v61 = vor.u32 %v3983_v42, %v3645_v47  ;;  %v1859_v54 = vpop.f32.mrf.mxu1  ;;  %v3549_v0 = vld [vmem:[%s5967_s1 + $0x6b8] sm:$0xf0] }
  0xdb   :  { %2266 = vmatpush.bf16.msra.mxu3 %v3416_v7  ;;  %v1895_v53 = vpop.f32.mrf.mxu3  ;;  %v1840_v7 = vpop.f32.mrf.mxu0 }
  0xdc   :  { %2210 = vmatpush.bf16.msra.mxu0 %v3216_v31  ;;  %v1841_v12 = vadd.f32 %v1840_v7, %v5565_v52  ;;  %v5751_v5 = vadd.f32 %v1895_v53, %v1877_v27  ;;  %v3640_v52 = vor.u32 %v3981_v3, %v3637_v4  ;;  %v3704_v31 = vor.u32 %v3997_v20, %v3701_v21  ;;  %v3685_v3 = vld [vmem:[%s5967_s1 + $0x7c8] sm:$0xf0]  ;;  %v3975_v4 = vld [vmem:[%s5967_s1 + $0x734] sm:$0xf]  ;;  %v3613_v27 = vld [vmem:[%s5967_s1 + $0x738] sm:$0xf0] }
  0xdd   :  { %2229 = vmatpush.bf16.msra.mxu1 %v3280_v16  ;;  %v3501_v16 = vld [vmem:[%s5967_s1 + $0x658] sm:$0xf0] }
  0xde   :  { %2248 = vmatpush.bf16.msra.mxu2 %v3344_v30  ;;  %v1860_v6 = vadd.f32 %v1859_v54, %v1841_v12  ;;  %v3576_v30 = vor.u32 %v3965_v1, %v3573_v15  ;;  %v3991_v1 = vld [vmem:[%s5967_s1 + $0x7b4] sm:$0xf]  ;;  %v3677_v12 = vld [vmem:[%s5967_s1 + $0x7b8] sm:$0xf0] }
  0xdf   :  { %2267 = vmatpush.bf16.msra.mxu3 %v3408_v36  ;;  %v3963_v36 = vld [vmem:[%s5967_s1 + $0x6d4] sm:$0xf] }
  0xe0   :  { %2211 = vmatpush.bf16.msra.mxu0 %v3208_v56  ;;  %v1878_v37 = vpop.f32.mrf.mxu2  ;;  %v3977_v56 = vld [vmem:[%s5967_s1 + $0x744] sm:$0xf]  ;;  %v3568_v49 = vor.u32 %v3963_v36, %v3565_v41 }
  0xe1   :  { %2230 = vmatpush.bf16.msra.mxu1 %v3272_v59  ;;  %v1879_v42 = vadd.f32 %v1878_v37, %v1860_v6  ;;  %v3696_v59 = vor.u32 %v3995_v44, %v3693_v50  ;;  %v3957_v36 = vld [vmem:[%s5967_s1 + $0x6a4] sm:$0xf]  ;;  %v3669_v44 = vld [vmem:[%s5967_s1 + $0x7a8] sm:$0xf0] }
  0xe2   :  { %2249 = vmatpush.bf16.msra.mxu2 %v3336_v19  ;;  %v1928_v8 = vpop.f32.mrf.mxu1  ;;  %v3504_v19 = vor.u32 %v3947_v34, %v3501_v16  ;;  %v3680_v34 = vor.u32 %v3991_v1, %v3677_v12  ;;  %v3477_v16 = vld [vmem:[%s5967_s1 + $0x628] sm:$0xf0]  ;;  %v3989_v41 = vld [vmem:[%s5967_s1 + $0x7a4] sm:$0xf] }
  0xe3   :  { %2268 = vmatpush.bf16.msra.mxu3 %v3400_v60  ;;  %v1897_v38 = vpop.f32.mrf.mxu3  ;;  %v1909_v47 = vpop.f32.mrf.mxu0  ;;  %v3945_v60 = vld [vmem:[%s5967_s1 + $0x644] sm:$0xf]  ;;  %v3653_v1 = vld [vmem:[%s5967_s1 + $0x788] sm:$0xf0] }
  0xe4   :  { %2280 = vmatpush.bf16.msrb.mxu0 %v3520_v2  ;;  %v1910_v9 = vadd.f32 %v1909_v47, %v5627_v43  ;;  %v5784_v14 = vadd.f32 %v1897_v38, %v1879_v42  ;;  %v3493_v43 = vld [vmem:[%s5967_s1 + $0x648] sm:$0xf0]  ;;  %2231 = vmatmul.bf16.vlgmr.msra.gmra.mxu1 %v4836_v24  ;;  %v3993_v2 = vld [vmem:[%s5967_s1 + $0x7c4] sm:$0xf]  ;;  %v3971_v47 = vld [vmem:[%s5967_s1 + $0x714] sm:$0xf] }
  0xe5   :  { %2299 = vmatpush.bf16.msrb.mxu1 %v3584_v57  ;;  %2212 = vmatmul.bf16.vlgmr.msra.gmra.mxu0 %v4834_v23  ;;  %v3624_v23 = vor.u32 %v3977_v56, %v3621_v13  ;;  %v3496_v24 = vor.u32 %v3945_v60, %v3493_v43  ;;  %v3688_v54 = vor.u32 %v3993_v2, %v3685_v3  ;;  %v3959_v57 = vld [vmem:[%s5967_s1 + $0x6b4] sm:$0xf]  ;;  %v3541_v38 = vld [vmem:[%s5967_s1 + $0x6a8] sm:$0xf0]  ;;  %v3469_v56 = vld [vmem:[%s5967_s1 + $0x618] sm:$0xf0] }
  0xe6   :  { %2318 = vmatpush.bf16.msrb.mxu2 %v3648_v61  ;;  %v1929_v53 = vadd.f32 %v1928_v8, %v1910_v9  ;;  %v3557_v61 = vld [vmem:[%s5967_s1 + $0x6c8] sm:$0xf0]  ;;  %2269 = vmatmul.bf16.vlgmr.msra.gmra.mxu3 %v4849_v29  ;;  %v3485_v29 = vld [vmem:[%s5967_s1 + $0x638] sm:$0xf0]  ;;  %v3552_v33 = vor.u32 %v3959_v57, %v3549_v0  ;;  %v3544_v9 = vor.u32 %v3957_v36, %v3541_v38  ;;  %v3955_v13 = vld [vmem:[%s5967_s1 + $0x694] sm:$0xf] }
  0xe7   :  { %2337 = vmatpush.bf16.msrb.mxu3 %v3712_v10  ;;  %2250 = vmatmul.bf16.vlgmr.msra.gmra.mxu2 %v4847_v28  ;;  %v3560_v7 = vor.u32 %v3961_v48, %v3557_v61  ;;  %v3943_v28 = vld [vmem:[%s5967_s1 + $0x634] sm:$0xf]  ;;  %v3597_v8 = vld [vmem:[%s5967_s1 + $0x718] sm:$0xf0]  ;;  %v3953_v57 = vld [vmem:[%s5967_s1 + $0x684] sm:$0xf] }
  0xe8   :  { %2281 = vmatpush.bf16.msrb.mxu0 %v3512_v26  ;;  %v1947_v10 = vpop.f32.mrf.mxu2  ;;  %v3488_v26 = vor.u32 %v3943_v28, %v3485_v29  ;;  %v3533_v60 = vld [vmem:[%s5967_s1 + $0x698] sm:$0xf0]  ;;  %v3987_v43 = vld [vmem:[%s5967_s1 + $0x794] sm:$0xf]  ;;  %v3461_v29 = vld [vmem:[%s5967_s1 + $0x608] sm:$0xf0] }
  0xe9   :  { %2300 = vmatpush.bf16.msrb.mxu1 %v3576_v30  ;;  %v1948_v15 = vadd.f32 %v1947_v10, %v1929_v53  ;;  %v3973_v30 = vld [vmem:[%s5967_s1 + $0x724] sm:$0xf]  ;;  %v3661_v48 = vld [vmem:[%s5967_s1 + $0x798] sm:$0xf0] }
  0xea   :  { %2319 = vmatpush.bf16.msrb.mxu2 %v3640_v52  ;;  %v1930_v21 = vpop.f32.mrf.mxu1  ;;  %v3616_v52 = vor.u32 %v3975_v4, %v3613_v27  ;;  %v3969_v4 = vld [vmem:[%s5967_s1 + $0x704] sm:$0xf]  ;;  %v3589_v27 = vld [vmem:[%s5967_s1 + $0x708] sm:$0xf0]  ;;  %v3664_v28 = vor.u32 %v3987_v43, %v3661_v48 }
  0xeb   :  { %2338 = vmatpush.bf16.msrb.mxu3 %v3704_v31  ;;  %v1966_v11 = vpop.f32.mrf.mxu3  ;;  %v1911_v20 = vpop.f32.mrf.mxu0  ;;  %v3605_v31 = vld [vmem:[%s5967_s1 + $0x728] sm:$0xf0]  ;;  %v3985_v0 = vld [vmem:[%s5967_s1 + $0x784] sm:$0xf] }
  0xec   :  { %2282 = vmatpush.bf16.msrb.mxu0 %v3504_v19  ;;  %v1912_v6 = vadd.f32 %v1911_v20, %v5684_v35  ;;  %v5839_v32 = vadd.f32 %v1966_v11, %v1948_v15  ;;  %v3941_v35 = vld [vmem:[%s5967_s1 + $0x624] sm:$0xf]  ;;  %v3608_v50 = vor.u32 %v3973_v30, %v3605_v31  ;;  %v3939_v19 = vld [vmem:[%s5967_s1 + $0x614] sm:$0xf]  ;;  %v3525_v11 = vld [vmem:[%s5967_s1 + $0x688] sm:$0xf0]  ;;  %v3656_v15 = vor.u32 %v3985_v0, %v3653_v1 }
  0xed   :  { %2301 = vmatpush.bf16.msrb.mxu1 %v3568_v49  ;;  %v3480_v42 = vor.u32 %v3941_v35, %v3477_v16  ;;  %v3528_v12 = vor.u32 %v3953_v57, %v3525_v11 }
  0xee   :  { %2320 = vmatpush.bf16.msrb.mxu2 %v3632_v51  ;;  %v1931_v37 = vadd.f32 %v1930_v21, %v1912_v6  ;;  %v3672_v51 = vor.u32 %v3989_v41, %v3669_v44 }
  0xef   :  { %2339 = vmatpush.bf16.msrb.mxu3 %v3696_v59 }
  0xf0   :  { %2283 = vmatpush.bf16.msrb.mxu0 %v3496_v24  ;;  %v1949_v49 = vpop.f32.mrf.mxu2  ;;  %v3472_v24 = vor.u32 %v3939_v19, %v3469_v56 }
  0xf1   :  { %2302 = vmatpush.bf16.msrb.mxu1 %v3560_v7  ;;  %v1950_v53 = vadd.f32 %v1949_v49, %v1931_v37 }
  0xf2   :  { %2321 = vmatpush.bf16.msrb.mxu2 %v3624_v23  ;;  %v1933_v2 = vpop.f32.mrf.mxu1  ;;  %v3600_v23 = vor.u32 %v3971_v47, %v3597_v8 }
  0xf3   :  { %2340 = vmatpush.bf16.msrb.mxu3 %v3688_v54  ;;  %v1968_v59 = vpop.f32.mrf.mxu3  ;;  %v1914_v61 = vpop.f32.mrf.mxu0  ;;  %v3536_v54 = vor.u32 %v3955_v13, %v3533_v60 }
  0xf4   :  { %2284 = vmatpush.bf16.msrb.mxu0 %v3488_v26  ;;  %v1915_v3 = vadd.f32 %v1914_v61, %v5751_v5  ;;  %v1969_v7 = vadd.f32 %v1968_v59, %v1950_v53  ;;  %v3937_v5 = vld [vmem:[%s5967_s1 + $0x604] sm:$0xf]  ;;  %2236 = vmatmul.bf16.gmra.mxu1 %v4968_v40 }
  0xf5   :  { %2303 = vmatpush.bf16.msrb.mxu1 %v3552_v33  ;;  %2217 = vmatmul.bf16.gmra.mxu0 %v4966_v39  ;;  %v3592_v39 = vor.u32 %v3969_v4, %v3589_v27  ;;  %v3464_v40 = vor.u32 %v3937_v5, %v3461_v29 }
  0xf6   :  { %2322 = vmatpush.bf16.msrb.mxu2 %v3616_v52  ;;  %v1934_v10 = vadd.f32 %v1933_v2, %v1915_v3  ;;  %2274 = vmatmul.bf16.gmra.mxu3 %v4981_v46 }
  0xf7   :  { %2341 = vmatpush.bf16.msrb.mxu3 %v3680_v34  ;;  %2255 = vmatmul.bf16.gmra.mxu2 %v4979_v45 }
  0xf8   :  { %2285 = vmatpush.bf16.msrb.mxu0 %v3480_v42  ;;  %v1952_v20 = vpop.f32.mrf.mxu2 }
  0xf9   :  { %2304 = vmatpush.bf16.msrb.mxu1 %v3544_v9  ;;  %v1953_v6 = vadd.f32 %v1952_v20, %v1934_v10 }
  0xfa   :  { %2323 = vmatpush.bf16.msrb.mxu2 %v3608_v50  ;;  %v1935_v26 = vpop.f32.mrf.mxu1 }
  0xfb   :  { %2342 = vmatpush.bf16.msrb.mxu3 %v3672_v51  ;;  %v1971_v21 = vpop.f32.mrf.mxu3  ;;  %v1916_v52 = vpop.f32.mrf.mxu0 }
  0xfc   :  { %2286 = vmatpush.bf16.msrb.mxu0 %v3472_v24  ;;  %v1917_v30 = vadd.f32 %v1916_v52, %v5784_v14  ;;  %v1972_v45 = vadd.f32 %v1971_v21, %v1953_v6 }
  0xfd   :  { %2305 = vmatpush.bf16.msrb.mxu1 %v3536_v54 }
  0xfe   :  { %2324 = vmatpush.bf16.msrb.mxu2 %v3600_v23  ;;  %v1936_v46 = vadd.f32 %v1935_v26, %v1917_v30 }
  0xff   :  { %2343 = vmatpush.bf16.msrb.mxu3 %v3664_v28 }
 0x100   :  { %2287 = vmatpush.bf16.msrb.mxu0 %v3464_v40  ;;  %v1954_v31 = vpop.f32.mrf.mxu2 }
 0x101   :  { %2306 = vmatpush.bf16.msrb.mxu1 %v3528_v12  ;;  %v1955_v34 = vadd.f32 %v1954_v31, %v1936_v46 }
 0x102   :  { %2325 = vmatpush.bf16.msrb.mxu2 %v3592_v39  ;;  %v2004_v16 = vpop.f32.mrf.mxu1 }
 0x103   :  { %2344 = vmatpush.bf16.msrb.mxu3 %v3656_v15  ;;  %v1973_v33 = vpop.f32.mrf.mxu3  ;;  %v1985_v35 = vpop.f32.mrf.mxu0 }
 0x104   :  { %v1986_v36 = vadd.f32 %v1985_v35, %v5839_v32  ;;  %v1974_v37 = vadd.f32 %v1973_v33, %v1955_v34  ;;  %2307 = vmatmul.bf16.vlgmr.msrb.gmra.mxu1 %v5112_v18 }
 0x105   :  { %2288 = vmatmul.bf16.vlgmr.msrb.gmra.mxu0 %v5110_v17 }
 0x106   :  { %v2005_v38 = vadd.f32 %v2004_v16, %v1986_v36  ;;  %2345 = vmatmul.bf16.vlgmr.msrb.gmra.mxu3 %v5125_v25  ;;  %v4008_v25 = vmov 32.0  }
 0x107   :  { %2326 = vmatmul.bf16.vlgmr.msrb.gmra.mxu2 %v5123_v22  ;;  %4002 = vrcp.f32 %v4008_v25 }
 0x108   :  { %v2023_v14 = vpop.f32.mrf.mxu2 }
 0x109   :  { %v2024_v44 = vadd.f32 %v2023_v14, %v2005_v38 }
 0x10a   :  { %v2006_v42 = vpop.f32.mrf.mxu1 }
 0x10b   :  { %v2042_v41 = vpop.f32.mrf.mxu3  ;;  %v1987_v50 = vpop.f32.mrf.mxu0 }
 0x10c   :  { %v1988_v47 = vadd.f32 %v1987_v50, %v1969_v7  ;;  %v2043_v8 = vadd.f32 %v2042_v41, %v2024_v44 }
 0x10d   :  { %v4003_v23 = vpop.eup %4002 }
 0x10e   :  { %v2007_v9 = vadd.f32 %v2006_v42, %v1988_v47  ;;  %vm2379_vm0 = vweird.f32 %v4003_v23 }
 0x110   :  { %v2025_v51 = vpop.f32.mrf.mxu2 }
 0x111   :  { %v2026_v19 = vadd.f32 %v2025_v51, %v2007_v9 }
 0x112   :  { %v2009_v13 = vpop.f32.mrf.mxu1 }
 0x113   :  { %v2044_v32 = vpop.f32.mrf.mxu3  ;;  %v1990_v56 = vpop.f32.mrf.mxu0 }
 0x114   :  { %v1991_v17 = vadd.f32 %v1990_v56, %v1972_v45  ;;  %v2045_v49 = vadd.f32 %v2044_v32, %v2026_v19  ;;  %2312 = vmatmul.bf16.gmra.mxu1 %v5244_v58  ;;  %v2375_v58 = vmul.f32 32.0, %v4003_v23 }
 0x115   :  { %2293 = vmatmul.bf16.gmra.mxu0 %v5242_v55 }
 0x116   :  { %v2010_v18 = vadd.f32 %v2009_v13, %v1991_v17  ;;  %v2356_v22 = vadd.f32 %v2045_v49, %v2043_v8  ;;  %2350 = vmatmul.bf16.gmra.mxu3 %v5257_v63  ;;  %v2376_v28 = vsub.f32 1.0, %v2375_v58 }
 0x117   :  { %2331 = vmatmul.bf16.gmra.mxu2 %v5255_v62 }
 0x118   :  { %v2377_v57 = vmul.f32 %v4003_v23, %v2376_v28 }
 0x11a   :  { %v2028_v59 = vpop.f32.mrf.mxu2  ;;  %v2011_v53 = vpop.f32.mrf.mxu1  ;;  %v2378_v21 = vadd.f32 %v4003_v23, %v2377_v57 }
 0x11b   :  { %v2047_v60 = vpop.f32.mrf.mxu3  ;;  %v2029_v43 = vadd.f32 %v2028_v59, %v2010_v18  ;;  %v1992_v48 = vpop.f32.mrf.mxu0 }
 0x11c   :  { %v1993_v61 = vadd.f32 %v1992_v48, %v1974_v37  ;;  %v5922_v26 = vsel %vm2379_vm0, %v4003_v23, %v2378_v21  ;;  %vm2555_vm0 = vcmask 1024  }
 0x11d   :  { %v2048_v2 = vadd.f32 %v2047_v60, %v2029_v43 }
 0x11e   :  { %v2012_v3 = vadd.f32 %v2011_v53, %v1993_v61 }
 0x11f   :  { %v2357_v24 = vadd.f32 %v2356_v22, %v2048_v2 }
 0x122   :  { %v2030_v55 = vpop.f32.mrf.mxu2  ;;  %v2080_v62 = vpop.f32.mrf.mxu1 }
 0x123   :  { %v2049_v4 = vpop.f32.mrf.mxu3  ;;  %v2031_v27 = vadd.f32 %v2030_v55, %v2012_v3  ;;  %v2061_v7 = vpop.f32.mrf.mxu0 }
 0x124   :  { %v2081_v54 = vadd.f32 %v2080_v62, %v2061_v7 }
 0x125   :  { %v2050_v63 = vadd.f32 %v2049_v4, %v2031_v27 }
 0x127   :  { %v2358_v5 = vadd.f32 %v2357_v24, %v2050_v63 }
 0x129   :  { %v2359_v29 = vrot.slane %v2358_v5, 4 }
 0x12a   :  { %v2099_v10 = vpop.f32.mrf.mxu2  ;;  %v2082_v40 = vpop.f32.mrf.mxu1 }
 0x12b   :  { %v2118_v11 = vpop.f32.mrf.mxu3  ;;  %v2360_v0 = vadd.f32 %v2359_v29, %v2358_v5  ;;  %v2100_v1 = vadd.f32 %v2099_v10, %v2081_v54  ;;  %v2063_v39 = vpop.f32.mrf.mxu0 }
 0x12c   :  { %v2083_v12 = vadd.f32 %v2082_v40, %v2063_v39 }
 0x12d   :  { %v2361_v15 = vrot.slane %v2360_v0, 2  ;;  %v2119_v20 = vadd.f32 %v2118_v11, %v2100_v1 }
 0x12f   :  { %v2362_v6 = vadd.f32 %v2361_v15, %v2360_v0 }
 0x131   :  { %v2363_v52 = vrot.slane %v2362_v6, 1 }
 0x132   :  { %v2101_v30 = vpop.f32.mrf.mxu2  ;;  %v2085_v34 = vpop.f32.mrf.mxu1 }
 0x133   :  { %v2120_v45 = vpop.f32.mrf.mxu3  ;;  %v2364_v46 = vadd.f32 %v2363_v52, %v2362_v6  ;;  %v2102_v31 = vadd.f32 %v2101_v30, %v2083_v12  ;;  %v2066_v33 = vpop.f32.mrf.mxu0 }
 0x134   :  { %v2086_v35 = vadd.f32 %v2085_v34, %v2066_v33 }
 0x135   :  { %v2381_v16 = vmul.f32 %v5922_v26, %v2364_v46  ;;  %v5925_v36 = vadd.f32 %v2120_v45, %v2102_v31 }
 0x137   :  { %v2383_v37 = vsub.f32 %v2043_v8, %v2381_v16  ;;  %v2385_v38 = vsub.f32 %v2045_v49, %v2381_v16  ;;  %v2387_v14 = vsub.f32 %v2048_v2, %v2381_v16  ;;  %v2389_v41 = vsub.f32 %v2050_v63, %v2381_v16 }
 0x139   :  { %v2391_v44 = vmul.f32 %v2383_v37, %v2383_v37  ;;  %v2393_v50 = vmul.f32 %v2385_v38, %v2385_v38  ;;  %v2395_v9 = vmul.f32 %v2387_v14, %v2387_v14  ;;  %v2397_v17 = vmul.f32 %v2389_v41, %v2389_v41 }
 0x13a   :  { %v2104_v42 = vpop.f32.mrf.mxu2  ;;  %v2087_v56 = vpop.f32.mrf.mxu1 }
 0x13b   :  { %v2123_v47 = vpop.f32.mrf.mxu3  ;;  %v2399_v51 = vadd.f32 %v2393_v50, %v2391_v44  ;;  %v2105_v32 = vadd.f32 %v2104_v42, %v2086_v35  ;;  %v2068_v19 = vpop.f32.mrf.mxu0 }
 0x13c   :  { %v2088_v13 = vadd.f32 %v2087_v56, %v2068_v19 }
 0x13d   :  { %v2400_v18 = vadd.f32 %v2399_v51, %v2395_v9  ;;  %v5927_v22 = vadd.f32 %v2123_v47, %v2105_v32 }
 0x13f   :  { %v2401_v25 = vadd.f32 %v2400_v18, %v2397_v17 }
 0x141   :  { %v2402_v59 = vrot.slane %v2401_v25, 4 }
 0x142   :  { %v2106_v8 = vpop.f32.mrf.mxu2  ;;  %v2156_v53 = vpop.f32.mrf.mxu1 }
 0x143   :  { %v2125_v49 = vpop.f32.mrf.mxu3  ;;  %v2403_v60 = vadd.f32 %v2402_v59, %v2401_v25  ;;  %v2107_v43 = vadd.f32 %v2106_v8, %v2088_v13  ;;  %v2137_v48 = vpop.f32.mrf.mxu0 }
 0x144   :  { %v2138_v61 = vadd.f32 %v2137_v48, %v2119_v20 }
 0x145   :  { %v2404_v2 = vrot.slane %v2403_v60, 2  ;;  %v5929_v3 = vadd.f32 %v2125_v49, %v2107_v43 }
 0x146   :  { %v2157_v23 = vadd.f32 %v2156_v53, %v2138_v61 }
 0x147   :  { %v2405_v24 = vadd.f32 %v2404_v2, %v2403_v60 }
 0x149   :  { %v2406_v55 = vrot.slane %v2405_v24, 1 }
 0x14a   :  { %v2175_v4 = vpop.f32.mrf.mxu2  ;;  %v2158_v54 = vpop.f32.mrf.mxu1 }
 0x14b   :  { %v2194_v58 = vpop.f32.mrf.mxu3  ;;  %v2407_v27 = vadd.f32 %v2406_v55, %v2405_v24  ;;  %v2176_v7 = vadd.f32 %v2175_v4, %v2157_v23  ;;  %v2139_v62 = vpop.f32.mrf.mxu0 }
 0x14c   :  { %v2140_v13 = vadd.f32 %v2139_v62, %v5925_v36 }
 0x14d   :  { %v2417_v63 = vmul.f32 %v2407_v27, %v5922_v26  ;;  %v2195_v28 = vadd.f32 %v2194_v58, %v2176_v7 }
 0x14f   :  { %v2420_v5 = vadd.f32 1e-05, %v2417_v63 }
 0x151   :  { %4004 = vrsqrt.f32 %v2420_v5  ;;  %vm2428_vm2 = vweird.f32 %v2420_v5 }
 0x152   :  { %v2177_v29 = vpop.f32.mrf.mxu2  ;;  %v2161_v11 = vpop.f32.mrf.mxu1 }
 0x153   :  { %v2196_v57 = vpop.f32.mrf.mxu3  ;;  %v2142_v10 = vpop.f32.mrf.mxu0 }
 0x157   :  { %v4005_v0 = vpop.eup %4004 }
 0x158   :  { %v2423_v1 = vmul.f32 %v4005_v0, %v2420_v5  ;;  %vm2429_vm1 = vweird.f32 %v4005_v0 }
 0x159   :  { %vm2430_vm3 = vmor %vm2428_vm2, %vm2429_vm1 }
 0x15a   :  { %v2424_v39 = vmul.f32 %v4005_v0, %v2423_v1  ;;  %v2180_v40 = vpop.f32.mrf.mxu2  ;;  %v2163_v20 = vpop.f32.mrf.mxu1 }
 0x15b   :  { %v2199_v12 = vpop.f32.mrf.mxu3  ;;  %v2144_v15 = vpop.f32.mrf.mxu0 }
 0x15c   :  { %v2425_v21 = vmul.f32 0.5, %v2424_v39  ;;  %v2145_v36 = vadd.f32 %v2144_v15, %v5929_v3 }
 0x15e   :  { %v2426_v6 = vsub.f32 1.5, %v2425_v21  ;;  %v2164_v27 = vadd.f32 %v2163_v20, %v2145_v36 }
 0x160   :  { %v2427_v52 = vmul.f32 %v4005_v0, %v2426_v6 }
 0x162   :  { %v2431_v30 = vsel %vm2430_vm3, %v4005_v0, %v2427_v52  ;;  %v2182_v45 = vpop.f32.mrf.mxu2  ;;  %v2232_v44 = vpop.f32.mrf.mxu1 }
 0x163   :  { %v2201_v46 = vpop.f32.mrf.mxu3  ;;  %v5932_v31 = vmul.f32 %v2431_v30, %v2383_v37  ;;  %v5934_v33 = vmul.f32 %v2431_v30, %v2385_v38  ;;  %v5936_v34 = vmul.f32 %v2431_v30, %v2387_v14  ;;  %v5938_v35 = vmul.f32 %v2431_v30, %v2389_v41  ;;  %v2213_v16 = vpop.f32.mrf.mxu0 }
 0x164   :  { %v2159_v37 = vadd.f32 %v2158_v54, %v2140_v13  ;;  %v2143_v41 = vadd.f32 %v2142_v10, %v5927_v22  ;;  %v2214_v8 = vadd.f32 %v2213_v16, %v2195_v28  ;;  %v2183_v63 = vadd.f32 %v2182_v45, %v2164_v27 }
 0x166   :  { %v2178_v18 = vadd.f32 %v2177_v29, %v2159_v37  ;;  %v2162_v49 = vadd.f32 %v2161_v11, %v2143_v41  ;;  %v2233_v61 = vadd.f32 %v2232_v44, %v2214_v8  ;;  %v2202_v0 = vadd.f32 %v2201_v46, %v2183_v63 }
 0x168   :  { %v2197_v59 = vadd.f32 %v2196_v57, %v2178_v18  ;;  %v2181_v53 = vadd.f32 %v2180_v40, %v2162_v49 }
 0x16a   :  { %v2251_v50 = vpop.f32.mrf.mxu2  ;;  %v2234_v9 = vpop.f32.mrf.mxu1  ;;  %v2200_v4 = vadd.f32 %v2199_v12, %v2181_v53 }
 0x16b   :  { %v2270_v42 = vpop.f32.mrf.mxu3  ;;  %v2215_v47 = vpop.f32.mrf.mxu0  ;;  %v2252_v24 = vadd.f32 %v2251_v50, %v2233_v61 }
 0x16c   :  { %v2216_v60 = vadd.f32 %v2215_v47, %v2197_v59 }
 0x16d   :  { %v2271_v7 = vadd.f32 %v2270_v42, %v2252_v24 }
 0x16e   :  { %v2235_v55 = vadd.f32 %v2234_v9, %v2216_v60 }
 0x172   :  { %v2253_v51 = vpop.f32.mrf.mxu2  ;;  %v2237_v56 = vpop.f32.mrf.mxu1 }
 0x173   :  { %v2272_v32 = vpop.f32.mrf.mxu3  ;;  %v2218_v19 = vpop.f32.mrf.mxu0  ;;  %v2254_v58 = vadd.f32 %v2253_v51, %v2235_v55 }
 0x174   :  { %v2219_v62 = vadd.f32 %v2218_v19, %v2200_v4 }
 0x175   :  { %v2273_v28 = vadd.f32 %v2272_v32, %v2254_v58 }
 0x176   :  { %v2238_v10 = vadd.f32 %v2237_v56, %v2219_v62 }
 0x17a   :  { %v2256_v17 = vpop.f32.mrf.mxu2  ;;  %v2239_v25 = vpop.f32.mrf.mxu1 }
 0x17b   :  { %v2275_v38 = vpop.f32.mrf.mxu3  ;;  %v2220_v14 = vpop.f32.mrf.mxu0  ;;  %v2257_v1 = vadd.f32 %v2256_v17, %v2238_v10 }
 0x17c   :  { %v2221_v3 = vadd.f32 %v2220_v14, %v2202_v0 }
 0x17d   :  { %v2276_v20 = vadd.f32 %v2275_v38, %v2257_v1  ;;  %v2419_v1 = vld [vmem:[%s5969_s2] sm:$0x3] }
 0x17e   :  { %v2240_v30 = vadd.f32 %v2239_v25, %v2221_v3  ;;  %v2463_v3 = vld [vmem:[%s5970_s3] sm:$0x3] }
 0x182   :  { %v2258_v43 = vpop.f32.mrf.mxu2  ;;  %v2308_v23 = vpop.f32.mrf.mxu1 }
 0x183   :  { %v2277_v48 = vpop.f32.mrf.mxu3  ;;  %v2289_v2 = vpop.f32.mrf.mxu0  ;;  %v2259_v42 = vadd.f32 %v2258_v43, %v2240_v30 }
 0x184   :  { %v2290_v5 = vadd.f32 %v2289_v2, %v2271_v7 }
 0x185   :  { %v2278_v32 = vadd.f32 %v2277_v48, %v2259_v42 }
 0x186   :  { %v2309_v39 = vadd.f32 %v2308_v23, %v2290_v5 }
 0x18a   :  { %v2327_v22 = vpop.f32.mrf.mxu2  ;;  %v2310_v57 = vpop.f32.mrf.mxu1 }
 0x18b   :  { %v2346_v54 = vpop.f32.mrf.mxu3  ;;  %v2291_v29 = vpop.f32.mrf.mxu0  ;;  %v2328_v40 = vadd.f32 %v2327_v22, %v2309_v39  ;;  %v2451_v39 = vperm.slane %v2419_v1, 0 }
 0x18c   :  { %v2292_v11 = vadd.f32 %v2291_v29, %v2273_v28 }
 0x18d   :  { %v2347_v16 = vadd.f32 %v2346_v54, %v2328_v40 }
 0x18e   :  { %v2311_v15 = vadd.f32 %v2310_v57, %v2292_v11 }
 0x192   :  { %v2329_v12 = vpop.f32.mrf.mxu2  ;;  %v2313_v50 = vpop.f32.mrf.mxu1 }
 0x193   :  { %v2348_v21 = vpop.f32.mrf.mxu3  ;;  %v2330_v6 = vadd.f32 %v2329_v12, %v2311_v15  ;;  %v2294_v52 = vpop.f32.mrf.mxu0  ;;  %v2465_v12 = vperm.slane %v2463_v3, 0 }
 0x194   :  { %v2295_v44 = vadd.f32 %v2294_v52, %v2276_v20  ;;  %v2461_v52 = vmul.f32 %v2451_v39, %v5938_v35 }
 0x195   :  { %v2349_v45 = vadd.f32 %v2348_v21, %v2330_v6  ;;  %v2459_v21 = vmul.f32 %v2451_v39, %v5936_v34  ;;  %v2455_v6 = vmul.f32 %v2451_v39, %v5932_v31 }
 0x196   :  { %v2314_v9 = vadd.f32 %v2313_v50, %v2295_v44  ;;  %v2475_v50 = vadd.f32 %v2465_v12, %v2461_v52 }
 0x197   :  { %v2365_v47 = vadd.f32 %v2349_v45, %v2347_v16  ;;  %v2469_v44 = vadd.f32 %v2465_v12, %v2455_v6 }
 0x198   :  { %vm2483_vm9 = vcmp.ge.f32.partialorder %v2475_v50, 0.0 }
 0x199   :  { %vm2477_vm8 = vcmp.ge.f32.partialorder %v2469_v44, 0.0  ;;  %v2485_v31 = vmul.f32 0.2, %v2469_v44 }
 0x19a   :  { %v2332_v51 = vpop.f32.mrf.mxu2  ;;  %v2315_v18 = vpop.f32.mrf.mxu1 }
 0x19b   :  { %v2351_v46 = vpop.f32.mrf.mxu3  ;;  %v2333_v19 = vadd.f32 %v2332_v51, %v2314_v9  ;;  %v2296_v56 = vpop.f32.mrf.mxu0  ;;  %v2452_v9 = vperm.slane %v2419_v1, 1 }
 0x19c   :  { %v2297_v37 = vadd.f32 %v2296_v56, %v2278_v32  ;;  %v2491_v56 = vmul.f32 0.2, %v2475_v50 }
 0x19d   :  { %v2352_v13 = vadd.f32 %v2351_v46, %v2333_v19  ;;  %v2466_v46 = vperm.slane %v2463_v3, 1 }
 0x19e   :  { %v2316_v38 = vadd.f32 %v2315_v18, %v2297_v37 }
 0x19f   :  { %v2366_v17 = vadd.f32 %v2365_v47, %v2352_v13 }
 0x1a2   :  { %v2334_v14 = vpop.f32.mrf.mxu2 }
 0x1a3   :  { %v2335_v41 = vadd.f32 %v2334_v14, %v2316_v38  ;;  %v2353_v25 = vpop.f32.mrf.mxu3 }
 0x1a5   :  { %v2354_v59 = vadd.f32 %v2353_v25, %v2335_v41 }
 0x1a7   :  { %v2367_v8 = vadd.f32 %v2366_v17, %v2354_v59 }
 0x1a9   :  { %v2368_v49 = vrot.slane %v2367_v8, 4 }
 0x1ab   :  { %v2369_v60 = vadd.f32 %v2368_v49, %v2367_v8  ;;  %v2513_v49 = vld [vmem:[%s5971_s4] sm:$0xff] }
 0x1ad   :  { %v2370_v43 = vrot.slane %v2369_v60, 2 }
 0x1af   :  { %v2371_v53 = vadd.f32 %v2370_v43, %v2369_v60  ;;  %v2493_v60 = vsel %vm2477_vm8, %v2469_v44, %v2485_v31  ;;  %v2499_v43 = vsel %vm2483_vm9, %v2475_v50, %v2491_v56 }
 0x1b1   :  { %v2372_v61 = vrot.slane %v2371_v53, 1 }
 0x1b3   :  { %v2373_v2 = vadd.f32 %v2372_v61, %v2371_v53 }
 0x1b5   :  { %v2382_v48 = vmul.f32 %v5922_v26, %v2373_v2 }
 0x1b7   :  { %v2384_v23 = vsub.f32 %v2347_v16, %v2382_v48  ;;  %v2386_v36 = vsub.f32 %v2349_v45, %v2382_v48  ;;  %v2388_v24 = vsub.f32 %v2352_v13, %v2382_v48  ;;  %v2390_v55 = vsub.f32 %v2354_v59, %v2382_v48 }
 0x1b8   :  { %v2473_v16 = vadd.f32 %v2465_v12, %v2459_v21 }
 0x1b9   :  { %v2392_v4 = vmul.f32 %v2384_v23, %v2384_v23  ;;  %v2394_v58 = vmul.f32 %v2386_v36, %v2386_v36  ;;  %v2396_v27 = vmul.f32 %v2388_v24, %v2388_v24  ;;  %v2398_v62 = vmul.f32 %v2390_v55, %v2390_v55 }
 0x1ba   :  { %vm2481_vm7 = vcmp.ge.f32.partialorder %v2473_v16, 0.0  ;;  %v2489_v34 = vmul.f32 0.2, %v2473_v16 }
 0x1bb   :  { %v2408_v7 = vadd.f32 %v2394_v58, %v2392_v4 }
 0x1bc   :  { %v2497_v8 = vsel %vm2481_vm7, %v2473_v16, %v2489_v34 }
 0x1bd   :  { %v2409_v22 = vadd.f32 %v2408_v7, %v2396_v27 }
 0x1bf   :  { %v2410_v54 = vadd.f32 %v2409_v22, %v2398_v62 }
 0x1c1   :  { %v2411_v63 = vrot.slane %v2410_v54, 4 }
 0x1c3   :  { %v2412_v28 = vadd.f32 %v2411_v63, %v2410_v54 }
 0x1c5   :  { %v2413_v5 = vrot.slane %v2412_v28, 2 }
 0x1c7   :  { %v2414_v29 = vadd.f32 %v2413_v5, %v2412_v28 }
 0x1c9   :  { %v2415_v57 = vrot.slane %v2414_v29, 1 }
 0x1cb   :  { %v2416_v10 = vadd.f32 %v2415_v57, %v2414_v29  ;;  %v2514_v57 = vld [vmem:[%s5971_s4 + $0x8] sm:$0xff] }
 0x1cd   :  { %v2418_v11 = vmul.f32 %v2416_v10, %v5922_v26  ;;  %v2457_v26 = vmul.f32 %v2451_v39, %v5934_v33 }
 0x1cf   :  { %v2421_v0 = vadd.f32 1e-05, %v2418_v11  ;;  %v2471_v47 = vadd.f32 %v2465_v12, %v2457_v26 }
 0x1d1   :  { %4006 = vrsqrt.f32 %v2421_v0  ;;  %vm2438_vm5 = vweird.f32 %v2421_v0  ;;  %vm2479_vm10 = vcmp.ge.f32.partialorder %v2471_v47, 0.0  ;;  %v2487_v13 = vmul.f32 0.2, %v2471_v47 }
 0x1d3   :  { %v2495_v53 = vsel %vm2479_vm10, %v2471_v47, %v2487_v13 }
 0x1d7   :  { %v4007_v40 = vpop.eup %4006 }
 0x1d8   :  { %v2433_v15 = vmul.f32 %v4007_v40, %v2421_v0  ;;  %vm2439_vm4 = vweird.f32 %v4007_v40 }
 0x1d9   :  { %vm2440_vm6 = vmor %vm2438_vm5, %vm2439_vm4 }
 0x1da   :  { %v2434_v20 = vmul.f32 %v4007_v40, %v2433_v15  ;;  %v2518_v15 = vunpack.c.h.bf16 %v2514_v57 }
 0x1dc   :  { %v2435_v30 = vmul.f32 0.5, %v2434_v20 }
 0x1de   :  { %v2436_v45 = vsub.f32 1.5, %v2435_v30 }
 0x1e0   :  { %v2437_v42 = vmul.f32 %v4007_v40, %v2436_v45 }
 0x1e2   :  { %v2441_v51 = vsel %vm2440_vm6, %v4007_v40, %v2437_v42  ;;  %v2517_v40 = vunpack.c.l.bf16 %v2514_v57 }
 0x1e3   :  { %v2443_v33 = vmul.f32 %v2441_v51, %v2384_v23  ;;  %v2445_v32 = vmul.f32 %v2441_v51, %v2386_v36  ;;  %v2447_v35 = vmul.f32 %v2441_v51, %v2388_v24  ;;  %v2449_v19 = vmul.f32 %v2441_v51, %v2390_v55 }
 0x1e4   :  { %v2515_v24 = vunpack.c.l.bf16 %v2513_v49  ;;  %v2516_v55 = vunpack.c.h.bf16 %v2513_v49 }
 0x1e5   :  { %v2458_v37 = vmul.f32 %v2452_v9, %v2445_v32  ;;  %v2462_v17 = vmul.f32 %v2452_v9, %v2449_v19  ;;  %v2460_v18 = vmul.f32 %v2452_v9, %v2447_v35  ;;  %v2456_v38 = vmul.f32 %v2452_v9, %v2443_v33 }
 0x1e7   :  { %v2476_v14 = vadd.f32 %v2466_v46, %v2462_v17  ;;  %v2474_v41 = vadd.f32 %v2466_v46, %v2460_v18  ;;  %v2470_v25 = vadd.f32 %v2466_v46, %v2456_v38  ;;  %v2472_v59 = vadd.f32 %v2466_v46, %v2458_v37 }
 0x1e9   :  { %vm2482_vm11 = vcmp.ge.f32.partialorder %v2474_v41, 0.0  ;;  %v2490_v61 = vmul.f32 0.2, %v2474_v41  ;;  %vm2478_vm12 = vcmp.ge.f32.partialorder %v2470_v25, 0.0  ;;  %v2486_v2 = vmul.f32 0.2, %v2470_v25 }
 0x1ea   :  { %vm2484_vm13 = vcmp.ge.f32.partialorder %v2476_v14, 0.0  ;;  %v2492_v48 = vmul.f32 0.2, %v2476_v14  ;;  %vm2480_vm14 = vcmp.ge.f32.partialorder %v2472_v59, 0.0  ;;  %v2488_v23 = vmul.f32 0.2, %v2472_v59 }
 0x1eb   :  { %v2498_v36 = vsel %vm2482_vm11, %v2474_v41, %v2490_v61  ;;  %v2494_v4 = vsel %vm2478_vm12, %v2470_v25, %v2486_v2 }
 0x1ec   :  { %v2503_v58 = vpack.c.bf16 %v2498_v36, %v2497_v8  ;;  %v2501_v27 = vpack.c.bf16 %v2494_v4, %v2493_v60  ;;  %v2500_v7 = vsel %vm2484_vm13, %v2476_v14, %v2492_v48  ;;  %v2496_v62 = vsel %vm2480_vm14, %v2472_v59, %v2488_v23 }
 0x1ed   :  { %v2504_v22 = vpack.c.bf16 %v2500_v7, %v2499_v43  ;;  %v2502_v54 = vpack.c.bf16 %v2496_v62, %v2495_v53 }
 0x1ee   :  { %v2509_v63 = vunpack.c.l.bf16 %v2503_v58  ;;  %v2510_v28 = vunpack.c.h.bf16 %v2503_v58  ;;  %v2505_v5 = vunpack.c.l.bf16 %v2501_v27  ;;  %v2506_v29 = vunpack.c.h.bf16 %v2501_v27 }
 0x1ef   :  { %v2511_v39 = vunpack.c.l.bf16 %v2504_v22  ;;  %v2512_v3 = vunpack.c.h.bf16 %v2504_v22  ;;  %v2507_v20 = vunpack.c.l.bf16 %v2502_v54  ;;  %v2508_v6 = vunpack.c.h.bf16 %v2502_v54 }
 0x1f0   :  { %v2536_v10 = vmul.f32 %v2515_v24, %v2509_v63  ;;  %v2537_v11 = vmul.f32 %v2516_v55, %v2510_v28  ;;  %v2519_v0 = vmul.f32 %v2515_v24, %v2505_v5  ;;  %v2520_v1 = vmul.f32 %v2516_v55, %v2506_v29 }
 0x1f1   :  { %v2538_v26 = vmul.f32 %v2517_v40, %v2511_v39  ;;  %v2539_v52 = vmul.f32 %v2518_v15, %v2512_v3  ;;  %v2521_v30 = vmul.f32 %v2517_v40, %v2507_v20  ;;  %v2522_v16 = vmul.f32 %v2518_v15, %v2508_v6 }
 0x1f2   :  { %v2540_v12 = vadd.f32 %v2537_v11, %v2536_v10  ;;  %v2523_v21 = vadd.f32 %v2520_v1, %v2519_v0 }
 0x1f3   :  { %v2543_v45 = vadd.f32 %v2539_v52, %v2538_v26  ;;  %v2526_v44 = vadd.f32 %v2522_v16, %v2521_v30 }
 0x1f4   :  { %2541 = vadd.xlane.f32.xlu1 %v2540_v12  ;;  %2524 = vadd.xlane.f32.xlu0 %v2523_v21 }
 0x1fc   :  { %2544 = vadd.xlane.f32.xlu1 %v2543_v45  ;;  %2527 = vadd.xlane.f32.xlu0 %v2526_v44 }
 0x267   :  { %v2542_v50 = vpop.xlane.xlu1 %2541  ;;  %v2525_v42 = vpop.xlane.xlu0 %2524 }
 0x26f   :  { %v2545_v47 = vpop.xlane.xlu1 %2544  ;;  %v2528_v9 = vpop.xlane.xlu0 %2527 }
 0x270   :  { %v2546_v34 = vadd.f32 %v2545_v47, %v2542_v50  ;;  %v2529_v51 = vadd.f32 %v2528_v9, %v2525_v42 }
 0x272   :  { %v2547_v46 = vrot.slane %v2546_v34, 4  ;;  %v2530_v31 = vrot.slane %v2529_v51, 4 }
 0x274   :  { %v2548_v33 = vadd.f32 %v2547_v46, %v2546_v34  ;;  %v2531_v32 = vadd.f32 %v2530_v31, %v2529_v51 }
 0x276   :  { %v2549_v35 = vrot.slane %v2548_v33, 2  ;;  %v2532_v19 = vrot.slane %v2531_v32, 2 }
 0x278   :  { %v2550_v56 = vadd.f32 %v2549_v35, %v2548_v33  ;;  %v2533_v13 = vadd.f32 %v2532_v19, %v2531_v32 }
 0x27a   :  { %v2551_v37 = vrot.slane %v2550_v56, 1  ;;  %v2534_v17 = vrot.slane %v2533_v13, 1 }
 0x27c   :  { %v2552_v18 = vadd.f32 %v2551_v37, %v2550_v56  ;;  %v2535_v38 = vadd.f32 %v2534_v17, %v2533_v13 }
 0x27e   :  { %v2554_v14 = vsel %vm2553_vm15, %v2535_v38, %v2552_v18 }
 0x27f   :  { %2556 = vst.msk [vmem:[%s5972_s5] sm:$0x3] %vm2555_vm0, %v2554_v14 }

</bundles_post_ra>
